<compile_context>
chip_gen: v5e
topology: v5e:2x2
jax: 0.10.0
libtpu: 0.0.40
codegen_flags: <defaults>
</compile_context>

<pallas_src>
import functools

import jax
import jax.numpy as jnp
from jax.experimental import pallas as pl
from jax.experimental.pallas import tpu as pltpu

BN_EPS = 1e-5          # nn.BatchNorm2d default eps
LRELU_SLOPE = 0.2      # nn.LeakyReLU(0.2)
VMEM_LIMIT = 32 * 1024 * 1024   # <= default scoped VMEM on v5e/v6e/v7x


def _pick_tile(dim, target):
    """Largest tile <= target (halving) that divides dim exactly."""
    t = min(dim, target)
    while t > 1 and dim % t:
        t //= 2
    return max(t, 1)


# ----------------------------- Pallas kernels -----------------------------

def _matmul_bnstats_kernel(p_ref, w_ref, y_ref, sum_ref, ssq_ref):
    """Tiled conv-as-matmul + per-channel BN partial statistics.

    grid = (M_tiles, K_tiles); K (reduction) is the last grid axis.  The f32
    output block y_ref stays resident across K and is used as the accumulator
    (init at k==0).  At k==last, per-M-tile channel sum / sum-of-squares are
    written so BatchNorm stats can be finalized outside without full-M
    residency inside the kernel.
    """
    k = pl.program_id(1)

    @pl.when(k == 0)
    def _():
        y_ref[...] = jnp.zeros_like(y_ref)

    y_ref[...] += jnp.dot(p_ref[...], w_ref[...],
                          preferred_element_type=jnp.float32)

    @pl.when(k == pl.num_programs(1) - 1)
    def _():
        y = y_ref[...]
        sum_ref[...] = jnp.sum(y, axis=0, keepdims=True)[None]       # (1,1,C)
        ssq_ref[...] = jnp.sum(y * y, axis=0, keepdims=True)[None]   # (1,1,C)


def _bn_lrelu_kernel(y_ref, scale_ref, shift_ref, o_ref):
    """Folded BatchNorm (y*scale + shift) + LeakyReLU(0.2); f32 math, bf16 out."""
    z = y_ref[...] * scale_ref[...] + shift_ref[...]
    o_ref[...] = jnp.where(z >= 0.0, z, LRELU_SLOPE * z).astype(o_ref.dtype)


def _final_dot_sigmoid_kernel(x_ref, w_ref, b_ref, o_ref):
    """Final Conv(C8->1, k4, p0) on a 4x4 map == flattened dot.

    Done as VPU multiply + lane reduction (avoids a wasteful Cout=1 MXU
    matmul), then bias + sigmoid.  Tiny output; f32 throughout.
    """
    x = x_ref[...].astype(jnp.float32)
    s = jnp.sum(x * w_ref[...], axis=1, keepdims=True) + b_ref[...]
    o_ref[...] = 1.0 / (1.0 + jnp.exp(-s))


# ----------------------------- Pallas wrappers -----------------------------

def conv_matmul_bn_stats(patches, w, *, tile_m=512, tile_k=512):
    """patches: (M, K) bf16, w: (K, C) bf16 -> (y (M,C) f32, sum, sumsq)."""
    M, K = patches.shape
    C = w.shape[1]
    tm = _pick_tile(M, tile_m)
    tk = _pick_tile(K, tile_k)
    m_tiles, k_tiles = M // tm, K // tk
    return pl.pallas_call(
        _matmul_bnstats_kernel,
        out_shape=(
            jax.ShapeDtypeStruct((M, C), jnp.float32),           # pre-BN conv out
            jax.ShapeDtypeStruct((m_tiles, 1, C), jnp.float32),  # per-tile sum
            jax.ShapeDtypeStruct((m_tiles, 1, C), jnp.float32),  # per-tile sum sq
        ),
        grid=(m_tiles, k_tiles),
        in_specs=[
            pl.BlockSpec((tm, tk), lambda m, k: (m, k)),
            pl.BlockSpec((tk, C), lambda m, k: (k, 0)),
        ],
        out_specs=(
            pl.BlockSpec((tm, C), lambda m, k: (m, 0)),
            pl.BlockSpec((1, 1, C), lambda m, k: (m, 0, 0)),
            pl.BlockSpec((1, 1, C), lambda m, k: (m, 0, 0)),
        ),
        compiler_params=pltpu.CompilerParams(
            dimension_semantics=("parallel", "arbitrary"),
            vmem_limit_bytes=VMEM_LIMIT),
    )(patches, w)


def bn_lrelu_apply(y, scale, shift, *, tile_m=1024):
    """y: (M, C) f32, scale/shift: (1, C) f32 -> (M, C) bf16."""
    M, C = y.shape
    tm = _pick_tile(M, tile_m)
    return pl.pallas_call(
        _bn_lrelu_kernel,
        out_shape=jax.ShapeDtypeStruct((M, C), jnp.bfloat16),
        grid=(M // tm,),
        in_specs=[
            pl.BlockSpec((tm, C), lambda m: (m, 0)),
            pl.BlockSpec((1, C), lambda m: (0, 0)),
            pl.BlockSpec((1, C), lambda m: (0, 0)),
        ],
        out_specs=pl.BlockSpec((tm, C), lambda m: (m, 0)),
        compiler_params=pltpu.CompilerParams(
            dimension_semantics=("parallel",),
            vmem_limit_bytes=VMEM_LIMIT),
    )(y, scale, shift)


def final_conv_sigmoid(x_flat, w_col, b, *, tile_n=256):
    """x_flat: (N, K) bf16, w_col: (K, 1) f32, b: (1, 1) f32 -> (N, 1) f32."""
    N, K = x_flat.shape
    w_row = w_col.reshape(1, K).astype(jnp.float32)
    tn = _pick_tile(N, tile_n)
    return pl.pallas_call(
        _final_dot_sigmoid_kernel,
        out_shape=jax.ShapeDtypeStruct((N, 1), jnp.float32),
        grid=(N // tn,),
        in_specs=[
            pl.BlockSpec((tn, K), lambda i: (i, 0)),
            pl.BlockSpec((1, K), lambda i: (0, 0)),
            pl.BlockSpec((1, 1), lambda i: (0, 0)),
        ],
        out_specs=pl.BlockSpec((tn, 1), lambda i: (i, 0)),
        compiler_params=pltpu.CompilerParams(
            dimension_semantics=("parallel",),
            vmem_limit_bytes=VMEM_LIMIT),
    )(x_flat, w_row, b)


# ------------------------------- JAX glue ----------------------------------

def _im2col_nhwc(x, k, stride, pad):
    """x: (N, H, W, C) -> patches (N*Ho*Wo, k*k*C), ordering (kh, kw, cin)."""
    N, H, W, C = x.shape
    if pad:
        x = jnp.pad(x, ((0, 0), (pad, pad), (pad, pad), (0, 0)))
    Hp, Wp = H + 2 * pad, W + 2 * pad
    Ho = (Hp - k) // stride + 1
    Wo = (Wp - k) // stride + 1
    cols = []
    for ki in range(k):
        for kj in range(k):
            cols.append(x[:, ki:ki + stride * Ho:stride,
                          kj:kj + stride * Wo:stride, :])
    p = jnp.stack(cols, axis=3)                 # (N, Ho, Wo, k*k, C)
    return p.reshape(N * Ho * Wo, k * k * C), Ho, Wo


def _pt_weight_to_matrix(w_oihw):
    """PyTorch conv weight (Cout, Cin, kh, kw) -> (kh*kw*Cin, Cout)."""
    cout, cin, kh, kw = w_oihw.shape
    return jnp.transpose(w_oihw, (2, 3, 1, 0)).reshape(kh * kw * cin, cout)


def init_discriminator_params(key, img_channels, features_disc):
    dims = [img_channels, features_disc, features_disc * 2,
            features_disc * 4, features_disc * 8]
    keys = jax.random.split(key, 6)
    blocks = []
    for i in range(4):
        cin, cout = dims[i], dims[i + 1]
        w = 0.02 * jax.random.normal(keys[i], (cout, cin, 4, 4), jnp.float32)
        blocks.append({
            "w": _pt_weight_to_matrix(w),
            "gamma": jnp.ones((1, cout), jnp.float32),   # BatchNorm2d weight=1
            "beta": jnp.zeros((1, cout), jnp.float32),   # BatchNorm2d bias=0
        })
    cin = dims[4]
    wf = 0.02 * jax.random.normal(keys[4], (1, cin, 4, 4), jnp.float32)
    bf = 0.02 * jax.random.normal(keys[5], (1,), jnp.float32)
    return {"blocks": blocks,
            "final": {"w": _pt_weight_to_matrix(wf), "b": bf.reshape(1, 1)}}


def discriminator_forward(params, x_nchw):
    """x_nchw: (N, img_channels, 64, 64) float32 -> (N, 1, 1, 1) in (0, 1)."""
    x = jnp.transpose(x_nchw, (0, 2, 3, 1)).astype(jnp.bfloat16)   # NHWC, bf16
    N = x.shape[0]

    # 4 x [Conv(k4,s2,p1,no bias) + BatchNorm(train stats) + LeakyReLU(0.2)]
    for blk in params["blocks"]:
        p, Ho, Wo = _im2col_nhwc(x, k=4, stride=2, pad=1)          # bf16 patches
        y, psum, pssq = conv_matmul_bn_stats(p, blk["w"].astype(jnp.bfloat16))
        M = p.shape[0]
        # Finalize BN batch statistics (biased var over N*Ho*Wo), fold with
        # gamma/beta into a single scale/shift.  Tiny (C,)-sized math in f32.
        mean = jnp.sum(psum, axis=(0, 1)) / M
        var = jnp.maximum(jnp.sum(pssq, axis=(0, 1)) / M - mean * mean, 0.0)
        inv = jax.lax.rsqrt(var + BN_EPS)
        scale = blk["gamma"][0] * inv
        shift = blk["beta"][0] - mean * scale
        a = bn_lrelu_apply(y, scale[None, :], shift[None, :])      # (M, C) bf16
        x = a.reshape(N, Ho, Wo, -1)

    # final Conv(k4,s2,p0) on a 4x4 map: Ho=Wo=1 -> it is a flattened dot.
    # Flatten order (kh, kw, cin) matches _pt_weight_to_matrix.
    x_flat = x.reshape(N, -1)
    out = final_conv_sigmoid(x_flat, params["final"]["w"], params["final"]["b"])
    return out.reshape(N, 1, 1, 1)                                 # NCHW


# --------------------------------- main -------------------------------------

if __name__ == "__main__":
    img_channels = 3
    features_disc = 16   # small demo width; main.py uses 64 (same architecture)

    key = jax.random.PRNGKey(0)
    kx, kp = jax.random.split(key)
    # DCGAN discriminator requires 64x64 spatial input for the final 4x4 conv.
    x = jax.random.normal(kx, (2, img_channels, 64, 64), jnp.float32)
    params = init_discriminator_params(kp, img_channels, features_disc)

    fwd = jax.jit(functools.partial(discriminator_forward, params))
    out = jax.block_until_ready(fwd(x))

    assert out.shape == (2, 1, 1, 1), out.shape
    assert bool(jnp.all((out > 0.0) & (out < 1.0)))  # sigmoid range
    print("KERNEL_OK")
</pallas_src>

<mosaic_0001>
module attributes {stable_mosaic.version = 11 : i64} {
  func.func @_matmul_bnstats_kernel(%arg0: i32, %arg1: i32, %arg2: memref<512x48xbf16, #tpu.memory_space<vmem>>, %arg3: memref<48x16xbf16, #tpu.memory_space<vmem>>, %arg4: memref<512x16xf32, #tpu.memory_space<vmem>>, %arg5: memref<1x1x16xf32, #tpu.memory_space<vmem>>, %arg6: memref<1x1x16xf32, #tpu.memory_space<vmem>>) attributes {dimension_semantics = [#tpu.dimension_semantics<parallel>, #tpu.dimension_semantics<arbitrary>], iteration_bounds = array<i64: 4, 1>, scalar_prefetch = 0 : i64, scratch_operands = 0 : i64, tpu.core_type = #tpu.core_type<tc>, window_params = [{transform_indices = @transform_0, window_bounds = array<i64: 512, 48>}, {transform_indices = @transform_1, window_bounds = array<i64: 48, 16>}, {transform_indices = @transform_2, window_bounds = array<i64: 512, 16>}, {transform_indices = @transform_3, window_bounds = array<i64: 1, 1, 16>}, {transform_indices = @transform_4, window_bounds = array<i64: 1, 1, 16>}]} {
    %c0_i32 = arith.constant 0 : i32
    %0 = arith.cmpi eq, %arg1, %c0_i32 : i32
    %1 = arith.extui %0 : i1 to i32
    %c0_i32_0 = arith.constant 0 : i32
    %2 = arith.cmpi ne, %1, %c0_i32_0 : i32
    scf.if %2 {
      %cst_10 = arith.constant 0.000000e+00 : f32
      %12 = vector.broadcast %cst_10 : f32 to vector<512x16xf32>
      %c0_11 = arith.constant 0 : index
      %c0_12 = arith.constant 0 : index
      %13 = vector.load %arg4[%c0_11, %c0_12] : memref<512x16xf32, #tpu.memory_space<vmem>>, vector<512x16xf32>
      tpu.vector_store %arg4[%c0_11, %c0_12], %12 {strides = array<i32>} : memref<512x16xf32, #tpu.memory_space<vmem>>, vector<512x16xf32>,
    } else {
    }
    %c0 = arith.constant 0 : index
    %c0_1 = arith.constant 0 : index
    %3 = vector.load %arg4[%c0, %c0_1] : memref<512x16xf32, #tpu.memory_space<vmem>>, vector<512x16xf32>
    %c0_2 = arith.constant 0 : index
    %c0_3 = arith.constant 0 : index
    %4 = vector.load %arg2[%c0_2, %c0_3] : memref<512x48xbf16, #tpu.memory_space<vmem>>, vector<512x48xbf16>
    %c0_4 = arith.constant 0 : index
    %c0_5 = arith.constant 0 : index
    %5 = vector.load %arg3[%c0_4, %c0_5] : memref<48x16xbf16, #tpu.memory_space<vmem>>, vector<48x16xbf16>
    %cst = arith.constant dense<0.000000e+00> : vector<512x16xf32>
    %6 = tpu.matmul %4, %5, %cst {dimension_numbers = #tpu.dot_dimension_numbers<[1], [0], [0], [1], [0, 0, 1, 1], [], []>} : vector<512x48xbf16>, vector<48x16xbf16>, vector<512x16xf32> -> vector<512x16xf32>
    %7 = arith.addf %3, %6 : vector<512x16xf32>
    %c0_6 = arith.constant 0 : index
    %c0_7 = arith.constant 0 : index
    %8 = vector.load %arg4[%c0_6, %c0_7] : memref<512x16xf32, #tpu.memory_space<vmem>>, vector<512x16xf32>
    tpu.vector_store %arg4[%c0_6, %c0_7], %7 {strides = array<i32>} : memref<512x16xf32, #tpu.memory_space<vmem>>, vector<512x16xf32>,
    %c0_i32_8 = arith.constant 0 : i32
    %9 = arith.cmpi eq, %arg1, %c0_i32_8 : i32
    %10 = arith.extui %9 : i1 to i32
    %c0_i32_9 = arith.constant 0 : i32
    %11 = arith.cmpi ne, %10, %c0_i32_9 : i32
    scf.if %11 {
      %c0_10 = arith.constant 0 : index
      %c0_11 = arith.constant 0 : index
      %12 = vector.load %arg4[%c0_10, %c0_11] : memref<512x16xf32, #tpu.memory_space<vmem>>, vector<512x16xf32>
      %cst_12 = arith.constant dense<0.000000e+00> : vector<16xf32>
      %13 = vector.multi_reduction <add>, %12, %cst_12 [0] : vector<512x16xf32> to vector<16xf32>
      %14 = vector.shape_cast %13 : vector<16xf32> to vector<1x16xf32>
      %15 = vector.shape_cast %14 : vector<1x16xf32> to vector<1x1x16xf32>
      %c0_13 = arith.constant 0 : index
      %c0_14 = arith.constant 0 : index
      %c0_15 = arith.constant 0 : index
      %16 = vector.load %arg5[%c0_13, %c0_14, %c0_15] : memref<1x1x16xf32, #tpu.memory_space<vmem>>, vector<1x1x16xf32>
      tpu.vector_store %arg5[%c0_13, %c0_14, %c0_15], %15 {strides = array<i32>} : memref<1x1x16xf32, #tpu.memory_space<vmem>>, vector<1x1x16xf32>,
      %17 = arith.mulf %12, %12 : vector<512x16xf32>
      %cst_16 = arith.constant dense<0.000000e+00> : vector<16xf32>
      %18 = vector.multi_reduction <add>, %17, %cst_16 [0] : vector<512x16xf32> to vector<16xf32>
      %19 = vector.shape_cast %18 : vector<16xf32> to vector<1x16xf32>
      %20 = vector.shape_cast %19 : vector<1x16xf32> to vector<1x1x16xf32>
      %c0_17 = arith.constant 0 : index
      %c0_18 = arith.constant 0 : index
      %c0_19 = arith.constant 0 : index
      %21 = vector.load %arg6[%c0_17, %c0_18, %c0_19] : memref<1x1x16xf32, #tpu.memory_space<vmem>>, vector<1x1x16xf32>
      tpu.vector_store %arg6[%c0_17, %c0_18, %c0_19], %20 {strides = array<i32>} : memref<1x1x16xf32, #tpu.memory_space<vmem>>, vector<1x1x16xf32>,
    } else {
    }
    return
  }
  func.func @transform_0(%arg0: i32, %arg1: i32) -> (i32, i32) {
    %c0_i32 = arith.constant 0 : i32
    return %arg0, %arg1 : i32, i32
  }
  func.func @transform_1(%arg0: i32, %arg1: i32) -> (i32, i32) {
    %c0_i32 = arith.constant 0 : i32
    %c0_i32_0 = arith.constant 0 : i32
    return %arg1, %c0_i32 : i32, i32
  }
  func.func @transform_2(%arg0: i32, %arg1: i32) -> (i32, i32) {
    %c0_i32 = arith.constant 0 : i32
    %c0_i32_0 = arith.constant 0 : i32
    return %arg0, %c0_i32 : i32, i32
  }
  func.func @transform_3(%arg0: i32, %arg1: i32) -> (i32, i32, i32) {
    %c0_i32 = arith.constant 0 : i32
    %c0_i32_0 = arith.constant 0 : i32
    %c0_i32_1 = arith.constant 0 : i32
    return %arg0, %c0_i32, %c0_i32_0 : i32, i32, i32
  }
  func.func @transform_4(%arg0: i32, %arg1: i32) -> (i32, i32, i32) {
    %c0_i32 = arith.constant 0 : i32
    %c0_i32_0 = arith.constant 0 : i32
    %c0_i32_1 = arith.constant 0 : i32
    return %arg0, %c0_i32, %c0_i32_0 : i32, i32, i32
  }
}

module attributes {stable_mosaic.version = 11 : i64} {
  func.func @_bn_lrelu_kernel(%arg0: i32, %arg1: memref<1024x16xf32, #tpu.memory_space<vmem>>, %arg2: memref<1x16xf32, #tpu.memory_space<vmem>>, %arg3: memref<1x16xf32, #tpu.memory_space<vmem>>, %arg4: memref<1024x16xbf16, #tpu.memory_space<vmem>>) attributes {dimension_semantics = [#tpu.dimension_semantics<parallel>], iteration_bounds = array<i64: 2>, scalar_prefetch = 0 : i64, scratch_operands = 0 : i64, tpu.core_type = #tpu.core_type<tc>, window_params = [{transform_indices = @transform_0, window_bounds = array<i64: 1024, 16>}, {pipeline_mode = #tpu.pipeline_mode<synchronous>, transform_indices = @transform_1, window_bounds = array<i64: 1, 16>}, {pipeline_mode = #tpu.pipeline_mode<synchronous>, transform_indices = @transform_2, window_bounds = array<i64: 1, 16>}, {transform_indices = @transform_3, window_bounds = array<i64: 1024, 16>}]} {
    %c0 = arith.constant 0 : index
    %c0_0 = arith.constant 0 : index
    %0 = vector.load %arg1[%c0, %c0_0] : memref<1024x16xf32, #tpu.memory_space<vmem>>, vector<1024x16xf32>
    %c0_1 = arith.constant 0 : index
    %c0_2 = arith.constant 0 : index
    %1 = vector.load %arg2[%c0_1, %c0_2] : memref<1x16xf32, #tpu.memory_space<vmem>>, vector<1x16xf32>
    %2 = vector.broadcast %1 : vector<1x16xf32> to vector<1024x16xf32>
    %3 = arith.mulf %0, %2 : vector<1024x16xf32>
    %c0_3 = arith.constant 0 : index
    %c0_4 = arith.constant 0 : index
    %4 = vector.load %arg3[%c0_3, %c0_4] : memref<1x16xf32, #tpu.memory_space<vmem>>, vector<1x16xf32>
    %5 = vector.broadcast %4 : vector<1x16xf32> to vector<1024x16xf32>
    %6 = arith.addf %3, %5 : vector<1024x16xf32>
    %cst = arith.constant 0.000000e+00 : f32
    %7 = vector.broadcast %cst : f32 to vector<1024x16xf32>
    %8 = arith.cmpf oge, %6, %7 : vector<1024x16xf32>
    %cst_5 = arith.constant 2.000000e-01 : f32
    %9 = vector.broadcast %cst_5 : f32 to vector<1024x16xf32>
    %10 = arith.mulf %9, %6 : vector<1024x16xf32>
    %11 = arith.select %8, %6, %10 : vector<1024x16xi1>, vector<1024x16xf32>
    %12 = arith.truncf %11 : vector<1024x16xf32> to vector<1024x16xbf16>
    %c0_6 = arith.constant 0 : index
    %c0_7 = arith.constant 0 : index
    %13 = vector.load %arg4[%c0_6, %c0_7] : memref<1024x16xbf16, #tpu.memory_space<vmem>>, vector<1024x16xbf16>
    tpu.vector_store %arg4[%c0_6, %c0_7], %12 {strides = array<i32>} : memref<1024x16xbf16, #tpu.memory_space<vmem>>, vector<1024x16xbf16>,
    return
  }
  func.func @transform_0(%arg0: i32) -> (i32, i32) {
    %c0_i32 = arith.constant 0 : i32
    %c0_i32_0 = arith.constant 0 : i32
    return %arg0, %c0_i32 : i32, i32
  }
  func.func @transform_1(%arg0: i32) -> (i32, i32) {
    %c0_i32 = arith.constant 0 : i32
    %c0_i32_0 = arith.constant 0 : i32
    %c0_i32_1 = arith.constant 0 : i32
    return %c0_i32, %c0_i32_0 : i32, i32
  }
  func.func @transform_2(%arg0: i32) -> (i32, i32) {
    %c0_i32 = arith.constant 0 : i32
    %c0_i32_0 = arith.constant 0 : i32
    %c0_i32_1 = arith.constant 0 : i32
    return %c0_i32, %c0_i32_0 : i32, i32
  }
  func.func @transform_3(%arg0: i32) -> (i32, i32) {
    %c0_i32 = arith.constant 0 : i32
    %c0_i32_0 = arith.constant 0 : i32
    return %arg0, %c0_i32 : i32, i32
  }
}

module attributes {stable_mosaic.version = 11 : i64} {
  func.func @_matmul_bnstats_kernel(%arg0: i32, %arg1: i32, %arg2: memref<512x256xbf16, #tpu.memory_space<vmem>>, %arg3: memref<256x32xbf16, #tpu.memory_space<vmem>>, %arg4: memref<512x32xf32, #tpu.memory_space<vmem>>, %arg5: memref<1x1x32xf32, #tpu.memory_space<vmem>>, %arg6: memref<1x1x32xf32, #tpu.memory_space<vmem>>) attributes {dimension_semantics = [#tpu.dimension_semantics<parallel>, #tpu.dimension_semantics<arbitrary>], iteration_bounds = array<i64: 1, 1>, scalar_prefetch = 0 : i64, scratch_operands = 0 : i64, tpu.core_type = #tpu.core_type<tc>, window_params = [{transform_indices = @transform_0, window_bounds = array<i64: 512, 256>}, {transform_indices = @transform_1, window_bounds = array<i64: 256, 32>}, {transform_indices = @transform_2, window_bounds = array<i64: 512, 32>}, {transform_indices = @transform_3, window_bounds = array<i64: 1, 1, 32>}, {transform_indices = @transform_4, window_bounds = array<i64: 1, 1, 32>}]} {
    %c0_i32 = arith.constant 0 : i32
    %0 = arith.cmpi eq, %arg1, %c0_i32 : i32
    %1 = arith.extui %0 : i1 to i32
    %c0_i32_0 = arith.constant 0 : i32
    %2 = arith.cmpi ne, %1, %c0_i32_0 : i32
    scf.if %2 {
      %cst_10 = arith.constant 0.000000e+00 : f32
      %12 = vector.broadcast %cst_10 : f32 to vector<512x32xf32>
      %c0_11 = arith.constant 0 : index
      %c0_12 = arith.constant 0 : index
      %13 = vector.load %arg4[%c0_11, %c0_12] : memref<512x32xf32, #tpu.memory_space<vmem>>, vector<512x32xf32>
      tpu.vector_store %arg4[%c0_11, %c0_12], %12 {strides = array<i32>} : memref<512x32xf32, #tpu.memory_space<vmem>>, vector<512x32xf32>,
    } else {
    }
    %c0 = arith.constant 0 : index
    %c0_1 = arith.constant 0 : index
    %3 = vector.load %arg4[%c0, %c0_1] : memref<512x32xf32, #tpu.memory_space<vmem>>, vector<512x32xf32>
    %c0_2 = arith.constant 0 : index
    %c0_3 = arith.constant 0 : index
    %4 = vector.load %arg2[%c0_2, %c0_3] : memref<512x256xbf16, #tpu.memory_space<vmem>>, vector<512x256xbf16>
    %c0_4 = arith.constant 0 : index
    %c0_5 = arith.constant 0 : index
    %5 = vector.load %arg3[%c0_4, %c0_5] : memref<256x32xbf16, #tpu.memory_space<vmem>>, vector<256x32xbf16>
    %cst = arith.constant dense<0.000000e+00> : vector<512x32xf32>
    %6 = tpu.matmul %4, %5, %cst {dimension_numbers = #tpu.dot_dimension_numbers<[1], [0], [0], [1], [0, 0, 1, 1], [], []>} : vector<512x256xbf16>, vector<256x32xbf16>, vector<512x32xf32> -> vector<512x32xf32>
    %7 = arith.addf %3, %6 : vector<512x32xf32>
    %c0_6 = arith.constant 0 : index
    %c0_7 = arith.constant 0 : index
    %8 = vector.load %arg4[%c0_6, %c0_7] : memref<512x32xf32, #tpu.memory_space<vmem>>, vector<512x32xf32>
    tpu.vector_store %arg4[%c0_6, %c0_7], %7 {strides = array<i32>} : memref<512x32xf32, #tpu.memory_space<vmem>>, vector<512x32xf32>,
    %c0_i32_8 = arith.constant 0 : i32
    %9 = arith.cmpi eq, %arg1, %c0_i32_8 : i32
    %10 = arith.extui %9 : i1 to i32
    %c0_i32_9 = arith.constant 0 : i32
    %11 = arith.cmpi ne, %10, %c0_i32_9 : i32
    scf.if %11 {
      %c0_10 = arith.constant 0 : index
      %c0_11 = arith.constant 0 : index
      %12 = vector.load %arg4[%c0_10, %c0_11] : memref<512x32xf32, #tpu.memory_space<vmem>>, vector<512x32xf32>
      %cst_12 = arith.constant dense<0.000000e+00> : vector<32xf32>
      %13 = vector.multi_reduction <add>, %12, %cst_12 [0] : vector<512x32xf32> to vector<32xf32>
      %14 = vector.shape_cast %13 : vector<32xf32> to vector<1x32xf32>
      %15 = vector.shape_cast %14 : vector<1x32xf32> to vector<1x1x32xf32>
      %c0_13 = arith.constant 0 : index
      %c0_14 = arith.constant 0 : index
      %c0_15 = arith.constant 0 : index
      %16 = vector.load %arg5[%c0_13, %c0_14, %c0_15] : memref<1x1x32xf32, #tpu.memory_space<vmem>>, vector<1x1x32xf32>
      tpu.vector_store %arg5[%c0_13, %c0_14, %c0_15], %15 {strides = array<i32>} : memref<1x1x32xf32, #tpu.memory_space<vmem>>, vector<1x1x32xf32>,
      %17 = arith.mulf %12, %12 : vector<512x32xf32>
      %cst_16 = arith.constant dense<0.000000e+00> : vector<32xf32>
      %18 = vector.multi_reduction <add>, %17, %cst_16 [0] : vector<512x32xf32> to vector<32xf32>
      %19 = vector.shape_cast %18 : vector<32xf32> to vector<1x32xf32>
      %20 = vector.shape_cast %19 : vector<1x32xf32> to vector<1x1x32xf32>
      %c0_17 = arith.constant 0 : index
      %c0_18 = arith.constant 0 : index
      %c0_19 = arith.constant 0 : index
      %21 = vector.load %arg6[%c0_17, %c0_18, %c0_19] : memref<1x1x32xf32, #tpu.memory_space<vmem>>, vector<1x1x32xf32>
      tpu.vector_store %arg6[%c0_17, %c0_18, %c0_19], %20 {strides = array<i32>} : memref<1x1x32xf32, #tpu.memory_space<vmem>>, vector<1x1x32xf32>,
    } else {
    }
    return
  }
  func.func @transform_0(%arg0: i32, %arg1: i32) -> (i32, i32) {
    %c0_i32 = arith.constant 0 : i32
    return %arg0, %arg1 : i32, i32
  }
  func.func @transform_1(%arg0: i32, %arg1: i32) -> (i32, i32) {
    %c0_i32 = arith.constant 0 : i32
    %c0_i32_0 = arith.constant 0 : i32
    return %arg1, %c0_i32 : i32, i32
  }
  func.func @transform_2(%arg0: i32, %arg1: i32) -> (i32, i32) {
    %c0_i32 = arith.constant 0 : i32
    %c0_i32_0 = arith.constant 0 : i32
    return %arg0, %c0_i32 : i32, i32
  }
  func.func @transform_3(%arg0: i32, %arg1: i32) -> (i32, i32, i32) {
    %c0_i32 = arith.constant 0 : i32
    %c0_i32_0 = arith.constant 0 : i32
    %c0_i32_1 = arith.constant 0 : i32
    return %arg0, %c0_i32, %c0_i32_0 : i32, i32, i32
  }
  func.func @transform_4(%arg0: i32, %arg1: i32) -> (i32, i32, i32) {
    %c0_i32 = arith.constant 0 : i32
    %c0_i32_0 = arith.constant 0 : i32
    %c0_i32_1 = arith.constant 0 : i32
    return %arg0, %c0_i32, %c0_i32_0 : i32, i32, i32
  }
}

module attributes {stable_mosaic.version = 11 : i64} {
  func.func @_bn_lrelu_kernel(%arg0: i32, %arg1: memref<512x32xf32, #tpu.memory_space<vmem>>, %arg2: memref<1x32xf32, #tpu.memory_space<vmem>>, %arg3: memref<1x32xf32, #tpu.memory_space<vmem>>, %arg4: memref<512x32xbf16, #tpu.memory_space<vmem>>) attributes {dimension_semantics = [#tpu.dimension_semantics<parallel>], iteration_bounds = array<i64: 1>, scalar_prefetch = 0 : i64, scratch_operands = 0 : i64, tpu.core_type = #tpu.core_type<tc>, window_params = [{transform_indices = @transform_0, window_bounds = array<i64: 512, 32>}, {pipeline_mode = #tpu.pipeline_mode<synchronous>, transform_indices = @transform_1, window_bounds = array<i64: 1, 32>}, {pipeline_mode = #tpu.pipeline_mode<synchronous>, transform_indices = @transform_2, window_bounds = array<i64: 1, 32>}, {transform_indices = @transform_3, window_bounds = array<i64: 512, 32>}]} {
    %c0 = arith.constant 0 : index
    %c0_0 = arith.constant 0 : index
    %0 = vector.load %arg1[%c0, %c0_0] : memref<512x32xf32, #tpu.memory_space<vmem>>, vector<512x32xf32>
    %c0_1 = arith.constant 0 : index
    %c0_2 = arith.constant 0 : index
    %1 = vector.load %arg2[%c0_1, %c0_2] : memref<1x32xf32, #tpu.memory_space<vmem>>, vector<1x32xf32>
    %2 = vector.broadcast %1 : vector<1x32xf32> to vector<512x32xf32>
    %3 = arith.mulf %0, %2 : vector<512x32xf32>
    %c0_3 = arith.constant 0 : index
    %c0_4 = arith.constant 0 : index
    %4 = vector.load %arg3[%c0_3, %c0_4] : memref<1x32xf32, #tpu.memory_space<vmem>>, vector<1x32xf32>
    %5 = vector.broadcast %4 : vector<1x32xf32> to vector<512x32xf32>
    %6 = arith.addf %3, %5 : vector<512x32xf32>
    %cst = arith.constant 0.000000e+00 : f32
    %7 = vector.broadcast %cst : f32 to vector<512x32xf32>
    %8 = arith.cmpf oge, %6, %7 : vector<512x32xf32>
    %cst_5 = arith.constant 2.000000e-01 : f32
    %9 = vector.broadcast %cst_5 : f32 to vector<512x32xf32>
    %10 = arith.mulf %9, %6 : vector<512x32xf32>
    %11 = arith.select %8, %6, %10 : vector<512x32xi1>, vector<512x32xf32>
    %12 = arith.truncf %11 : vector<512x32xf32> to vector<512x32xbf16>
    %c0_6 = arith.constant 0 : index
    %c0_7 = arith.constant 0 : index
    %13 = vector.load %arg4[%c0_6, %c0_7] : memref<512x32xbf16, #tpu.memory_space<vmem>>, vector<512x32xbf16>
    tpu.vector_store %arg4[%c0_6, %c0_7], %12 {strides = array<i32>} : memref<512x32xbf16, #tpu.memory_space<vmem>>, vector<512x32xbf16>,
    return
  }
  func.func @transform_0(%arg0: i32) -> (i32, i32) {
    %c0_i32 = arith.constant 0 : i32
    %c0_i32_0 = arith.constant 0 : i32
    return %arg0, %c0_i32 : i32, i32
  }
  func.func @transform_1(%arg0: i32) -> (i32, i32) {
    %c0_i32 = arith.constant 0 : i32
    %c0_i32_0 = arith.constant 0 : i32
    %c0_i32_1 = arith.constant 0 : i32
    return %c0_i32, %c0_i32_0 : i32, i32
  }
  func.func @transform_2(%arg0: i32) -> (i32, i32) {
    %c0_i32 = arith.constant 0 : i32
    %c0_i32_0 = arith.constant 0 : i32
    %c0_i32_1 = arith.constant 0 : i32
    return %c0_i32, %c0_i32_0 : i32, i32
  }
  func.func @transform_3(%arg0: i32) -> (i32, i32) {
    %c0_i32 = arith.constant 0 : i32
    %c0_i32_0 = arith.constant 0 : i32
    return %arg0, %c0_i32 : i32, i32
  }
}

module attributes {stable_mosaic.version = 11 : i64} {
  func.func @_matmul_bnstats_kernel(%arg0: i32, %arg1: i32, %arg2: memref<128x512xbf16, #tpu.memory_space<vmem>>, %arg3: memref<512x64xbf16, #tpu.memory_space<vmem>>, %arg4: memref<128x64xf32, #tpu.memory_space<vmem>>, %arg5: memref<1x1x64xf32, #tpu.memory_space<vmem>>, %arg6: memref<1x1x64xf32, #tpu.memory_space<vmem>>) attributes {dimension_semantics = [#tpu.dimension_semantics<parallel>, #tpu.dimension_semantics<arbitrary>], iteration_bounds = array<i64: 1, 1>, scalar_prefetch = 0 : i64, scratch_operands = 0 : i64, tpu.core_type = #tpu.core_type<tc>, window_params = [{transform_indices = @transform_0, window_bounds = array<i64: 128, 512>}, {transform_indices = @transform_1, window_bounds = array<i64: 512, 64>}, {transform_indices = @transform_2, window_bounds = array<i64: 128, 64>}, {transform_indices = @transform_3, window_bounds = array<i64: 1, 1, 64>}, {transform_indices = @transform_4, window_bounds = array<i64: 1, 1, 64>}]} {
    %c0_i32 = arith.constant 0 : i32
    %0 = arith.cmpi eq, %arg1, %c0_i32 : i32
    %1 = arith.extui %0 : i1 to i32
    %c0_i32_0 = arith.constant 0 : i32
    %2 = arith.cmpi ne, %1, %c0_i32_0 : i32
    scf.if %2 {
      %cst_10 = arith.constant 0.000000e+00 : f32
      %12 = vector.broadcast %cst_10 : f32 to vector<128x64xf32>
      %c0_11 = arith.constant 0 : index
      %c0_12 = arith.constant 0 : index
      %13 = vector.load %arg4[%c0_11, %c0_12] : memref<128x64xf32, #tpu.memory_space<vmem>>, vector<128x64xf32>
      tpu.vector_store %arg4[%c0_11, %c0_12], %12 {strides = array<i32>} : memref<128x64xf32, #tpu.memory_space<vmem>>, vector<128x64xf32>,
    } else {
    }
    %c0 = arith.constant 0 : index
    %c0_1 = arith.constant 0 : index
    %3 = vector.load %arg4[%c0, %c0_1] : memref<128x64xf32, #tpu.memory_space<vmem>>, vector<128x64xf32>
    %c0_2 = arith.constant 0 : index
    %c0_3 = arith.constant 0 : index
    %4 = vector.load %arg2[%c0_2, %c0_3] : memref<128x512xbf16, #tpu.memory_space<vmem>>, vector<128x512xbf16>
    %c0_4 = arith.constant 0 : index
    %c0_5 = arith.constant 0 : index
    %5 = vector.load %arg3[%c0_4, %c0_5] : memref<512x64xbf16, #tpu.memory_space<vmem>>, vector<512x64xbf16>
    %cst = arith.constant dense<0.000000e+00> : vector<128x64xf32>
    %6 = tpu.matmul %4, %5, %cst {dimension_numbers = #tpu.dot_dimension_numbers<[1], [0], [0], [1], [0, 0, 1, 1], [], []>} : vector<128x512xbf16>, vector<512x64xbf16>, vector<128x64xf32> -> vector<128x64xf32>
    %7 = arith.addf %3, %6 : vector<128x64xf32>
    %c0_6 = arith.constant 0 : index
    %c0_7 = arith.constant 0 : index
    %8 = vector.load %arg4[%c0_6, %c0_7] : memref<128x64xf32, #tpu.memory_space<vmem>>, vector<128x64xf32>
    tpu.vector_store %arg4[%c0_6, %c0_7], %7 {strides = array<i32>} : memref<128x64xf32, #tpu.memory_space<vmem>>, vector<128x64xf32>,
    %c0_i32_8 = arith.constant 0 : i32
    %9 = arith.cmpi eq, %arg1, %c0_i32_8 : i32
    %10 = arith.extui %9 : i1 to i32
    %c0_i32_9 = arith.constant 0 : i32
    %11 = arith.cmpi ne, %10, %c0_i32_9 : i32
    scf.if %11 {
      %c0_10 = arith.constant 0 : index
      %c0_11 = arith.constant 0 : index
      %12 = vector.load %arg4[%c0_10, %c0_11] : memref<128x64xf32, #tpu.memory_space<vmem>>, vector<128x64xf32>
      %cst_12 = arith.constant dense<0.000000e+00> : vector<64xf32>
      %13 = vector.multi_reduction <add>, %12, %cst_12 [0] : vector<128x64xf32> to vector<64xf32>
      %14 = vector.shape_cast %13 : vector<64xf32> to vector<1x64xf32>
      %15 = vector.shape_cast %14 : vector<1x64xf32> to vector<1x1x64xf32>
      %c0_13 = arith.constant 0 : index
      %c0_14 = arith.constant 0 : index
      %c0_15 = arith.constant 0 : index
      %16 = vector.load %arg5[%c0_13, %c0_14, %c0_15] : memref<1x1x64xf32, #tpu.memory_space<vmem>>, vector<1x1x64xf32>
      tpu.vector_store %arg5[%c0_13, %c0_14, %c0_15], %15 {strides = array<i32>} : memref<1x1x64xf32, #tpu.memory_space<vmem>>, vector<1x1x64xf32>,
      %17 = arith.mulf %12, %12 : vector<128x64xf32>
      %cst_16 = arith.constant dense<0.000000e+00> : vector<64xf32>
      %18 = vector.multi_reduction <add>, %17, %cst_16 [0] : vector<128x64xf32> to vector<64xf32>
      %19 = vector.shape_cast %18 : vector<64xf32> to vector<1x64xf32>
      %20 = vector.shape_cast %19 : vector<1x64xf32> to vector<1x1x64xf32>
      %c0_17 = arith.constant 0 : index
      %c0_18 = arith.constant 0 : index
      %c0_19 = arith.constant 0 : index
      %21 = vector.load %arg6[%c0_17, %c0_18, %c0_19] : memref<1x1x64xf32, #tpu.memory_space<vmem>>, vector<1x1x64xf32>
      tpu.vector_store %arg6[%c0_17, %c0_18, %c0_19], %20 {strides = array<i32>} : memref<1x1x64xf32, #tpu.memory_space<vmem>>, vector<1x1x64xf32>,
    } else {
    }
    return
  }
  func.func @transform_0(%arg0: i32, %arg1: i32) -> (i32, i32) {
    %c0_i32 = arith.constant 0 : i32
    return %arg0, %arg1 : i32, i32
  }
  func.func @transform_1(%arg0: i32, %arg1: i32) -> (i32, i32) {
    %c0_i32 = arith.constant 0 : i32
    %c0_i32_0 = arith.constant 0 : i32
    return %arg1, %c0_i32 : i32, i32
  }
  func.func @transform_2(%arg0: i32, %arg1: i32) -> (i32, i32) {
    %c0_i32 = arith.constant 0 : i32
    %c0_i32_0 = arith.constant 0 : i32
    return %arg0, %c0_i32 : i32, i32
  }
  func.func @transform_3(%arg0: i32, %arg1: i32) -> (i32, i32, i32) {
    %c0_i32 = arith.constant 0 : i32
    %c0_i32_0 = arith.constant 0 : i32
    %c0_i32_1 = arith.constant 0 : i32
    return %arg0, %c0_i32, %c0_i32_0 : i32, i32, i32
  }
  func.func @transform_4(%arg0: i32, %arg1: i32) -> (i32, i32, i32) {
    %c0_i32 = arith.constant 0 : i32
    %c0_i32_0 = arith.constant 0 : i32
    %c0_i32_1 = arith.constant 0 : i32
    return %arg0, %c0_i32, %c0_i32_0 : i32, i32, i32
  }
}

module attributes {stable_mosaic.version = 11 : i64} {
  func.func @_bn_lrelu_kernel(%arg0: i32, %arg1: memref<128x64xf32, #tpu.memory_space<vmem>>, %arg2: memref<1x64xf32, #tpu.memory_space<vmem>>, %arg3: memref<1x64xf32, #tpu.memory_space<vmem>>, %arg4: memref<128x64xbf16, #tpu.memory_space<vmem>>) attributes {dimension_semantics = [#tpu.dimension_semantics<parallel>], iteration_bounds = array<i64: 1>, scalar_prefetch = 0 : i64, scratch_operands = 0 : i64, tpu.core_type = #tpu.core_type<tc>, window_params = [{transform_indices = @transform_0, window_bounds = array<i64: 128, 64>}, {pipeline_mode = #tpu.pipeline_mode<synchronous>, transform_indices = @transform_1, window_bounds = array<i64: 1, 64>}, {pipeline_mode = #tpu.pipeline_mode<synchronous>, transform_indices = @transform_2, window_bounds = array<i64: 1, 64>}, {transform_indices = @transform_3, window_bounds = array<i64: 128, 64>}]} {
    %c0 = arith.constant 0 : index
    %c0_0 = arith.constant 0 : index
    %0 = vector.load %arg1[%c0, %c0_0] : memref<128x64xf32, #tpu.memory_space<vmem>>, vector<128x64xf32>
    %c0_1 = arith.constant 0 : index
    %c0_2 = arith.constant 0 : index
    %1 = vector.load %arg2[%c0_1, %c0_2] : memref<1x64xf32, #tpu.memory_space<vmem>>, vector<1x64xf32>
    %2 = vector.broadcast %1 : vector<1x64xf32> to vector<128x64xf32>
    %3 = arith.mulf %0, %2 : vector<128x64xf32>
    %c0_3 = arith.constant 0 : index
    %c0_4 = arith.constant 0 : index
    %4 = vector.load %arg3[%c0_3, %c0_4] : memref<1x64xf32, #tpu.memory_space<vmem>>, vector<1x64xf32>
    %5 = vector.broadcast %4 : vector<1x64xf32> to vector<128x64xf32>
    %6 = arith.addf %3, %5 : vector<128x64xf32>
    %cst = arith.constant 0.000000e+00 : f32
    %7 = vector.broadcast %cst : f32 to vector<128x64xf32>
    %8 = arith.cmpf oge, %6, %7 : vector<128x64xf32>
    %cst_5 = arith.constant 2.000000e-01 : f32
    %9 = vector.broadcast %cst_5 : f32 to vector<128x64xf32>
    %10 = arith.mulf %9, %6 : vector<128x64xf32>
    %11 = arith.select %8, %6, %10 : vector<128x64xi1>, vector<128x64xf32>
    %12 = arith.truncf %11 : vector<128x64xf32> to vector<128x64xbf16>
    %c0_6 = arith.constant 0 : index
    %c0_7 = arith.constant 0 : index
    %13 = vector.load %arg4[%c0_6, %c0_7] : memref<128x64xbf16, #tpu.memory_space<vmem>>, vector<128x64xbf16>
    tpu.vector_store %arg4[%c0_6, %c0_7], %12 {strides = array<i32>} : memref<128x64xbf16, #tpu.memory_space<vmem>>, vector<128x64xbf16>,
    return
  }
  func.func @transform_0(%arg0: i32) -> (i32, i32) {
    %c0_i32 = arith.constant 0 : i32
    %c0_i32_0 = arith.constant 0 : i32
    return %arg0, %c0_i32 : i32, i32
  }
  func.func @transform_1(%arg0: i32) -> (i32, i32) {
    %c0_i32 = arith.constant 0 : i32
    %c0_i32_0 = arith.constant 0 : i32
    %c0_i32_1 = arith.constant 0 : i32
    return %c0_i32, %c0_i32_0 : i32, i32
  }
  func.func @transform_2(%arg0: i32) -> (i32, i32) {
    %c0_i32 = arith.constant 0 : i32
    %c0_i32_0 = arith.constant 0 : i32
    %c0_i32_1 = arith.constant 0 : i32
    return %c0_i32, %c0_i32_0 : i32, i32
  }
  func.func @transform_3(%arg0: i32) -> (i32, i32) {
    %c0_i32 = arith.constant 0 : i32
    %c0_i32_0 = arith.constant 0 : i32
    return %arg0, %c0_i32 : i32, i32
  }
}

module attributes {stable_mosaic.version = 11 : i64} {
  func.func @_matmul_bnstats_kernel(%arg0: i32, %arg1: i32, %arg2: memref<32x512xbf16, #tpu.memory_space<vmem>>, %arg3: memref<512x128xbf16, #tpu.memory_space<vmem>>, %arg4: memref<32x128xf32, #tpu.memory_space<vmem>>, %arg5: memref<1x1x128xf32, #tpu.memory_space<vmem>>, %arg6: memref<1x1x128xf32, #tpu.memory_space<vmem>>) attributes {dimension_semantics = [#tpu.dimension_semantics<parallel>, #tpu.dimension_semantics<arbitrary>], iteration_bounds = array<i64: 1, 2>, scalar_prefetch = 0 : i64, scratch_operands = 0 : i64, tpu.core_type = #tpu.core_type<tc>, window_params = [{transform_indices = @transform_0, window_bounds = array<i64: 32, 512>}, {transform_indices = @transform_1, window_bounds = array<i64: 512, 128>}, {transform_indices = @transform_2, window_bounds = array<i64: 32, 128>}, {transform_indices = @transform_3, window_bounds = array<i64: 1, 1, 128>}, {transform_indices = @transform_4, window_bounds = array<i64: 1, 1, 128>}]} {
    %c0_i32 = arith.constant 0 : i32
    %0 = arith.cmpi eq, %arg1, %c0_i32 : i32
    %1 = arith.extui %0 : i1 to i32
    %c0_i32_0 = arith.constant 0 : i32
    %2 = arith.cmpi ne, %1, %c0_i32_0 : i32
    scf.if %2 {
      %cst_9 = arith.constant 0.000000e+00 : f32
      %12 = vector.broadcast %cst_9 : f32 to vector<32x128xf32>
      %c0_10 = arith.constant 0 : index
      %c0_11 = arith.constant 0 : index
      %13 = vector.load %arg4[%c0_10, %c0_11] : memref<32x128xf32, #tpu.memory_space<vmem>>, vector<32x128xf32>
      tpu.vector_store %arg4[%c0_10, %c0_11], %12 {strides = array<i32>} : memref<32x128xf32, #tpu.memory_space<vmem>>, vector<32x128xf32>,
    } else {
    }
    %c0 = arith.constant 0 : index
    %c0_1 = arith.constant 0 : index
    %3 = vector.load %arg4[%c0, %c0_1] : memref<32x128xf32, #tpu.memory_space<vmem>>, vector<32x128xf32>
    %c0_2 = arith.constant 0 : index
    %c0_3 = arith.constant 0 : index
    %4 = vector.load %arg2[%c0_2, %c0_3] : memref<32x512xbf16, #tpu.memory_space<vmem>>, vector<32x512xbf16>
    %c0_4 = arith.constant 0 : index
    %c0_5 = arith.constant 0 : index
    %5 = vector.load %arg3[%c0_4, %c0_5] : memref<512x128xbf16, #tpu.memory_space<vmem>>, vector<512x128xbf16>
    %cst = arith.constant dense<0.000000e+00> : vector<32x128xf32>
    %6 = tpu.matmul %4, %5, %cst {dimension_numbers = #tpu.dot_dimension_numbers<[1], [0], [0], [1], [0, 0, 1, 1], [], []>} : vector<32x512xbf16>, vector<512x128xbf16>, vector<32x128xf32> -> vector<32x128xf32>
    %7 = arith.addf %3, %6 : vector<32x128xf32>
    %c0_6 = arith.constant 0 : index
    %c0_7 = arith.constant 0 : index
    %8 = vector.load %arg4[%c0_6, %c0_7] : memref<32x128xf32, #tpu.memory_space<vmem>>, vector<32x128xf32>
    tpu.vector_store %arg4[%c0_6, %c0_7], %7 {strides = array<i32>} : memref<32x128xf32, #tpu.memory_space<vmem>>, vector<32x128xf32>,
    %c1_i32 = arith.constant 1 : i32
    %9 = arith.cmpi eq, %arg1, %c1_i32 : i32
    %10 = arith.extui %9 : i1 to i32
    %c0_i32_8 = arith.constant 0 : i32
    %11 = arith.cmpi ne, %10, %c0_i32_8 : i32
    scf.if %11 {
      %c0_9 = arith.constant 0 : index
      %c0_10 = arith.constant 0 : index
      %12 = vector.load %arg4[%c0_9, %c0_10] : memref<32x128xf32, #tpu.memory_space<vmem>>, vector<32x128xf32>
      %cst_11 = arith.constant dense<0.000000e+00> : vector<128xf32>
      %13 = vector.multi_reduction <add>, %12, %cst_11 [0] : vector<32x128xf32> to vector<128xf32>
      %14 = vector.shape_cast %13 : vector<128xf32> to vector<1x128xf32>
      %15 = vector.shape_cast %14 : vector<1x128xf32> to vector<1x1x128xf32>
      %c0_12 = arith.constant 0 : index
      %c0_13 = arith.constant 0 : index
      %c0_14 = arith.constant 0 : index
      %16 = vector.load %arg5[%c0_12, %c0_13, %c0_14] : memref<1x1x128xf32, #tpu.memory_space<vmem>>, vector<1x1x128xf32>
      tpu.vector_store %arg5[%c0_12, %c0_13, %c0_14], %15 {strides = array<i32>} : memref<1x1x128xf32, #tpu.memory_space<vmem>>, vector<1x1x128xf32>,
      %17 = arith.mulf %12, %12 : vector<32x128xf32>
      %cst_15 = arith.constant dense<0.000000e+00> : vector<128xf32>
      %18 = vector.multi_reduction <add>, %17, %cst_15 [0] : vector<32x128xf32> to vector<128xf32>
      %19 = vector.shape_cast %18 : vector<128xf32> to vector<1x128xf32>
      %20 = vector.shape_cast %19 : vector<1x128xf32> to vector<1x1x128xf32>
      %c0_16 = arith.constant 0 : index
      %c0_17 = arith.constant 0 : index
      %c0_18 = arith.constant 0 : index
      %21 = vector.load %arg6[%c0_16, %c0_17, %c0_18] : memref<1x1x128xf32, #tpu.memory_space<vmem>>, vector<1x1x128xf32>
      tpu.vector_store %arg6[%c0_16, %c0_17, %c0_18], %20 {strides = array<i32>} : memref<1x1x128xf32, #tpu.memory_space<vmem>>, vector<1x1x128xf32>,
    } else {
    }
    return
  }
  func.func @transform_0(%arg0: i32, %arg1: i32) -> (i32, i32) {
    %c0_i32 = arith.constant 0 : i32
    return %arg0, %arg1 : i32, i32
  }
  func.func @transform_1(%arg0: i32, %arg1: i32) -> (i32, i32) {
    %c0_i32 = arith.constant 0 : i32
    %c0_i32_0 = arith.constant 0 : i32
    return %arg1, %c0_i32 : i32, i32
  }
  func.func @transform_2(%arg0: i32, %arg1: i32) -> (i32, i32) {
    %c0_i32 = arith.constant 0 : i32
    %c0_i32_0 = arith.constant 0 : i32
    return %arg0, %c0_i32 : i32, i32
  }
  func.func @transform_3(%arg0: i32, %arg1: i32) -> (i32, i32, i32) {
    %c0_i32 = arith.constant 0 : i32
    %c0_i32_0 = arith.constant 0 : i32
    %c0_i32_1 = arith.constant 0 : i32
    return %arg0, %c0_i32, %c0_i32_0 : i32, i32, i32
  }
  func.func @transform_4(%arg0: i32, %arg1: i32) -> (i32, i32, i32) {
    %c0_i32 = arith.constant 0 : i32
    %c0_i32_0 = arith.constant 0 : i32
    %c0_i32_1 = arith.constant 0 : i32
    return %arg0, %c0_i32, %c0_i32_0 : i32, i32, i32
  }
}

module attributes {stable_mosaic.version = 11 : i64} {
  func.func @_bn_lrelu_kernel(%arg0: i32, %arg1: memref<32x128xf32, #tpu.memory_space<vmem>>, %arg2: memref<1x128xf32, #tpu.memory_space<vmem>>, %arg3: memref<1x128xf32, #tpu.memory_space<vmem>>, %arg4: memref<32x128xbf16, #tpu.memory_space<vmem>>) attributes {dimension_semantics = [#tpu.dimension_semantics<parallel>], iteration_bounds = array<i64: 1>, scalar_prefetch = 0 : i64, scratch_operands = 0 : i64, tpu.core_type = #tpu.core_type<tc>, window_params = [{transform_indices = @transform_0, window_bounds = array<i64: 32, 128>}, {pipeline_mode = #tpu.pipeline_mode<synchronous>, transform_indices = @transform_1, window_bounds = array<i64: 1, 128>}, {pipeline_mode = #tpu.pipeline_mode<synchronous>, transform_indices = @transform_2, window_bounds = array<i64: 1, 128>}, {transform_indices = @transform_3, window_bounds = array<i64: 32, 128>}]} {
    %c0 = arith.constant 0 : index
    %c0_0 = arith.constant 0 : index
    %0 = vector.load %arg1[%c0, %c0_0] : memref<32x128xf32, #tpu.memory_space<vmem>>, vector<32x128xf32>
    %c0_1 = arith.constant 0 : index
    %c0_2 = arith.constant 0 : index
    %1 = vector.load %arg2[%c0_1, %c0_2] : memref<1x128xf32, #tpu.memory_space<vmem>>, vector<1x128xf32>
    %2 = vector.broadcast %1 : vector<1x128xf32> to vector<32x128xf32>
    %3 = arith.mulf %0, %2 : vector<32x128xf32>
    %c0_3 = arith.constant 0 : index
    %c0_4 = arith.constant 0 : index
    %4 = vector.load %arg3[%c0_3, %c0_4] : memref<1x128xf32, #tpu.memory_space<vmem>>, vector<1x128xf32>
    %5 = vector.broadcast %4 : vector<1x128xf32> to vector<32x128xf32>
    %6 = arith.addf %3, %5 : vector<32x128xf32>
    %cst = arith.constant 0.000000e+00 : f32
    %7 = vector.broadcast %cst : f32 to vector<32x128xf32>
    %8 = arith.cmpf oge, %6, %7 : vector<32x128xf32>
    %cst_5 = arith.constant 2.000000e-01 : f32
    %9 = vector.broadcast %cst_5 : f32 to vector<32x128xf32>
    %10 = arith.mulf %9, %6 : vector<32x128xf32>
    %11 = arith.select %8, %6, %10 : vector<32x128xi1>, vector<32x128xf32>
    %12 = arith.truncf %11 : vector<32x128xf32> to vector<32x128xbf16>
    %c0_6 = arith.constant 0 : index
    %c0_7 = arith.constant 0 : index
    %13 = vector.load %arg4[%c0_6, %c0_7] : memref<32x128xbf16, #tpu.memory_space<vmem>>, vector<32x128xbf16>
    tpu.vector_store %arg4[%c0_6, %c0_7], %12 {strides = array<i32>} : memref<32x128xbf16, #tpu.memory_space<vmem>>, vector<32x128xbf16>,
    return
  }
  func.func @transform_0(%arg0: i32) -> (i32, i32) {
    %c0_i32 = arith.constant 0 : i32
    %c0_i32_0 = arith.constant 0 : i32
    return %arg0, %c0_i32 : i32, i32
  }
  func.func @transform_1(%arg0: i32) -> (i32, i32) {
    %c0_i32 = arith.constant 0 : i32
    %c0_i32_0 = arith.constant 0 : i32
    %c0_i32_1 = arith.constant 0 : i32
    return %c0_i32, %c0_i32_0 : i32, i32
  }
  func.func @transform_2(%arg0: i32) -> (i32, i32) {
    %c0_i32 = arith.constant 0 : i32
    %c0_i32_0 = arith.constant 0 : i32
    %c0_i32_1 = arith.constant 0 : i32
    return %c0_i32, %c0_i32_0 : i32, i32
  }
  func.func @transform_3(%arg0: i32) -> (i32, i32) {
    %c0_i32 = arith.constant 0 : i32
    %c0_i32_0 = arith.constant 0 : i32
    return %arg0, %c0_i32 : i32, i32
  }
}

module attributes {stable_mosaic.version = 11 : i64} {
  func.func @_final_dot_sigmoid_kernel(%arg0: i32, %arg1: memref<2x2048xbf16, #tpu.memory_space<vmem>>, %arg2: memref<1x2048xf32, #tpu.memory_space<vmem>>, %arg3: memref<1x1xf32, #tpu.memory_space<vmem>>, %arg4: memref<2x1xf32, #tpu.memory_space<vmem>>) attributes {dimension_semantics = [#tpu.dimension_semantics<parallel>], iteration_bounds = array<i64: 1>, scalar_prefetch = 0 : i64, scratch_operands = 0 : i64, tpu.core_type = #tpu.core_type<tc>, window_params = [{transform_indices = @transform_0, window_bounds = array<i64: 2, 2048>}, {pipeline_mode = #tpu.pipeline_mode<synchronous>, transform_indices = @transform_1, window_bounds = array<i64: 1, 2048>}, {pipeline_mode = #tpu.pipeline_mode<synchronous>, transform_indices = @transform_2, window_bounds = array<i64: 1, 1>}, {transform_indices = @transform_3, window_bounds = array<i64: 2, 1>}]} {
    %c0 = arith.constant 0 : index
    %c0_0 = arith.constant 0 : index
    %0 = vector.load %arg1[%c0, %c0_0] : memref<2x2048xbf16, #tpu.memory_space<vmem>>, vector<2x2048xbf16>
    %1 = arith.extf %0 : vector<2x2048xbf16> to vector<2x2048xf32>
    %c0_1 = arith.constant 0 : index
    %c0_2 = arith.constant 0 : index
    %2 = vector.load %arg2[%c0_1, %c0_2] : memref<1x2048xf32, #tpu.memory_space<vmem>>, vector<1x2048xf32>
    %3 = vector.broadcast %2 : vector<1x2048xf32> to vector<2x2048xf32>
    %4 = arith.mulf %1, %3 : vector<2x2048xf32>
    %cst = arith.constant dense<0.000000e+00> : vector<2xf32>
    %5 = vector.multi_reduction <add>, %4, %cst [1] : vector<2x2048xf32> to vector<2xf32>
    %6 = vector.shape_cast %5 : vector<2xf32> to vector<2x1xf32>
    %c0_3 = arith.constant 0 : index
    %c0_4 = arith.constant 0 : index
    %7 = vector.load %arg3[%c0_3, %c0_4] : memref<1x1xf32, #tpu.memory_space<vmem>>, vector<1x1xf32>
    %8 = vector.broadcast %7 : vector<1x1xf32> to vector<2x1xf32>
    %9 = arith.addf %6, %8 : vector<2x1xf32>
    %cst_5 = arith.constant 0.000000e+00 : f32
    %10 = vector.broadcast %cst_5 : f32 to vector<2x1xf32>
    %11 = arith.subf %10, %9 : vector<2x1xf32>
    %12 = math.exp %11 : vector<2x1xf32>
    %cst_6 = arith.constant 1.000000e+00 : f32
    %13 = vector.broadcast %cst_6 : f32 to vector<2x1xf32>
    %14 = arith.addf %13, %12 : vector<2x1xf32>
    %cst_7 = arith.constant 1.000000e+00 : f32
    %15 = vector.broadcast %cst_7 : f32 to vector<2x1xf32>
    %16 = arith.divf %15, %14 : vector<2x1xf32>
    %c0_8 = arith.constant 0 : index
    %c0_9 = arith.constant 0 : index
    %17 = vector.load %arg4[%c0_8, %c0_9] : memref<2x1xf32, #tpu.memory_space<vmem>>, vector<2x1xf32>
    tpu.vector_store %arg4[%c0_8, %c0_9], %16 {strides = array<i32>} : memref<2x1xf32, #tpu.memory_space<vmem>>, vector<2x1xf32>,
    return
  }
  func.func @transform_0(%arg0: i32) -> (i32, i32) {
    %c0_i32 = arith.constant 0 : i32
    %c0_i32_0 = arith.constant 0 : i32
    return %arg0, %c0_i32 : i32, i32
  }
  func.func @transform_1(%arg0: i32) -> (i32, i32) {
    %c0_i32 = arith.constant 0 : i32
    %c0_i32_0 = arith.constant 0 : i32
    %c0_i32_1 = arith.constant 0 : i32
    return %c0_i32, %c0_i32_0 : i32, i32
  }
  func.func @transform_2(%arg0: i32) -> (i32, i32) {
    %c0_i32 = arith.constant 0 : i32
    %c0_i32_0 = arith.constant 0 : i32
    %c0_i32_1 = arith.constant 0 : i32
    return %c0_i32, %c0_i32_0 : i32, i32
  }
  func.func @transform_3(%arg0: i32) -> (i32, i32) {
    %c0_i32 = arith.constant 0 : i32
    %c0_i32_0 = arith.constant 0 : i32
    return %arg0, %c0_i32 : i32, i32
  }
}

</mosaic_0001>

<bundles_post_ra>
// kernel: discriminator_forward.10
= control target key start
LH: loop header
LB: loop body
LE: loop exit
PB: predicated region body
PF: predicated region fallthrough
CT: control target
= control target key end

     0   :  { %s1314_s12 = smov 0   ;;  %s2000_s0 = inlined_call_operand.vmem [shape: f32[2048,16], index: 0, kind: input, shape index: {}]   ;;  %s2001_s1 = inlined_call_operand.vmem [shape: f32[1,16], index: 1, kind: input, shape index: {}]   ;;  %s2002_s2 = inlined_call_operand.vmem [shape: f32[1,16], index: 2, kind: input, shape index: {}]   ;;  %s2003_s3 = inlined_call_operand.vmem [shape: bf16[2048,16], index: 3, kind: output, shape index: {}]  }
   0x1 LB: > { %s1263_s13 = sadd.s32 4294967295, %s1292_s12   ;;  %p1267_p0 = scmp.ge.s32.totalorder %s1292_s12, 1  ;;  %s1292_s12 = sphi %s1314_s12, %s13_s12  }
   0x2   : > { %p138_p1 = scmp.lt.s32.totalorder %s1292_s12, 3 }
   0x4   : > { %p139_p2 = pnand %p1267_p0, %p138_p1 }
   0x5   : > { %s1268_s14 = sshll.u32 (!%p139_p2), %s1263_s13, 7 }
   0x6   : > { %142 = sbr.rel (%p139_p2) target bundleno = 212 (0xd4), region = 32  ;;  %p163_p3 = scmp.lt.s32.totalorder (!%p139_p2), %s1268_s14, 255 }
   0xb   : > { %s2005_s14 = smov (!%p163_p3, %s1268_s14), 255  ;;  %v1327_v0 = vld [vmem:[%s2001_s1] ss:$0 sm:$0xff]  ;;  %vm1078_vm0 = vcmask 125952  }
   0xc   : > { %s1269_s17 = sshll.u32 %s2005_s14, 3  ;;  %v1338_v1 = vld [vmem:[%s2002_s2] ss:$0 sm:$0xff]  ;;  %s1271_s23 = sshll.u32 %s2005_s14, 2 }
   0xd   : > { %s1333_s20 = scalar_lea.vmem %s2000_s0, %s1269_s17  ;;  %s1366_s26 = scalar_lea.vmem %s2003_s3, %s1271_s23 }
   0xe   : > { %v174_v2 = vld [vmem:[%s1333_s20] sm:$0xff]  ;;  %v175_v3 = vld [vmem:[%s1333_s20 + $0x8] sm:$0xff]  ;;  %v176_v4 = vld [vmem:[%s1333_s20 + $0x10] sm:$0xff] }
   0xf   : > { %v306_v5 = vmul.f32 %v1327_v0, %v174_v2  ;;  %v307_v6 = vmul.f32 %v1327_v0, %v175_v3  ;;  %v308_v7 = vmul.f32 %v1327_v0, %v176_v4  ;;  %v177_v8 = vld [vmem:[%s1333_s20 + $0x18] sm:$0xff]  ;;  %v178_v9 = vld [vmem:[%s1333_s20 + $0x20] sm:$0xff]  ;;  %v179_v10 = vld [vmem:[%s1333_s20 + $0x28] sm:$0xff] }
  0x10   : > { %v309_v11 = vmul.f32 %v1327_v0, %v177_v8  ;;  %v310_v12 = vmul.f32 %v1327_v0, %v178_v9  ;;  %v311_v13 = vmul.f32 %v1327_v0, %v179_v10  ;;  %v180_v14 = vld [vmem:[%s1333_s20 + $0x30] sm:$0xff]  ;;  %v181_v15 = vld [vmem:[%s1333_s20 + $0x38] sm:$0xff]  ;;  %v182_v31 = vld [vmem:[%s1333_s20 + $0x40] sm:$0xff] }
  0x11   : > { %v438_v16 = vadd.f32 %v1338_v1, %v306_v5  ;;  %v439_v17 = vadd.f32 %v1338_v1, %v307_v6  ;;  %v440_v18 = vadd.f32 %v1338_v1, %v308_v7  ;;  %v312_v19 = vmul.f32 %v1327_v0, %v180_v14  ;;  %v183_v36 = vld [vmem:[%s1333_s20 + $0x48] sm:$0xff]  ;;  %v184_v37 = vld [vmem:[%s1333_s20 + $0x50] sm:$0xff]  ;;  %v185_v38 = vld [vmem:[%s1333_s20 + $0x58] sm:$0xff] }
  0x12   : > { %v441_v20 = vadd.f32 %v1338_v1, %v309_v11  ;;  %v442_v21 = vadd.f32 %v1338_v1, %v310_v12  ;;  %v443_v22 = vadd.f32 %v1338_v1, %v311_v13  ;;  %v313_v23 = vmul.f32 %v1327_v0, %v181_v15  ;;  %v186_v50 = vld [vmem:[%s1333_s20 + $0x60] sm:$0xff]  ;;  %v187_v2 = vld [vmem:[%s1333_s20 + $0x68] sm:$0xff]  ;;  %v188_v8 = vld [vmem:[%s1333_s20 + $0x70] sm:$0xff] }
  0x13   : > { %vm566_vm1 = vcmp.ge.f32.partialorder %v438_v16, 0.0  ;;  %v694_v24 = vmul.f32 0.2, %v438_v16  ;;  %vm567_vm2 = vcmp.ge.f32.partialorder %v439_v17, 0.0  ;;  %v695_v25 = vmul.f32 0.2, %v439_v17 }
  0x14   : > { %vm568_vm3 = vcmp.ge.f32.partialorder %v440_v18, 0.0  ;;  %v696_v26 = vmul.f32 0.2, %v440_v18  ;;  %vm569_vm4 = vcmp.ge.f32.partialorder %v441_v20, 0.0  ;;  %v697_v27 = vmul.f32 0.2, %v441_v20 }
  0x15   : > { %v822_v28 = vsel %vm566_vm1, %v438_v16, %v694_v24  ;;  %v823_v29 = vsel %vm567_vm2, %v439_v17, %v695_v25  ;;  %vm570_vm5 = vcmp.ge.f32.partialorder %v442_v21, 0.0  ;;  %v698_v30 = vmul.f32 0.2, %v442_v21  ;;  %v189_v13 = vld [vmem:[%s1333_s20 + $0x78] sm:$0xff]  ;;  %v190_v14 = vld [vmem:[%s1333_s20 + $0x80] sm:$0xff] }
  0x16   : > { %v950_v32 = vpack.c.bf16 %v822_v28, %v822_v28  ;;  %v951_v33 = vpack.c.bf16 %v823_v29, %v823_v29  ;;  %v824_v34 = vsel %vm568_vm3, %v440_v18, %v696_v26  ;;  %v825_v35 = vsel %vm569_vm4, %v441_v20, %v697_v27  ;;  %v193_v28 = vld [vmem:[%s1333_s20 + $0x98] sm:$0xff] }
  0x17   : > { %v952_v39 = vpack.c.bf16 %v824_v34, %v824_v34  ;;  %v953_v40 = vpack.c.bf16 %v825_v35, %v825_v35  ;;  %v826_v41 = vsel %vm570_vm5, %v442_v21, %v698_v30  ;;  %vm571_vm6 = vcmp.ge.f32.partialorder %v443_v22, 0.0 }
  0x18   : > { %1079 = vst.msk [vmem:[%s1366_s26] sm:$0xf] %vm1078_vm0, %v950_v32  ;;  %v954_v42 = vpack.c.bf16 %v826_v41, %v826_v41  ;;  %v699_v43 = vmul.f32 0.2, %v443_v22  ;;  %v444_v44 = vadd.f32 %v1338_v1, %v312_v19  ;;  %v445_v45 = vadd.f32 %v1338_v1, %v313_v23  ;;  %v192_v23 = vld [vmem:[%s1333_s20 + $0x90] sm:$0xff] }
  0x19   : > { %1080 = vst.msk [vmem:[%s1366_s26 + $0x4] sm:$0xf] %vm1078_vm0, %v951_v33  ;;  %v314_v46 = vmul.f32 %v1327_v0, %v182_v31  ;;  %v315_v47 = vmul.f32 %v1327_v0, %v183_v36  ;;  %v316_v48 = vmul.f32 %v1327_v0, %v184_v37  ;;  %v317_v49 = vmul.f32 %v1327_v0, %v185_v38 }
  0x1a   : > { %1081 = vst.msk [vmem:[%s1366_s26 + $0x8] sm:$0xf] %vm1078_vm0, %v952_v39  ;;  %v827_v51 = vsel %vm571_vm6, %v443_v22, %v699_v43  ;;  %vm572_vm7 = vcmp.ge.f32.partialorder %v444_v44, 0.0  ;;  %v700_v52 = vmul.f32 0.2, %v444_v44  ;;  %vm573_vm8 = vcmp.ge.f32.partialorder %v445_v45, 0.0 }
  0x1b   : > { %1082 = vst.msk [vmem:[%s1366_s26 + $0xc] sm:$0xf] %vm1078_vm0, %v953_v40  ;;  %v955_v53 = vpack.c.bf16 %v827_v51, %v827_v51  ;;  %v701_v54 = vmul.f32 0.2, %v445_v45  ;;  %v446_v55 = vadd.f32 %v1338_v1, %v314_v46  ;;  %v447_v56 = vadd.f32 %v1338_v1, %v315_v47  ;;  %v191_v22 = vld [vmem:[%s1333_s20 + $0x88] sm:$0xff]  ;;  %v194_v39 = vld [vmem:[%s1333_s20 + $0xa0] sm:$0xff] }
  0x1c   : > { %1083 = vst.msk [vmem:[%s1366_s26 + $0x10] sm:$0xf] %vm1078_vm0, %v954_v42  ;;  %v828_v57 = vsel %vm572_vm7, %v444_v44, %v700_v52  ;;  %v448_v58 = vadd.f32 %v1338_v1, %v316_v48  ;;  %v449_v59 = vadd.f32 %v1338_v1, %v317_v49  ;;  %v318_v60 = vmul.f32 %v1327_v0, %v186_v50  ;;  %v195_v50 = vld [vmem:[%s1333_s20 + $0xa8] sm:$0xff] }
  0x1d   : > { %1084 = vst.msk [vmem:[%s1366_s26 + $0x14] sm:$0xf] %vm1078_vm0, %v955_v53  ;;  %v956_v61 = vpack.c.bf16 %v828_v57, %v828_v57  ;;  %v829_v62 = vsel %vm573_vm8, %v445_v45, %v701_v54  ;;  %vm574_vm9 = vcmp.ge.f32.partialorder %v446_v55, 0.0  ;;  %v702_v63 = vmul.f32 0.2, %v446_v55  ;;  %v196_v54 = vld [vmem:[%s1333_s20 + $0xb0] sm:$0xff] }
  0x1e   : > { %v957_v3 = vpack.c.bf16 %v829_v62, %v829_v62  ;;  %vm575_vm10 = vcmp.ge.f32.partialorder %v447_v56, 0.0  ;;  %v703_v4 = vmul.f32 0.2, %v447_v56  ;;  %vm576_vm11 = vcmp.ge.f32.partialorder %v448_v58, 0.0 }
  0x1f   : > { %1085 = vst.msk [vmem:[%s1366_s26 + $0x18] sm:$0xf] %vm1078_vm0, %v956_v61  ;;  %v830_v5 = vsel %vm574_vm9, %v446_v55, %v702_v63  ;;  %v704_v6 = vmul.f32 0.2, %v448_v58  ;;  %vm577_vm12 = vcmp.ge.f32.partialorder %v449_v59, 0.0  ;;  %v450_v7 = vadd.f32 %v1338_v1, %v318_v60  ;;  %v197_v55 = vld [vmem:[%s1333_s20 + $0xb8] sm:$0xff] }
  0x20   : > { %1086 = vst.msk [vmem:[%s1366_s26 + $0x1c] sm:$0xf] %vm1078_vm0, %v957_v3  ;;  %v958_v9 = vpack.c.bf16 %v830_v5, %v830_v5  ;;  %v831_v10 = vsel %vm575_vm10, %v447_v56, %v703_v4  ;;  %v705_v11 = vmul.f32 0.2, %v449_v59  ;;  %v319_v12 = vmul.f32 %v1327_v0, %v187_v2  ;;  %v198_v4 = vld [vmem:[%s1333_s20 + $0xc0] sm:$0xff]  ;;  %v199_v5 = vld [vmem:[%s1333_s20 + $0xc8] sm:$0xff] }
  0x21   : > { %v959_v15 = vpack.c.bf16 %v831_v10, %v831_v10  ;;  %v832_v16 = vsel %vm576_vm11, %v448_v58, %v704_v6  ;;  %vm578_vm13 = vcmp.ge.f32.partialorder %v450_v7, 0.0  ;;  %v706_v17 = vmul.f32 0.2, %v450_v7  ;;  %v200_v6 = vld [vmem:[%s1333_s20 + $0xd0] sm:$0xff] }
  0x22   : > { %1087 = vst.msk [vmem:[%s1366_s26 + $0x20] sm:$0xf] %vm1078_vm0, %v958_v9  ;;  %v960_v18 = vpack.c.bf16 %v832_v16, %v832_v16  ;;  %v833_v19 = vsel %vm577_vm12, %v449_v59, %v705_v11  ;;  %v451_v20 = vadd.f32 %v1338_v1, %v319_v12  ;;  %v320_v21 = vmul.f32 %v1327_v0, %v188_v8 }
  0x23   : > { %1088 = vst.msk [vmem:[%s1366_s26 + $0x24] sm:$0xf] %vm1078_vm0, %v959_v15  ;;  %v961_v24 = vpack.c.bf16 %v833_v19, %v833_v19  ;;  %v834_v25 = vsel %vm578_vm13, %v450_v7, %v706_v17  ;;  %v321_v26 = vmul.f32 %v1327_v0, %v189_v13  ;;  %v322_v27 = vmul.f32 %v1327_v0, %v190_v14 }
  0x24   : > { %1089 = vst.msk [vmem:[%s1366_s26 + $0x28] sm:$0xf] %vm1078_vm0, %v960_v18  ;;  %v962_v29 = vpack.c.bf16 %v834_v25, %v834_v25  ;;  %vm579_vm14 = vcmp.ge.f32.partialorder %v451_v20, 0.0  ;;  %v707_v30 = vmul.f32 0.2, %v451_v20  ;;  %v452_v31 = vadd.f32 %v1338_v1, %v320_v21  ;;  %v201_v18 = vld [vmem:[%s1333_s20 + $0xd8] sm:$0xff] }
  0x25   : > { %1090 = vst.msk [vmem:[%s1366_s26 + $0x2c] sm:$0xf] %vm1078_vm0, %v961_v24  ;;  %v453_v32 = vadd.f32 %v1338_v1, %v321_v26  ;;  %v454_v33 = vadd.f32 %v1338_v1, %v322_v27  ;;  %v323_v34 = vmul.f32 %v1327_v0, %v191_v22  ;;  %v324_v35 = vmul.f32 %v1327_v0, %v192_v23 }
  0x26   : > { %1091 = vst.msk [vmem:[%s1366_s26 + $0x30] sm:$0xf] %vm1078_vm0, %v962_v29  ;;  %v835_v36 = vsel %vm579_vm14, %v451_v20, %v707_v30  ;;  %vm580_vm15 = vcmp.ge.f32.partialorder %v452_v31, 0.0  ;;  %v708_v37 = vmul.f32 0.2, %v452_v31  ;;  %v325_v38 = vmul.f32 %v1327_v0, %v193_v28  ;;  %v202_v28 = vld [vmem:[%s1333_s20 + $0xe0] sm:$0xff] }
  0x27   : > { %v963_v40 = vpack.c.bf16 %v835_v36, %v835_v36  ;;  %vm581_vm1 = vcmp.ge.f32.partialorder %v453_v32, 0.0  ;;  %v709_v41 = vmul.f32 0.2, %v453_v32  ;;  %vm582_vm2 = vcmp.ge.f32.partialorder %v454_v33, 0.0 }
  0x28   : > { %v836_v42 = vsel %vm580_vm15, %v452_v31, %v708_v37  ;;  %v710_v43 = vmul.f32 0.2, %v454_v33  ;;  %v455_v44 = vadd.f32 %v1338_v1, %v323_v34  ;;  %v456_v45 = vadd.f32 %v1338_v1, %v324_v35 }
  0x29   : > { %1092 = vst.msk [vmem:[%s1366_s26 + $0x34] sm:$0xf] %vm1078_vm0, %v963_v40  ;;  %v964_v46 = vpack.c.bf16 %v836_v42, %v836_v42  ;;  %v837_v47 = vsel %vm581_vm1, %v453_v32, %v709_v41  ;;  %v457_v48 = vadd.f32 %v1338_v1, %v325_v38  ;;  %v326_v49 = vmul.f32 %v1327_v0, %v194_v39  ;;  %v203_v32 = vld [vmem:[%s1333_s20 + $0xe8] sm:$0xff] }
  0x2a   : > { %v965_v51 = vpack.c.bf16 %v837_v47, %v837_v47  ;;  %v838_v52 = vsel %vm582_vm2, %v454_v33, %v710_v43  ;;  %vm583_vm3 = vcmp.ge.f32.partialorder %v455_v44, 0.0  ;;  %v711_v53 = vmul.f32 0.2, %v455_v44  ;;  %v204_v33 = vld [vmem:[%s1333_s20 + $0xf0] sm:$0xff] }
  0x2b   : > { %1093 = vst.msk [vmem:[%s1366_s26 + $0x38] sm:$0xf] %vm1078_vm0, %v964_v46  ;;  %v966_v56 = vpack.c.bf16 %v838_v52, %v838_v52  ;;  %vm584_vm4 = vcmp.ge.f32.partialorder %v456_v45, 0.0  ;;  %v712_v57 = vmul.f32 0.2, %v456_v45  ;;  %vm585_vm5 = vcmp.ge.f32.partialorder %v457_v48, 0.0 }
  0x2c   : > { %1094 = vst.msk [vmem:[%s1366_s26 + $0x3c] sm:$0xf] %vm1078_vm0, %v965_v51  ;;  %v839_v58 = vsel %vm583_vm3, %v455_v44, %v711_v53  ;;  %v713_v59 = vmul.f32 0.2, %v457_v48  ;;  %v458_v60 = vadd.f32 %v1338_v1, %v326_v49  ;;  %v327_v61 = vmul.f32 %v1327_v0, %v195_v50  ;;  %v205_v44 = vld [vmem:[%s1333_s20 + $0xf8] sm:$0xff]  ;;  %v206_v52 = vld [vmem:[%s1333_s20 + $0x100] sm:$0xff] }
  0x2d   : > { %1095 = vst.msk [vmem:[%s1366_s26 + $0x40] sm:$0xf] %vm1078_vm0, %v966_v56  ;;  %v967_v62 = vpack.c.bf16 %v839_v58, %v839_v58  ;;  %v840_v63 = vsel %vm584_vm4, %v456_v45, %v712_v57  ;;  %v328_v2 = vmul.f32 %v1327_v0, %v196_v54  ;;  %v329_v3 = vmul.f32 %v1327_v0, %v197_v55  ;;  %v207_v57 = vld [vmem:[%s1333_s20 + $0x108] sm:$0xff]  ;;  %v208_v58 = vld [vmem:[%s1333_s20 + $0x110] sm:$0xff] }
  0x2e   : > { %v968_v7 = vpack.c.bf16 %v840_v63, %v840_v63  ;;  %v841_v8 = vsel %vm585_vm5, %v457_v48, %v713_v59  ;;  %vm586_vm6 = vcmp.ge.f32.partialorder %v458_v60, 0.0  ;;  %v714_v9 = vmul.f32 0.2, %v458_v60 }
  0x2f   : > { %1096 = vst.msk [vmem:[%s1366_s26 + $0x44] sm:$0xf] %vm1078_vm0, %v967_v62  ;;  %v969_v10 = vpack.c.bf16 %v841_v8, %v841_v8  ;;  %v459_v11 = vadd.f32 %v1338_v1, %v327_v61  ;;  %v460_v12 = vadd.f32 %v1338_v1, %v328_v2  ;;  %v461_v13 = vadd.f32 %v1338_v1, %v329_v3 }
  0x30   : > { %1097 = vst.msk [vmem:[%s1366_s26 + $0x48] sm:$0xf] %vm1078_vm0, %v968_v7  ;;  %v842_v14 = vsel %vm586_vm6, %v458_v60, %v714_v9  ;;  %v330_v15 = vmul.f32 %v1327_v0, %v198_v4  ;;  %v331_v16 = vmul.f32 %v1327_v0, %v199_v5  ;;  %v332_v17 = vmul.f32 %v1327_v0, %v200_v6  ;;  %v209_v6 = vld [vmem:[%s1333_s20 + $0x118] sm:$0xff] }
  0x31   : > { %1098 = vst.msk [vmem:[%s1366_s26 + $0x4c] sm:$0xf] %vm1078_vm0, %v969_v10  ;;  %v970_v19 = vpack.c.bf16 %v842_v14, %v842_v14  ;;  %vm587_vm7 = vcmp.ge.f32.partialorder %v459_v11, 0.0  ;;  %v715_v20 = vmul.f32 0.2, %v459_v11  ;;  %vm588_vm8 = vcmp.ge.f32.partialorder %v460_v12, 0.0 }
  0x32   : > { %v716_v21 = vmul.f32 0.2, %v460_v12  ;;  %vm589_vm9 = vcmp.ge.f32.partialorder %v461_v13, 0.0  ;;  %v717_v22 = vmul.f32 0.2, %v461_v13  ;;  %v462_v23 = vadd.f32 %v1338_v1, %v330_v15  ;;  %v210_v14 = vld [vmem:[%s1333_s20 + $0x120] sm:$0xff] }
  0x33   : > { %1099 = vst.msk [vmem:[%s1366_s26 + $0x50] sm:$0xf] %vm1078_vm0, %v970_v19  ;;  %v843_v24 = vsel %vm587_vm7, %v459_v11, %v715_v20  ;;  %v463_v25 = vadd.f32 %v1338_v1, %v331_v16  ;;  %v464_v26 = vadd.f32 %v1338_v1, %v332_v17  ;;  %v333_v27 = vmul.f32 %v1327_v0, %v201_v18  ;;  %v211_v19 = vld [vmem:[%s1333_s20 + $0x128] sm:$0xff]  ;;  %v212_v20 = vld [vmem:[%s1333_s20 + $0x130] sm:$0xff] }
  0x34   : > { %v971_v29 = vpack.c.bf16 %v843_v24, %v843_v24  ;;  %v844_v30 = vsel %vm588_vm8, %v460_v12, %v716_v21  ;;  %v845_v31 = vsel %vm589_vm9, %v461_v13, %v717_v22  ;;  %vm590_vm10 = vcmp.ge.f32.partialorder %v462_v23, 0.0 }
  0x35   : > { %v972_v34 = vpack.c.bf16 %v844_v30, %v844_v30  ;;  %v973_v35 = vpack.c.bf16 %v845_v31, %v845_v31  ;;  %v718_v36 = vmul.f32 0.2, %v462_v23  ;;  %vm591_vm11 = vcmp.ge.f32.partialorder %v463_v25, 0.0  ;;  %v213_v30 = vld [vmem:[%s1333_s20 + $0x138] sm:$0xff] }
  0x36   : > { %1100 = vst.msk [vmem:[%s1366_s26 + $0x54] sm:$0xf] %vm1078_vm0, %v971_v29  ;;  %v719_v37 = vmul.f32 0.2, %v463_v25  ;;  %vm592_vm12 = vcmp.ge.f32.partialorder %v464_v26, 0.0  ;;  %v465_v38 = vadd.f32 %v1338_v1, %v333_v27  ;;  %v334_v39 = vmul.f32 %v1327_v0, %v202_v28 }
  0x37   : > { %1101 = vst.msk [vmem:[%s1366_s26 + $0x58] sm:$0xf] %vm1078_vm0, %v972_v34  ;;  %v846_v40 = vsel %vm590_vm10, %v462_v23, %v718_v36  ;;  %v720_v41 = vmul.f32 0.2, %v464_v26  ;;  %v335_v42 = vmul.f32 %v1327_v0, %v203_v32  ;;  %v336_v43 = vmul.f32 %v1327_v0, %v204_v33 }
  0x38   : > { %1102 = vst.msk [vmem:[%s1366_s26 + $0x5c] sm:$0xf] %vm1078_vm0, %v973_v35  ;;  %v974_v45 = vpack.c.bf16 %v846_v40, %v846_v40  ;;  %v847_v46 = vsel %vm591_vm11, %v463_v25, %v719_v37  ;;  %vm593_vm13 = vcmp.ge.f32.partialorder %v465_v38, 0.0  ;;  %v721_v47 = vmul.f32 0.2, %v465_v38 }
  0x39   : > { %v975_v48 = vpack.c.bf16 %v847_v46, %v847_v46  ;;  %v848_v49 = vsel %vm592_vm12, %v464_v26, %v720_v41  ;;  %v466_v50 = vadd.f32 %v1338_v1, %v334_v39  ;;  %v467_v51 = vadd.f32 %v1338_v1, %v335_v42 }
  0x3a   : > { %1103 = vst.msk [vmem:[%s1366_s26 + $0x60] sm:$0xf] %vm1078_vm0, %v974_v45  ;;  %v976_v53 = vpack.c.bf16 %v848_v49, %v848_v49  ;;  %v849_v54 = vsel %vm593_vm13, %v465_v38, %v721_v47  ;;  %v468_v55 = vadd.f32 %v1338_v1, %v336_v43  ;;  %v337_v56 = vmul.f32 %v1327_v0, %v205_v44  ;;  %v214_v38 = vld [vmem:[%s1333_s20 + $0x140] sm:$0xff]  ;;  %v215_v43 = vld [vmem:[%s1333_s20 + $0x148] sm:$0xff]  ;;  %v216_v44 = vld [vmem:[%s1333_s20 + $0x150] sm:$0xff] }
  0x3b   : > { %1104 = vst.msk [vmem:[%s1366_s26 + $0x64] sm:$0xf] %vm1078_vm0, %v975_v48  ;;  %v977_v59 = vpack.c.bf16 %v849_v54, %v849_v54  ;;  %vm594_vm14 = vcmp.ge.f32.partialorder %v466_v50, 0.0  ;;  %v722_v60 = vmul.f32 0.2, %v466_v50  ;;  %vm595_vm15 = vcmp.ge.f32.partialorder %v467_v51, 0.0 }
  0x3c   : > { %1105 = vst.msk [vmem:[%s1366_s26 + $0x68] sm:$0xf] %vm1078_vm0, %v976_v53  ;;  %v723_v61 = vmul.f32 0.2, %v467_v51  ;;  %vm596_vm1 = vcmp.ge.f32.partialorder %v468_v55, 0.0  ;;  %v469_v62 = vadd.f32 %v1338_v1, %v337_v56  ;;  %v338_v63 = vmul.f32 %v1327_v0, %v206_v52  ;;  %v217_v54 = vld [vmem:[%s1333_s20 + $0x158] sm:$0xff] }
  0x3d   : > { %1106 = vst.msk [vmem:[%s1366_s26 + $0x6c] sm:$0xf] %vm1078_vm0, %v977_v59  ;;  %v850_v2 = vsel %vm594_vm14, %v466_v50, %v722_v60  ;;  %v724_v3 = vmul.f32 0.2, %v468_v55  ;;  %v339_v4 = vmul.f32 %v1327_v0, %v207_v57  ;;  %v340_v5 = vmul.f32 %v1327_v0, %v208_v58 }
  0x3e   : > { %v978_v7 = vpack.c.bf16 %v850_v2, %v850_v2  ;;  %v851_v8 = vsel %vm595_vm15, %v467_v51, %v723_v61  ;;  %vm597_vm2 = vcmp.ge.f32.partialorder %v469_v62, 0.0  ;;  %v725_v9 = vmul.f32 0.2, %v469_v62 }
  0x3f   : > { %v979_v10 = vpack.c.bf16 %v851_v8, %v851_v8  ;;  %v852_v11 = vsel %vm596_vm1, %v468_v55, %v724_v3  ;;  %v470_v12 = vadd.f32 %v1338_v1, %v338_v63  ;;  %v471_v13 = vadd.f32 %v1338_v1, %v339_v4 }
  0x40   : > { %1107 = vst.msk [vmem:[%s1366_s26 + $0x70] sm:$0xf] %vm1078_vm0, %v978_v7  ;;  %v980_v15 = vpack.c.bf16 %v852_v11, %v852_v11  ;;  %v853_v16 = vsel %vm597_vm2, %v469_v62, %v725_v9  ;;  %v472_v17 = vadd.f32 %v1338_v1, %v340_v5  ;;  %v341_v18 = vmul.f32 %v1327_v0, %v209_v6  ;;  %v218_v62 = vld [vmem:[%s1333_s20 + $0x160] sm:$0xff]  ;;  %v219_v5 = vld [vmem:[%s1333_s20 + $0x168] sm:$0xff]  ;;  %v220_v6 = vld [vmem:[%s1333_s20 + $0x170] sm:$0xff] }
  0x41   : > { %1108 = vst.msk [vmem:[%s1366_s26 + $0x74] sm:$0xf] %vm1078_vm0, %v979_v10  ;;  %v981_v21 = vpack.c.bf16 %v853_v16, %v853_v16  ;;  %vm598_vm3 = vcmp.ge.f32.partialorder %v470_v12, 0.0  ;;  %v726_v22 = vmul.f32 0.2, %v470_v12  ;;  %vm599_vm4 = vcmp.ge.f32.partialorder %v471_v13, 0.0 }
  0x42   : > { %1109 = vst.msk [vmem:[%s1366_s26 + $0x78] sm:$0xf] %vm1078_vm0, %v980_v15  ;;  %v727_v23 = vmul.f32 0.2, %v471_v13  ;;  %vm600_vm5 = vcmp.ge.f32.partialorder %v472_v17, 0.0  ;;  %v473_v24 = vadd.f32 %v1338_v1, %v341_v18  ;;  %v342_v25 = vmul.f32 %v1327_v0, %v210_v14  ;;  %v221_v16 = vld [vmem:[%s1333_s20 + $0x178] sm:$0xff] }
  0x43   : > { %1110 = vst.msk [vmem:[%s1366_s26 + $0x7c] sm:$0xf] %vm1078_vm0, %v981_v21  ;;  %v854_v26 = vsel %vm598_vm3, %v470_v12, %v726_v22  ;;  %v728_v27 = vmul.f32 0.2, %v472_v17  ;;  %v343_v28 = vmul.f32 %v1327_v0, %v211_v19  ;;  %v344_v29 = vmul.f32 %v1327_v0, %v212_v20 }
  0x44   : > { %v982_v31 = vpack.c.bf16 %v854_v26, %v854_v26  ;;  %v855_v32 = vsel %vm599_vm4, %v471_v13, %v727_v23  ;;  %vm601_vm6 = vcmp.ge.f32.partialorder %v473_v24, 0.0  ;;  %v729_v33 = vmul.f32 0.2, %v473_v24 }
  0x45   : > { %v983_v34 = vpack.c.bf16 %v855_v32, %v855_v32  ;;  %v856_v35 = vsel %vm600_vm5, %v472_v17, %v728_v27  ;;  %v474_v36 = vadd.f32 %v1338_v1, %v342_v25  ;;  %v475_v37 = vadd.f32 %v1338_v1, %v343_v28 }
  0x46   : > { %1111 = vst.msk [vmem:[%s1366_s26 + $0x80] sm:$0xf] %vm1078_vm0, %v982_v31  ;;  %v984_v39 = vpack.c.bf16 %v856_v35, %v856_v35  ;;  %v857_v40 = vsel %vm601_vm6, %v473_v24, %v729_v33  ;;  %v476_v41 = vadd.f32 %v1338_v1, %v344_v29  ;;  %v345_v42 = vmul.f32 %v1327_v0, %v213_v30  ;;  %v222_v24 = vld [vmem:[%s1333_s20 + $0x180] sm:$0xff]  ;;  %v223_v29 = vld [vmem:[%s1333_s20 + $0x188] sm:$0xff]  ;;  %v224_v30 = vld [vmem:[%s1333_s20 + $0x190] sm:$0xff] }
  0x47   : > { %1112 = vst.msk [vmem:[%s1366_s26 + $0x84] sm:$0xf] %vm1078_vm0, %v983_v34  ;;  %v985_v45 = vpack.c.bf16 %v857_v40, %v857_v40  ;;  %vm602_vm7 = vcmp.ge.f32.partialorder %v474_v36, 0.0  ;;  %v730_v46 = vmul.f32 0.2, %v474_v36  ;;  %vm603_vm8 = vcmp.ge.f32.partialorder %v475_v37, 0.0 }
  0x48   : > { %1113 = vst.msk [vmem:[%s1366_s26 + $0x88] sm:$0xf] %vm1078_vm0, %v984_v39  ;;  %v731_v47 = vmul.f32 0.2, %v475_v37  ;;  %vm604_vm9 = vcmp.ge.f32.partialorder %v476_v41, 0.0  ;;  %v477_v48 = vadd.f32 %v1338_v1, %v345_v42  ;;  %v346_v49 = vmul.f32 %v1327_v0, %v214_v38  ;;  %v225_v40 = vld [vmem:[%s1333_s20 + $0x198] sm:$0xff] }
  0x49   : > { %1114 = vst.msk [vmem:[%s1366_s26 + $0x8c] sm:$0xf] %vm1078_vm0, %v985_v45  ;;  %v858_v50 = vsel %vm602_vm7, %v474_v36, %v730_v46  ;;  %v732_v51 = vmul.f32 0.2, %v476_v41  ;;  %v347_v52 = vmul.f32 %v1327_v0, %v215_v43  ;;  %v348_v53 = vmul.f32 %v1327_v0, %v216_v44 }
  0x4a   : > { %v986_v55 = vpack.c.bf16 %v858_v50, %v858_v50  ;;  %v859_v56 = vsel %vm603_vm8, %v475_v37, %v731_v47  ;;  %vm605_vm10 = vcmp.ge.f32.partialorder %v477_v48, 0.0  ;;  %v733_v57 = vmul.f32 0.2, %v477_v48 }
  0x4b   : > { %v987_v58 = vpack.c.bf16 %v859_v56, %v859_v56  ;;  %v860_v59 = vsel %vm604_vm9, %v476_v41, %v732_v51  ;;  %v478_v60 = vadd.f32 %v1338_v1, %v346_v49  ;;  %v479_v61 = vadd.f32 %v1338_v1, %v347_v52 }
  0x4c   : > { %1115 = vst.msk [vmem:[%s1366_s26 + $0x90] sm:$0xf] %vm1078_vm0, %v986_v55  ;;  %v988_v63 = vpack.c.bf16 %v860_v59, %v860_v59  ;;  %v861_v2 = vsel %vm605_vm10, %v477_v48, %v733_v57  ;;  %v480_v3 = vadd.f32 %v1338_v1, %v348_v53  ;;  %v349_v4 = vmul.f32 %v1327_v0, %v217_v54  ;;  %v226_v48 = vld [vmem:[%s1333_s20 + $0x1a0] sm:$0xff]  ;;  %v227_v53 = vld [vmem:[%s1333_s20 + $0x1a8] sm:$0xff]  ;;  %v228_v54 = vld [vmem:[%s1333_s20 + $0x1b0] sm:$0xff] }
  0x4d   : > { %1116 = vst.msk [vmem:[%s1366_s26 + $0x94] sm:$0xf] %vm1078_vm0, %v987_v58  ;;  %v989_v7 = vpack.c.bf16 %v861_v2, %v861_v2  ;;  %vm606_vm11 = vcmp.ge.f32.partialorder %v478_v60, 0.0  ;;  %v734_v8 = vmul.f32 0.2, %v478_v60  ;;  %vm607_vm12 = vcmp.ge.f32.partialorder %v479_v61, 0.0 }
  0x4e   : > { %1117 = vst.msk [vmem:[%s1366_s26 + $0x98] sm:$0xf] %vm1078_vm0, %v988_v63  ;;  %v735_v9 = vmul.f32 0.2, %v479_v61  ;;  %vm608_vm13 = vcmp.ge.f32.partialorder %v480_v3, 0.0  ;;  %v481_v10 = vadd.f32 %v1338_v1, %v349_v4  ;;  %v350_v11 = vmul.f32 %v1327_v0, %v218_v62  ;;  %v229_v2 = vld [vmem:[%s1333_s20 + $0x1b8] sm:$0xff] }
  0x4f   : > { %1118 = vst.msk [vmem:[%s1366_s26 + $0x9c] sm:$0xf] %vm1078_vm0, %v989_v7  ;;  %v862_v12 = vsel %vm606_vm11, %v478_v60, %v734_v8  ;;  %v736_v13 = vmul.f32 0.2, %v480_v3  ;;  %v351_v14 = vmul.f32 %v1327_v0, %v219_v5  ;;  %v352_v15 = vmul.f32 %v1327_v0, %v220_v6 }
  0x50   : > { %v990_v17 = vpack.c.bf16 %v862_v12, %v862_v12  ;;  %v863_v18 = vsel %vm607_vm12, %v479_v61, %v735_v9  ;;  %vm609_vm14 = vcmp.ge.f32.partialorder %v481_v10, 0.0  ;;  %v737_v19 = vmul.f32 0.2, %v481_v10 }
  0x51   : > { %v991_v20 = vpack.c.bf16 %v863_v18, %v863_v18  ;;  %v864_v21 = vsel %vm608_vm13, %v480_v3, %v736_v13  ;;  %v482_v22 = vadd.f32 %v1338_v1, %v350_v11  ;;  %v483_v23 = vadd.f32 %v1338_v1, %v351_v14 }
  0x52   : > { %1119 = vst.msk [vmem:[%s1366_s26 + $0xa0] sm:$0xf] %vm1078_vm0, %v990_v17  ;;  %v992_v25 = vpack.c.bf16 %v864_v21, %v864_v21  ;;  %v865_v26 = vsel %vm609_vm14, %v481_v10, %v737_v19  ;;  %v484_v27 = vadd.f32 %v1338_v1, %v352_v15  ;;  %v353_v28 = vmul.f32 %v1327_v0, %v221_v16  ;;  %v230_v10 = vld [vmem:[%s1333_s20 + $0x1c0] sm:$0xff]  ;;  %v231_v15 = vld [vmem:[%s1333_s20 + $0x1c8] sm:$0xff]  ;;  %v232_v16 = vld [vmem:[%s1333_s20 + $0x1d0] sm:$0xff] }
  0x53   : > { %1120 = vst.msk [vmem:[%s1366_s26 + $0xa4] sm:$0xf] %vm1078_vm0, %v991_v20  ;;  %v993_v31 = vpack.c.bf16 %v865_v26, %v865_v26  ;;  %vm610_vm15 = vcmp.ge.f32.partialorder %v482_v22, 0.0  ;;  %v738_v32 = vmul.f32 0.2, %v482_v22  ;;  %vm611_vm1 = vcmp.ge.f32.partialorder %v483_v23, 0.0 }
  0x54   : > { %1121 = vst.msk [vmem:[%s1366_s26 + $0xa8] sm:$0xf] %vm1078_vm0, %v992_v25  ;;  %v739_v33 = vmul.f32 0.2, %v483_v23  ;;  %vm612_vm2 = vcmp.ge.f32.partialorder %v484_v27, 0.0  ;;  %v485_v34 = vadd.f32 %v1338_v1, %v353_v28  ;;  %v354_v35 = vmul.f32 %v1327_v0, %v222_v24  ;;  %v233_v26 = vld [vmem:[%s1333_s20 + $0x1d8] sm:$0xff] }
  0x55   : > { %1122 = vst.msk [vmem:[%s1366_s26 + $0xac] sm:$0xf] %vm1078_vm0, %v993_v31  ;;  %v866_v36 = vsel %vm610_vm15, %v482_v22, %v738_v32  ;;  %v740_v37 = vmul.f32 0.2, %v484_v27  ;;  %v355_v38 = vmul.f32 %v1327_v0, %v223_v29  ;;  %v356_v39 = vmul.f32 %v1327_v0, %v224_v30 }
  0x56   : > { %v994_v41 = vpack.c.bf16 %v866_v36, %v866_v36  ;;  %v867_v42 = vsel %vm611_vm1, %v483_v23, %v739_v33  ;;  %vm613_vm3 = vcmp.ge.f32.partialorder %v485_v34, 0.0  ;;  %v741_v43 = vmul.f32 0.2, %v485_v34 }
  0x57   : > { %v995_v44 = vpack.c.bf16 %v867_v42, %v867_v42  ;;  %v868_v45 = vsel %vm612_vm2, %v484_v27, %v740_v37  ;;  %v486_v46 = vadd.f32 %v1338_v1, %v354_v35  ;;  %v487_v47 = vadd.f32 %v1338_v1, %v355_v38 }
  0x58   : > { %1123 = vst.msk [vmem:[%s1366_s26 + $0xb0] sm:$0xf] %vm1078_vm0, %v994_v41  ;;  %v996_v49 = vpack.c.bf16 %v868_v45, %v868_v45  ;;  %v869_v50 = vsel %vm613_vm3, %v485_v34, %v741_v43  ;;  %v488_v51 = vadd.f32 %v1338_v1, %v356_v39  ;;  %v357_v52 = vmul.f32 %v1327_v0, %v225_v40  ;;  %v234_v34 = vld [vmem:[%s1333_s20 + $0x1e0] sm:$0xff]  ;;  %v235_v39 = vld [vmem:[%s1333_s20 + $0x1e8] sm:$0xff]  ;;  %v236_v40 = vld [vmem:[%s1333_s20 + $0x1f0] sm:$0xff] }
  0x59   : > { %1124 = vst.msk [vmem:[%s1366_s26 + $0xb4] sm:$0xf] %vm1078_vm0, %v995_v44  ;;  %v997_v55 = vpack.c.bf16 %v869_v50, %v869_v50  ;;  %vm614_vm4 = vcmp.ge.f32.partialorder %v486_v46, 0.0  ;;  %v742_v56 = vmul.f32 0.2, %v486_v46  ;;  %vm615_vm5 = vcmp.ge.f32.partialorder %v487_v47, 0.0 }
  0x5a   : > { %1125 = vst.msk [vmem:[%s1366_s26 + $0xb8] sm:$0xf] %vm1078_vm0, %v996_v49  ;;  %v743_v57 = vmul.f32 0.2, %v487_v47  ;;  %vm616_vm6 = vcmp.ge.f32.partialorder %v488_v51, 0.0  ;;  %v489_v58 = vadd.f32 %v1338_v1, %v357_v52  ;;  %v358_v59 = vmul.f32 %v1327_v0, %v226_v48  ;;  %v237_v50 = vld [vmem:[%s1333_s20 + $0x1f8] sm:$0xff] }
  0x5b   : > { %1126 = vst.msk [vmem:[%s1366_s26 + $0xbc] sm:$0xf] %vm1078_vm0, %v997_v55  ;;  %v870_v60 = vsel %vm614_vm4, %v486_v46, %v742_v56  ;;  %v744_v61 = vmul.f32 0.2, %v488_v51  ;;  %v359_v62 = vmul.f32 %v1327_v0, %v227_v53  ;;  %v360_v63 = vmul.f32 %v1327_v0, %v228_v54 }
  0x5c   : > { %v998_v3 = vpack.c.bf16 %v870_v60, %v870_v60  ;;  %v871_v4 = vsel %vm615_vm5, %v487_v47, %v743_v57  ;;  %vm617_vm7 = vcmp.ge.f32.partialorder %v489_v58, 0.0  ;;  %v745_v5 = vmul.f32 0.2, %v489_v58 }
  0x5d   : > { %v999_v6 = vpack.c.bf16 %v871_v4, %v871_v4  ;;  %v872_v7 = vsel %vm616_vm6, %v488_v51, %v744_v61  ;;  %v490_v8 = vadd.f32 %v1338_v1, %v358_v59  ;;  %v491_v9 = vadd.f32 %v1338_v1, %v359_v62 }
  0x5e   : > { %1127 = vst.msk [vmem:[%s1366_s26 + $0xc0] sm:$0xf] %vm1078_vm0, %v998_v3  ;;  %v1000_v11 = vpack.c.bf16 %v872_v7, %v872_v7  ;;  %v873_v12 = vsel %vm617_vm7, %v489_v58, %v745_v5  ;;  %v492_v13 = vadd.f32 %v1338_v1, %v360_v63  ;;  %v361_v14 = vmul.f32 %v1327_v0, %v229_v2  ;;  %v238_v58 = vld [vmem:[%s1333_s20 + $0x200] sm:$0xff]  ;;  %v239_v63 = vld [vmem:[%s1333_s20 + $0x208] sm:$0xff]  ;;  %v240_v2 = vld [vmem:[%s1333_s20 + $0x210] sm:$0xff] }
  0x5f   : > { %1128 = vst.msk [vmem:[%s1366_s26 + $0xc4] sm:$0xf] %vm1078_vm0, %v999_v6  ;;  %v1001_v17 = vpack.c.bf16 %v873_v12, %v873_v12  ;;  %vm618_vm8 = vcmp.ge.f32.partialorder %v490_v8, 0.0  ;;  %v746_v18 = vmul.f32 0.2, %v490_v8  ;;  %vm619_vm9 = vcmp.ge.f32.partialorder %v491_v9, 0.0 }
  0x60   : > { %1129 = vst.msk [vmem:[%s1366_s26 + $0xc8] sm:$0xf] %vm1078_vm0, %v1000_v11  ;;  %v747_v19 = vmul.f32 0.2, %v491_v9  ;;  %vm620_vm10 = vcmp.ge.f32.partialorder %v492_v13, 0.0  ;;  %v493_v20 = vadd.f32 %v1338_v1, %v361_v14  ;;  %v362_v21 = vmul.f32 %v1327_v0, %v230_v10  ;;  %v241_v12 = vld [vmem:[%s1333_s20 + $0x218] sm:$0xff] }
  0x61   : > { %1130 = vst.msk [vmem:[%s1366_s26 + $0xcc] sm:$0xf] %vm1078_vm0, %v1001_v17  ;;  %v874_v22 = vsel %vm618_vm8, %v490_v8, %v746_v18  ;;  %v748_v23 = vmul.f32 0.2, %v492_v13  ;;  %v363_v24 = vmul.f32 %v1327_v0, %v231_v15  ;;  %v364_v25 = vmul.f32 %v1327_v0, %v232_v16  ;;  %v1669_v17 = vld [vmem:[%s2002_s2] ss:$0 sm:$0xff] }
  0x62   : > { %v1002_v27 = vpack.c.bf16 %v874_v22, %v874_v22  ;;  %v875_v28 = vsel %vm619_vm9, %v491_v9, %v747_v19  ;;  %vm621_vm11 = vcmp.ge.f32.partialorder %v493_v20, 0.0  ;;  %v749_v29 = vmul.f32 0.2, %v493_v20  ;;  %v242_v19 = vld [vmem:[%s1333_s20 + $0x220] sm:$0xff] }
  0x63   : > { %v1003_v30 = vpack.c.bf16 %v875_v28, %v875_v28  ;;  %v876_v31 = vsel %vm620_vm10, %v492_v13, %v748_v23  ;;  %v494_v32 = vadd.f32 %v1338_v1, %v362_v21  ;;  %v495_v33 = vadd.f32 %v1338_v1, %v363_v24  ;;  %v1680_v23 = vld [vmem:[%s2001_s1] ss:$0 sm:$0xff] }
  0x64   : > { %1131 = vst.msk [vmem:[%s1366_s26 + $0xd0] sm:$0xf] %vm1078_vm0, %v1002_v27  ;;  %v1004_v35 = vpack.c.bf16 %v876_v31, %v876_v31  ;;  %v877_v36 = vsel %vm621_vm11, %v493_v20, %v749_v29  ;;  %v496_v37 = vadd.f32 %v1338_v1, %v364_v25  ;;  %v365_v38 = vmul.f32 %v1327_v0, %v233_v26  ;;  %v243_v25 = vld [vmem:[%s1333_s20 + $0x228] sm:$0xff]  ;;  %v244_v26 = vld [vmem:[%s1333_s20 + $0x230] sm:$0xff] }
  0x65   : > { %1132 = vst.msk [vmem:[%s1366_s26 + $0xd4] sm:$0xf] %vm1078_vm0, %v1003_v30  ;;  %v1005_v41 = vpack.c.bf16 %v877_v36, %v877_v36  ;;  %vm622_vm12 = vcmp.ge.f32.partialorder %v494_v32, 0.0  ;;  %v750_v42 = vmul.f32 0.2, %v494_v32  ;;  %vm623_vm13 = vcmp.ge.f32.partialorder %v495_v33, 0.0 }
  0x66   : > { %1133 = vst.msk [vmem:[%s1366_s26 + $0xd8] sm:$0xf] %vm1078_vm0, %v1004_v35  ;;  %v751_v43 = vmul.f32 0.2, %v495_v33  ;;  %vm624_vm14 = vcmp.ge.f32.partialorder %v496_v37, 0.0  ;;  %v497_v44 = vadd.f32 %v1338_v1, %v365_v38  ;;  %v366_v45 = vmul.f32 %v1327_v0, %v234_v34  ;;  %v245_v36 = vld [vmem:[%s1333_s20 + $0x238] sm:$0xff] }
  0x67   : > { %1134 = vst.msk [vmem:[%s1366_s26 + $0xdc] sm:$0xf] %vm1078_vm0, %v1005_v41  ;;  %v878_v46 = vsel %vm622_vm12, %v494_v32, %v750_v42  ;;  %v752_v47 = vmul.f32 0.2, %v496_v37  ;;  %v367_v48 = vmul.f32 %v1327_v0, %v235_v39  ;;  %v368_v49 = vmul.f32 %v1327_v0, %v236_v40 }
  0x68   : > { %v1006_v51 = vpack.c.bf16 %v878_v46, %v878_v46  ;;  %v879_v52 = vsel %vm623_vm13, %v495_v33, %v751_v43  ;;  %vm625_vm15 = vcmp.ge.f32.partialorder %v497_v44, 0.0  ;;  %v753_v53 = vmul.f32 0.2, %v497_v44 }
  0x69   : > { %v1007_v54 = vpack.c.bf16 %v879_v52, %v879_v52  ;;  %v880_v55 = vsel %vm624_vm14, %v496_v37, %v752_v47  ;;  %v498_v56 = vadd.f32 %v1338_v1, %v366_v45  ;;  %v499_v57 = vadd.f32 %v1338_v1, %v367_v48 }
  0x6a   : > { %1135 = vst.msk [vmem:[%s1366_s26 + $0xe0] sm:$0xf] %vm1078_vm0, %v1006_v51  ;;  %v1008_v59 = vpack.c.bf16 %v880_v55, %v880_v55  ;;  %v881_v60 = vsel %vm625_vm15, %v497_v44, %v753_v53  ;;  %v500_v61 = vadd.f32 %v1338_v1, %v368_v49  ;;  %v369_v62 = vmul.f32 %v1327_v0, %v237_v50  ;;  %v246_v44 = vld [vmem:[%s1333_s20 + $0x240] sm:$0xff]  ;;  %v247_v49 = vld [vmem:[%s1333_s20 + $0x248] sm:$0xff]  ;;  %v248_v50 = vld [vmem:[%s1333_s20 + $0x250] sm:$0xff] }
  0x6b   : > { %1136 = vst.msk [vmem:[%s1366_s26 + $0xe4] sm:$0xf] %vm1078_vm0, %v1007_v54  ;;  %v1009_v3 = vpack.c.bf16 %v881_v60, %v881_v60  ;;  %vm626_vm1 = vcmp.ge.f32.partialorder %v498_v56, 0.0  ;;  %v754_v4 = vmul.f32 0.2, %v498_v56  ;;  %vm627_vm2 = vcmp.ge.f32.partialorder %v499_v57, 0.0 }
  0x6c   : > { %1137 = vst.msk [vmem:[%s1366_s26 + $0xe8] sm:$0xf] %vm1078_vm0, %v1008_v59  ;;  %v755_v5 = vmul.f32 0.2, %v499_v57  ;;  %vm628_vm3 = vcmp.ge.f32.partialorder %v500_v61, 0.0  ;;  %v501_v6 = vadd.f32 %v1338_v1, %v369_v62  ;;  %v370_v7 = vmul.f32 %v1327_v0, %v238_v58  ;;  %v249_v60 = vld [vmem:[%s1333_s20 + $0x258] sm:$0xff] }
  0x6d   : > { %1138 = vst.msk [vmem:[%s1366_s26 + $0xec] sm:$0xf] %vm1078_vm0, %v1009_v3  ;;  %v882_v8 = vsel %vm626_vm1, %v498_v56, %v754_v4  ;;  %v756_v9 = vmul.f32 0.2, %v500_v61  ;;  %v371_v10 = vmul.f32 %v1327_v0, %v239_v63  ;;  %v372_v11 = vmul.f32 %v1327_v0, %v240_v2 }
  0x6e   : > { %v1010_v13 = vpack.c.bf16 %v882_v8, %v882_v8  ;;  %v883_v14 = vsel %vm627_vm2, %v499_v57, %v755_v5  ;;  %vm629_vm4 = vcmp.ge.f32.partialorder %v501_v6, 0.0  ;;  %v757_v1 = vmul.f32 0.2, %v501_v6 }
  0x6f   : > { %v1011_v15 = vpack.c.bf16 %v883_v14, %v883_v14  ;;  %v884_v16 = vsel %vm628_vm3, %v500_v61, %v756_v9  ;;  %v502_v18 = vadd.f32 %v1669_v17, %v370_v7  ;;  %v503_v0 = vadd.f32 %v1669_v17, %v371_v10 }
  0x70   : > { %1139 = vst.msk [vmem:[%s1366_s26 + $0xf0] sm:$0xf] %vm1078_vm0, %v1010_v13  ;;  %v1012_v20 = vpack.c.bf16 %v884_v16, %v884_v16  ;;  %v885_v21 = vsel %vm629_vm4, %v501_v6, %v757_v1  ;;  %v504_v22 = vadd.f32 %v1669_v17, %v372_v11  ;;  %v373_v24 = vmul.f32 %v1680_v23, %v241_v12  ;;  %v250_v6 = vld [vmem:[%s1333_s20 + $0x260] sm:$0xff]  ;;  %v251_v11 = vld [vmem:[%s1333_s20 + $0x268] sm:$0xff]  ;;  %v252_v12 = vld [vmem:[%s1333_s20 + $0x270] sm:$0xff] }
  0x71   : > { %1140 = vst.msk [vmem:[%s1366_s26 + $0xf4] sm:$0xf] %vm1078_vm0, %v1011_v15  ;;  %v1013_v27 = vpack.c.bf16 %v885_v21, %v885_v21  ;;  %vm630_vm5 = vcmp.ge.f32.partialorder %v502_v18, 0.0  ;;  %v758_v28 = vmul.f32 0.2, %v502_v18  ;;  %vm631_vm6 = vcmp.ge.f32.partialorder %v503_v0, 0.0 }
  0x72   : > { %1141 = vst.msk [vmem:[%s1366_s26 + $0xf8] sm:$0xf] %vm1078_vm0, %v1012_v20  ;;  %v759_v29 = vmul.f32 0.2, %v503_v0  ;;  %vm632_vm7 = vcmp.ge.f32.partialorder %v504_v22, 0.0  ;;  %v505_v30 = vadd.f32 %v1669_v17, %v373_v24  ;;  %v374_v31 = vmul.f32 %v1680_v23, %v242_v19  ;;  %v253_v21 = vld [vmem:[%s1333_s20 + $0x278] sm:$0xff] }
  0x73   : > { %1142 = vst.msk [vmem:[%s1366_s26 + $0xfc] sm:$0xf] %vm1078_vm0, %v1013_v27  ;;  %v886_v32 = vsel %vm630_vm5, %v502_v18, %v758_v28  ;;  %v760_v33 = vmul.f32 0.2, %v504_v22  ;;  %v375_v34 = vmul.f32 %v1680_v23, %v243_v25  ;;  %v376_v35 = vmul.f32 %v1680_v23, %v244_v26 }
  0x74   : > { %v1014_v37 = vpack.c.bf16 %v886_v32, %v886_v32  ;;  %v887_v38 = vsel %vm631_vm6, %v503_v0, %v759_v29  ;;  %vm633_vm8 = vcmp.ge.f32.partialorder %v505_v30, 0.0  ;;  %v761_v39 = vmul.f32 0.2, %v505_v30 }
  0x75   : > { %v1015_v40 = vpack.c.bf16 %v887_v38, %v887_v38  ;;  %v888_v41 = vsel %vm632_vm7, %v504_v22, %v760_v33  ;;  %v506_v42 = vadd.f32 %v1669_v17, %v374_v31  ;;  %v507_v43 = vadd.f32 %v1669_v17, %v375_v34 }
  0x76   : > { %1143 = vst.msk [vmem:[%s1366_s26 + $0x100] sm:$0xf] %vm1078_vm0, %v1014_v37  ;;  %v1016_v45 = vpack.c.bf16 %v888_v41, %v888_v41  ;;  %v889_v46 = vsel %vm633_vm8, %v505_v30, %v761_v39  ;;  %v508_v47 = vadd.f32 %v1669_v17, %v376_v35  ;;  %v377_v48 = vmul.f32 %v1680_v23, %v245_v36  ;;  %v254_v30 = vld [vmem:[%s1333_s20 + $0x280] sm:$0xff]  ;;  %v255_v35 = vld [vmem:[%s1333_s20 + $0x288] sm:$0xff]  ;;  %v256_v36 = vld [vmem:[%s1333_s20 + $0x290] sm:$0xff] }
  0x77   : > { %1144 = vst.msk [vmem:[%s1366_s26 + $0x104] sm:$0xf] %vm1078_vm0, %v1015_v40  ;;  %v1017_v51 = vpack.c.bf16 %v889_v46, %v889_v46  ;;  %vm634_vm9 = vcmp.ge.f32.partialorder %v506_v42, 0.0  ;;  %v762_v52 = vmul.f32 0.2, %v506_v42  ;;  %vm635_vm10 = vcmp.ge.f32.partialorder %v507_v43, 0.0 }
  0x78   : > { %1145 = vst.msk [vmem:[%s1366_s26 + $0x108] sm:$0xf] %vm1078_vm0, %v1016_v45  ;;  %v763_v53 = vmul.f32 0.2, %v507_v43  ;;  %vm636_vm11 = vcmp.ge.f32.partialorder %v508_v47, 0.0  ;;  %v509_v54 = vadd.f32 %v1669_v17, %v377_v48  ;;  %v378_v55 = vmul.f32 %v1680_v23, %v246_v44  ;;  %v257_v46 = vld [vmem:[%s1333_s20 + $0x298] sm:$0xff] }
  0x79   : > { %1146 = vst.msk [vmem:[%s1366_s26 + $0x10c] sm:$0xf] %vm1078_vm0, %v1017_v51  ;;  %v890_v56 = vsel %vm634_vm9, %v506_v42, %v762_v52  ;;  %v764_v57 = vmul.f32 0.2, %v508_v47  ;;  %v379_v58 = vmul.f32 %v1680_v23, %v247_v49  ;;  %v380_v59 = vmul.f32 %v1680_v23, %v248_v50 }
  0x7a   : > { %v1018_v61 = vpack.c.bf16 %v890_v56, %v890_v56  ;;  %v891_v62 = vsel %vm635_vm10, %v507_v43, %v763_v53  ;;  %vm637_vm12 = vcmp.ge.f32.partialorder %v509_v54, 0.0  ;;  %v765_v63 = vmul.f32 0.2, %v509_v54 }
  0x7b   : > { %v1019_v2 = vpack.c.bf16 %v891_v62, %v891_v62  ;;  %v892_v3 = vsel %vm636_vm11, %v508_v47, %v764_v57  ;;  %v510_v4 = vadd.f32 %v1669_v17, %v378_v55  ;;  %v511_v5 = vadd.f32 %v1669_v17, %v379_v58 }
  0x7c   : > { %1147 = vst.msk [vmem:[%s1366_s26 + $0x110] sm:$0xf] %vm1078_vm0, %v1018_v61  ;;  %v1020_v7 = vpack.c.bf16 %v892_v3, %v892_v3  ;;  %v893_v8 = vsel %vm637_vm12, %v509_v54, %v765_v63  ;;  %v512_v9 = vadd.f32 %v1669_v17, %v380_v59  ;;  %v381_v10 = vmul.f32 %v1680_v23, %v249_v60  ;;  %v258_v54 = vld [vmem:[%s1333_s20 + $0x2a0] sm:$0xff]  ;;  %v259_v59 = vld [vmem:[%s1333_s20 + $0x2a8] sm:$0xff]  ;;  %v260_v60 = vld [vmem:[%s1333_s20 + $0x2b0] sm:$0xff] }
  0x7d   : > { %1148 = vst.msk [vmem:[%s1366_s26 + $0x114] sm:$0xf] %vm1078_vm0, %v1019_v2  ;;  %v1021_v13 = vpack.c.bf16 %v893_v8, %v893_v8  ;;  %vm638_vm13 = vcmp.ge.f32.partialorder %v510_v4, 0.0  ;;  %v766_v14 = vmul.f32 0.2, %v510_v4  ;;  %vm639_vm14 = vcmp.ge.f32.partialorder %v511_v5, 0.0 }
  0x7e   : > { %1149 = vst.msk [vmem:[%s1366_s26 + $0x118] sm:$0xf] %vm1078_vm0, %v1020_v7  ;;  %v767_v1 = vmul.f32 0.2, %v511_v5  ;;  %vm640_vm15 = vcmp.ge.f32.partialorder %v512_v9, 0.0  ;;  %v513_v15 = vadd.f32 %v1669_v17, %v381_v10  ;;  %v382_v16 = vmul.f32 %v1680_v23, %v250_v6  ;;  %v261_v8 = vld [vmem:[%s1333_s20 + $0x2b8] sm:$0xff] }
  0x7f   : > { %1150 = vst.msk [vmem:[%s1366_s26 + $0x11c] sm:$0xf] %vm1078_vm0, %v1021_v13  ;;  %v894_v18 = vsel %vm638_vm13, %v510_v4, %v766_v14  ;;  %v768_v0 = vmul.f32 0.2, %v512_v9  ;;  %v383_v19 = vmul.f32 %v1680_v23, %v251_v11  ;;  %v384_v20 = vmul.f32 %v1680_v23, %v252_v12 }
  0x80   : > { %v1022_v22 = vpack.c.bf16 %v894_v18, %v894_v18  ;;  %v895_v24 = vsel %vm639_vm14, %v511_v5, %v767_v1  ;;  %vm641_vm1 = vcmp.ge.f32.partialorder %v513_v15, 0.0  ;;  %v769_v25 = vmul.f32 0.2, %v513_v15 }
  0x81   : > { %v1023_v26 = vpack.c.bf16 %v895_v24, %v895_v24  ;;  %v896_v27 = vsel %vm640_vm15, %v512_v9, %v768_v0  ;;  %v514_v28 = vadd.f32 %v1669_v17, %v382_v16  ;;  %v515_v29 = vadd.f32 %v1669_v17, %v383_v19 }
  0x82   : > { %1151 = vst.msk [vmem:[%s1366_s26 + $0x120] sm:$0xf] %vm1078_vm0, %v1022_v22  ;;  %v1024_v31 = vpack.c.bf16 %v896_v27, %v896_v27  ;;  %v897_v32 = vsel %vm641_vm1, %v513_v15, %v769_v25  ;;  %v516_v33 = vadd.f32 %v1669_v17, %v384_v20  ;;  %v385_v34 = vmul.f32 %v1680_v23, %v253_v21  ;;  %v262_v15 = vld [vmem:[%s1333_s20 + $0x2c0] sm:$0xff]  ;;  %v263_v20 = vld [vmem:[%s1333_s20 + $0x2c8] sm:$0xff]  ;;  %v264_v21 = vld [vmem:[%s1333_s20 + $0x2d0] sm:$0xff] }
  0x83   : > { %1152 = vst.msk [vmem:[%s1366_s26 + $0x124] sm:$0xf] %vm1078_vm0, %v1023_v26  ;;  %v1025_v37 = vpack.c.bf16 %v897_v32, %v897_v32  ;;  %vm642_vm2 = vcmp.ge.f32.partialorder %v514_v28, 0.0  ;;  %v770_v38 = vmul.f32 0.2, %v514_v28  ;;  %vm643_vm3 = vcmp.ge.f32.partialorder %v515_v29, 0.0 }
  0x84   : > { %1153 = vst.msk [vmem:[%s1366_s26 + $0x128] sm:$0xf] %vm1078_vm0, %v1024_v31  ;;  %v771_v39 = vmul.f32 0.2, %v515_v29  ;;  %vm644_vm4 = vcmp.ge.f32.partialorder %v516_v33, 0.0  ;;  %v517_v40 = vadd.f32 %v1669_v17, %v385_v34  ;;  %v386_v41 = vmul.f32 %v1680_v23, %v254_v30  ;;  %v265_v32 = vld [vmem:[%s1333_s20 + $0x2d8] sm:$0xff] }
  0x85   : > { %1154 = vst.msk [vmem:[%s1366_s26 + $0x12c] sm:$0xf] %vm1078_vm0, %v1025_v37  ;;  %v898_v42 = vsel %vm642_vm2, %v514_v28, %v770_v38  ;;  %v772_v43 = vmul.f32 0.2, %v516_v33  ;;  %v387_v44 = vmul.f32 %v1680_v23, %v255_v35  ;;  %v388_v45 = vmul.f32 %v1680_v23, %v256_v36 }
  0x86   : > { %v1026_v47 = vpack.c.bf16 %v898_v42, %v898_v42  ;;  %v899_v48 = vsel %vm643_vm3, %v515_v29, %v771_v39  ;;  %vm645_vm5 = vcmp.ge.f32.partialorder %v517_v40, 0.0  ;;  %v773_v49 = vmul.f32 0.2, %v517_v40 }
  0x87   : > { %v1027_v50 = vpack.c.bf16 %v899_v48, %v899_v48  ;;  %v900_v51 = vsel %vm644_vm4, %v516_v33, %v772_v43  ;;  %v518_v52 = vadd.f32 %v1669_v17, %v386_v41  ;;  %v519_v53 = vadd.f32 %v1669_v17, %v387_v44 }
  0x88   : > { %1155 = vst.msk [vmem:[%s1366_s26 + $0x130] sm:$0xf] %vm1078_vm0, %v1026_v47  ;;  %v1028_v55 = vpack.c.bf16 %v900_v51, %v900_v51  ;;  %v901_v56 = vsel %vm645_vm5, %v517_v40, %v773_v49  ;;  %v520_v57 = vadd.f32 %v1669_v17, %v388_v45  ;;  %v389_v58 = vmul.f32 %v1680_v23, %v257_v46  ;;  %v266_v40 = vld [vmem:[%s1333_s20 + $0x2e0] sm:$0xff]  ;;  %v267_v45 = vld [vmem:[%s1333_s20 + $0x2e8] sm:$0xff]  ;;  %v268_v46 = vld [vmem:[%s1333_s20 + $0x2f0] sm:$0xff] }
  0x89   : > { %1156 = vst.msk [vmem:[%s1366_s26 + $0x134] sm:$0xf] %vm1078_vm0, %v1027_v50  ;;  %v1029_v61 = vpack.c.bf16 %v901_v56, %v901_v56  ;;  %vm646_vm6 = vcmp.ge.f32.partialorder %v518_v52, 0.0  ;;  %v774_v62 = vmul.f32 0.2, %v518_v52  ;;  %vm647_vm7 = vcmp.ge.f32.partialorder %v519_v53, 0.0 }
  0x8a   : > { %1157 = vst.msk [vmem:[%s1366_s26 + $0x138] sm:$0xf] %vm1078_vm0, %v1028_v55  ;;  %v775_v63 = vmul.f32 0.2, %v519_v53  ;;  %vm648_vm8 = vcmp.ge.f32.partialorder %v520_v57, 0.0  ;;  %v521_v2 = vadd.f32 %v1669_v17, %v389_v58  ;;  %v390_v3 = vmul.f32 %v1680_v23, %v258_v54  ;;  %v269_v56 = vld [vmem:[%s1333_s20 + $0x2f8] sm:$0xff] }
  0x8b   : > { %1158 = vst.msk [vmem:[%s1366_s26 + $0x13c] sm:$0xf] %vm1078_vm0, %v1029_v61  ;;  %v902_v4 = vsel %vm646_vm6, %v518_v52, %v774_v62  ;;  %v776_v5 = vmul.f32 0.2, %v520_v57  ;;  %v391_v6 = vmul.f32 %v1680_v23, %v259_v59  ;;  %v392_v7 = vmul.f32 %v1680_v23, %v260_v60 }
  0x8c   : > { %v1030_v9 = vpack.c.bf16 %v902_v4, %v902_v4  ;;  %v903_v10 = vsel %vm647_vm7, %v519_v53, %v775_v63  ;;  %vm649_vm9 = vcmp.ge.f32.partialorder %v521_v2, 0.0  ;;  %v777_v11 = vmul.f32 0.2, %v521_v2 }
  0x8d   : > { %v1031_v12 = vpack.c.bf16 %v903_v10, %v903_v10  ;;  %v904_v13 = vsel %vm648_vm8, %v520_v57, %v776_v5  ;;  %v522_v14 = vadd.f32 %v1669_v17, %v390_v3  ;;  %v523_v1 = vadd.f32 %v1669_v17, %v391_v6 }
  0x8e   : > { %1159 = vst.msk [vmem:[%s1366_s26 + $0x140] sm:$0xf] %vm1078_vm0, %v1030_v9  ;;  %v1032_v16 = vpack.c.bf16 %v904_v13, %v904_v13  ;;  %v905_v18 = vsel %vm649_vm9, %v521_v2, %v777_v11  ;;  %v524_v0 = vadd.f32 %v1669_v17, %v392_v7  ;;  %v393_v19 = vmul.f32 %v1680_v23, %v261_v8  ;;  %v270_v2 = vld [vmem:[%s1333_s20 + $0x300] sm:$0xff]  ;;  %v271_v7 = vld [vmem:[%s1333_s20 + $0x308] sm:$0xff]  ;;  %v272_v8 = vld [vmem:[%s1333_s20 + $0x310] sm:$0xff] }
  0x8f   : > { %1160 = vst.msk [vmem:[%s1366_s26 + $0x144] sm:$0xf] %vm1078_vm0, %v1031_v12  ;;  %v1033_v22 = vpack.c.bf16 %v905_v18, %v905_v18  ;;  %vm650_vm10 = vcmp.ge.f32.partialorder %v522_v14, 0.0  ;;  %v778_v24 = vmul.f32 0.2, %v522_v14  ;;  %vm651_vm11 = vcmp.ge.f32.partialorder %v523_v1, 0.0 }
  0x90   : > { %1161 = vst.msk [vmem:[%s1366_s26 + $0x148] sm:$0xf] %vm1078_vm0, %v1032_v16  ;;  %v779_v25 = vmul.f32 0.2, %v523_v1  ;;  %vm652_vm12 = vcmp.ge.f32.partialorder %v524_v0, 0.0  ;;  %v525_v26 = vadd.f32 %v1669_v17, %v393_v19  ;;  %v394_v27 = vmul.f32 %v1680_v23, %v262_v15  ;;  %v273_v18 = vld [vmem:[%s1333_s20 + $0x318] sm:$0xff] }
  0x91   : > { %1162 = vst.msk [vmem:[%s1366_s26 + $0x14c] sm:$0xf] %vm1078_vm0, %v1033_v22  ;;  %v906_v28 = vsel %vm650_vm10, %v522_v14, %v778_v24  ;;  %v780_v29 = vmul.f32 0.2, %v524_v0  ;;  %v395_v30 = vmul.f32 %v1680_v23, %v263_v20  ;;  %v396_v31 = vmul.f32 %v1680_v23, %v264_v21 }
  0x92   : > { %v1034_v33 = vpack.c.bf16 %v906_v28, %v906_v28  ;;  %v907_v34 = vsel %vm651_vm11, %v523_v1, %v779_v25  ;;  %vm653_vm13 = vcmp.ge.f32.partialorder %v525_v26, 0.0  ;;  %v781_v35 = vmul.f32 0.2, %v525_v26 }
  0x93   : > { %v1035_v36 = vpack.c.bf16 %v907_v34, %v907_v34  ;;  %v908_v37 = vsel %vm652_vm12, %v524_v0, %v780_v29  ;;  %v526_v38 = vadd.f32 %v1669_v17, %v394_v27  ;;  %v527_v39 = vadd.f32 %v1669_v17, %v395_v30 }
  0x94   : > { %1163 = vst.msk [vmem:[%s1366_s26 + $0x150] sm:$0xf] %vm1078_vm0, %v1034_v33  ;;  %v1036_v41 = vpack.c.bf16 %v908_v37, %v908_v37  ;;  %v909_v42 = vsel %vm653_vm13, %v525_v26, %v781_v35  ;;  %v528_v43 = vadd.f32 %v1669_v17, %v396_v31  ;;  %v397_v44 = vmul.f32 %v1680_v23, %v265_v32  ;;  %v274_v26 = vld [vmem:[%s1333_s20 + $0x320] sm:$0xff]  ;;  %v275_v31 = vld [vmem:[%s1333_s20 + $0x328] sm:$0xff]  ;;  %v276_v32 = vld [vmem:[%s1333_s20 + $0x330] sm:$0xff] }
  0x95   : > { %1164 = vst.msk [vmem:[%s1366_s26 + $0x154] sm:$0xf] %vm1078_vm0, %v1035_v36  ;;  %v1037_v47 = vpack.c.bf16 %v909_v42, %v909_v42  ;;  %vm654_vm14 = vcmp.ge.f32.partialorder %v526_v38, 0.0  ;;  %v782_v48 = vmul.f32 0.2, %v526_v38  ;;  %vm655_vm15 = vcmp.ge.f32.partialorder %v527_v39, 0.0 }
  0x96   : > { %1165 = vst.msk [vmem:[%s1366_s26 + $0x158] sm:$0xf] %vm1078_vm0, %v1036_v41  ;;  %v783_v49 = vmul.f32 0.2, %v527_v39  ;;  %vm656_vm1 = vcmp.ge.f32.partialorder %v528_v43, 0.0  ;;  %v529_v50 = vadd.f32 %v1669_v17, %v397_v44  ;;  %v398_v51 = vmul.f32 %v1680_v23, %v266_v40  ;;  %v277_v42 = vld [vmem:[%s1333_s20 + $0x338] sm:$0xff] }
  0x97   : > { %1166 = vst.msk [vmem:[%s1366_s26 + $0x15c] sm:$0xf] %vm1078_vm0, %v1037_v47  ;;  %v910_v52 = vsel %vm654_vm14, %v526_v38, %v782_v48  ;;  %v784_v53 = vmul.f32 0.2, %v528_v43  ;;  %v399_v54 = vmul.f32 %v1680_v23, %v267_v45  ;;  %v400_v55 = vmul.f32 %v1680_v23, %v268_v46 }
  0x98   : > { %v1038_v57 = vpack.c.bf16 %v910_v52, %v910_v52  ;;  %v911_v58 = vsel %vm655_vm15, %v527_v39, %v783_v49  ;;  %vm657_vm2 = vcmp.ge.f32.partialorder %v529_v50, 0.0  ;;  %v785_v59 = vmul.f32 0.2, %v529_v50 }
  0x99   : > { %v1039_v60 = vpack.c.bf16 %v911_v58, %v911_v58  ;;  %v912_v61 = vsel %vm656_vm1, %v528_v43, %v784_v53  ;;  %v530_v62 = vadd.f32 %v1669_v17, %v398_v51  ;;  %v531_v63 = vadd.f32 %v1669_v17, %v399_v54 }
  0x9a   : > { %1167 = vst.msk [vmem:[%s1366_s26 + $0x160] sm:$0xf] %vm1078_vm0, %v1038_v57  ;;  %v1040_v3 = vpack.c.bf16 %v912_v61, %v912_v61  ;;  %v913_v4 = vsel %vm657_vm2, %v529_v50, %v785_v59  ;;  %v532_v5 = vadd.f32 %v1669_v17, %v400_v55  ;;  %v401_v6 = vmul.f32 %v1680_v23, %v269_v56  ;;  %v278_v50 = vld [vmem:[%s1333_s20 + $0x340] sm:$0xff]  ;;  %v279_v55 = vld [vmem:[%s1333_s20 + $0x348] sm:$0xff]  ;;  %v280_v56 = vld [vmem:[%s1333_s20 + $0x350] sm:$0xff] }
  0x9b   : > { %1168 = vst.msk [vmem:[%s1366_s26 + $0x164] sm:$0xf] %vm1078_vm0, %v1039_v60  ;;  %v1041_v9 = vpack.c.bf16 %v913_v4, %v913_v4  ;;  %vm658_vm3 = vcmp.ge.f32.partialorder %v530_v62, 0.0  ;;  %v786_v10 = vmul.f32 0.2, %v530_v62  ;;  %vm659_vm4 = vcmp.ge.f32.partialorder %v531_v63, 0.0 }
  0x9c   : > { %1169 = vst.msk [vmem:[%s1366_s26 + $0x168] sm:$0xf] %vm1078_vm0, %v1040_v3  ;;  %v787_v11 = vmul.f32 0.2, %v531_v63  ;;  %vm660_vm5 = vcmp.ge.f32.partialorder %v532_v5, 0.0  ;;  %v533_v12 = vadd.f32 %v1669_v17, %v401_v6  ;;  %v402_v13 = vmul.f32 %v1680_v23, %v270_v2  ;;  %v281_v4 = vld [vmem:[%s1333_s20 + $0x358] sm:$0xff] }
  0x9d   : > { %1170 = vst.msk [vmem:[%s1366_s26 + $0x16c] sm:$0xf] %vm1078_vm0, %v1041_v9  ;;  %v914_v14 = vsel %vm658_vm3, %v530_v62, %v786_v10  ;;  %v788_v1 = vmul.f32 0.2, %v532_v5  ;;  %v403_v15 = vmul.f32 %v1680_v23, %v271_v7  ;;  %v404_v16 = vmul.f32 %v1680_v23, %v272_v8 }
  0x9e   : > { %v1042_v0 = vpack.c.bf16 %v914_v14, %v914_v14  ;;  %v915_v19 = vsel %vm659_vm4, %v531_v63, %v787_v11  ;;  %vm661_vm6 = vcmp.ge.f32.partialorder %v533_v12, 0.0  ;;  %v789_v20 = vmul.f32 0.2, %v533_v12 }
  0x9f   : > { %v1043_v21 = vpack.c.bf16 %v915_v19, %v915_v19  ;;  %v916_v22 = vsel %vm660_vm5, %v532_v5, %v788_v1  ;;  %v534_v24 = vadd.f32 %v1669_v17, %v402_v13  ;;  %v535_v25 = vadd.f32 %v1669_v17, %v403_v15 }
  0xa0   : > { %1171 = vst.msk [vmem:[%s1366_s26 + $0x170] sm:$0xf] %vm1078_vm0, %v1042_v0  ;;  %v1044_v27 = vpack.c.bf16 %v916_v22, %v916_v22  ;;  %v917_v28 = vsel %vm661_vm6, %v533_v12, %v789_v20  ;;  %v536_v29 = vadd.f32 %v1669_v17, %v404_v16  ;;  %v405_v30 = vmul.f32 %v1680_v23, %v273_v18  ;;  %v282_v12 = vld [vmem:[%s1333_s20 + $0x360] sm:$0xff]  ;;  %v283_v16 = vld [vmem:[%s1333_s20 + $0x368] sm:$0xff]  ;;  %v284_v18 = vld [vmem:[%s1333_s20 + $0x370] sm:$0xff] }
  0xa1   : > { %1172 = vst.msk [vmem:[%s1366_s26 + $0x174] sm:$0xf] %vm1078_vm0, %v1043_v21  ;;  %v1045_v33 = vpack.c.bf16 %v917_v28, %v917_v28  ;;  %vm662_vm7 = vcmp.ge.f32.partialorder %v534_v24, 0.0  ;;  %v790_v34 = vmul.f32 0.2, %v534_v24  ;;  %vm663_vm8 = vcmp.ge.f32.partialorder %v535_v25, 0.0 }
  0xa2   : > { %1173 = vst.msk [vmem:[%s1366_s26 + $0x178] sm:$0xf] %vm1078_vm0, %v1044_v27  ;;  %v791_v35 = vmul.f32 0.2, %v535_v25  ;;  %vm664_vm9 = vcmp.ge.f32.partialorder %v536_v29, 0.0  ;;  %v537_v36 = vadd.f32 %v1669_v17, %v405_v30  ;;  %v406_v37 = vmul.f32 %v1680_v23, %v274_v26  ;;  %v285_v28 = vld [vmem:[%s1333_s20 + $0x378] sm:$0xff] }
  0xa3   : > { %1174 = vst.msk [vmem:[%s1366_s26 + $0x17c] sm:$0xf] %vm1078_vm0, %v1045_v33  ;;  %v918_v38 = vsel %vm662_vm7, %v534_v24, %v790_v34  ;;  %v792_v39 = vmul.f32 0.2, %v536_v29  ;;  %v407_v40 = vmul.f32 %v1680_v23, %v275_v31  ;;  %v408_v41 = vmul.f32 %v1680_v23, %v276_v32 }
  0xa4   : > { %v1046_v43 = vpack.c.bf16 %v918_v38, %v918_v38  ;;  %v919_v44 = vsel %vm663_vm8, %v535_v25, %v791_v35  ;;  %vm665_vm10 = vcmp.ge.f32.partialorder %v537_v36, 0.0  ;;  %v793_v45 = vmul.f32 0.2, %v537_v36 }
  0xa5   : > { %v1047_v46 = vpack.c.bf16 %v919_v44, %v919_v44  ;;  %v920_v47 = vsel %vm664_vm9, %v536_v29, %v792_v39  ;;  %v538_v48 = vadd.f32 %v1669_v17, %v406_v37  ;;  %v539_v49 = vadd.f32 %v1669_v17, %v407_v40 }
  0xa6   : > { %1175 = vst.msk [vmem:[%s1366_s26 + $0x180] sm:$0xf] %vm1078_vm0, %v1046_v43  ;;  %v1048_v51 = vpack.c.bf16 %v920_v47, %v920_v47  ;;  %v921_v52 = vsel %vm665_vm10, %v537_v36, %v793_v45  ;;  %v540_v53 = vadd.f32 %v1669_v17, %v408_v41  ;;  %v409_v54 = vmul.f32 %v1680_v23, %v277_v42  ;;  %v286_v36 = vld [vmem:[%s1333_s20 + $0x380] sm:$0xff]  ;;  %v287_v41 = vld [vmem:[%s1333_s20 + $0x388] sm:$0xff]  ;;  %v288_v42 = vld [vmem:[%s1333_s20 + $0x390] sm:$0xff] }
  0xa7   : > { %1176 = vst.msk [vmem:[%s1366_s26 + $0x184] sm:$0xf] %vm1078_vm0, %v1047_v46  ;;  %v1049_v57 = vpack.c.bf16 %v921_v52, %v921_v52  ;;  %vm666_vm11 = vcmp.ge.f32.partialorder %v538_v48, 0.0  ;;  %v794_v58 = vmul.f32 0.2, %v538_v48  ;;  %vm667_vm12 = vcmp.ge.f32.partialorder %v539_v49, 0.0 }
  0xa8   : > { %1177 = vst.msk [vmem:[%s1366_s26 + $0x188] sm:$0xf] %vm1078_vm0, %v1048_v51  ;;  %v795_v59 = vmul.f32 0.2, %v539_v49  ;;  %vm668_vm13 = vcmp.ge.f32.partialorder %v540_v53, 0.0  ;;  %v541_v60 = vadd.f32 %v1669_v17, %v409_v54  ;;  %v410_v61 = vmul.f32 %v1680_v23, %v278_v50  ;;  %v289_v52 = vld [vmem:[%s1333_s20 + $0x398] sm:$0xff] }
  0xa9   : > { %1178 = vst.msk [vmem:[%s1366_s26 + $0x18c] sm:$0xf] %vm1078_vm0, %v1049_v57  ;;  %v922_v62 = vsel %vm666_vm11, %v538_v48, %v794_v58  ;;  %v796_v63 = vmul.f32 0.2, %v540_v53  ;;  %v411_v2 = vmul.f32 %v1680_v23, %v279_v55  ;;  %v412_v3 = vmul.f32 %v1680_v23, %v280_v56 }
  0xaa   : > { %v1050_v5 = vpack.c.bf16 %v922_v62, %v922_v62  ;;  %v923_v6 = vsel %vm667_vm12, %v539_v49, %v795_v59  ;;  %vm669_vm14 = vcmp.ge.f32.partialorder %v541_v60, 0.0  ;;  %v797_v7 = vmul.f32 0.2, %v541_v60 }
  0xab   : > { %v1051_v8 = vpack.c.bf16 %v923_v6, %v923_v6  ;;  %v924_v9 = vsel %vm668_vm13, %v540_v53, %v796_v63  ;;  %v542_v10 = vadd.f32 %v1669_v17, %v410_v61  ;;  %v543_v11 = vadd.f32 %v1669_v17, %v411_v2 }
  0xac   : > { %1179 = vst.msk [vmem:[%s1366_s26 + $0x190] sm:$0xf] %vm1078_vm0, %v1050_v5  ;;  %v1052_v13 = vpack.c.bf16 %v924_v9, %v924_v9  ;;  %v925_v14 = vsel %vm669_vm14, %v541_v60, %v797_v7  ;;  %v544_v1 = vadd.f32 %v1669_v17, %v412_v3  ;;  %v413_v15 = vmul.f32 %v1680_v23, %v281_v4  ;;  %v290_v60 = vld [vmem:[%s1333_s20 + $0x3a0] sm:$0xff]  ;;  %v291_v3 = vld [vmem:[%s1333_s20 + $0x3a8] sm:$0xff]  ;;  %v292_v4 = vld [vmem:[%s1333_s20 + $0x3b0] sm:$0xff] }
  0xad   : > { %1180 = vst.msk [vmem:[%s1366_s26 + $0x194] sm:$0xf] %vm1078_vm0, %v1051_v8  ;;  %v1053_v0 = vpack.c.bf16 %v925_v14, %v925_v14  ;;  %vm670_vm15 = vcmp.ge.f32.partialorder %v542_v10, 0.0  ;;  %v798_v19 = vmul.f32 0.2, %v542_v10  ;;  %vm671_vm1 = vcmp.ge.f32.partialorder %v543_v11, 0.0 }
  0xae   : > { %1181 = vst.msk [vmem:[%s1366_s26 + $0x198] sm:$0xf] %vm1078_vm0, %v1052_v13  ;;  %v799_v20 = vmul.f32 0.2, %v543_v11  ;;  %vm672_vm2 = vcmp.ge.f32.partialorder %v544_v1, 0.0  ;;  %v545_v21 = vadd.f32 %v1669_v17, %v413_v15  ;;  %v414_v22 = vmul.f32 %v1680_v23, %v282_v12  ;;  %v293_v14 = vld [vmem:[%s1333_s20 + $0x3b8] sm:$0xff] }
  0xaf   : > { %1182 = vst.msk [vmem:[%s1366_s26 + $0x19c] sm:$0xf] %vm1078_vm0, %v1053_v0  ;;  %v926_v24 = vsel %vm670_vm15, %v542_v10, %v798_v19  ;;  %v800_v25 = vmul.f32 0.2, %v544_v1  ;;  %v415_v26 = vmul.f32 %v1680_v23, %v283_v16  ;;  %v416_v27 = vmul.f32 %v1680_v23, %v284_v18 }
  0xb0   : > { %v1054_v29 = vpack.c.bf16 %v926_v24, %v926_v24  ;;  %v927_v30 = vsel %vm671_vm1, %v543_v11, %v799_v20  ;;  %vm673_vm3 = vcmp.ge.f32.partialorder %v545_v21, 0.0  ;;  %v801_v31 = vmul.f32 0.2, %v545_v21 }
  0xb1   : > { %v1055_v32 = vpack.c.bf16 %v927_v30, %v927_v30  ;;  %v928_v33 = vsel %vm672_vm2, %v544_v1, %v800_v25  ;;  %v546_v34 = vadd.f32 %v1669_v17, %v414_v22  ;;  %v547_v35 = vadd.f32 %v1669_v17, %v415_v26 }
  0xb2   : > { %1183 = vst.msk [vmem:[%s1366_s26 + $0x1a0] sm:$0xf] %vm1078_vm0, %v1054_v29  ;;  %v1056_v37 = vpack.c.bf16 %v928_v33, %v928_v33  ;;  %v929_v38 = vsel %vm673_vm3, %v545_v21, %v801_v31  ;;  %v548_v39 = vadd.f32 %v1669_v17, %v416_v27  ;;  %v417_v40 = vmul.f32 %v1680_v23, %v285_v28  ;;  %v294_v21 = vld [vmem:[%s1333_s20 + $0x3c0] sm:$0xff]  ;;  %v295_v27 = vld [vmem:[%s1333_s20 + $0x3c8] sm:$0xff]  ;;  %v296_v28 = vld [vmem:[%s1333_s20 + $0x3d0] sm:$0xff] }
  0xb3   : > { %1184 = vst.msk [vmem:[%s1366_s26 + $0x1a4] sm:$0xf] %vm1078_vm0, %v1055_v32  ;;  %v1057_v43 = vpack.c.bf16 %v929_v38, %v929_v38  ;;  %vm674_vm4 = vcmp.ge.f32.partialorder %v546_v34, 0.0  ;;  %v802_v44 = vmul.f32 0.2, %v546_v34  ;;  %vm675_vm5 = vcmp.ge.f32.partialorder %v547_v35, 0.0 }
  0xb4   : > { %1185 = vst.msk [vmem:[%s1366_s26 + $0x1a8] sm:$0xf] %vm1078_vm0, %v1056_v37  ;;  %v803_v45 = vmul.f32 0.2, %v547_v35  ;;  %vm676_vm6 = vcmp.ge.f32.partialorder %v548_v39, 0.0  ;;  %v549_v46 = vadd.f32 %v1669_v17, %v417_v40  ;;  %v418_v47 = vmul.f32 %v1680_v23, %v286_v36  ;;  %v297_v38 = vld [vmem:[%s1333_s20 + $0x3d8] sm:$0xff] }
  0xb5   : > { %1186 = vst.msk [vmem:[%s1366_s26 + $0x1ac] sm:$0xf] %vm1078_vm0, %v1057_v43  ;;  %v930_v48 = vsel %vm674_vm4, %v546_v34, %v802_v44  ;;  %v804_v49 = vmul.f32 0.2, %v548_v39  ;;  %v419_v50 = vmul.f32 %v1680_v23, %v287_v41  ;;  %v420_v51 = vmul.f32 %v1680_v23, %v288_v42 }
  0xb6   : > { %v1058_v53 = vpack.c.bf16 %v930_v48, %v930_v48  ;;  %v931_v54 = vsel %vm675_vm5, %v547_v35, %v803_v45  ;;  %vm677_vm7 = vcmp.ge.f32.partialorder %v549_v46, 0.0  ;;  %v805_v55 = vmul.f32 0.2, %v549_v46 }
  0xb7   : > { %v1059_v56 = vpack.c.bf16 %v931_v54, %v931_v54  ;;  %v932_v57 = vsel %vm676_vm6, %v548_v39, %v804_v49  ;;  %v550_v58 = vadd.f32 %v1669_v17, %v418_v47  ;;  %v551_v59 = vadd.f32 %v1669_v17, %v419_v50 }
  0xb8   : > { %1187 = vst.msk [vmem:[%s1366_s26 + $0x1b0] sm:$0xf] %vm1078_vm0, %v1058_v53  ;;  %v1060_v61 = vpack.c.bf16 %v932_v57, %v932_v57  ;;  %v933_v62 = vsel %vm677_vm7, %v549_v46, %v805_v55  ;;  %v552_v63 = vadd.f32 %v1669_v17, %v420_v51  ;;  %v421_v2 = vmul.f32 %v1680_v23, %v289_v52  ;;  %v298_v46 = vld [vmem:[%s1333_s20 + $0x3e0] sm:$0xff]  ;;  %v299_v51 = vld [vmem:[%s1333_s20 + $0x3e8] sm:$0xff]  ;;  %v300_v52 = vld [vmem:[%s1333_s20 + $0x3f0] sm:$0xff] }
  0xb9   : > { %1188 = vst.msk [vmem:[%s1366_s26 + $0x1b4] sm:$0xf] %vm1078_vm0, %v1059_v56  ;;  %v1061_v5 = vpack.c.bf16 %v933_v62, %v933_v62  ;;  %vm678_vm8 = vcmp.ge.f32.partialorder %v550_v58, 0.0  ;;  %v806_v6 = vmul.f32 0.2, %v550_v58  ;;  %vm679_vm9 = vcmp.ge.f32.partialorder %v551_v59, 0.0 }
  0xba   : > { %1189 = vst.msk [vmem:[%s1366_s26 + $0x1b8] sm:$0xf] %vm1078_vm0, %v1060_v61  ;;  %v807_v7 = vmul.f32 0.2, %v551_v59  ;;  %vm680_vm10 = vcmp.ge.f32.partialorder %v552_v63, 0.0  ;;  %v553_v8 = vadd.f32 %v1669_v17, %v421_v2  ;;  %v422_v9 = vmul.f32 %v1680_v23, %v290_v60  ;;  %v301_v62 = vld [vmem:[%s1333_s20 + $0x3f8] sm:$0xff] }
  0xbb   : > { %1190 = vst.msk [vmem:[%s1366_s26 + $0x1bc] sm:$0xf] %vm1078_vm0, %v1061_v5  ;;  %v934_v10 = vsel %vm678_vm8, %v550_v58, %v806_v6  ;;  %v808_v11 = vmul.f32 0.2, %v552_v63  ;;  %v423_v12 = vmul.f32 %v1680_v23, %v291_v3  ;;  %v424_v13 = vmul.f32 %v1680_v23, %v292_v4 }
  0xbc   : > { %v1062_v1 = vpack.c.bf16 %v934_v10, %v934_v10  ;;  %v935_v15 = vsel %vm679_vm9, %v551_v59, %v807_v7  ;;  %vm681_vm11 = vcmp.ge.f32.partialorder %v553_v8, 0.0  ;;  %v809_v16 = vmul.f32 0.2, %v553_v8 }
  0xbd   : > { %v1063_v18 = vpack.c.bf16 %v935_v15, %v935_v15  ;;  %v936_v0 = vsel %vm680_vm10, %v552_v63, %v808_v11  ;;  %v554_v19 = vadd.f32 %v1669_v17, %v422_v9  ;;  %v555_v20 = vadd.f32 %v1669_v17, %v423_v12 }
  0xbe   : > { %1191 = vst.msk [vmem:[%s1366_s26 + $0x1c0] sm:$0xf] %vm1078_vm0, %v1062_v1  ;;  %v1064_v22 = vpack.c.bf16 %v936_v0, %v936_v0  ;;  %v937_v24 = vsel %vm681_vm11, %v553_v8, %v809_v16  ;;  %v556_v25 = vadd.f32 %v1669_v17, %v424_v13  ;;  %v425_v26 = vmul.f32 %v1680_v23, %v293_v14 }
  0xbf   : > { %1192 = vst.msk [vmem:[%s1366_s26 + $0x1c4] sm:$0xf] %vm1078_vm0, %v1063_v18  ;;  %v1065_v29 = vpack.c.bf16 %v937_v24, %v937_v24  ;;  %vm682_vm12 = vcmp.ge.f32.partialorder %v554_v19, 0.0  ;;  %v810_v30 = vmul.f32 0.2, %v554_v19  ;;  %vm683_vm13 = vcmp.ge.f32.partialorder %v555_v20, 0.0 }
  0xc0   : > { %1193 = vst.msk [vmem:[%s1366_s26 + $0x1c8] sm:$0xf] %vm1078_vm0, %v1064_v22  ;;  %v811_v31 = vmul.f32 0.2, %v555_v20  ;;  %vm684_vm14 = vcmp.ge.f32.partialorder %v556_v25, 0.0  ;;  %v557_v32 = vadd.f32 %v1669_v17, %v425_v26  ;;  %v426_v33 = vmul.f32 %v1680_v23, %v294_v21 }
  0xc1   : > { %1194 = vst.msk [vmem:[%s1366_s26 + $0x1cc] sm:$0xf] %vm1078_vm0, %v1065_v29  ;;  %v938_v34 = vsel %vm682_vm12, %v554_v19, %v810_v30  ;;  %v812_v35 = vmul.f32 0.2, %v556_v25  ;;  %v427_v36 = vmul.f32 %v1680_v23, %v295_v27  ;;  %v428_v37 = vmul.f32 %v1680_v23, %v296_v28 }
  0xc2   : > { %v1066_v39 = vpack.c.bf16 %v938_v34, %v938_v34  ;;  %v939_v40 = vsel %vm683_vm13, %v555_v20, %v811_v31  ;;  %vm685_vm15 = vcmp.ge.f32.partialorder %v557_v32, 0.0  ;;  %v813_v41 = vmul.f32 0.2, %v557_v32 }
  0xc3   : > { %v1067_v42 = vpack.c.bf16 %v939_v40, %v939_v40  ;;  %v940_v43 = vsel %vm684_vm14, %v556_v25, %v812_v35  ;;  %v558_v44 = vadd.f32 %v1669_v17, %v426_v33  ;;  %v559_v45 = vadd.f32 %v1669_v17, %v427_v36 }
  0xc4   : > { %1195 = vst.msk [vmem:[%s1366_s26 + $0x1d0] sm:$0xf] %vm1078_vm0, %v1066_v39  ;;  %v1068_v47 = vpack.c.bf16 %v940_v43, %v940_v43  ;;  %v941_v48 = vsel %vm685_vm15, %v557_v32, %v813_v41  ;;  %v560_v49 = vadd.f32 %v1669_v17, %v428_v37  ;;  %v429_v50 = vmul.f32 %v1680_v23, %v297_v38 }
  0xc5   : > { %1196 = vst.msk [vmem:[%s1366_s26 + $0x1d4] sm:$0xf] %vm1078_vm0, %v1067_v42  ;;  %v1069_v53 = vpack.c.bf16 %v941_v48, %v941_v48  ;;  %vm686_vm1 = vcmp.ge.f32.partialorder %v558_v44, 0.0  ;;  %v814_v54 = vmul.f32 0.2, %v558_v44  ;;  %vm687_vm2 = vcmp.ge.f32.partialorder %v559_v45, 0.0 }
  0xc6   : > { %1197 = vst.msk [vmem:[%s1366_s26 + $0x1d8] sm:$0xf] %vm1078_vm0, %v1068_v47  ;;  %v815_v55 = vmul.f32 0.2, %v559_v45  ;;  %vm688_vm3 = vcmp.ge.f32.partialorder %v560_v49, 0.0  ;;  %v561_v56 = vadd.f32 %v1669_v17, %v429_v50  ;;  %v430_v57 = vmul.f32 %v1680_v23, %v298_v46 }
  0xc7   : > { %1198 = vst.msk [vmem:[%s1366_s26 + $0x1dc] sm:$0xf] %vm1078_vm0, %v1069_v53  ;;  %v942_v58 = vsel %vm686_vm1, %v558_v44, %v814_v54  ;;  %v816_v59 = vmul.f32 0.2, %v560_v49  ;;  %v431_v60 = vmul.f32 %v1680_v23, %v299_v51  ;;  %v432_v61 = vmul.f32 %v1680_v23, %v300_v52 }
  0xc8   : > { %v1070_v63 = vpack.c.bf16 %v942_v58, %v942_v58  ;;  %v943_v2 = vsel %vm687_vm2, %v559_v45, %v815_v55  ;;  %vm689_vm4 = vcmp.ge.f32.partialorder %v561_v56, 0.0  ;;  %v817_v3 = vmul.f32 0.2, %v561_v56 }
  0xc9   : > { %v1071_v4 = vpack.c.bf16 %v943_v2, %v943_v2  ;;  %v944_v5 = vsel %vm688_vm3, %v560_v49, %v816_v59  ;;  %v562_v6 = vadd.f32 %v1669_v17, %v430_v57  ;;  %v563_v7 = vadd.f32 %v1669_v17, %v431_v60 }
  0xca   : > { %1199 = vst.msk [vmem:[%s1366_s26 + $0x1e0] sm:$0xf] %vm1078_vm0, %v1070_v63  ;;  %v1072_v8 = vpack.c.bf16 %v944_v5, %v944_v5  ;;  %v945_v9 = vsel %vm689_vm4, %v561_v56, %v817_v3  ;;  %v564_v10 = vadd.f32 %v1669_v17, %v432_v61  ;;  %v433_v11 = vmul.f32 %v1680_v23, %v301_v62 }
  0xcb   : > { %1200 = vst.msk [vmem:[%s1366_s26 + $0x1e4] sm:$0xf] %vm1078_vm0, %v1071_v4  ;;  %v1073_v12 = vpack.c.bf16 %v945_v9, %v945_v9  ;;  %vm690_vm5 = vcmp.ge.f32.partialorder %v562_v6, 0.0  ;;  %v818_v13 = vmul.f32 0.2, %v562_v6  ;;  %vm691_vm6 = vcmp.ge.f32.partialorder %v563_v7, 0.0 }
  0xcc   : > { %1201 = vst.msk [vmem:[%s1366_s26 + $0x1e8] sm:$0xf] %vm1078_vm0, %v1072_v8  ;;  %v819_v14 = vmul.f32 0.2, %v563_v7  ;;  %vm692_vm7 = vcmp.ge.f32.partialorder %v564_v10, 0.0  ;;  %v565_v1 = vadd.f32 %v1669_v17, %v433_v11 }
  0xcd   : > { %1202 = vst.msk [vmem:[%s1366_s26 + $0x1ec] sm:$0xf] %vm1078_vm0, %v1073_v12  ;;  %v946_v15 = vsel %vm690_vm5, %v562_v6, %v818_v13  ;;  %v820_v23 = vmul.f32 0.2, %v564_v10 }
  0xce   : > { %v1074_v16 = vpack.c.bf16 %v946_v15, %v946_v15  ;;  %v947_v18 = vsel %vm691_vm6, %v563_v7, %v819_v14  ;;  %vm693_vm8 = vcmp.ge.f32.partialorder %v565_v1, 0.0  ;;  %v821_v0 = vmul.f32 0.2, %v565_v1 }
  0xcf   : > { %v1075_v19 = vpack.c.bf16 %v947_v18, %v947_v18  ;;  %v948_v20 = vsel %vm692_vm7, %v564_v10, %v820_v23 }
  0xd0   : > { %1203 = vst.msk [vmem:[%s1366_s26 + $0x1f0] sm:$0xf] %vm1078_vm0, %v1074_v16  ;;  %v1076_v21 = vpack.c.bf16 %v948_v20, %v948_v20  ;;  %v949_v22 = vsel %vm693_vm8, %v565_v1, %v821_v0 }
  0xd1   : > { %1204 = vst.msk [vmem:[%s1366_s26 + $0x1f4] sm:$0xf] %vm1078_vm0, %v1075_v19  ;;  %v1077_v24 = vpack.c.bf16 %v949_v22, %v949_v22 }
  0xd2   : > { %1205 = vst.msk [vmem:[%s1366_s26 + $0x1f8] sm:$0xf] %vm1078_vm0, %v1076_v21 }
  0xd3   : > { %1206 = vst.msk [vmem:[%s1366_s26 + $0x1fc] sm:$0xf] %vm1078_vm0, %v1077_v24 }
  0xd4 PF: > { %s13_s12 = sadd.s32 1, %s1292_s12  }
  0xd5   : > { %p10_p4 = scmp.ge.s32.totalorder %s13_s12, 4  }
  0xd7   :  { %12 = sbr.rel (!%p10_p4) target bundleno = 1 (0x1), region = 62 }

// kernel: discriminator_forward.9
= control target key start
LH: loop header
LB: loop body
LE: loop exit
PB: predicated region body
PF: predicated region fallthrough
CT: control target
= control target key end

     0   :  { %s1876_s15 = smov 0   ;;  %s1878_s16 = smov 0   ;;  %s2577_s0 = inlined_call_operand.vmem [shape: bf16[2048,48], index: 0, kind: input, shape index: {}]   ;;  %s2578_s1 = inlined_call_operand.vmem [shape: bf16[48,16], index: 1, kind: input, shape index: {}]   ;;  %s2579_s2 = inlined_call_operand.vmem [shape: f32[2048,16], index: 2, kind: output, shape index: {0}]   ;;  %s2580_s3 = inlined_call_operand.vmem [shape: f32[4,1,16], index: 3, kind: output, shape index: {1}]   ;;  %s2581_s4 = inlined_call_operand.vmem [shape: f32[4,1,16], index: 4, kind: output, shape index: {2}]  }
   0x1   :  { %s1880_s17 = smov 0  }
   0x2 LB: > { %s27_s18 = sadd.s32 1, %s1844_s16  ;;  %p1578_p0 = scmp.ge.s32.totalorder %s1848_s17, 1  ;;  %s1848_s17 = sphi %s1880_s17, %s15_s17   ;;  %s1844_s16 = sphi %s1878_s16, %s2583_s16   ;;  %s1840_s15 = sphi %s1876_s15, %s2582_s15  }
   0x3   : > { %p29_p1 = scmp.ge.s32.totalorder %s27_s18, 4  ;;  %p196_p2 = scmp.lt.s32.totalorder %s1848_s17, 5 }
   0x5   : > { %s2585_s18 = smov (%p29_p1, %s27_s18), 0  ;;  %p197_p3 = pnand %p1578_p0, %p196_p2 }
   0x6   : > { %s1579_s21 = sshll.u32 (!%p197_p3), %s1840_s15, 6  ;;  %p257_p5 = scmp.lt.s32.totalorder (!%p197_p3), %s1840_s15, 3 }
   0x7   : > { %200 = sbr.rel (%p197_p3) target bundleno = 394 (0x18a), region = 28  ;;  %p237_p4 = scmp.lt.s32.totalorder (!%p197_p3), %s1579_s21, 255 }
   0xc   : > { %v1791_v0 = vld [vmem:[%s2578_s1 + $0x10] sm:$0xff]  ;;  %v1790_v1 = vld [vmem:[%s2578_s1 + $0x8] sm:$0xff]  ;;  %s2587_s21 = smov (!%p237_p4, %s1579_s21), 255  ;;  %v1789_v2 = vld [vmem:[%s2578_s1] sm:$0xff]  ;;  %vm645_vm0 = vcmask 392192   ;;  %vm268_vm1 = vcmask 130048  }
   0xd   : > { %747 = vmatpush.bf16.msra.mxu0 %v1791_v0  ;;  %1792 = vmatpush.bf16.msra.mxu1 %v1791_v0  ;;  %s1580_s24 = sshll.u32 %s2587_s21, 2  ;;  %s1582_s30 = sshll.u32 %s2587_s21, 3  ;;  %v1850_v23 = vmov 0.0   ;;  %vm1240_vm2 = vcmask 122880  }
   0xe   : > { %1793 = vmatpush.bf16.msra.mxu2 %v1791_v0  ;;  %1794 = vmatpush.bf16.msra.mxu3 %v1791_v0  ;;  %s1912_s29 = scalar_lea.vmem %s2577_s0, %s1580_s24  ;;  %s1952_s7 = scalar_lea.vmem %s2579_s2, %s1582_s30 }
   0xf   : > { %v1757_v3 = vld [vmem:[%s1912_s29] sm:$0xff]  ;;  %v1758_v5 = vld [vmem:[%s1912_s29 + $0x8] sm:$0xff]  ;;  %v1759_v8 = vld [vmem:[%s1912_s29 + $0x10] sm:$0xff]  ;;  %269 = vst.msk [vmem:[%s1952_s7] sm:$0xff] %vm268_vm1, %v1850_v23  ;;  %s2589_s15 = smov (!%p257_p5, %s1840_s15), 3 }
  0x10   : > { %v1765_v4 = vld [vmem:[%s1912_s29 + $0x40] sm:$0xff]  ;;  %v1766_v6 = vld [vmem:[%s1912_s29 + $0x48] sm:$0xff]  ;;  %v1767_v9 = vld [vmem:[%s1912_s29 + $0x50] sm:$0xff]  ;;  %270 = vst.msk [vmem:[%s1952_s7 + $0x8] sm:$0xff] %vm268_vm1, %v1850_v23  ;;  %s259_s10 = scalar_lea.vmem %s2580_s3, %s2589_s15  ;;  %s262_s13 = scalar_lea.vmem %s2581_s4, %s2589_s15 }
  0x11   : > { %748 = vmatpush.bf16.msra.mxu0 %v1790_v1  ;;  %1795 = vmatpush.bf16.msra.mxu1 %v1790_v1  ;;  %v1773_v7 = vld [vmem:[%s1912_s29 + $0x80] sm:$0xff]  ;;  %v1774_v10 = vld [vmem:[%s1912_s29 + $0x88] sm:$0xff]  ;;  %v1760_v11 = vld [vmem:[%s1912_s29 + $0x18] sm:$0xff]  ;;  %271 = vst.msk [vmem:[%s1952_s7 + $0x10] sm:$0xff] %vm268_vm1, %v1850_v23 }
  0x12   : > { %1796 = vmatpush.bf16.msra.mxu2 %v1790_v1  ;;  %1797 = vmatpush.bf16.msra.mxu3 %v1790_v1  ;;  %v1768_v12 = vld [vmem:[%s1912_s29 + $0x58] sm:$0xff]  ;;  %v1775_v13 = vld [vmem:[%s1912_s29 + $0x90] sm:$0xff]  ;;  %v1781_v14 = vld [vmem:[%s1912_s29 + $0xc0] sm:$0xff]  ;;  %272 = vst.msk [vmem:[%s1952_s7 + $0x18] sm:$0xff] %vm268_vm1, %v1850_v23 }
  0x13   : > { %v1761_v15 = vld [vmem:[%s1912_s29 + $0x20] sm:$0xff]  ;;  %v1776_v17 = vld [vmem:[%s1912_s29 + $0x98] sm:$0xff]  ;;  %v1782_v18 = vld [vmem:[%s1912_s29 + $0xc8] sm:$0xff]  ;;  %273 = vst.msk [vmem:[%s1952_s7 + $0x20] sm:$0xff] %vm268_vm1, %v1850_v23 }
  0x14   : > { %v1769_v16 = vld [vmem:[%s1912_s29 + $0x60] sm:$0xff]  ;;  %v1762_v19 = vld [vmem:[%s1912_s29 + $0x28] sm:$0xff]  ;;  %v1783_v22 = vld [vmem:[%s1912_s29 + $0xd0] sm:$0xff]  ;;  %274 = vst.msk [vmem:[%s1952_s7 + $0x28] sm:$0xff] %vm268_vm1, %v1850_v23 }
  0x15   : > { %749 = vmatpush.bf16.msra.mxu0 %v1789_v2  ;;  %1798 = vmatpush.bf16.msra.mxu1 %v1789_v2  ;;  %v1770_v20 = vld [vmem:[%s1912_s29 + $0x68] sm:$0xff]  ;;  %v1777_v21 = vld [vmem:[%s1912_s29 + $0xa0] sm:$0xff]  ;;  %275 = vst.msk [vmem:[%s1952_s7 + $0x30] sm:$0xff] %vm268_vm1, %v1850_v23  ;;  %v1763_v24 = vld [vmem:[%s1912_s29 + $0x30] sm:$0xff] }
  0x16   : > { %1799 = vmatpush.bf16.msra.mxu2 %v1789_v2  ;;  %1800 = vmatpush.bf16.msra.mxu3 %v1789_v2  ;;  %276 = vst.msk [vmem:[%s1952_s7 + $0x38] sm:$0xff] %vm268_vm1, %v1850_v23  ;;  %v1771_v25 = vld [vmem:[%s1912_s29 + $0x70] sm:$0xff]  ;;  %v1778_v26 = vld [vmem:[%s1912_s29 + $0xa8] sm:$0xff]  ;;  %v1784_v27 = vld [vmem:[%s1912_s29 + $0xd8] sm:$0xff] }
  0x17   : > { %277 = vst.msk [vmem:[%s1952_s7 + $0x40] sm:$0xff] %vm268_vm1, %v1850_v23  ;;  %v1764_v28 = vld [vmem:[%s1912_s29 + $0x38] sm:$0xff]  ;;  %v1779_v30 = vld [vmem:[%s1912_s29 + $0xb0] sm:$0xff]  ;;  %v1785_v31 = vld [vmem:[%s1912_s29 + $0xe0] sm:$0xff] }
  0x18   : > { %1723 = vmatmul.msk.bf16.vlgmr.msra.gmra.mxu0 %vm645_vm0, %v1757_v3  ;;  %1731 = vmatmul.msk.bf16.vlgmr.msra.gmra.mxu1 %vm645_vm0, %v1765_v4  ;;  %278 = vst.msk [vmem:[%s1952_s7 + $0x48] sm:$0xff] %vm268_vm1, %v1850_v23  ;;  %v1772_v29 = vld [vmem:[%s1912_s29 + $0x78] sm:$0xff]  ;;  %v333_v32 = vld [vmem:[%s1952_s7] sm:$0xff]  ;;  %v1786_v39 = vld [vmem:[%s1912_s29 + $0xe8] sm:$0xff] }
  0x19   : > { %1739 = vmatmul.msk.bf16.vlgmr.msra.gmra.mxu2 %vm645_vm0, %v1773_v7  ;;  %1747 = vmatmul.msk.bf16.vlgmr.msra.gmra.mxu3 %vm645_vm0, %v1781_v14  ;;  %279 = vst.msk [vmem:[%s1952_s7 + $0x50] sm:$0xff] %vm268_vm1, %v1850_v23  ;;  %v1780_v38 = vld [vmem:[%s1912_s29 + $0xb8] sm:$0xff]  ;;  %v334_v40 = vld [vmem:[%s1952_s7 + $0x8] sm:$0xff]  ;;  %v335_v41 = vld [vmem:[%s1952_s7 + $0x10] sm:$0xff] }
  0x1a   : > { %280 = vst.msk [vmem:[%s1952_s7 + $0x58] sm:$0xff] %vm268_vm1, %v1850_v23  ;;  %v336_v50 = vld [vmem:[%s1952_s7 + $0x18] sm:$0xff]  ;;  %v1787_v58 = vld [vmem:[%s1912_s29 + $0xf0] sm:$0xff]  ;;  %v337_v59 = vld [vmem:[%s1952_s7 + $0x20] sm:$0xff] }
  0x1b   : > { %281 = vst.msk [vmem:[%s1952_s7 + $0x60] sm:$0xff] %vm268_vm1, %v1850_v23  ;;  %v338_v0 = vld [vmem:[%s1952_s7 + $0x28] sm:$0xff] }
  0x1c   : > { %282 = vst.msk [vmem:[%s1952_s7 + $0x68] sm:$0xff] %vm268_vm1, %v1850_v23  ;;  %v339_v14 = vld [vmem:[%s1952_s7 + $0x30] sm:$0xff] }
  0x1d   : > { %283 = vst.msk [vmem:[%s1952_s7 + $0x70] sm:$0xff] %vm268_vm1, %v1850_v23 }
  0x1e   : > { %284 = vst.msk [vmem:[%s1952_s7 + $0x78] sm:$0xff] %vm268_vm1, %v1850_v23 }
  0x1f   : > { %285 = vst.msk [vmem:[%s1952_s7 + $0x80] sm:$0xff] %vm268_vm1, %v1850_v23 }
  0x20   : > { %286 = vst.msk [vmem:[%s1952_s7 + $0x88] sm:$0xff] %vm268_vm1, %v1850_v23 }
  0x21   : > { %287 = vst.msk [vmem:[%s1952_s7 + $0x90] sm:$0xff] %vm268_vm1, %v1850_v23 }
  0x22   : > { %288 = vst.msk [vmem:[%s1952_s7 + $0x98] sm:$0xff] %vm268_vm1, %v1850_v23 }
  0x23   : > { %289 = vst.msk [vmem:[%s1952_s7 + $0xa0] sm:$0xff] %vm268_vm1, %v1850_v23 }
  0x24   : > { %290 = vst.msk [vmem:[%s1952_s7 + $0xa8] sm:$0xff] %vm268_vm1, %v1850_v23 }
  0x25   : > { %291 = vst.msk [vmem:[%s1952_s7 + $0xb0] sm:$0xff] %vm268_vm1, %v1850_v23 }
  0x26   : > { %292 = vst.msk [vmem:[%s1952_s7 + $0xb8] sm:$0xff] %vm268_vm1, %v1850_v23  ;;  %v349_v43 = vld [vmem:[%s1952_s7 + $0x80] sm:$0xff] }
  0x27   : > { %293 = vst.msk [vmem:[%s1952_s7 + $0xc0] sm:$0xff] %vm268_vm1, %v1850_v23  ;;  %v350_v45 = vld [vmem:[%s1952_s7 + $0x88] sm:$0xff] }
  0x28   : > { %1724 = vmatmul.msk.bf16.gmra.mxu0 %vm645_vm0, %v1758_v5  ;;  %1732 = vmatmul.msk.bf16.gmra.mxu1 %vm645_vm0, %v1766_v6  ;;  %294 = vst.msk [vmem:[%s1952_s7 + $0xc8] sm:$0xff] %vm268_vm1, %v1850_v23  ;;  %v351_v51 = vld [vmem:[%s1952_s7 + $0x90] sm:$0xff] }
  0x29   : > { %1740 = vmatmul.msk.bf16.gmra.mxu2 %vm645_vm0, %v1774_v10  ;;  %1748 = vmatmul.msk.bf16.gmra.mxu3 %vm645_vm0, %v1782_v18  ;;  %295 = vst.msk [vmem:[%s1952_s7 + $0xd0] sm:$0xff] %vm268_vm1, %v1850_v23  ;;  %v352_v55 = vld [vmem:[%s1952_s7 + $0x98] sm:$0xff] }
  0x2a   : > { %296 = vst.msk [vmem:[%s1952_s7 + $0xd8] sm:$0xff] %vm268_vm1, %v1850_v23  ;;  %v353_v1 = vld [vmem:[%s1952_s7 + $0xa0] sm:$0xff] }
  0x2b   : > { %297 = vst.msk [vmem:[%s1952_s7 + $0xe0] sm:$0xff] %vm268_vm1, %v1850_v23  ;;  %v354_v7 = vld [vmem:[%s1952_s7 + $0xa8] sm:$0xff] }
  0x2c   : > { %298 = vst.msk [vmem:[%s1952_s7 + $0xe8] sm:$0xff] %vm268_vm1, %v1850_v23 }
  0x2d   : > { %299 = vst.msk [vmem:[%s1952_s7 + $0xf0] sm:$0xff] %vm268_vm1, %v1850_v23 }
  0x2e   : > { %300 = vst.msk [vmem:[%s1952_s7 + $0xf8] sm:$0xff] %vm268_vm1, %v1850_v23 }
  0x2f   : > { %301 = vst.msk [vmem:[%s1952_s7 + $0x100] sm:$0xff] %vm268_vm1, %v1850_v23 }
  0x30   : > { %302 = vst.msk [vmem:[%s1952_s7 + $0x108] sm:$0xff] %vm268_vm1, %v1850_v23 }
  0x31   : > { %303 = vst.msk [vmem:[%s1952_s7 + $0x110] sm:$0xff] %vm268_vm1, %v1850_v23 }
  0x32   : > { %304 = vst.msk [vmem:[%s1952_s7 + $0x118] sm:$0xff] %vm268_vm1, %v1850_v23 }
  0x33   : > { %305 = vst.msk [vmem:[%s1952_s7 + $0x120] sm:$0xff] %vm268_vm1, %v1850_v23 }
  0x34   : > { %306 = vst.msk [vmem:[%s1952_s7 + $0x128] sm:$0xff] %vm268_vm1, %v1850_v23 }
  0x35   : > { %307 = vst.msk [vmem:[%s1952_s7 + $0x130] sm:$0xff] %vm268_vm1, %v1850_v23 }
  0x36   : > { %308 = vst.msk [vmem:[%s1952_s7 + $0x138] sm:$0xff] %vm268_vm1, %v1850_v23  ;;  %v365_v2 = vld [vmem:[%s1952_s7 + $0x100] sm:$0xff] }
  0x37   : > { %309 = vst.msk [vmem:[%s1952_s7 + $0x140] sm:$0xff] %vm268_vm1, %v1850_v23 }
  0x38   : > { %1725 = vmatmul.msk.bf16.gmra.mxu0 %vm645_vm0, %v1759_v8  ;;  %1733 = vmatmul.msk.bf16.gmra.mxu1 %vm645_vm0, %v1767_v9  ;;  %310 = vst.msk [vmem:[%s1952_s7 + $0x148] sm:$0xff] %vm268_vm1, %v1850_v23  ;;  %v366_v9 = vld [vmem:[%s1952_s7 + $0x108] sm:$0xff] }
  0x39   : > { %1741 = vmatmul.msk.bf16.gmra.mxu2 %vm645_vm0, %v1775_v13  ;;  %1749 = vmatmul.msk.bf16.gmra.mxu3 %vm645_vm0, %v1783_v22  ;;  %311 = vst.msk [vmem:[%s1952_s7 + $0x150] sm:$0xff] %vm268_vm1, %v1850_v23  ;;  %v1788_v13 = vld [vmem:[%s1912_s29 + $0xf8] sm:$0xff] }
  0x3a   : > { %312 = vst.msk [vmem:[%s1952_s7 + $0x158] sm:$0xff] %vm268_vm1, %v1850_v23 }
  0x3b   : > { %313 = vst.msk [vmem:[%s1952_s7 + $0x160] sm:$0xff] %vm268_vm1, %v1850_v23 }
  0x3c   : > { %314 = vst.msk [vmem:[%s1952_s7 + $0x168] sm:$0xff] %vm268_vm1, %v1850_v23 }
  0x3d   : > { %315 = vst.msk [vmem:[%s1952_s7 + $0x170] sm:$0xff] %vm268_vm1, %v1850_v23 }
  0x3e   : > { %316 = vst.msk [vmem:[%s1952_s7 + $0x178] sm:$0xff] %vm268_vm1, %v1850_v23 }
  0x3f   : > { %317 = vst.msk [vmem:[%s1952_s7 + $0x180] sm:$0xff] %vm268_vm1, %v1850_v23 }
  0x40   : > { %318 = vst.msk [vmem:[%s1952_s7 + $0x188] sm:$0xff] %vm268_vm1, %v1850_v23 }
  0x41   : > { %319 = vst.msk [vmem:[%s1952_s7 + $0x190] sm:$0xff] %vm268_vm1, %v1850_v23 }
  0x42   : > { %320 = vst.msk [vmem:[%s1952_s7 + $0x198] sm:$0xff] %vm268_vm1, %v1850_v23 }
  0x43   : > { %321 = vst.msk [vmem:[%s1952_s7 + $0x1a0] sm:$0xff] %vm268_vm1, %v1850_v23 }
  0x44   : > { %322 = vst.msk [vmem:[%s1952_s7 + $0x1a8] sm:$0xff] %vm268_vm1, %v1850_v23 }
  0x45   : > { %323 = vst.msk [vmem:[%s1952_s7 + $0x1b0] sm:$0xff] %vm268_vm1, %v1850_v23 }
  0x46   : > { %324 = vst.msk [vmem:[%s1952_s7 + $0x1b8] sm:$0xff] %vm268_vm1, %v1850_v23 }
  0x47   : > { %325 = vst.msk [vmem:[%s1952_s7 + $0x1c0] sm:$0xff] %vm268_vm1, %v1850_v23 }
  0x48   : > { %1726 = vmatmul.msk.bf16.gmra.mxu0 %vm645_vm0, %v1760_v11  ;;  %1734 = vmatmul.msk.bf16.gmra.mxu1 %vm645_vm0, %v1768_v12  ;;  %326 = vst.msk [vmem:[%s1952_s7 + $0x1c8] sm:$0xff] %vm268_vm1, %v1850_v23 }
  0x49   : > { %1742 = vmatmul.msk.bf16.gmra.mxu2 %vm645_vm0, %v1776_v17  ;;  %1750 = vmatmul.msk.bf16.gmra.mxu3 %vm645_vm0, %v1784_v27  ;;  %327 = vst.msk [vmem:[%s1952_s7 + $0x1d0] sm:$0xff] %vm268_vm1, %v1850_v23 }
  0x4a   : > { %328 = vst.msk [vmem:[%s1952_s7 + $0x1d8] sm:$0xff] %vm268_vm1, %v1850_v23 }
  0x4b   : > { %329 = vst.msk [vmem:[%s1952_s7 + $0x1e0] sm:$0xff] %vm268_vm1, %v1850_v23 }
  0x4c   : > { %330 = vst.msk [vmem:[%s1952_s7 + $0x1e8] sm:$0xff] %vm268_vm1, %v1850_v23 }
  0x4d   : > { %331 = vst.msk [vmem:[%s1952_s7 + $0x1f0] sm:$0xff] %vm268_vm1, %v1850_v23 }
  0x4e   : > { %332 = vst.msk [vmem:[%s1952_s7 + $0x1f8] sm:$0xff] %vm268_vm1, %v1850_v23 }
  0x58   : > { %1727 = vmatmul.msk.bf16.gmra.mxu0 %vm645_vm0, %v1761_v15  ;;  %1735 = vmatmul.msk.bf16.gmra.mxu1 %vm645_vm0, %v1769_v16 }
  0x59   : > { %1743 = vmatmul.msk.bf16.gmra.mxu2 %vm645_vm0, %v1777_v21  ;;  %1751 = vmatmul.msk.bf16.gmra.mxu3 %vm645_vm0, %v1785_v31  ;;  %v367_v21 = vld [vmem:[%s1952_s7 + $0x110] sm:$0xff] }
  0x68   : > { %1728 = vmatmul.msk.bf16.gmra.mxu0 %vm645_vm0, %v1762_v19  ;;  %1736 = vmatmul.msk.bf16.gmra.mxu1 %vm645_vm0, %v1770_v20  ;;  %v340_v19 = vld [vmem:[%s1952_s7 + $0x38] sm:$0xff]  ;;  %v355_v20 = vld [vmem:[%s1952_s7 + $0xb0] sm:$0xff] }
  0x69   : > { %1744 = vmatmul.msk.bf16.gmra.mxu2 %vm645_vm0, %v1778_v26  ;;  %1752 = vmatmul.msk.bf16.gmra.mxu3 %vm645_vm0, %v1786_v39  ;;  %v356_v26 = vld [vmem:[%s1952_s7 + $0xb8] sm:$0xff]  ;;  %v357_v39 = vld [vmem:[%s1952_s7 + $0xc0] sm:$0xff] }
  0x78   : > { %1729 = vmatmul.msk.bf16.gmra.mxu0 %vm645_vm0, %v1763_v24  ;;  %1737 = vmatmul.msk.bf16.gmra.mxu1 %vm645_vm0, %v1771_v25 }
  0x79   : > { %1745 = vmatmul.msk.bf16.gmra.mxu2 %vm645_vm0, %v1779_v30  ;;  %1753 = vmatmul.msk.bf16.gmra.mxu3 %vm645_vm0, %v1787_v58 }
  0x88   : > { %1730 = vmatmul.msk.bf16.gmra.mxu0 %vm645_vm0, %v1764_v28  ;;  %1738 = vmatmul.msk.bf16.gmra.mxu1 %vm645_vm0, %v1772_v29  ;;  %v368_v28 = vld [vmem:[%s1952_s7 + $0x118] sm:$0xff] }
  0x89   : > { %1746 = vmatmul.msk.bf16.gmra.mxu2 %vm645_vm0, %v1780_v38  ;;  %1754 = vmatmul.msk.bf16.gmra.mxu3 %vm645_vm0, %v1788_v13  ;;  %v342_v38 = vld [vmem:[%s1952_s7 + $0x48] sm:$0xff]  ;;  %v384_v13 = vld [vmem:[%s1952_s7 + $0x198] sm:$0xff] }
  0x95   : > { %v751_v33 = vpop.f32.mrf.mxu0  ;;  %v791_v35 = vpop.f32.mrf.mxu1 }
  0x96   : > { %v911_v34 = vadd.f32 %v751_v33, %v333_v32  ;;  %v927_v48 = vadd.f32 %v791_v35, %v349_v43  ;;  %v341_v32 = vld [vmem:[%s1952_s7 + $0x40] sm:$0xff] }
  0x98   : > { %976 = vst.msk [vmem:[%s1952_s7] sm:$0xff] %vm268_vm1, %v911_v34 }
  0x99   : > { %992 = vst.msk [vmem:[%s1952_s7 + $0x80] sm:$0xff] %vm268_vm1, %v927_v48 }
  0x9c   : > { %v831_v63 = vpop.f32.mrf.mxu2 }
  0x9d   : > { %v753_v36 = vpop.f32.mrf.mxu0  ;;  %v793_v37 = vpop.f32.mrf.mxu1  ;;  %v943_v4 = vadd.f32 %v831_v63, %v365_v2  ;;  %v359_v63 = vld [vmem:[%s1952_s7 + $0xd0] sm:$0xff] }
  0x9e   : > { %v912_v44 = vadd.f32 %v753_v36, %v334_v40  ;;  %v928_v49 = vadd.f32 %v793_v37, %v350_v45  ;;  %v871_v37 = vpop.f32.mrf.mxu3  ;;  %v369_v40 = vld [vmem:[%s1952_s7 + $0x120] sm:$0xff]  ;;  %v383_v2 = vld [vmem:[%s1952_s7 + $0x190] sm:$0xff] }
  0x9f   : > { %1008 = vst.msk [vmem:[%s1952_s7 + $0x100] sm:$0xff] %vm268_vm1, %v943_v4 }
  0xa0   : > { %977 = vst.msk [vmem:[%s1952_s7 + $0x8] sm:$0xff] %vm268_vm1, %v912_v44 }
  0xa1   : > { %993 = vst.msk [vmem:[%s1952_s7 + $0x88] sm:$0xff] %vm268_vm1, %v928_v49  ;;  %v370_v49 = vld [vmem:[%s1952_s7 + $0x128] sm:$0xff] }
  0xa4   : > { %v833_v10 = vpop.f32.mrf.mxu2 }
  0xa5   : > { %v756_v42 = vpop.f32.mrf.mxu0  ;;  %v796_v47 = vpop.f32.mrf.mxu1  ;;  %v944_v12 = vadd.f32 %v833_v10, %v366_v9  ;;  %v372_v9 = vld [vmem:[%s1952_s7 + $0x138] sm:$0xff] }
  0xa6   : > { %v913_v46 = vadd.f32 %v756_v42, %v335_v41  ;;  %v929_v52 = vadd.f32 %v796_v47, %v351_v51  ;;  %v381_v41 = vld [vmem:[%s1952_s7 + $0x180] sm:$0xff]  ;;  %v358_v47 = vld [vmem:[%s1952_s7 + $0xc8] sm:$0xff] }
  0xa7   : > { %1009 = vst.msk [vmem:[%s1952_s7 + $0x108] sm:$0xff] %vm268_vm1, %v944_v12  ;;  %v959_v45 = vadd.f32 %v871_v37, %v381_v41 }
  0xa8   : > { %978 = vst.msk [vmem:[%s1952_s7 + $0x10] sm:$0xff] %vm268_vm1, %v913_v46 }
  0xa9   : > { %994 = vst.msk [vmem:[%s1952_s7 + $0x90] sm:$0xff] %vm268_vm1, %v929_v52 }
  0xaa   : > { %1024 = vst.msk [vmem:[%s1952_s7 + $0x180] sm:$0xff] %vm268_vm1, %v959_v45 }
  0xac   : > { %v836_v18 = vpop.f32.mrf.mxu2 }
  0xad   : > { %v758_v53 = vpop.f32.mrf.mxu0  ;;  %v798_v56 = vpop.f32.mrf.mxu1  ;;  %v945_v23 = vadd.f32 %v836_v18, %v367_v21  ;;  %v1043_v18 = vld [vmem:[%s1952_s7] sm:$0xff] }
  0xae   : > { %v914_v54 = vadd.f32 %v758_v53, %v336_v50  ;;  %v930_v57 = vadd.f32 %v798_v56, %v352_v55  ;;  %v382_v53 = vld [vmem:[%s1952_s7 + $0x188] sm:$0xff]  ;;  %v343_v56 = vld [vmem:[%s1952_s7 + $0x50] sm:$0xff] }
  0xaf   : > { %1010 = vst.msk [vmem:[%s1952_s7 + $0x110] sm:$0xff] %vm268_vm1, %v945_v23 }
  0xb0   : > { %979 = vst.msk [vmem:[%s1952_s7 + $0x18] sm:$0xff] %vm268_vm1, %v914_v54  ;;  %v873_v54 = vpop.f32.mrf.mxu3 }
  0xb1   : > { %995 = vst.msk [vmem:[%s1952_s7 + $0x98] sm:$0xff] %vm268_vm1, %v930_v57  ;;  %v960_v55 = vadd.f32 %v873_v54, %v382_v53  ;;  %v373_v53 = vld [vmem:[%s1952_s7 + $0x140] sm:$0xff] }
  0xb3   : > { %1025 = vst.msk [vmem:[%s1952_s7 + $0x188] sm:$0xff] %vm268_vm1, %v960_v55 }
  0xb4   : > { %v838_v29 = vpop.f32.mrf.mxu2 }
  0xb5   : > { %v761_v60 = vpop.f32.mrf.mxu0  ;;  %v801_v62 = vpop.f32.mrf.mxu1  ;;  %v946_v31 = vadd.f32 %v838_v29, %v368_v28 }
  0xb6   : > { %v915_v61 = vadd.f32 %v761_v60, %v337_v59  ;;  %v931_v3 = vadd.f32 %v801_v62, %v353_v1  ;;  %v344_v62 = vld [vmem:[%s1952_s7 + $0x58] sm:$0xff] }
  0xb7   : > { %1011 = vst.msk [vmem:[%s1952_s7 + $0x118] sm:$0xff] %vm268_vm1, %v946_v31  ;;  %v1046_v23 = vld [vmem:[%s1952_s7 + $0x18] sm:$0xff] }
  0xb8   : > { %980 = vst.msk [vmem:[%s1952_s7 + $0x20] sm:$0xff] %vm268_vm1, %v915_v61  ;;  %v876_v61 = vpop.f32.mrf.mxu3 }
  0xb9   : > { %996 = vst.msk [vmem:[%s1952_s7 + $0xa0] sm:$0xff] %vm268_vm1, %v931_v3 }
  0xbc   : > { %v841_v36 = vpop.f32.mrf.mxu2 }
  0xbd   : > { %v763_v5 = vpop.f32.mrf.mxu0  ;;  %v803_v8 = vpop.f32.mrf.mxu1  ;;  %v947_v43 = vadd.f32 %v841_v36, %v369_v40 }
  0xbe   : > { %v916_v6 = vadd.f32 %v763_v5, %v338_v0  ;;  %v932_v11 = vadd.f32 %v803_v8, %v354_v7  ;;  %v371_v0 = vld [vmem:[%s1952_s7 + $0x130] sm:$0xff]  ;;  %v961_v5 = vadd.f32 %v876_v61, %v383_v2  ;;  %v360_v7 = vld [vmem:[%s1952_s7 + $0xd8] sm:$0xff]  ;;  %v362_v61 = vld [vmem:[%s1952_s7 + $0xe8] sm:$0xff] }
  0xbf   : > { %1012 = vst.msk [vmem:[%s1952_s7 + $0x120] sm:$0xff] %vm268_vm1, %v947_v43  ;;  %v1047_v29 = vld [vmem:[%s1952_s7 + $0x20] sm:$0xff] }
  0xc0   : > { %981 = vst.msk [vmem:[%s1952_s7 + $0x28] sm:$0xff] %vm268_vm1, %v916_v6 }
  0xc1   : > { %997 = vst.msk [vmem:[%s1952_s7 + $0xa8] sm:$0xff] %vm268_vm1, %v932_v11 }
  0xc2   : > { %1026 = vst.msk [vmem:[%s1952_s7 + $0x190] sm:$0xff] %vm268_vm1, %v961_v5  ;;  %v386_v5 = vld [vmem:[%s1952_s7 + $0x1a8] sm:$0xff] }
  0xc4   : > { %v843_v50 = vpop.f32.mrf.mxu2 }
  0xc5   : > { %v766_v15 = vpop.f32.mrf.mxu0  ;;  %v806_v17 = vpop.f32.mrf.mxu1  ;;  %v948_v52 = vadd.f32 %v843_v50, %v370_v49  ;;  %v1114_v50 = vsel %vm268_vm1, %v1047_v29, 0.0 }
  0xc6   : > { %v917_v16 = vadd.f32 %v766_v15, %v339_v14  ;;  %v933_v22 = vadd.f32 %v806_v17, %v355_v20  ;;  %v878_v14 = vpop.f32.mrf.mxu3  ;;  %v345_v17 = vld [vmem:[%s1952_s7 + $0x60] sm:$0xff] }
  0xc7   : > { %1013 = vst.msk [vmem:[%s1952_s7 + $0x128] sm:$0xff] %vm268_vm1, %v948_v52  ;;  %v962_v15 = vadd.f32 %v878_v14, %v384_v13  ;;  %v361_v52 = vld [vmem:[%s1952_s7 + $0xe0] sm:$0xff]  ;;  %v347_v13 = vld [vmem:[%s1952_s7 + $0x70] sm:$0xff] }
  0xc8   : > { %982 = vst.msk [vmem:[%s1952_s7 + $0x30] sm:$0xff] %vm268_vm1, %v917_v16  ;;  %v1044_v16 = vld [vmem:[%s1952_s7 + $0x8] sm:$0xff] }
  0xc9   : > { %998 = vst.msk [vmem:[%s1952_s7 + $0xb0] sm:$0xff] %vm268_vm1, %v933_v22  ;;  %v1243_v21 = vmul.f32 %v1044_v16, %v1044_v16 }
  0xca   : > { %1027 = vst.msk [vmem:[%s1952_s7 + $0x198] sm:$0xff] %vm268_vm1, %v962_v15 }
  0xcb   : > { %v1307_v31 = vsel %vm268_vm1, %v1243_v21, 0.0 }
  0xcc   : > { %v846_v60 = vpop.f32.mrf.mxu2 }
  0xcd   : > { %v768_v24 = vpop.f32.mrf.mxu0  ;;  %v808_v27 = vpop.f32.mrf.mxu1  ;;  %v949_v4 = vadd.f32 %v846_v60, %v371_v0  ;;  %v385_v60 = vld [vmem:[%s1952_s7 + $0x1a0] sm:$0xff] }
  0xce   : > { %v918_v25 = vadd.f32 %v768_v24, %v340_v19  ;;  %v934_v30 = vadd.f32 %v808_v27, %v356_v26  ;;  %v1045_v19 = vld [vmem:[%s1952_s7 + $0x10] sm:$0xff]  ;;  %v1242_v26 = vmul.f32 %v1043_v18, %v1043_v18  ;;  %v881_v28 = vpop.f32.mrf.mxu3 }
  0xcf   : > { %1014 = vst.msk [vmem:[%s1952_s7 + $0x130] sm:$0xff] %vm268_vm1, %v949_v4  ;;  %v1244_v27 = vmul.f32 %v1045_v19, %v1045_v19  ;;  %v1110_v37 = vsel %vm268_vm1, %v1045_v19, 0.0 }
  0xd0   : > { %983 = vst.msk [vmem:[%s1952_s7 + $0x38] sm:$0xff] %vm268_vm1, %v918_v25  ;;  %v1306_v36 = vsel %vm268_vm1, %v1242_v26, 0.0 }
  0xd1   : > { %999 = vst.msk [vmem:[%s1952_s7 + $0xb8] sm:$0xff] %vm268_vm1, %v934_v30  ;;  %v1108_v30 = vsel %vm268_vm1, %v1044_v16, 0.0  ;;  %v1308_v41 = vadd.f32 %v1307_v31, %v1306_v36 }
  0xd4   : > { %v848_v10 = vpop.f32.mrf.mxu2 }
  0xd5   : > { %v771_v33 = vpop.f32.mrf.mxu0  ;;  %v811_v35 = vpop.f32.mrf.mxu1  ;;  %v950_v12 = vadd.f32 %v848_v10, %v372_v9 }
  0xd6   : > { %v919_v34 = vadd.f32 %v771_v33, %v341_v32  ;;  %v935_v42 = vadd.f32 %v811_v35, %v357_v39  ;;  %v1245_v32 = vmul.f32 %v1046_v23, %v1046_v23  ;;  %v1107_v33 = vsel %vm268_vm1, %v1043_v18, 0.0  ;;  %v346_v35 = vld [vmem:[%s1952_s7 + $0x68] sm:$0xff] }
  0xd7   : > { %1015 = vst.msk [vmem:[%s1952_s7 + $0x138] sm:$0xff] %vm268_vm1, %v950_v12  ;;  %v1246_v39 = vmul.f32 %v1047_v29, %v1047_v29  ;;  %v1109_v40 = vadd.f32 %v1108_v30, %v1107_v33 }
  0xd8   : > { %984 = vst.msk [vmem:[%s1952_s7 + $0x40] sm:$0xff] %vm268_vm1, %v919_v34  ;;  %v1048_v34 = vld [vmem:[%s1952_s7 + $0x28] sm:$0xff]  ;;  %v1311_v45 = vsel %vm268_vm1, %v1245_v32, 0.0 }
  0xd9   : > { %1000 = vst.msk [vmem:[%s1952_s7 + $0xc0] sm:$0xff] %vm268_vm1, %v935_v42  ;;  %v1049_v42 = vld [vmem:[%s1952_s7 + $0x30] sm:$0xff] }
  0xda   : > { %v1118_v15 = vsel %vm268_vm1, %v1049_v42, 0.0 }
  0xdc   : > { %v851_v25 = vpop.f32.mrf.mxu2 }
  0xdd   : > { %v773_v44 = vpop.f32.mrf.mxu0  ;;  %v813_v48 = vpop.f32.mrf.mxu1 }
  0xde   : > { %v920_v46 = vadd.f32 %v773_v44, %v342_v38  ;;  %v936_v51 = vadd.f32 %v813_v48, %v358_v47  ;;  %v1309_v38 = vsel %vm268_vm1, %v1244_v27, 0.0  ;;  %v1112_v44 = vsel %vm268_vm1, %v1046_v23, 0.0 }
  0xdf   : > { %v1111_v48 = vadd.f32 %v1110_v37, %v1109_v40  ;;  %v1310_v49 = vadd.f32 %v1309_v38, %v1308_v41  ;;  %v1051_v2 = vld [vmem:[%s1952_s7 + $0x40] sm:$0xff] }
  0xe0   : > { %985 = vst.msk [vmem:[%s1952_s7 + $0x48] sm:$0xff] %vm268_vm1, %v920_v46  ;;  %v1247_v46 = vmul.f32 %v1048_v34, %v1048_v34  ;;  %v1122_v30 = vsel %vm268_vm1, %v1051_v2, 0.0 }
  0xe1   : > { %1001 = vst.msk [vmem:[%s1952_s7 + $0xc8] sm:$0xff] %vm268_vm1, %v936_v51  ;;  %v1050_v51 = vld [vmem:[%s1952_s7 + $0x38] sm:$0xff]  ;;  %v1113_v0 = vadd.f32 %v1112_v44, %v1111_v48 }
  0xe3   : > { %v1115_v10 = vadd.f32 %v1114_v50, %v1113_v0  ;;  %v387_v0 = vld [vmem:[%s1952_s7 + $0x1b0] sm:$0xff] }
  0xe4   : > { %v853_v55 = vpop.f32.mrf.mxu2 }
  0xe5   : > { %v776_v57 = vpop.f32.mrf.mxu0  ;;  %v816_v59 = vpop.f32.mrf.mxu1 }
  0xe6   : > { %v921_v58 = vadd.f32 %v776_v57, %v343_v56  ;;  %v937_v1 = vadd.f32 %v816_v59, %v359_v63  ;;  %v1313_v56 = vsel %vm268_vm1, %v1246_v39, 0.0  ;;  %v1248_v57 = vmul.f32 %v1049_v42, %v1049_v42  ;;  %v883_v63 = vpop.f32.mrf.mxu3  ;;  %v348_v42 = vld [vmem:[%s1952_s7 + $0x78] sm:$0xff] }
  0xe7   : > { %v951_v59 = vadd.f32 %v851_v25, %v373_v53  ;;  %v1052_v12 = vld [vmem:[%s1952_s7 + $0x48] sm:$0xff]  ;;  %v964_v14 = vadd.f32 %v883_v63, %v386_v5 }
  0xe8   : > { %986 = vst.msk [vmem:[%s1952_s7 + $0x50] sm:$0xff] %vm268_vm1, %v921_v58  ;;  %v1317_v16 = vsel %vm268_vm1, %v1248_v57, 0.0  ;;  %v1124_v37 = vsel %vm268_vm1, %v1052_v12, 0.0  ;;  %v375_v57 = vld [vmem:[%s1952_s7 + $0x150] sm:$0xff] }
  0xe9   : > { %1002 = vst.msk [vmem:[%s1952_s7 + $0xd0] sm:$0xff] %vm268_vm1, %v937_v1  ;;  %v1312_v1 = vadd.f32 %v1311_v45, %v1310_v49 }
  0xea   : > { %1016 = vst.msk [vmem:[%s1952_s7 + $0x140] sm:$0xff] %vm268_vm1, %v951_v59 }
  0xeb   : > { %1029 = vst.msk [vmem:[%s1952_s7 + $0x1a8] sm:$0xff] %vm268_vm1, %v964_v14 }
  0xec   : > { %v856_v29 = vpop.f32.mrf.mxu2 }
  0xed   : > { %v778_v3 = vpop.f32.mrf.mxu0  ;;  %v818_v8 = vpop.f32.mrf.mxu1 }
  0xee   : > { %v922_v6 = vadd.f32 %v778_v3, %v344_v62  ;;  %v938_v11 = vadd.f32 %v818_v8, %v360_v7  ;;  %v374_v62 = vld [vmem:[%s1952_s7 + $0x148] sm:$0xff]  ;;  %v963_v3 = vadd.f32 %v881_v28, %v385_v60  ;;  %v1315_v7 = vsel %vm268_vm1, %v1247_v46, 0.0  ;;  %v886_v33 = vpop.f32.mrf.mxu3 }
  0xef   : > { %v1249_v8 = vmul.f32 %v1050_v51, %v1050_v51  ;;  %v952_v9 = vadd.f32 %v853_v55, %v374_v62 }
  0xf0   : > { %987 = vst.msk [vmem:[%s1952_s7 + $0x58] sm:$0xff] %vm268_vm1, %v922_v6  ;;  %v1116_v6 = vsel %vm268_vm1, %v1048_v34, 0.0 }
  0xf1   : > { %1003 = vst.msk [vmem:[%s1952_s7 + $0xd8] sm:$0xff] %vm268_vm1, %v938_v11  ;;  %v1314_v11 = vadd.f32 %v1313_v56, %v1312_v1  ;;  %v1117_v18 = vadd.f32 %v1116_v6, %v1115_v10  ;;  %v1319_v23 = vsel %vm268_vm1, %v1249_v8, 0.0  ;;  %v363_v56 = vld [vmem:[%s1952_s7 + $0xf0] sm:$0xff]  ;;  %v364_v1 = vld [vmem:[%s1952_s7 + $0xf8] sm:$0xff]  ;;  %v953_v6 = vadd.f32 %v856_v29, %v375_v57 }
  0xf2   : > { %1028 = vst.msk [vmem:[%s1952_s7 + $0x1a0] sm:$0xff] %vm268_vm1, %v963_v3  ;;  %v388_v8 = vld [vmem:[%s1952_s7 + $0x1b8] sm:$0xff] }
  0xf3   : > { %v1316_v19 = vadd.f32 %v1315_v7, %v1314_v11  ;;  %1017 = vst.msk [vmem:[%s1952_s7 + $0x148] sm:$0xff] %vm268_vm1, %v952_v9  ;;  %v1119_v26 = vadd.f32 %v1118_v15, %v1117_v18  ;;  %v965_v7 = vadd.f32 %v886_v33, %v387_v0  ;;  %v1059_v18 = vld [vmem:[%s1952_s7 + $0x80] sm:$0xff] }
  0xf4   : > { %v858_v59 = vpop.f32.mrf.mxu2  ;;  %1018 = vst.msk [vmem:[%s1952_s7 + $0x150] sm:$0xff] %vm268_vm1, %v953_v6 }
  0xf5   : > { %v781_v20 = vpop.f32.mrf.mxu0  ;;  %v821_v24 = vpop.f32.mrf.mxu1  ;;  %v1318_v27 = vadd.f32 %v1317_v16, %v1316_v19  ;;  %1030 = vst.msk [vmem:[%s1952_s7 + $0x1b0] sm:$0xff] %vm268_vm1, %v965_v7  ;;  %v1066_v7 = vld [vmem:[%s1952_s7 + $0xb8] sm:$0xff] }
  0xf6   : > { %v923_v22 = vadd.f32 %v781_v20, %v345_v17  ;;  %v939_v58 = vadd.f32 %v821_v24, %v361_v52  ;;  %v1250_v17 = vmul.f32 %v1051_v2, %v1051_v2  ;;  %v1053_v20 = vld [vmem:[%s1952_s7 + $0x50] sm:$0xff]  ;;  %v1251_v24 = vmul.f32 %v1052_v12, %v1052_v12  ;;  %v376_v2 = vld [vmem:[%s1952_s7 + $0x158] sm:$0xff]  ;;  %v888_v3 = vpop.f32.mrf.mxu3 }
  0xf7   : > { %v1252_v32 = vmul.f32 %v1053_v20, %v1053_v20  ;;  %v1054_v36 = vld [vmem:[%s1952_s7 + $0x58] sm:$0xff]  ;;  %v954_v12 = vadd.f32 %v858_v59, %v376_v2  ;;  %v966_v15 = vadd.f32 %v888_v3, %v388_v8 }
  0xf8   : > { %988 = vst.msk [vmem:[%s1952_s7 + $0x60] sm:$0xff] %vm268_vm1, %v923_v22  ;;  %v1120_v22 = vsel %vm268_vm1, %v1050_v51, 0.0  ;;  %v1321_v31 = vsel %vm268_vm1, %v1250_v17, 0.0  ;;  %v1323_v38 = vsel %vm268_vm1, %v1251_v24, 0.0  ;;  %v1253_v45 = vmul.f32 %v1054_v36, %v1054_v36 }
  0xf9   : > { %1004 = vst.msk [vmem:[%s1952_s7 + $0xe0] sm:$0xff] %vm268_vm1, %v939_v58  ;;  %v1121_v34 = vadd.f32 %v1120_v22, %v1119_v26  ;;  %v1325_v44 = vsel %vm268_vm1, %v1252_v32, 0.0  ;;  %v1128_v51 = vsel %vm268_vm1, %v1054_v36, 0.0  ;;  %v1060_v22 = vld [vmem:[%s1952_s7 + $0x88] sm:$0xff] }
  0xfa   : > { %v1327_v60 = vsel %vm268_vm1, %v1253_v45, 0.0  ;;  %1019 = vst.msk [vmem:[%s1952_s7 + $0x158] sm:$0xff] %vm268_vm1, %v954_v12 }
  0xfb   : > { %v1123_v40 = vadd.f32 %v1122_v30, %v1121_v34  ;;  %1031 = vst.msk [vmem:[%s1952_s7 + $0x1b8] sm:$0xff] %vm268_vm1, %v966_v15  ;;  %v1138_v34 = vsel %vm268_vm1, %v1059_v18, 0.0 }
  0xfc   : > { %v861_v26 = vpop.f32.mrf.mxu2 }
  0xfd   : > { %v783_v43 = vpop.f32.mrf.mxu0  ;;  %v823_v54 = vpop.f32.mrf.mxu1  ;;  %v1125_v46 = vadd.f32 %v1124_v37, %v1123_v40 }
  0xfe   : > { %v924_v47 = vadd.f32 %v783_v43, %v346_v35  ;;  %v940_v4 = vadd.f32 %v823_v54, %v362_v61  ;;  %v1320_v35 = vadd.f32 %v1319_v23, %v1318_v27  ;;  %v1126_v43 = vsel %vm268_vm1, %v1053_v20, 0.0 }
  0xff   : > { %v1055_v39 = vld [vmem:[%s1952_s7 + $0x60] sm:$0xff]  ;;  %v1127_v53 = vadd.f32 %v1126_v43, %v1125_v46  ;;  %v1258_v27 = vmul.f32 %v1059_v18, %v1059_v18  ;;  %v1265_v18 = vmul.f32 %v1066_v7, %v1066_v7 }
 0x100   : > { %989 = vst.msk [vmem:[%s1952_s7 + $0x68] sm:$0xff] %vm268_vm1, %v924_v47  ;;  %v1322_v41 = vadd.f32 %v1321_v31, %v1320_v35  ;;  %v1254_v48 = vmul.f32 %v1055_v39, %v1055_v39  ;;  %v1130_v61 = vsel %vm268_vm1, %v1055_v39, 0.0  ;;  %v891_v31 = vpop.f32.mrf.mxu3  ;;  %v1259_v35 = vmul.f32 %v1060_v22, %v1060_v22  ;;  %v1063_v43 = vld [vmem:[%s1952_s7 + $0xa0] sm:$0xff] }
 0x101   : > { %1005 = vst.msk [vmem:[%s1952_s7 + $0xe8] sm:$0xff] %vm268_vm1, %v940_v4  ;;  %v1129_v4 = vadd.f32 %v1128_v51, %v1127_v53  ;;  %v377_v53 = vld [vmem:[%s1952_s7 + $0x160] sm:$0xff] }
 0x102   : > { %v1324_v47 = vadd.f32 %v1323_v38, %v1322_v41  ;;  %v1329_v5 = vsel %vm268_vm1, %v1254_v48, 0.0  ;;  %v1062_v38 = vld [vmem:[%s1952_s7 + $0x98] sm:$0xff]  ;;  %v1337_v41 = vsel %vm268_vm1, %v1258_v27, 0.0  ;;  %v1339_v46 = vsel %vm268_vm1, %v1259_v35, 0.0 }
 0x103   : > { %v1131_v14 = vadd.f32 %v1130_v61, %v1129_v4  ;;  %v1261_v48 = vmul.f32 %v1062_v38, %v1062_v38  ;;  %v1144_v57 = vsel %vm268_vm1, %v1062_v38, 0.0  ;;  %v955_v59 = vadd.f32 %v861_v26, %v377_v53  ;;  %v390_v61 = vld [vmem:[%s1952_s7 + $0x1c8] sm:$0xff]  ;;  %v1069_v26 = vld [vmem:[%s1952_s7 + $0xd0] sm:$0xff] }
 0x104   : > { %v1326_v54 = vadd.f32 %v1325_v44, %v1324_v47  ;;  %v1146_v4 = vsel %vm268_vm1, %v1063_v43, 0.0 }
 0x105   : > { %v786_v21 = vpop.f32.mrf.mxu0  ;;  %v826_v28 = vpop.f32.mrf.mxu1  ;;  %v1343_v3 = vsel %vm268_vm1, %v1261_v48, 0.0  ;;  %1020 = vst.msk [vmem:[%s1952_s7 + $0x160] sm:$0xff] %vm268_vm1, %v955_v59 }
 0x106   : > { %v925_v25 = vadd.f32 %v786_v21, %v347_v13  ;;  %v941_v63 = vadd.f32 %v826_v28, %v363_v56  ;;  %v1328_v13 = vadd.f32 %v1327_v60, %v1326_v54  ;;  %v1061_v28 = vld [vmem:[%s1952_s7 + $0x90] sm:$0xff]  ;;  %v389_v54 = vld [vmem:[%s1952_s7 + $0x1c0] sm:$0xff]  ;;  %v863_v56 = vpop.f32.mrf.mxu2 }
 0x107   : > { %v1056_v49 = vld [vmem:[%s1952_s7 + $0x68] sm:$0xff]  ;;  %v1260_v37 = vmul.f32 %v1061_v28, %v1061_v28  ;;  %v1142_v47 = vsel %vm268_vm1, %v1061_v28, 0.0  ;;  %v967_v60 = vadd.f32 %v891_v31, %v389_v54 }
 0x108   : > { %990 = vst.msk [vmem:[%s1952_s7 + $0x70] sm:$0xff] %vm268_vm1, %v925_v25  ;;  %v1255_v62 = vmul.f32 %v1056_v49, %v1056_v49  ;;  %v1132_v9 = vsel %vm268_vm1, %v1056_v49, 0.0  ;;  %v1330_v19 = vadd.f32 %v1329_v5, %v1328_v13  ;;  %v1064_v49 = vld [vmem:[%s1952_s7 + $0xa8] sm:$0xff]  ;;  %v1067_v13 = vld [vmem:[%s1952_s7 + $0xc0] sm:$0xff] }
 0x109   : > { %1006 = vst.msk [vmem:[%s1952_s7 + $0xf0] sm:$0xff] %vm268_vm1, %v941_v63  ;;  %v1133_v20 = vadd.f32 %v1132_v9, %v1131_v14  ;;  %v1065_v63 = vld [vmem:[%s1952_s7 + $0xb0] sm:$0xff]  ;;  %v1263_v5 = vmul.f32 %v1064_v49, %v1064_v49  ;;  %v1154_v31 = vsel %vm268_vm1, %v1067_v13, 0.0 }
 0x10a   : > { %v1331_v16 = vsel %vm268_vm1, %v1255_v62, 0.0  ;;  %v893_v62 = vpop.f32.mrf.mxu3  ;;  %1032 = vst.msk [vmem:[%s1952_s7 + $0x1c0] sm:$0xff] %vm268_vm1, %v967_v60  ;;  %v1264_v12 = vmul.f32 %v1065_v63, %v1065_v63 }
 0x10b   : > { %v1332_v23 = vadd.f32 %v1331_v16, %v1330_v19  ;;  %v968_v6 = vadd.f32 %v893_v62, %v390_v61  ;;  %v1347_v16 = vsel %vm268_vm1, %v1263_v5, 0.0  ;;  %v1068_v19 = vld [vmem:[%s1952_s7 + $0xc8] sm:$0xff] }
 0x10c   : > { %v1156_v38 = vsel %vm268_vm1, %v1068_v19, 0.0 }
 0x10d   : > { %v788_v50 = vpop.f32.mrf.mxu0  ;;  %v828_v58 = vpop.f32.mrf.mxu1  ;;  %1033 = vst.msk [vmem:[%s1952_s7 + $0x1c8] sm:$0xff] %vm268_vm1, %v968_v6 }
 0x10e   : > { %v926_v52 = vadd.f32 %v788_v50, %v348_v42  ;;  %v942_v11 = vadd.f32 %v828_v58, %v364_v1  ;;  %v1140_v42 = vsel %vm268_vm1, %v1060_v22, 0.0  ;;  %v1341_v50 = vsel %vm268_vm1, %v1260_v37, 0.0  ;;  %v866_v22 = vpop.f32.mrf.mxu2 }
 0x10f   : > { %v1057_v55 = vld [vmem:[%s1952_s7 + $0x70] sm:$0xff]  ;;  %v1262_v58 = vmul.f32 %v1063_v43, %v1063_v43  ;;  %v1158_v43 = vsel %vm268_vm1, %v1069_v26, 0.0 }
 0x110   : > { %991 = vst.msk [vmem:[%s1952_s7 + $0x78] sm:$0xff] %vm268_vm1, %v926_v52  ;;  %v1256_v10 = vmul.f32 %v1057_v55, %v1057_v55  ;;  %v1134_v17 = vsel %vm268_vm1, %v1057_v55, 0.0  ;;  %v378_v55 = vld [vmem:[%s1952_s7 + $0x168] sm:$0xff]  ;;  %v1073_v62 = vld [vmem:[%s1952_s7 + $0xf0] sm:$0xff] }
 0x111   : > { %1007 = vst.msk [vmem:[%s1952_s7 + $0xf8] sm:$0xff] %vm268_vm1, %v942_v11  ;;  %v1135_v24 = vadd.f32 %v1134_v17, %v1133_v20  ;;  %v956_v2 = vadd.f32 %v863_v56, %v378_v55  ;;  %v1148_v11 = vsel %vm268_vm1, %v1064_v49, 0.0  ;;  %v1150_v17 = vsel %vm268_vm1, %v1065_v63, 0.0 }
 0x112   : > { %v1333_v21 = vsel %vm268_vm1, %v1256_v10, 0.0  ;;  %v1345_v10 = vsel %vm268_vm1, %v1262_v58, 0.0  ;;  %v896_v27 = vpop.f32.mrf.mxu3  ;;  %v392_v58 = vld [vmem:[%s1952_s7 + $0x1d8] sm:$0xff] }
 0x113   : > { %v1334_v32 = vadd.f32 %v1333_v21, %v1332_v23  ;;  %1021 = vst.msk [vmem:[%s1952_s7 + $0x168] sm:$0xff] %vm268_vm1, %v956_v2  ;;  %v1349_v23 = vsel %vm268_vm1, %v1264_v12, 0.0 }
 0x116   : > { %v868_v53 = vpop.f32.mrf.mxu2 }
 0x117   : > { %v1058_v25 = vld [vmem:[%s1952_s7 + $0x78] sm:$0xff] }
 0x118   : > { %v1136_v29 = vsel %vm268_vm1, %v1058_v25, 0.0  ;;  %v1257_v30 = vmul.f32 %v1058_v25, %v1058_v25  ;;  %v1266_v25 = vmul.f32 %v1067_v13, %v1067_v13  ;;  %v1074_v5 = vld [vmem:[%s1952_s7 + $0xf8] sm:$0xff]  ;;  %v1166_v13 = vsel %vm268_vm1, %v1073_v62, 0.0 }
 0x119   : > { %v1137_v33 = vadd.f32 %v1136_v29, %v1135_v24  ;;  %v1152_v24 = vsel %vm268_vm1, %v1066_v7, 0.0 }
 0x11a   : > { %v1335_v36 = vsel %vm268_vm1, %v1257_v30, 0.0  ;;  %v1351_v30 = vsel %vm268_vm1, %v1265_v18, 0.0  ;;  %v1353_v37 = vsel %vm268_vm1, %v1266_v25, 0.0  ;;  %v898_v59 = vpop.f32.mrf.mxu3 }
 0x11b   : > { %v1139_v39 = vadd.f32 %v1138_v34, %v1137_v33  ;;  %v1336_v40 = vadd.f32 %v1335_v36, %v1334_v32  ;;  %v1267_v32 = vmul.f32 %v1068_v19, %v1068_v19  ;;  %v1268_v33 = vmul.f32 %v1069_v26, %v1069_v26  ;;  %v1070_v34 = vld [vmem:[%s1952_s7 + $0xd8] sm:$0xff] }
 0x11c   : > { %v970_v63 = vadd.f32 %v898_v59, %v392_v58 }
 0x11d   : > { %v1141_v44 = vadd.f32 %v1140_v42, %v1139_v39  ;;  %v1338_v45 = vadd.f32 %v1337_v41, %v1336_v40  ;;  %v1071_v39 = vld [vmem:[%s1952_s7 + $0xe0] sm:$0xff]  ;;  %v1355_v42 = vsel %vm268_vm1, %v1267_v32, 0.0 }
 0x11e   : > { %v1270_v54 = vmul.f32 %v1071_v39, %v1071_v39  ;;  %1035 = vst.msk [vmem:[%s1952_s7 + $0x1d8] sm:$0xff] %vm268_vm1, %v970_v63  ;;  %v1083_v63 = vld [vmem:[%s1952_s7 + $0x140] sm:$0xff] }
 0x11f   : > { %v1143_v51 = vadd.f32 %v1142_v47, %v1141_v44  ;;  %v1340_v52 = vadd.f32 %v1339_v46, %v1338_v45  ;;  %v1269_v44 = vmul.f32 %v1070_v34, %v1070_v34  ;;  %v1072_v45 = vld [vmem:[%s1952_s7 + $0xe8] sm:$0xff]  ;;  %v1357_v46 = vsel %vm268_vm1, %v1268_v33, 0.0 }
 0x120   : > { %v1160_v47 = vsel %vm268_vm1, %v1070_v34, 0.0  ;;  %v1271_v2 = vmul.f32 %v1072_v45, %v1072_v45  ;;  %v1361_v6 = vsel %vm268_vm1, %v1270_v54, 0.0  ;;  %v1164_v7 = vsel %vm268_vm1, %v1072_v45, 0.0  ;;  %v1079_v34 = vld [vmem:[%s1952_s7 + $0x120] sm:$0xff] }
 0x121   : > { %v1145_v0 = vadd.f32 %v1144_v57, %v1143_v51  ;;  %v1342_v1 = vadd.f32 %v1341_v50, %v1340_v52  ;;  %v379_v50 = vld [vmem:[%s1952_s7 + $0x170] sm:$0xff]  ;;  %v380_v52 = vld [vmem:[%s1952_s7 + $0x178] sm:$0xff] }
 0x122   : > { %v391_v51 = vld [vmem:[%s1952_s7 + $0x1d0] sm:$0xff]  ;;  %v957_v55 = vadd.f32 %v866_v22, %v379_v50  ;;  %v958_v57 = vadd.f32 %v868_v53, %v380_v52  ;;  %v1363_v12 = vsel %vm268_vm1, %v1271_v2, 0.0 }
 0x123   : > { %v1147_v8 = vadd.f32 %v1146_v4, %v1145_v0  ;;  %v1344_v9 = vadd.f32 %v1343_v3, %v1342_v1  ;;  %v969_v56 = vadd.f32 %v896_v27, %v391_v51  ;;  %v1359_v0 = vsel %vm268_vm1, %v1269_v44, 0.0  ;;  %v1077_v22 = vld [vmem:[%s1952_s7 + $0x110] sm:$0xff]  ;;  %v394_v44 = vld [vmem:[%s1952_s7 + $0x1e8] sm:$0xff] }
 0x124   : > { %v1162_v1 = vsel %vm268_vm1, %v1071_v39, 0.0  ;;  %1022 = vst.msk [vmem:[%s1952_s7 + $0x170] sm:$0xff] %vm268_vm1, %v957_v55  ;;  %v1276_v33 = vmul.f32 %v1077_v22, %v1077_v22  ;;  %v1081_v50 = vld [vmem:[%s1952_s7 + $0x130] sm:$0xff]  ;;  %v1178_v55 = vsel %vm268_vm1, %v1079_v34, 0.0 }
 0x125   : > { %v1149_v14 = vadd.f32 %v1148_v11, %v1147_v8  ;;  %v1346_v15 = vadd.f32 %v1345_v10, %v1344_v9  ;;  %1034 = vst.msk [vmem:[%s1952_s7 + $0x1d0] sm:$0xff] %vm268_vm1, %v969_v56  ;;  %v1272_v8 = vmul.f32 %v1073_v62, %v1073_v62  ;;  %v1075_v9 = vld [vmem:[%s1952_s7 + $0x100] sm:$0xff]  ;;  %v1280_v62 = vmul.f32 %v1081_v50, %v1081_v50 }
 0x126   : > { %1023 = vst.msk [vmem:[%s1952_s7 + $0x178] sm:$0xff] %vm268_vm1, %v958_v57  ;;  %v1274_v18 = vmul.f32 %v1075_v9, %v1075_v9  ;;  %v1170_v25 = vsel %vm268_vm1, %v1075_v9, 0.0  ;;  %v1373_v45 = vsel %vm268_vm1, %v1276_v33, 0.0  ;;  %v1082_v57 = vld [vmem:[%s1952_s7 + $0x138] sm:$0xff]  ;;  %v395_v33 = vld [vmem:[%s1952_s7 + $0x1f0] sm:$0xff] }
 0x127   : > { %v1348_v20 = vadd.f32 %v1347_v16, %v1346_v15  ;;  %v1151_v21 = vadd.f32 %v1150_v17, %v1149_v14  ;;  %v1273_v14 = vmul.f32 %v1074_v5, %v1074_v5  ;;  %v1076_v15 = vld [vmem:[%s1952_s7 + $0x108] sm:$0xff]  ;;  %v1365_v19 = vsel %vm268_vm1, %v1272_v8, 0.0 }
 0x128   : > { %v1275_v26 = vmul.f32 %v1076_v15, %v1076_v15  ;;  %v1172_v32 = vsel %vm268_vm1, %v1076_v15, 0.0  ;;  %v1381_v8 = vsel %vm268_vm1, %v1280_v62, 0.0  ;;  %v1184_v9 = vsel %vm268_vm1, %v1082_v57, 0.0 }
 0x129   : > { %v1153_v28 = vadd.f32 %v1152_v24, %v1151_v21  ;;  %v1350_v29 = vadd.f32 %v1349_v23, %v1348_v20  ;;  %v1168_v20 = vsel %vm268_vm1, %v1074_v5, 0.0  ;;  %v901_v21 = vpop.f32.mrf.mxu3  ;;  %v1367_v27 = vsel %vm268_vm1, %v1273_v14, 0.0  ;;  %v1084_v5 = vld [vmem:[%s1952_s7 + $0x148] sm:$0xff] }
 0x12b   : > { %v1155_v35 = vadd.f32 %v1154_v31, %v1153_v28  ;;  %v1352_v36 = vadd.f32 %v1351_v30, %v1350_v29  ;;  %v1078_v28 = vld [vmem:[%s1952_s7 + $0x118] sm:$0xff]  ;;  %v1369_v31 = vsel %vm268_vm1, %v1274_v18, 0.0 }
 0x12c   : > { %v1277_v39 = vmul.f32 %v1078_v28, %v1078_v28  ;;  %v1086_v18 = vld [vmem:[%s1952_s7 + $0x158] sm:$0xff] }
 0x12d   : > { %v1157_v40 = vadd.f32 %v1156_v38, %v1155_v35  ;;  %v1354_v41 = vadd.f32 %v1353_v37, %v1352_v36  ;;  %v1371_v37 = vsel %vm268_vm1, %v1275_v26, 0.0  ;;  %v1174_v38 = vsel %vm268_vm1, %v1077_v22, 0.0  ;;  %v1087_v26 = vld [vmem:[%s1952_s7 + $0x160] sm:$0xff] }
 0x12e   : > { %v1375_v54 = vsel %vm268_vm1, %v1277_v39, 0.0  ;;  %v1188_v22 = vsel %vm268_vm1, %v1084_v5, 0.0 }
 0x12f   : > { %v1159_v48 = vadd.f32 %v1158_v43, %v1157_v40  ;;  %v1356_v49 = vadd.f32 %v1355_v42, %v1354_v41  ;;  %v1080_v40 = vld [vmem:[%s1952_s7 + $0x128] sm:$0xff]  ;;  %v393_v43 = vld [vmem:[%s1952_s7 + $0x1e0] sm:$0xff] }
 0x130   : > { %v1279_v56 = vmul.f32 %v1080_v40, %v1080_v40 }
 0x131   : > { %v1161_v60 = vadd.f32 %v1160_v47, %v1159_v48  ;;  %v1358_v61 = vadd.f32 %v1357_v46, %v1356_v49  ;;  %v1176_v46 = vsel %vm268_vm1, %v1078_v28, 0.0  ;;  %v1278_v47 = vmul.f32 %v1079_v34, %v1079_v34  ;;  %v903_v49 = vpop.f32.mrf.mxu3  ;;  %v396_v34 = vld [vmem:[%s1952_s7 + $0x1f8] sm:$0xff] }
 0x132   : > { %v971_v48 = vadd.f32 %v901_v21, %v393_v43  ;;  %v972_v53 = vadd.f32 %v903_v49, %v394_v44  ;;  %v1379_v2 = vsel %vm268_vm1, %v1279_v56, 0.0  ;;  %v1090_v49 = vld [vmem:[%s1952_s7 + $0x178] sm:$0xff] }
 0x133   : > { %v1163_v3 = vadd.f32 %v1162_v1, %v1161_v60  ;;  %v1360_v4 = vadd.f32 %v1359_v0, %v1358_v61  ;;  %v1377_v60 = vsel %vm268_vm1, %v1278_v47, 0.0  ;;  %v1180_v61 = vsel %vm268_vm1, %v1080_v40, 0.0 }
 0x134   : > { %1036 = vst.msk [vmem:[%s1952_s7 + $0x1e0] sm:$0xff] %vm268_vm1, %v971_v48 }
 0x135   : > { %v1362_v10 = vadd.f32 %v1361_v6, %v1360_v4  ;;  %v1165_v11 = vadd.f32 %v1164_v7, %v1163_v3  ;;  %1037 = vst.msk [vmem:[%s1952_s7 + $0x1e8] sm:$0xff] %vm268_vm1, %v972_v53  ;;  %v1182_v3 = vsel %vm268_vm1, %v1081_v50, 0.0  ;;  %v1281_v4 = vmul.f32 %v1082_v57, %v1082_v57  ;;  %v1091_v53 = vld [vmem:[%s1952_s7 + $0x180] sm:$0xff] }
 0x136   : > { %v1290_v62 = vmul.f32 %v1091_v53, %v1091_v53 }
 0x137   : > { %v1364_v16 = vadd.f32 %v1363_v12, %v1362_v10  ;;  %v1167_v17 = vadd.f32 %v1166_v13, %v1165_v11  ;;  %v1282_v10 = vmul.f32 %v1083_v63, %v1083_v63  ;;  %v1085_v12 = vld [vmem:[%s1952_s7 + $0x150] sm:$0xff]  ;;  %v1383_v15 = vsel %vm268_vm1, %v1281_v4, 0.0 }
 0x138   : > { %v1190_v28 = vsel %vm268_vm1, %v1085_v12, 0.0  ;;  %v1202_v4 = vsel %vm268_vm1, %v1091_v53, 0.0 }
 0x139   : > { %v1366_v23 = vadd.f32 %v1365_v19, %v1364_v16  ;;  %v1169_v24 = vadd.f32 %v1168_v20, %v1167_v17  ;;  %v906_v11 = vpop.f32.mrf.mxu3  ;;  %v1186_v16 = vsel %vm268_vm1, %v1083_v63, 0.0  ;;  %v1283_v17 = vmul.f32 %v1084_v5, %v1084_v5 }
 0x13a   : > { %v1385_v21 = vsel %vm268_vm1, %v1282_v10, 0.0  ;;  %v1401_v10 = vsel %vm268_vm1, %v1290_v62, 0.0 }
 0x13b   : > { %v1171_v29 = vadd.f32 %v1170_v25, %v1169_v24  ;;  %v1368_v30 = vadd.f32 %v1367_v27, %v1366_v23  ;;  %v1284_v23 = vmul.f32 %v1085_v12, %v1085_v12  ;;  %v1387_v27 = vsel %vm268_vm1, %v1283_v17, 0.0 }
 0x13d   : > { %v1173_v35 = vadd.f32 %v1172_v32, %v1171_v29  ;;  %v1370_v36 = vadd.f32 %v1369_v31, %v1368_v30  ;;  %v1285_v29 = vmul.f32 %v1086_v18, %v1086_v18  ;;  %v1088_v32 = vld [vmem:[%s1952_s7 + $0x168] sm:$0xff] }
 0x13f   : > { %v1175_v41 = vadd.f32 %v1174_v38, %v1173_v35  ;;  %v1372_v42 = vadd.f32 %v1371_v37, %v1370_v36  ;;  %v1389_v35 = vsel %vm268_vm1, %v1284_v23, 0.0  ;;  %v1192_v36 = vsel %vm268_vm1, %v1086_v18, 0.0 }
 0x140   : > { %v1286_v37 = vmul.f32 %v1087_v26, %v1087_v26  ;;  %v973_v38 = vadd.f32 %v906_v11, %v395_v33  ;;  %v1391_v44 = vsel %vm268_vm1, %v1285_v29, 0.0 }
 0x141   : > { %v1177_v51 = vadd.f32 %v1176_v46, %v1175_v41  ;;  %v1374_v52 = vadd.f32 %v1373_v45, %v1372_v42  ;;  %v908_v39 = vpop.f32.mrf.mxu3  ;;  %v1089_v42 = vld [vmem:[%s1952_s7 + $0x170] sm:$0xff]  ;;  %v1194_v45 = vsel %vm268_vm1, %v1087_v26, 0.0  ;;  %v1287_v46 = vmul.f32 %v1088_v32, %v1088_v32 }
 0x142   : > { %v974_v43 = vadd.f32 %v908_v39, %v396_v34  ;;  %1038 = vst.msk [vmem:[%s1952_s7 + $0x1f0] sm:$0xff] %vm268_vm1, %v973_v38  ;;  %v1393_v50 = vsel %vm268_vm1, %v1286_v37, 0.0  ;;  %v1198_v57 = vsel %vm268_vm1, %v1089_v42, 0.0  ;;  %v1099_v37 = vld [vmem:[%s1952_s7 + $0x1c0] sm:$0xff] }
 0x143   : > { %v1179_v58 = vadd.f32 %v1178_v55, %v1177_v51  ;;  %v1376_v59 = vadd.f32 %v1375_v54, %v1374_v52  ;;  %v1196_v51 = vsel %vm268_vm1, %v1088_v32, 0.0  ;;  %v1288_v52 = vmul.f32 %v1089_v42, %v1089_v42 }
 0x144   : > { %1039 = vst.msk [vmem:[%s1952_s7 + $0x1f8] sm:$0xff] %vm268_vm1, %v974_v43  ;;  %v1395_v56 = vsel %vm268_vm1, %v1287_v46, 0.0  ;;  %v1100_v43 = vld [vmem:[%s1952_s7 + $0x1c8] sm:$0xff]  ;;  %v1218_v53 = vsel %vm268_vm1, %v1099_v37, 0.0 }
 0x145   : > { %v1378_v0 = vadd.f32 %v1377_v60, %v1376_v59  ;;  %v1181_v1 = vadd.f32 %v1180_v61, %v1179_v58  ;;  %v1289_v58 = vmul.f32 %v1090_v49, %v1090_v49  ;;  %v1092_v59 = vld [vmem:[%s1952_s7 + $0x188] sm:$0xff]  ;;  %v1397_v63 = vsel %vm268_vm1, %v1288_v52, 0.0 }
 0x146   : > { %v1291_v5 = vmul.f32 %v1092_v59, %v1092_v59  ;;  %v1204_v11 = vsel %vm268_vm1, %v1092_v59, 0.0  ;;  %v1220_v59 = vsel %vm268_vm1, %v1100_v43, 0.0 }
 0x147   : > { %v1183_v6 = vadd.f32 %v1182_v3, %v1181_v1  ;;  %v1380_v7 = vadd.f32 %v1379_v2, %v1378_v0  ;;  %v1200_v0 = vsel %vm268_vm1, %v1090_v49, 0.0  ;;  %v1093_v1 = vld [vmem:[%s1952_s7 + $0x190] sm:$0xff] }
 0x148   : > { %v1292_v12 = vmul.f32 %v1093_v1, %v1093_v1  ;;  %v1206_v17 = vsel %vm268_vm1, %v1093_v1, 0.0  ;;  %v1101_v49 = vld [vmem:[%s1952_s7 + $0x1d0] sm:$0xff] }
 0x149   : > { %v1185_v13 = vadd.f32 %v1184_v9, %v1183_v6  ;;  %v1382_v14 = vadd.f32 %v1381_v8, %v1380_v7  ;;  %v1399_v6 = vsel %vm268_vm1, %v1289_v58, 0.0  ;;  %v1094_v7 = vld [vmem:[%s1952_s7 + $0x198] sm:$0xff]  ;;  %v1222_v1 = vsel %vm268_vm1, %v1101_v49, 0.0 }
 0x14a   : > { %v1293_v18 = vmul.f32 %v1094_v7, %v1094_v7  ;;  %v1208_v23 = vsel %vm268_vm1, %v1094_v7, 0.0 }
 0x14b   : > { %v1187_v19 = vadd.f32 %v1186_v16, %v1185_v13  ;;  %v1384_v20 = vadd.f32 %v1383_v15, %v1382_v14  ;;  %v1095_v13 = vld [vmem:[%s1952_s7 + $0x1a0] sm:$0xff]  ;;  %v1403_v16 = vsel %vm268_vm1, %v1291_v5, 0.0  ;;  %v1104_v5 = vld [vmem:[%s1952_s7 + $0x1e8] sm:$0xff] }
 0x14c   : > { %v1210_v29 = vsel %vm268_vm1, %v1095_v13, 0.0 }
 0x14d   : > { %v1189_v24 = vadd.f32 %v1188_v22, %v1187_v19  ;;  %v1386_v25 = vadd.f32 %v1385_v21, %v1384_v20  ;;  %v1096_v19 = vld [vmem:[%s1952_s7 + $0x1a8] sm:$0xff]  ;;  %v1405_v22 = vsel %vm268_vm1, %v1292_v12, 0.0 }
 0x14f   : > { %v1191_v30 = vadd.f32 %v1190_v28, %v1189_v24  ;;  %v1388_v31 = vadd.f32 %v1387_v27, %v1386_v25  ;;  %v1294_v24 = vmul.f32 %v1095_v13, %v1095_v13  ;;  %v1097_v25 = vld [vmem:[%s1952_s7 + $0x1b0] sm:$0xff]  ;;  %v1407_v28 = vsel %vm268_vm1, %v1293_v18, 0.0 }
 0x151   : > { %v1193_v40 = vadd.f32 %v1192_v36, %v1191_v30  ;;  %v1390_v41 = vadd.f32 %v1389_v35, %v1388_v31  ;;  %v1295_v30 = vmul.f32 %v1096_v19, %v1096_v19  ;;  %v1098_v31 = vld [vmem:[%s1952_s7 + $0x1b8] sm:$0xff]  ;;  %v1409_v34 = vsel %vm268_vm1, %v1294_v24, 0.0 }
 0x152   : > { %v1212_v35 = vsel %vm268_vm1, %v1096_v19, 0.0  ;;  %v1296_v36 = vmul.f32 %v1097_v25, %v1097_v25  ;;  %v1297_v42 = vmul.f32 %v1098_v31, %v1098_v31  ;;  %v1228_v19 = vsel %vm268_vm1, %v1104_v5, 0.0 }
 0x153   : > { %v1392_v47 = vadd.f32 %v1391_v44, %v1390_v41  ;;  %v1195_v48 = vadd.f32 %v1194_v45, %v1193_v40  ;;  %v1411_v40 = vsel %vm268_vm1, %v1295_v30, 0.0  ;;  %v1214_v41 = vsel %vm268_vm1, %v1097_v25, 0.0 }
 0x154   : > { %v1413_v46 = vsel %vm268_vm1, %v1296_v36, 0.0  ;;  %v1415_v52 = vsel %vm268_vm1, %v1297_v42, 0.0 }
 0x155   : > { %v1394_v54 = vadd.f32 %v1393_v50, %v1392_v47  ;;  %v1197_v55 = vadd.f32 %v1196_v51, %v1195_v48  ;;  %v1216_v47 = vsel %vm268_vm1, %v1098_v31, 0.0  ;;  %v1298_v48 = vmul.f32 %v1099_v37, %v1099_v37 }
 0x157   : > { %v1396_v60 = vadd.f32 %v1395_v56, %v1394_v54  ;;  %v1199_v61 = vadd.f32 %v1198_v57, %v1197_v55  ;;  %v1299_v54 = vmul.f32 %v1100_v43, %v1100_v43  ;;  %v1102_v55 = vld [vmem:[%s1952_s7 + $0x1d8] sm:$0xff]  ;;  %v1417_v58 = vsel %vm268_vm1, %v1298_v48, 0.0 }
 0x158   : > { %v1224_v7 = vsel %vm268_vm1, %v1102_v55, 0.0 }
 0x159   : > { %v1398_v2 = vadd.f32 %v1397_v63, %v1396_v60  ;;  %v1201_v3 = vadd.f32 %v1200_v0, %v1199_v61  ;;  %v1300_v60 = vmul.f32 %v1101_v49, %v1101_v49  ;;  %v1103_v63 = vld [vmem:[%s1952_s7 + $0x1e0] sm:$0xff]  ;;  %v1419_v0 = vsel %vm268_vm1, %v1299_v54, 0.0 }
 0x15a   : > { %v1226_v13 = vsel %vm268_vm1, %v1103_v63, 0.0 }
 0x15b   : > { %v1203_v8 = vadd.f32 %v1202_v4, %v1201_v3  ;;  %v1400_v9 = vadd.f32 %v1399_v6, %v1398_v2  ;;  %v1301_v2 = vmul.f32 %v1102_v55, %v1102_v55  ;;  %v1421_v6 = vsel %vm268_vm1, %v1300_v60, 0.0 }
 0x15d   : > { %v1205_v14 = vadd.f32 %v1204_v11, %v1203_v8  ;;  %v1402_v15 = vadd.f32 %v1401_v10, %v1400_v9  ;;  %v1302_v8 = vmul.f32 %v1103_v63, %v1103_v63  ;;  %v1105_v11 = vld [vmem:[%s1952_s7 + $0x1f0] sm:$0xff]  ;;  %v1423_v12 = vsel %vm268_vm1, %v1301_v2, 0.0 }
 0x15e   : > { %v1230_v24 = vsel %vm268_vm1, %v1105_v11, 0.0 }
 0x15f   : > { %v1207_v20 = vadd.f32 %v1206_v17, %v1205_v14  ;;  %v1404_v21 = vadd.f32 %v1403_v16, %v1402_v15  ;;  %v1303_v14 = vmul.f32 %v1104_v5, %v1104_v5  ;;  %v1106_v17 = vld [vmem:[%s1952_s7 + $0x1f8] sm:$0xff]  ;;  %v1425_v18 = vsel %vm268_vm1, %v1302_v8, 0.0 }
 0x160   : > { %v1305_v25 = vmul.f32 %v1106_v17, %v1106_v17 }
 0x161   : > { %v1209_v26 = vadd.f32 %v1208_v23, %v1207_v20  ;;  %v1406_v27 = vadd.f32 %v1405_v22, %v1404_v21  ;;  %v1304_v20 = vmul.f32 %v1105_v11, %v1105_v11  ;;  %v1427_v23 = vsel %vm268_vm1, %v1303_v14, 0.0 }
 0x163   : > { %v1211_v32 = vadd.f32 %v1210_v29, %v1209_v26  ;;  %v1408_v33 = vadd.f32 %v1407_v28, %v1406_v27  ;;  %v1429_v28 = vsel %vm268_vm1, %v1304_v20, 0.0  ;;  %v1232_v29 = vsel %vm268_vm1, %v1106_v17, 0.0 }
 0x165   : > { %v1410_v38 = vadd.f32 %v1409_v34, %v1408_v33  ;;  %v1213_v39 = vadd.f32 %v1212_v35, %v1211_v32  ;;  %v1431_v32 = vsel %vm268_vm1, %v1305_v25, 0.0 }
 0x167   : > { %v1215_v44 = vadd.f32 %v1214_v41, %v1213_v39  ;;  %v1412_v45 = vadd.f32 %v1411_v40, %v1410_v38 }
 0x169   : > { %v1217_v50 = vadd.f32 %v1216_v47, %v1215_v44  ;;  %v1414_v51 = vadd.f32 %v1413_v46, %v1412_v45 }
 0x16b   : > { %v1219_v56 = vadd.f32 %v1218_v53, %v1217_v50  ;;  %v1416_v57 = vadd.f32 %v1415_v52, %v1414_v51 }
 0x16d   : > { %v1221_v61 = vadd.f32 %v1220_v59, %v1219_v56  ;;  %v1418_v62 = vadd.f32 %v1417_v58, %v1416_v57 }
 0x16f   : > { %v1223_v3 = vadd.f32 %v1222_v1, %v1221_v61  ;;  %v1420_v4 = vadd.f32 %v1419_v0, %v1418_v62 }
 0x171   : > { %v1225_v9 = vadd.f32 %v1224_v7, %v1223_v3  ;;  %v1422_v10 = vadd.f32 %v1421_v6, %v1420_v4 }
 0x173   : > { %v1424_v15 = vadd.f32 %v1423_v12, %v1422_v10  ;;  %v1227_v16 = vadd.f32 %v1226_v13, %v1225_v9 }
 0x175   : > { %v1426_v21 = vadd.f32 %v1425_v18, %v1424_v15  ;;  %v1229_v22 = vadd.f32 %v1228_v19, %v1227_v16 }
 0x177   : > { %v1428_v26 = vadd.f32 %v1427_v23, %v1426_v21  ;;  %v1231_v27 = vadd.f32 %v1230_v24, %v1229_v22 }
 0x179   : > { %v1430_v30 = vadd.f32 %v1429_v28, %v1428_v26  ;;  %v1233_v31 = vadd.f32 %v1232_v29, %v1231_v27 }
 0x17b   : > { %v1234_v33 = vrot.slane %v1233_v31, 4  ;;  %v1432_v34 = vadd.f32 %v1431_v32, %v1430_v30 }
 0x17d   : > { %v1235_v35 = vadd.f32 %v1234_v33, %v1233_v31  ;;  %v1433_v36 = vrot.slane %v1432_v34, 4 }
 0x17f   : > { %v1236_v37 = vrot.slane %v1235_v35, 2  ;;  %v1434_v38 = vadd.f32 %v1433_v36, %v1432_v34 }
 0x181   : > { %v1237_v39 = vadd.f32 %v1236_v37, %v1235_v35  ;;  %v1435_v40 = vrot.slane %v1434_v38, 2 }
 0x183   : > { %v1238_v41 = vrot.slane %v1237_v39, 1  ;;  %v1436_v42 = vadd.f32 %v1435_v40, %v1434_v38 }
 0x185   : > { %v1239_v43 = vadd.f32 %v1238_v41, %v1237_v39  ;;  %v1437_v44 = vrot.slane %v1436_v42, 1 }
 0x187   : > { %1241 = vst.msk [vmem:[%s259_s10] sm:$0x1] %vm1240_vm2, %v1239_v43  ;;  %v1438_v45 = vadd.f32 %v1437_v44, %v1436_v42 }
 0x189   : > { %1439 = vst.msk [vmem:[%s262_s13] sm:$0x1] %vm1240_vm2, %v1438_v45 }
 0x18a PF: > { %s15_s17 = sadd.s32 1, %s1848_s17   ;;  %s2582_s15 = smov %s1844_s16 }
 0x18b   : > { %p12_p6 = scmp.ge.s32.totalorder %s15_s17, 6   ;;  %s2583_s16 = smov %s2585_s18 }
 0x18d   :  { %14 = sbr.rel (!%p12_p6) target bundleno = 2 (0x2), region = 93 }

// kernel: discriminator_forward.11
= control target key start
LH: loop header
LB: loop body
LE: loop exit
PB: predicated region body
PF: predicated region fallthrough
CT: control target
= control target key end

     0   :  { %vm18_vm0 = vcmask 261120   ;;  %vm1326_vm1 = vcmask 253952   ;;  %s3507_s1 = inlined_call_operand.vmem [shape: bf16[256,32], index: 1, kind: input, shape index: {}]   ;;  %s3508_s0 = inlined_call_operand.vmem [shape: bf16[512,256], index: 0, kind: input, shape index: {}]   ;;  %s3509_s2 = inlined_call_operand.vmem [shape: f32[512,32], index: 2, kind: output, shape index: {0}]   ;;  %s3510_s3 = inlined_call_operand.vmem [shape: f32[1,1,32], index: 3, kind: output, shape index: {1}]   ;;  %s3511_s4 = inlined_call_operand.vmem [shape: f32[1,1,32], index: 4, kind: output, shape index: {2}]  }
   0x1   :  { %v1929_v0 = vld [vmem:[%s3507_s1 + $0x38] sm:$0xff]  ;;  %v1928_v2 = vld [vmem:[%s3507_s1 + $0x30] sm:$0xff]  ;;  %v1927_v4 = vld [vmem:[%s3507_s1 + $0x28] sm:$0xff] }
   0x2   :  { %v1937_v1 = vld [vmem:[%s3507_s1 + $0x78] sm:$0xff]  ;;  %659 = vmatpush.bf16.msra.mxu0 %v1929_v0  ;;  %v1936_v3 = vld [vmem:[%s3507_s1 + $0x70] sm:$0xff]  ;;  %1938 = vmatpush.bf16.msra.mxu2 %v1929_v0  ;;  %v1935_v5 = vld [vmem:[%s3507_s1 + $0x68] sm:$0xff] }
   0x3   :  { %828 = vmatpush.bf16.msra.mxu1 %v1937_v1  ;;  %1946 = vmatpush.bf16.msra.mxu3 %v1937_v1  ;;  %v1926_v6 = vld [vmem:[%s3507_s1 + $0x20] sm:$0xff]  ;;  %v1925_v8 = vld [vmem:[%s3507_s1 + $0x18] sm:$0xff]  ;;  %v1924_v10 = vld [vmem:[%s3507_s1 + $0x10] sm:$0xff] }
   0x4   :  { %v1934_v7 = vld [vmem:[%s3507_s1 + $0x60] sm:$0xff]  ;;  %v1933_v9 = vld [vmem:[%s3507_s1 + $0x58] sm:$0xff]  ;;  %v1932_v11 = vld [vmem:[%s3507_s1 + $0x50] sm:$0xff] }
   0x5   :  { %v1923_v12 = vld [vmem:[%s3507_s1 + $0x8] sm:$0xff]  ;;  %v1922_v14 = vld [vmem:[%s3507_s1] sm:$0xff]  ;;  %v1548_v22 = vld [vmem:[%s3508_s0 + $0x10] sm:$0xf] }
   0x6   :  { %660 = vmatpush.bf16.msra.mxu0 %v1928_v2  ;;  %1939 = vmatpush.bf16.msra.mxu2 %v1928_v2  ;;  %v1931_v13 = vld [vmem:[%s3507_s1 + $0x48] sm:$0xff]  ;;  %v1930_v15 = vld [vmem:[%s3507_s1 + $0x40] sm:$0xff]  ;;  %v1861_v23 = vld [vmem:[%s3508_s0 + $0x14] sm:$0xf0] }
   0x7   :  { %829 = vmatpush.bf16.msra.mxu1 %v1936_v3  ;;  %1947 = vmatpush.bf16.msra.mxu3 %v1936_v3  ;;  %v1540_v16 = vld [vmem:[%s3508_s0] sm:$0xf]  ;;  %v1859_v17 = vld [vmem:[%s3508_s0 + $0x4] sm:$0xf0]  ;;  %v1858_v18 = vld [vmem:[%s3508_s0 + $0x4] sm:$0xf]  ;;  %v1549_v26 = vor.u32 %v1861_v23, %v1548_v22 }
   0x8   :  { %v1542_v19 = vld [vmem:[%s3508_s0 + $0x8] sm:$0xf0]  ;;  %v1541_v20 = vor.u32 %v1859_v17, %v1540_v16  ;;  %v1860_v24 = vld [vmem:[%s3508_s0 + $0x14] sm:$0xf]  ;;  %v1550_v25 = vld [vmem:[%s3508_s0 + $0x18] sm:$0xf0] }
   0x9   :  { %v1545_v21 = vor.u32 %v1858_v18, %v1542_v19  ;;  %v1553_v27 = vor.u32 %v1860_v24, %v1550_v25  ;;  %v1668_v28 = vld [vmem:[%s3508_s0 + $0x100] sm:$0xf]  ;;  %v1891_v29 = vld [vmem:[%s3508_s0 + $0x104] sm:$0xf0]  ;;  %v1890_v30 = vld [vmem:[%s3508_s0 + $0x104] sm:$0xf] }
   0xa   :  { %661 = vmatpush.bf16.msra.mxu0 %v1927_v4  ;;  %1940 = vmatpush.bf16.msra.mxu2 %v1927_v4  ;;  %v1669_v31 = vor.u32 %v1891_v29, %v1668_v28  ;;  %v1670_v32 = vld [vmem:[%s3508_s0 + $0x108] sm:$0xf0]  ;;  %v1556_v34 = vld [vmem:[%s3508_s0 + $0x20] sm:$0xf]  ;;  %v1863_v35 = vld [vmem:[%s3508_s0 + $0x24] sm:$0xf0] }
   0xb   :  { %830 = vmatpush.bf16.msra.mxu1 %v1935_v5  ;;  %1948 = vmatpush.bf16.msra.mxu3 %v1935_v5  ;;  %v1673_v33 = vor.u32 %v1890_v30, %v1670_v32  ;;  %v1862_v36 = vld [vmem:[%s3508_s0 + $0x24] sm:$0xf]  ;;  %v1558_v37 = vld [vmem:[%s3508_s0 + $0x28] sm:$0xf0]  ;;  %v1557_v38 = vor.u32 %v1863_v35, %v1556_v34  ;;  %v1676_v40 = vld [vmem:[%s3508_s0 + $0x110] sm:$0xf] }
   0xc   :  { %v1561_v39 = vor.u32 %v1862_v36, %v1558_v37  ;;  %v1893_v41 = vld [vmem:[%s3508_s0 + $0x114] sm:$0xf0]  ;;  %v1892_v42 = vld [vmem:[%s3508_s0 + $0x114] sm:$0xf]  ;;  %v1678_v44 = vld [vmem:[%s3508_s0 + $0x118] sm:$0xf0] }
   0xd   :  { %v1677_v43 = vor.u32 %v1893_v41, %v1676_v40  ;;  %v1681_v45 = vor.u32 %v1892_v42, %v1678_v44  ;;  %v1564_v46 = vld [vmem:[%s3508_s0 + $0x30] sm:$0xf]  ;;  %v1865_v47 = vld [vmem:[%s3508_s0 + $0x34] sm:$0xf0]  ;;  %v1864_v48 = vld [vmem:[%s3508_s0 + $0x34] sm:$0xf] }
   0xe   :  { %662 = vmatpush.bf16.msra.mxu0 %v1926_v6  ;;  %1941 = vmatpush.bf16.msra.mxu2 %v1926_v6  ;;  %v1566_v49 = vld [vmem:[%s3508_s0 + $0x38] sm:$0xf0]  ;;  %v1565_v50 = vor.u32 %v1865_v47, %v1564_v46  ;;  %v1684_v52 = vld [vmem:[%s3508_s0 + $0x120] sm:$0xf]  ;;  %v1895_v53 = vld [vmem:[%s3508_s0 + $0x124] sm:$0xf0] }
   0xf   :  { %831 = vmatpush.bf16.msra.mxu1 %v1934_v7  ;;  %1949 = vmatpush.bf16.msra.mxu3 %v1934_v7  ;;  %v1569_v51 = vor.u32 %v1864_v48, %v1566_v49  ;;  %v1894_v54 = vld [vmem:[%s3508_s0 + $0x124] sm:$0xf]  ;;  %v1685_v55 = vor.u32 %v1895_v53, %v1684_v52  ;;  %v1686_v56 = vld [vmem:[%s3508_s0 + $0x128] sm:$0xf0]  ;;  %v1572_v58 = vld [vmem:[%s3508_s0 + $0x40] sm:$0xf] }
  0x10   :  { %v1689_v57 = vor.u32 %v1894_v54, %v1686_v56  ;;  %v1867_v59 = vld [vmem:[%s3508_s0 + $0x44] sm:$0xf0]  ;;  %v1866_v60 = vld [vmem:[%s3508_s0 + $0x44] sm:$0xf]  ;;  %v1574_v61 = vld [vmem:[%s3508_s0 + $0x48] sm:$0xf0] }
  0x11   :  { %v1573_v62 = vor.u32 %v1867_v59, %v1572_v58  ;;  %v1577_v63 = vor.u32 %v1866_v60, %v1574_v61  ;;  %v1692_v0 = vld [vmem:[%s3508_s0 + $0x130] sm:$0xf]  ;;  %v1897_v1 = vld [vmem:[%s3508_s0 + $0x134] sm:$0xf0]  ;;  %v1896_v2 = vld [vmem:[%s3508_s0 + $0x134] sm:$0xf] }
  0x12   :  { %663 = vmatpush.bf16.msra.mxu0 %v1925_v8  ;;  %1942 = vmatpush.bf16.msra.mxu2 %v1925_v8  ;;  %v1693_v3 = vor.u32 %v1897_v1, %v1692_v0  ;;  %v1694_v4 = vld [vmem:[%s3508_s0 + $0x138] sm:$0xf0]  ;;  %v1580_v6 = vld [vmem:[%s3508_s0 + $0x50] sm:$0xf]  ;;  %v1869_v7 = vld [vmem:[%s3508_s0 + $0x54] sm:$0xf0] }
  0x13   :  { %832 = vmatpush.bf16.msra.mxu1 %v1933_v9  ;;  %1950 = vmatpush.bf16.msra.mxu3 %v1933_v9  ;;  %v1697_v5 = vor.u32 %v1896_v2, %v1694_v4  ;;  %v1868_v8 = vld [vmem:[%s3508_s0 + $0x54] sm:$0xf]  ;;  %v1582_v9 = vld [vmem:[%s3508_s0 + $0x58] sm:$0xf0]  ;;  %v1702_v16 = vld [vmem:[%s3508_s0 + $0x148] sm:$0xf0] }
  0x14   :  { %v1588_v18 = vld [vmem:[%s3508_s0 + $0x60] sm:$0xf]  ;;  %v1871_v19 = vld [vmem:[%s3508_s0 + $0x64] sm:$0xf0]  ;;  %v1590_v22 = vld [vmem:[%s3508_s0 + $0x68] sm:$0xf0] }
  0x15   :  { %v1589_v23 = vor.u32 %v1871_v19, %v1588_v18  ;;  %v1708_v25 = vld [vmem:[%s3508_s0 + $0x150] sm:$0xf]  ;;  %v1900_v28 = vld [vmem:[%s3508_s0 + $0x154] sm:$0xf]  ;;  %v1710_v29 = vld [vmem:[%s3508_s0 + $0x158] sm:$0xf0] }
  0x16   :  { %664 = vmatpush.bf16.msra.mxu0 %v1924_v10  ;;  %1943 = vmatpush.bf16.msra.mxu2 %v1924_v10  ;;  %v1581_v10 = vor.u32 %v1869_v7, %v1580_v6  ;;  %v1713_v30 = vor.u32 %v1900_v28, %v1710_v29  ;;  %v1873_v32 = vld [vmem:[%s3508_s0 + $0x74] sm:$0xf0]  ;;  %v1598_v34 = vld [vmem:[%s3508_s0 + $0x78] sm:$0xf0]  ;;  %v1604_v37 = vld [vmem:[%s3508_s0 + $0x80] sm:$0xf] }
  0x17   :  { %833 = vmatpush.bf16.msra.mxu1 %v1932_v11  ;;  %1951 = vmatpush.bf16.msra.mxu3 %v1932_v11  ;;  %v1585_v11 = vor.u32 %v1868_v8, %v1582_v9  ;;  %v1606_v40 = vld [vmem:[%s3508_s0 + $0x88] sm:$0xf0]  ;;  %v1716_v47 = vld [vmem:[%s3508_s0 + $0x160] sm:$0xf]  ;;  %v1903_v48 = vld [vmem:[%s3508_s0 + $0x164] sm:$0xf0] }
  0x18   :  { %v1717_v49 = vor.u32 %v1903_v48, %v1716_v47  ;;  %v1612_v56 = vld [vmem:[%s3508_s0 + $0x90] sm:$0xf]  ;;  %v1876_v58 = vld [vmem:[%s3508_s0 + $0x94] sm:$0xf]  ;;  %v1614_v59 = vld [vmem:[%s3508_s0 + $0x98] sm:$0xf0] }
  0x19   :  { %v1617_v61 = vor.u32 %v1876_v58, %v1614_v59  ;;  %v1724_v0 = vld [vmem:[%s3508_s0 + $0x170] sm:$0xf]  ;;  %v1905_v1 = vld [vmem:[%s3508_s0 + $0x174] sm:$0xf0]  ;;  %v1726_v4 = vld [vmem:[%s3508_s0 + $0x178] sm:$0xf0] }
  0x1a   :  { %665 = vmatpush.bf16.msra.mxu0 %v1923_v12  ;;  %1944 = vmatpush.bf16.msra.mxu2 %v1923_v12  ;;  %v1700_v12 = vld [vmem:[%s3508_s0 + $0x140] sm:$0xf]  ;;  %v1725_v2 = vor.u32 %v1905_v1, %v1724_v0  ;;  %v1879_v18 = vld [vmem:[%s3508_s0 + $0xa4] sm:$0xf0]  ;;  %v1878_v19 = vld [vmem:[%s3508_s0 + $0xa4] sm:$0xf] }
  0x1b   :  { %834 = vmatpush.bf16.msra.mxu1 %v1931_v13  ;;  %1952 = vmatpush.bf16.msra.mxu3 %v1931_v13  ;;  %v1899_v13 = vld [vmem:[%s3508_s0 + $0x144] sm:$0xf0]  ;;  %v1880_v47 = vld [vmem:[%s3508_s0 + $0xb4] sm:$0xf]  ;;  %v1630_v48 = vld [vmem:[%s3508_s0 + $0xb8] sm:$0xf0] }
  0x1c   :  { %v1740_v58 = vld [vmem:[%s3508_s0 + $0x190] sm:$0xf]  ;;  %v1909_v59 = vld [vmem:[%s3508_s0 + $0x194] sm:$0xf0]  ;;  %v1742_v0 = vld [vmem:[%s3508_s0 + $0x198] sm:$0xf0] }
  0x1e   :  { %666 = vmatpush.bf16.msra.mxu0 %v1922_v14  ;;  %1945 = vmatpush.bf16.msra.mxu2 %v1922_v14  ;;  %v1898_v14 = vld [vmem:[%s3508_s0 + $0x144] sm:$0xf] }
  0x1f   :  { %835 = vmatpush.bf16.msra.mxu1 %v1930_v15  ;;  %1953 = vmatpush.bf16.msra.mxu3 %v1930_v15  ;;  %v1701_v15 = vor.u32 %v1899_v13, %v1700_v12  ;;  %v1705_v17 = vor.u32 %v1898_v14, %v1702_v16 }
  0x21   :  { %667 = vmatmul.bf16.vlgmr.msra.gmra.mxu0 %v1541_v20  ;;  %747 = vmatmul.bf16.vlgmr.msra.gmra.mxu2 %v1669_v31  ;;  %v1955_v20 = vmov 0.0   ;;  %v1596_v31 = vld [vmem:[%s3508_s0 + $0x70] sm:$0xf] }
  0x22   :  { %836 = vmatmul.bf16.vlgmr.msra.gmra.mxu1 %v1545_v21  ;;  %916 = vmatmul.bf16.vlgmr.msra.gmra.mxu3 %v1673_v33  ;;  %19 = vst.msk [vmem:[%s3509_s2] sm:$0xff] %vm18_vm0, %v1955_v20  ;;  %v1870_v21 = vld [vmem:[%s3508_s0 + $0x64] sm:$0xf]  ;;  %v1872_v33 = vld [vmem:[%s3508_s0 + $0x74] sm:$0xf]  ;;  %v1597_v35 = vor.u32 %v1873_v32, %v1596_v31 }
  0x23   :  { %20 = vst.msk [vmem:[%s3509_s2 + $0x8] sm:$0xff] %vm18_vm0, %v1955_v20  ;;  %v1593_v24 = vor.u32 %v1870_v21, %v1590_v22  ;;  %v1601_v36 = vor.u32 %v1872_v33, %v1598_v34  ;;  %v1734_v31 = vld [vmem:[%s3508_s0 + $0x188] sm:$0xf0] }
  0x24   :  { %21 = vst.msk [vmem:[%s3509_s2 + $0x10] sm:$0xff] %vm18_vm0, %v1955_v20 }
  0x25   :  { %22 = vst.msk [vmem:[%s3509_s2 + $0x18] sm:$0xff] %vm18_vm0, %v1955_v20 }
  0x26   :  { %23 = vst.msk [vmem:[%s3509_s2 + $0x20] sm:$0xff] %vm18_vm0, %v1955_v20 }
  0x27   :  { %24 = vst.msk [vmem:[%s3509_s2 + $0x28] sm:$0xff] %vm18_vm0, %v1955_v20 }
  0x28   :  { %25 = vst.msk [vmem:[%s3509_s2 + $0x30] sm:$0xff] %vm18_vm0, %v1955_v20 }
  0x29   :  { %26 = vst.msk [vmem:[%s3509_s2 + $0x38] sm:$0xff] %vm18_vm0, %v1955_v20  ;;  %v83_v44 = vld [vmem:[%s3509_s2] sm:$0xff] }
  0x2a   :  { %27 = vst.msk [vmem:[%s3509_s2 + $0x40] sm:$0xff] %vm18_vm0, %v1955_v20  ;;  %v84_v7 = vld [vmem:[%s3509_s2 + $0x8] sm:$0xff] }
  0x2b   :  { %28 = vst.msk [vmem:[%s3509_s2 + $0x48] sm:$0xff] %vm18_vm0, %v1955_v20  ;;  %v85_v9 = vld [vmem:[%s3509_s2 + $0x10] sm:$0xff] }
  0x2c   :  { %29 = vst.msk [vmem:[%s3509_s2 + $0x50] sm:$0xff] %vm18_vm0, %v1955_v20  ;;  %v86_v12 = vld [vmem:[%s3509_s2 + $0x18] sm:$0xff] }
  0x2d   :  { %30 = vst.msk [vmem:[%s3509_s2 + $0x58] sm:$0xff] %vm18_vm0, %v1955_v20 }
  0x2e   :  { %31 = vst.msk [vmem:[%s3509_s2 + $0x60] sm:$0xff] %vm18_vm0, %v1955_v20 }
  0x2f   :  { %32 = vst.msk [vmem:[%s3509_s2 + $0x68] sm:$0xff] %vm18_vm0, %v1955_v20 }
  0x30   :  { %33 = vst.msk [vmem:[%s3509_s2 + $0x70] sm:$0xff] %vm18_vm0, %v1955_v20 }
  0x31   :  { %672 = vmatmul.bf16.gmra.mxu0 %v1549_v26  ;;  %752 = vmatmul.bf16.gmra.mxu2 %v1677_v43  ;;  %v1901_v26 = vld [vmem:[%s3508_s0 + $0x154] sm:$0xf0]  ;;  %34 = vst.msk [vmem:[%s3509_s2 + $0x78] sm:$0xff] %vm18_vm0, %v1955_v20 }
  0x32   :  { %841 = vmatmul.bf16.gmra.mxu1 %v1553_v27  ;;  %921 = vmatmul.bf16.gmra.mxu3 %v1681_v45  ;;  %v1709_v27 = vor.u32 %v1901_v26, %v1708_v25  ;;  %35 = vst.msk [vmem:[%s3509_s2 + $0x80] sm:$0xff] %vm18_vm0, %v1955_v20  ;;  %v1732_v26 = vld [vmem:[%s3508_s0 + $0x180] sm:$0xf] }
  0x33   :  { %36 = vst.msk [vmem:[%s3509_s2 + $0x88] sm:$0xff] %vm18_vm0, %v1955_v20 }
  0x34   :  { %37 = vst.msk [vmem:[%s3509_s2 + $0x90] sm:$0xff] %vm18_vm0, %v1955_v20 }
  0x35   :  { %38 = vst.msk [vmem:[%s3509_s2 + $0x98] sm:$0xff] %vm18_vm0, %v1955_v20 }
  0x36   :  { %39 = vst.msk [vmem:[%s3509_s2 + $0xa0] sm:$0xff] %vm18_vm0, %v1955_v20 }
  0x37   :  { %40 = vst.msk [vmem:[%s3509_s2 + $0xa8] sm:$0xff] %vm18_vm0, %v1955_v20 }
  0x38   :  { %41 = vst.msk [vmem:[%s3509_s2 + $0xb0] sm:$0xff] %vm18_vm0, %v1955_v20 }
  0x39   :  { %42 = vst.msk [vmem:[%s3509_s2 + $0xb8] sm:$0xff] %vm18_vm0, %v1955_v20 }
  0x3a   :  { %43 = vst.msk [vmem:[%s3509_s2 + $0xc0] sm:$0xff] %vm18_vm0, %v1955_v20 }
  0x3b   :  { %44 = vst.msk [vmem:[%s3509_s2 + $0xc8] sm:$0xff] %vm18_vm0, %v1955_v20 }
  0x3c   :  { %45 = vst.msk [vmem:[%s3509_s2 + $0xd0] sm:$0xff] %vm18_vm0, %v1955_v20 }
  0x3d   :  { %46 = vst.msk [vmem:[%s3509_s2 + $0xd8] sm:$0xff] %vm18_vm0, %v1955_v20 }
  0x3e   :  { %47 = vst.msk [vmem:[%s3509_s2 + $0xe0] sm:$0xff] %vm18_vm0, %v1955_v20 }
  0x3f   :  { %48 = vst.msk [vmem:[%s3509_s2 + $0xe8] sm:$0xff] %vm18_vm0, %v1955_v20 }
  0x40   :  { %49 = vst.msk [vmem:[%s3509_s2 + $0xf0] sm:$0xff] %vm18_vm0, %v1955_v20 }
  0x41   :  { %677 = vmatmul.bf16.gmra.mxu0 %v1557_v38  ;;  %757 = vmatmul.bf16.gmra.mxu2 %v1685_v55  ;;  %50 = vst.msk [vmem:[%s3509_s2 + $0xf8] sm:$0xff] %vm18_vm0, %v1955_v20  ;;  %v1875_v38 = vld [vmem:[%s3508_s0 + $0x84] sm:$0xf0] }
  0x42   :  { %846 = vmatmul.bf16.gmra.mxu1 %v1561_v39  ;;  %926 = vmatmul.bf16.gmra.mxu3 %v1689_v57  ;;  %51 = vst.msk [vmem:[%s3509_s2 + $0x100] sm:$0xff] %vm18_vm0, %v1955_v20  ;;  %v1874_v39 = vld [vmem:[%s3508_s0 + $0x84] sm:$0xf]  ;;  %v1605_v41 = vor.u32 %v1875_v38, %v1604_v37  ;;  %v1877_v57 = vld [vmem:[%s3508_s0 + $0x94] sm:$0xf0]  ;;  %v88_v37 = vld [vmem:[%s3509_s2 + $0x28] sm:$0xff] }
  0x43   :  { %52 = vst.msk [vmem:[%s3509_s2 + $0x108] sm:$0xff] %vm18_vm0, %v1955_v20  ;;  %v1609_v42 = vor.u32 %v1874_v39, %v1606_v40  ;;  %v1613_v60 = vor.u32 %v1877_v57, %v1612_v56 }
  0x44   :  { %53 = vst.msk [vmem:[%s3509_s2 + $0x110] sm:$0xff] %vm18_vm0, %v1955_v20 }
  0x45   :  { %54 = vst.msk [vmem:[%s3509_s2 + $0x118] sm:$0xff] %vm18_vm0, %v1955_v20 }
  0x46   :  { %55 = vst.msk [vmem:[%s3509_s2 + $0x120] sm:$0xff] %vm18_vm0, %v1955_v20 }
  0x47   :  { %56 = vst.msk [vmem:[%s3509_s2 + $0x128] sm:$0xff] %vm18_vm0, %v1955_v20 }
  0x48   :  { %57 = vst.msk [vmem:[%s3509_s2 + $0x130] sm:$0xff] %vm18_vm0, %v1955_v20 }
  0x49   :  { %58 = vst.msk [vmem:[%s3509_s2 + $0x138] sm:$0xff] %vm18_vm0, %v1955_v20  ;;  %v115_v39 = vld [vmem:[%s3509_s2 + $0x100] sm:$0xff] }
  0x4a   :  { %59 = vst.msk [vmem:[%s3509_s2 + $0x140] sm:$0xff] %vm18_vm0, %v1955_v20 }
  0x4b   :  { %60 = vst.msk [vmem:[%s3509_s2 + $0x148] sm:$0xff] %vm18_vm0, %v1955_v20 }
  0x4c   :  { %61 = vst.msk [vmem:[%s3509_s2 + $0x150] sm:$0xff] %vm18_vm0, %v1955_v20 }
  0x4d   :  { %62 = vst.msk [vmem:[%s3509_s2 + $0x158] sm:$0xff] %vm18_vm0, %v1955_v20 }
  0x4e   :  { %63 = vst.msk [vmem:[%s3509_s2 + $0x160] sm:$0xff] %vm18_vm0, %v1955_v20 }
  0x4f   :  { %64 = vst.msk [vmem:[%s3509_s2 + $0x168] sm:$0xff] %vm18_vm0, %v1955_v20 }
  0x50   :  { %65 = vst.msk [vmem:[%s3509_s2 + $0x170] sm:$0xff] %vm18_vm0, %v1955_v20 }
  0x51   :  { %682 = vmatmul.bf16.gmra.mxu0 %v1565_v50  ;;  %762 = vmatmul.bf16.gmra.mxu2 %v1693_v3  ;;  %v1902_v50 = vld [vmem:[%s3508_s0 + $0x164] sm:$0xf]  ;;  %66 = vst.msk [vmem:[%s3509_s2 + $0x178] sm:$0xff] %vm18_vm0, %v1955_v20  ;;  %v1904_v3 = vld [vmem:[%s3508_s0 + $0x174] sm:$0xf] }
  0x52   :  { %851 = vmatmul.bf16.gmra.mxu1 %v1569_v51  ;;  %931 = vmatmul.bf16.gmra.mxu3 %v1697_v5  ;;  %v1718_v51 = vld [vmem:[%s3508_s0 + $0x168] sm:$0xf0]  ;;  %67 = vst.msk [vmem:[%s3509_s2 + $0x180] sm:$0xff] %vm18_vm0, %v1955_v20  ;;  %v1729_v5 = vor.u32 %v1904_v3, %v1726_v4 }
  0x53   :  { %v1721_v53 = vor.u32 %v1902_v50, %v1718_v51  ;;  %68 = vst.msk [vmem:[%s3509_s2 + $0x188] sm:$0xff] %vm18_vm0, %v1955_v20  ;;  %v1633_v50 = vor.u32 %v1880_v47, %v1630_v48  ;;  %v1884_v47 = vld [vmem:[%s3508_s0 + $0xd4] sm:$0xf]  ;;  %v1646_v48 = vld [vmem:[%s3508_s0 + $0xd8] sm:$0xf0] }
  0x54   :  { %69 = vst.msk [vmem:[%s3509_s2 + $0x190] sm:$0xff] %vm18_vm0, %v1955_v20 }
  0x55   :  { %70 = vst.msk [vmem:[%s3509_s2 + $0x198] sm:$0xff] %vm18_vm0, %v1955_v20 }
  0x56   :  { %71 = vst.msk [vmem:[%s3509_s2 + $0x1a0] sm:$0xff] %vm18_vm0, %v1955_v20 }
  0x57   :  { %72 = vst.msk [vmem:[%s3509_s2 + $0x1a8] sm:$0xff] %vm18_vm0, %v1955_v20 }
  0x58   :  { %73 = vst.msk [vmem:[%s3509_s2 + $0x1b0] sm:$0xff] %vm18_vm0, %v1955_v20 }
  0x59   :  { %74 = vst.msk [vmem:[%s3509_s2 + $0x1b8] sm:$0xff] %vm18_vm0, %v1955_v20 }
  0x5a   :  { %75 = vst.msk [vmem:[%s3509_s2 + $0x1c0] sm:$0xff] %vm18_vm0, %v1955_v20 }
  0x5b   :  { %76 = vst.msk [vmem:[%s3509_s2 + $0x1c8] sm:$0xff] %vm18_vm0, %v1955_v20 }
  0x5c   :  { %77 = vst.msk [vmem:[%s3509_s2 + $0x1d0] sm:$0xff] %vm18_vm0, %v1955_v20 }
  0x5d   :  { %78 = vst.msk [vmem:[%s3509_s2 + $0x1d8] sm:$0xff] %vm18_vm0, %v1955_v20 }
  0x5e   :  { %79 = vst.msk [vmem:[%s3509_s2 + $0x1e0] sm:$0xff] %vm18_vm0, %v1955_v20 }
  0x5f   :  { %80 = vst.msk [vmem:[%s3509_s2 + $0x1e8] sm:$0xff] %vm18_vm0, %v1955_v20 }
  0x60   :  { %81 = vst.msk [vmem:[%s3509_s2 + $0x1f0] sm:$0xff] %vm18_vm0, %v1955_v20 }
  0x61   :  { %687 = vmatmul.bf16.gmra.mxu0 %v1573_v62  ;;  %767 = vmatmul.bf16.gmra.mxu2 %v1701_v15  ;;  %82 = vst.msk [vmem:[%s3509_s2 + $0x1f8] sm:$0xff] %vm18_vm0, %v1955_v20  ;;  %v1622_v20 = vld [vmem:[%s3508_s0 + $0xa8] sm:$0xf0] }
  0x62   :  { %856 = vmatmul.bf16.gmra.mxu1 %v1577_v63  ;;  %936 = vmatmul.bf16.gmra.mxu3 %v1705_v17  ;;  %v1620_v17 = vld [vmem:[%s3508_s0 + $0xa0] sm:$0xf]  ;;  %v1625_v22 = vor.u32 %v1878_v19, %v1622_v20 }
  0x63   :  { %v1621_v21 = vor.u32 %v1879_v18, %v1620_v17 }
  0x71   :  { %692 = vmatmul.bf16.gmra.mxu0 %v1581_v10  ;;  %772 = vmatmul.bf16.gmra.mxu2 %v1709_v27  ;;  %v1907_v27 = vld [vmem:[%s3508_s0 + $0x184] sm:$0xf0] }
  0x72   :  { %861 = vmatmul.bf16.gmra.mxu1 %v1585_v11  ;;  %941 = vmatmul.bf16.gmra.mxu3 %v1713_v30  ;;  %v1733_v29 = vor.u32 %v1907_v27, %v1732_v26  ;;  %v1906_v30 = vld [vmem:[%s3508_s0 + $0x184] sm:$0xf]  ;;  %v1748_v26 = vld [vmem:[%s3508_s0 + $0x1a0] sm:$0xf]  ;;  %v1911_v27 = vld [vmem:[%s3508_s0 + $0x1a4] sm:$0xf0] }
  0x73   :  { %v1737_v33 = vor.u32 %v1906_v30, %v1734_v31  ;;  %v1749_v31 = vor.u32 %v1911_v27, %v1748_v26  ;;  %v1764_v26 = vld [vmem:[%s3508_s0 + $0x1c0] sm:$0xf]  ;;  %v1915_v27 = vld [vmem:[%s3508_s0 + $0x1c4] sm:$0xf0] }
  0x81   :  { %697 = vmatmul.bf16.gmra.mxu0 %v1589_v23  ;;  %777 = vmatmul.bf16.gmra.mxu2 %v1717_v49 }
  0x82   :  { %866 = vmatmul.bf16.gmra.mxu1 %v1593_v24  ;;  %946 = vmatmul.bf16.gmra.mxu3 %v1721_v53  ;;  %v87_v24 = vld [vmem:[%s3509_s2 + $0x20] sm:$0xff]  ;;  %v89_v53 = vld [vmem:[%s3509_s2 + $0x30] sm:$0xff] }
  0x91   :  { %702 = vmatmul.bf16.gmra.mxu0 %v1597_v35  ;;  %782 = vmatmul.bf16.gmra.mxu2 %v1725_v2 }
  0x92   :  { %871 = vmatmul.bf16.gmra.mxu1 %v1601_v36  ;;  %951 = vmatmul.bf16.gmra.mxu3 %v1729_v5  ;;  %v90_v5 = vld [vmem:[%s3509_s2 + $0x38] sm:$0xff] }
  0x9e   :  { %v668_v43 = vpop.f32.mrf.mxu0 }
  0x9f   :  { %v837_v45 = vpop.f32.mrf.mxu1 }
  0xa0   :  { %v838_v46 = vadd.f32 %v837_v45, %v668_v43  ;;  %v1628_v45 = vld [vmem:[%s3508_s0 + $0xb0] sm:$0xf] }
  0xa1   :  { %707 = vmatmul.bf16.gmra.mxu0 %v1605_v41  ;;  %787 = vmatmul.bf16.gmra.mxu2 %v1733_v29 }
  0xa2   :  { %v997_v52 = vadd.f32 %v838_v46, %v83_v44  ;;  %876 = vmatmul.bf16.gmra.mxu1 %v1609_v42  ;;  %956 = vmatmul.bf16.gmra.mxu3 %v1737_v33  ;;  %v1881_v46 = vld [vmem:[%s3508_s0 + $0xb4] sm:$0xf0] }
  0xa3   :  { %v1629_v49 = vor.u32 %v1881_v46, %v1628_v45  ;;  %v1644_v45 = vld [vmem:[%s3508_s0 + $0xd0] sm:$0xf]  ;;  %v1885_v46 = vld [vmem:[%s3508_s0 + $0xd4] sm:$0xf0] }
  0xa4   :  { %1062 = vst.msk [vmem:[%s3509_s2] sm:$0xff] %vm18_vm0, %v997_v52  ;;  %v748_v32 = vpop.f32.mrf.mxu2 }
  0xa5   :  { %v917_v35 = vpop.f32.mrf.mxu3 }
  0xa6   :  { %v670_v54 = vpop.f32.mrf.mxu0  ;;  %v918_v40 = vadd.f32 %v917_v35, %v748_v32  ;;  %v1750_v32 = vld [vmem:[%s3508_s0 + $0x1a8] sm:$0xf0] }
  0xa7   :  { %v839_v55 = vpop.f32.mrf.mxu1 }
  0xa8   :  { %v840_v6 = vadd.f32 %v839_v55, %v670_v54  ;;  %v1029_v43 = vadd.f32 %v918_v40, %v115_v39  ;;  %v116_v55 = vld [vmem:[%s3509_s2 + $0x108] sm:$0xff]  ;;  %v119_v39 = vld [vmem:[%s3509_s2 + $0x120] sm:$0xff] }
  0xaa   :  { %v998_v10 = vadd.f32 %v840_v6, %v84_v7  ;;  %1094 = vst.msk [vmem:[%s3509_s2 + $0x100] sm:$0xff] %vm18_vm0, %v1029_v43  ;;  %v117_v7 = vld [vmem:[%s3509_s2 + $0x110] sm:$0xff] }
  0xac   :  { %1063 = vst.msk [vmem:[%s3509_s2 + $0x8] sm:$0xff] %vm18_vm0, %v998_v10  ;;  %v750_v42 = vpop.f32.mrf.mxu2 }
  0xad   :  { %v919_v51 = vpop.f32.mrf.mxu3 }
  0xae   :  { %v673_v62 = vpop.f32.mrf.mxu0  ;;  %v920_v56 = vadd.f32 %v919_v51, %v750_v42 }
  0xaf   :  { %v842_v63 = vpop.f32.mrf.mxu1 }
  0xb0   :  { %v843_v8 = vadd.f32 %v842_v63, %v673_v62  ;;  %v1030_v62 = vadd.f32 %v920_v56, %v116_v55  ;;  %v1741_v63 = vor.u32 %v1909_v59, %v1740_v58  ;;  %v120_v55 = vld [vmem:[%s3509_s2 + $0x128] sm:$0xff]  ;;  %v1756_v58 = vld [vmem:[%s3508_s0 + $0x1b0] sm:$0xf]  ;;  %v1913_v59 = vld [vmem:[%s3508_s0 + $0x1b4] sm:$0xf0] }
  0xb1   :  { %712 = vmatmul.bf16.gmra.mxu0 %v1613_v60  ;;  %v1908_v60 = vld [vmem:[%s3508_s0 + $0x194] sm:$0xf] }
  0xb2   :  { %881 = vmatmul.bf16.gmra.mxu1 %v1617_v61  ;;  %v999_v14 = vadd.f32 %v843_v8, %v85_v9  ;;  %v1745_v2 = vor.u32 %v1908_v60, %v1742_v0  ;;  %1095 = vst.msk [vmem:[%s3509_s2 + $0x108] sm:$0xff] %vm18_vm0, %v1030_v62  ;;  %792 = vmatmul.bf16.gmra.mxu2 %v1741_v63  ;;  %v1912_v60 = vld [vmem:[%s3508_s0 + $0x1b4] sm:$0xf]  ;;  %v1758_v0 = vld [vmem:[%s3508_s0 + $0x1b8] sm:$0xf0] }
  0xb3   :  { %v1757_v63 = vor.u32 %v1913_v59, %v1756_v58  ;;  %v1917_v58 = vld [vmem:[%s3508_s0 + $0x1d4] sm:$0xf0] }
  0xb4   :  { %1064 = vst.msk [vmem:[%s3509_s2 + $0x10] sm:$0xff] %vm18_vm0, %v999_v14  ;;  %v753_v61 = vpop.f32.mrf.mxu2  ;;  %961 = vmatmul.bf16.gmra.mxu3 %v1745_v2  ;;  %v1883_v14 = vld [vmem:[%s3508_s0 + $0xc4] sm:$0xf0]  ;;  %v1761_v2 = vor.u32 %v1912_v60, %v1758_v0 }
  0xb5   :  { %v922_v3 = vpop.f32.mrf.mxu3 }
  0xb6   :  { %v675_v11 = vpop.f32.mrf.mxu0  ;;  %v923_v8 = vadd.f32 %v922_v3, %v753_v61 }
  0xb7   :  { %v844_v13 = vpop.f32.mrf.mxu1 }
  0xb8   :  { %v845_v15 = vadd.f32 %v844_v13, %v675_v11  ;;  %v1031_v11 = vadd.f32 %v923_v8, %v117_v7  ;;  %v1636_v13 = vld [vmem:[%s3508_s0 + $0xc0] sm:$0xf]  ;;  %v121_v7 = vld [vmem:[%s3509_s2 + $0x130] sm:$0xff] }
  0xb9   :  { %v1637_v17 = vor.u32 %v1883_v14, %v1636_v13  ;;  %v1652_v13 = vld [vmem:[%s3508_s0 + $0xe0] sm:$0xf]  ;;  %v1887_v14 = vld [vmem:[%s3508_s0 + $0xe4] sm:$0xf0] }
  0xba   :  { %v1000_v16 = vadd.f32 %v845_v15, %v86_v12  ;;  %v1882_v15 = vld [vmem:[%s3508_s0 + $0xc4] sm:$0xf]  ;;  %1096 = vst.msk [vmem:[%s3509_s2 + $0x110] sm:$0xff] %vm18_vm0, %v1031_v11 }
  0xbc   :  { %1065 = vst.msk [vmem:[%s3509_s2 + $0x18] sm:$0xff] %vm18_vm0, %v1000_v16  ;;  %v755_v10 = vpop.f32.mrf.mxu2  ;;  %v1638_v16 = vld [vmem:[%s3508_s0 + $0xc8] sm:$0xf0] }
  0xbd   :  { %v1641_v18 = vor.u32 %v1882_v15, %v1638_v16  ;;  %v924_v19 = vpop.f32.mrf.mxu3  ;;  %v1886_v15 = vld [vmem:[%s3508_s0 + $0xe4] sm:$0xf]  ;;  %v1654_v16 = vld [vmem:[%s3508_s0 + $0xe8] sm:$0xf0] }
  0xbe   :  { %v678_v23 = vpop.f32.mrf.mxu0 }
  0xbf   :  { %v847_v25 = vpop.f32.mrf.mxu1 }
  0xc0   :  { %v848_v28 = vadd.f32 %v847_v25, %v678_v23  ;;  %v118_v23 = vld [vmem:[%s3509_s2 + $0x118] sm:$0xff] }
  0xc1   :  { %717 = vmatmul.bf16.gmra.mxu0 %v1621_v21  ;;  %v91_v21 = vld [vmem:[%s3509_s2 + $0x40] sm:$0xff] }
  0xc2   :  { %v1001_v34 = vadd.f32 %v848_v28, %v87_v24  ;;  %886 = vmatmul.bf16.gmra.mxu1 %v1625_v22  ;;  %v925_v24 = vadd.f32 %v924_v19, %v755_v10  ;;  %v1910_v28 = vld [vmem:[%s3508_s0 + $0x1a4] sm:$0xf]  ;;  %797 = vmatmul.bf16.gmra.mxu2 %v1749_v31  ;;  %v1765_v31 = vor.u32 %v1915_v27, %v1764_v26 }
  0xc4   :  { %1066 = vst.msk [vmem:[%s3509_s2 + $0x20] sm:$0xff] %vm18_vm0, %v1001_v34  ;;  %v758_v29 = vpop.f32.mrf.mxu2  ;;  %v1032_v30 = vadd.f32 %v925_v24, %v118_v23  ;;  %v1753_v34 = vor.u32 %v1910_v28, %v1750_v32  ;;  %v122_v23 = vld [vmem:[%s3509_s2 + $0x138] sm:$0xff]  ;;  %v1914_v28 = vld [vmem:[%s3508_s0 + $0x1c4] sm:$0xf]  ;;  %v1766_v32 = vld [vmem:[%s3508_s0 + $0x1c8] sm:$0xf0] }
  0xc5   :  { %v927_v35 = vpop.f32.mrf.mxu3 }
  0xc6   :  { %v680_v36 = vpop.f32.mrf.mxu0  ;;  %1097 = vst.msk [vmem:[%s3509_s2 + $0x118] sm:$0xff] %vm18_vm0, %v1032_v30  ;;  %966 = vmatmul.bf16.gmra.mxu3 %v1753_v34  ;;  %v928_v40 = vadd.f32 %v927_v35, %v758_v29  ;;  %v1769_v34 = vor.u32 %v1914_v28, %v1766_v32 }
  0xc7   :  { %v849_v38 = vpop.f32.mrf.mxu1 }
  0xc8   :  { %v850_v41 = vadd.f32 %v849_v38, %v680_v36  ;;  %v1033_v43 = vadd.f32 %v928_v40, %v119_v39  ;;  %v123_v39 = vld [vmem:[%s3509_s2 + $0x140] sm:$0xff] }
  0xca   :  { %v1002_v44 = vadd.f32 %v850_v41, %v88_v37  ;;  %v92_v37 = vld [vmem:[%s3509_s2 + $0x48] sm:$0xff]  ;;  %1098 = vst.msk [vmem:[%s3509_s2 + $0x120] sm:$0xff] %vm18_vm0, %v1033_v43 }
  0xcc   :  { %1067 = vst.msk [vmem:[%s3509_s2 + $0x28] sm:$0xff] %vm18_vm0, %v1002_v44  ;;  %v760_v42 = vpop.f32.mrf.mxu2 }
  0xcd   :  { %v929_v51 = vpop.f32.mrf.mxu3 }
  0xce   :  { %v683_v52 = vpop.f32.mrf.mxu0  ;;  %v930_v56 = vadd.f32 %v929_v51, %v760_v42 }
  0xcf   :  { %v852_v54 = vpop.f32.mrf.mxu1 }
  0xd0   :  { %v853_v57 = vadd.f32 %v852_v54, %v683_v52  ;;  %v1034_v62 = vadd.f32 %v930_v56, %v120_v55  ;;  %v124_v55 = vld [vmem:[%s3509_s2 + $0x148] sm:$0xff] }
  0xd1   :  { %722 = vmatmul.bf16.gmra.mxu0 %v1629_v49  ;;  %v1645_v49 = vor.u32 %v1885_v46, %v1644_v45  ;;  %v1660_v45 = vld [vmem:[%s3508_s0 + $0xf0] sm:$0xf]  ;;  %v1889_v46 = vld [vmem:[%s3508_s0 + $0xf4] sm:$0xf0] }
  0xd2   :  { %v1003_v1 = vadd.f32 %v853_v57, %v89_v53  ;;  %891 = vmatmul.bf16.gmra.mxu1 %v1633_v50  ;;  %v1649_v50 = vor.u32 %v1884_v47, %v1646_v48  ;;  %v93_v53 = vld [vmem:[%s3509_s2 + $0x50] sm:$0xff]  ;;  %1099 = vst.msk [vmem:[%s3509_s2 + $0x128] sm:$0xff] %vm18_vm0, %v1034_v62  ;;  %802 = vmatmul.bf16.gmra.mxu2 %v1757_v63  ;;  %v1662_v48 = vld [vmem:[%s3508_s0 + $0xf8] sm:$0xf0] }
  0xd3   :  { %v1888_v47 = vld [vmem:[%s3508_s0 + $0xf4] sm:$0xf]  ;;  %v1774_v62 = vld [vmem:[%s3508_s0 + $0x1d8] sm:$0xf0] }
  0xd4   :  { %1068 = vst.msk [vmem:[%s3509_s2 + $0x30] sm:$0xff] %vm18_vm0, %v1003_v1  ;;  %v763_v61 = vpop.f32.mrf.mxu2  ;;  %v1665_v51 = vor.u32 %v1888_v47, %v1662_v48  ;;  %v1920_v48 = vld [vmem:[%s3508_s0 + $0x1f4] sm:$0xf] }
  0xd5   :  { %v932_v3 = vpop.f32.mrf.mxu3 }
  0xd6   :  { %v685_v4 = vpop.f32.mrf.mxu0  ;;  %971 = vmatmul.bf16.gmra.mxu3 %v1761_v2  ;;  %v933_v8 = vadd.f32 %v932_v3, %v763_v61  ;;  %v1916_v61 = vld [vmem:[%s3508_s0 + $0x1d4] sm:$0xf] }
  0xd7   :  { %v854_v6 = vpop.f32.mrf.mxu1  ;;  %v1777_v0 = vor.u32 %v1916_v61, %v1774_v62 }
  0xd8   :  { %v855_v9 = vadd.f32 %v854_v6, %v685_v4  ;;  %v1035_v11 = vadd.f32 %v933_v8, %v121_v7  ;;  %v125_v7 = vld [vmem:[%s3509_s2 + $0x150] sm:$0xff] }
  0xda   :  { %v1004_v12 = vadd.f32 %v855_v9, %v90_v5  ;;  %v94_v5 = vld [vmem:[%s3509_s2 + $0x58] sm:$0xff]  ;;  %1100 = vst.msk [vmem:[%s3509_s2 + $0x130] sm:$0xff] %vm18_vm0, %v1035_v11 }
  0xdc   :  { %1069 = vst.msk [vmem:[%s3509_s2 + $0x38] sm:$0xff] %vm18_vm0, %v1004_v12  ;;  %v765_v10 = vpop.f32.mrf.mxu2 }
  0xdd   :  { %v934_v19 = vpop.f32.mrf.mxu3 }
  0xde   :  { %v688_v20 = vpop.f32.mrf.mxu0  ;;  %v935_v24 = vadd.f32 %v934_v19, %v765_v10  ;;  %v1780_v19 = vld [vmem:[%s3508_s0 + $0x1e0] sm:$0xf] }
  0xdf   :  { %v857_v22 = vpop.f32.mrf.mxu1 }
  0xe0   :  { %v858_v25 = vadd.f32 %v857_v22, %v688_v20  ;;  %v1036_v30 = vadd.f32 %v935_v24, %v122_v23  ;;  %v1918_v23 = vld [vmem:[%s3508_s0 + $0x1e4] sm:$0xf]  ;;  %v1782_v24 = vld [vmem:[%s3508_s0 + $0x1e8] sm:$0xf0] }
  0xe1   :  { %727 = vmatmul.bf16.gmra.mxu0 %v1637_v17  ;;  %v1653_v17 = vor.u32 %v1887_v14, %v1652_v13  ;;  %v99_v13 = vld [vmem:[%s3509_s2 + $0x80] sm:$0xff]  ;;  %v1785_v26 = vor.u32 %v1918_v23, %v1782_v24 }
  0xe2   :  { %v1005_v33 = vadd.f32 %v858_v25, %v91_v21  ;;  %896 = vmatmul.bf16.gmra.mxu1 %v1641_v18  ;;  %v1657_v18 = vor.u32 %v1886_v15, %v1654_v16  ;;  %v95_v21 = vld [vmem:[%s3509_s2 + $0x60] sm:$0xff]  ;;  %1101 = vst.msk [vmem:[%s3509_s2 + $0x138] sm:$0xff] %vm18_vm0, %v1036_v30  ;;  %807 = vmatmul.bf16.gmra.mxu2 %v1765_v31  ;;  %v100_v30 = vld [vmem:[%s3509_s2 + $0x88] sm:$0xff] }
  0xe4   :  { %1070 = vst.msk [vmem:[%s3509_s2 + $0x40] sm:$0xff] %vm18_vm0, %v1005_v33  ;;  %v768_v29 = vpop.f32.mrf.mxu2 }
  0xe5   :  { %v937_v35 = vpop.f32.mrf.mxu3 }
  0xe6   :  { %v690_v36 = vpop.f32.mrf.mxu0  ;;  %976 = vmatmul.bf16.gmra.mxu3 %v1769_v34  ;;  %v938_v40 = vadd.f32 %v937_v35, %v768_v29 }
  0xe7   :  { %v859_v38 = vpop.f32.mrf.mxu1 }
  0xe8   :  { %v860_v41 = vadd.f32 %v859_v38, %v690_v36  ;;  %v1037_v43 = vadd.f32 %v938_v40, %v123_v39  ;;  %v101_v40 = vld [vmem:[%s3509_s2 + $0x90] sm:$0xff] }
  0xea   :  { %v1006_v44 = vadd.f32 %v860_v41, %v92_v37  ;;  %v96_v37 = vld [vmem:[%s3509_s2 + $0x68] sm:$0xff]  ;;  %1102 = vst.msk [vmem:[%s3509_s2 + $0x140] sm:$0xff] %vm18_vm0, %v1037_v43  ;;  %v1921_v43 = vld [vmem:[%s3508_s0 + $0x1f4] sm:$0xf0] }
  0xec   :  { %1071 = vst.msk [vmem:[%s3509_s2 + $0x48] sm:$0xff] %vm18_vm0, %v1006_v44  ;;  %v770_v42 = vpop.f32.mrf.mxu2 }
  0xee   :  { %v693_v52 = vpop.f32.mrf.mxu0 }
  0xef   :  { %v862_v54 = vpop.f32.mrf.mxu1 }
  0xf0   :  { %v863_v57 = vadd.f32 %v862_v54, %v693_v52  ;;  %v939_v52 = vpop.f32.mrf.mxu3 }
  0xf1   :  { %732 = vmatmul.bf16.gmra.mxu0 %v1645_v49  ;;  %v97_v49 = vld [vmem:[%s3509_s2 + $0x70] sm:$0xff]  ;;  %v940_v56 = vadd.f32 %v939_v52, %v770_v42 }
  0xf2   :  { %v1007_v1 = vadd.f32 %v863_v57, %v93_v53  ;;  %901 = vmatmul.bf16.gmra.mxu1 %v1649_v50  ;;  %v1661_v50 = vor.u32 %v1889_v46, %v1660_v45  ;;  %v1772_v57 = vld [vmem:[%s3508_s0 + $0x1d0] sm:$0xf]  ;;  %v128_v45 = vld [vmem:[%s3509_s2 + $0x168] sm:$0xff] }
  0xf3   :  { %v1773_v60 = vor.u32 %v1917_v58, %v1772_v57  ;;  %v1038_v63 = vadd.f32 %v940_v56, %v124_v55  ;;  %v1788_v42 = vld [vmem:[%s3508_s0 + $0x1f0] sm:$0xf]  ;;  %v102_v56 = vld [vmem:[%s3509_s2 + $0x98] sm:$0xff] }
  0xf4   :  { %1072 = vst.msk [vmem:[%s3509_s2 + $0x50] sm:$0xff] %vm18_vm0, %v1007_v1  ;;  %v773_v2 = vpop.f32.mrf.mxu2  ;;  %v1789_v47 = vor.u32 %v1921_v43, %v1788_v42  ;;  %v107_v42 = vld [vmem:[%s3509_s2 + $0xc0] sm:$0xff] }
  0xf5   :  { %1103 = vst.msk [vmem:[%s3509_s2 + $0x148] sm:$0xff] %vm18_vm0, %v1038_v63  ;;  %812 = vmatmul.bf16.gmra.mxu2 %v1773_v60 }
  0xf6   :  { %v695_v4 = vpop.f32.mrf.mxu0  ;;  %981 = vmatmul.bf16.gmra.mxu3 %v1777_v0 }
  0xf7   :  { %v864_v6 = vpop.f32.mrf.mxu1 }
  0xf8   :  { %v865_v9 = vadd.f32 %v864_v6, %v695_v4  ;;  %v942_v3 = vpop.f32.mrf.mxu3 }
  0xf9   :  { %v943_v8 = vadd.f32 %v942_v3, %v773_v2  ;;  %v103_v2 = vld [vmem:[%s3509_s2 + $0xa0] sm:$0xff] }
  0xfa   :  { %v1008_v12 = vadd.f32 %v865_v9, %v94_v5  ;;  %v98_v5 = vld [vmem:[%s3509_s2 + $0x78] sm:$0xff] }
  0xfb   :  { %v1039_v10 = vadd.f32 %v943_v8, %v125_v7 }
  0xfc   :  { %1073 = vst.msk [vmem:[%s3509_s2 + $0x58] sm:$0xff] %vm18_vm0, %v1008_v12  ;;  %v775_v12 = vpop.f32.mrf.mxu2 }
  0xfd   :  { %1104 = vst.msk [vmem:[%s3509_s2 + $0x150] sm:$0xff] %vm18_vm0, %v1039_v10 }
  0xfe   :  { %v698_v20 = vpop.f32.mrf.mxu0 }
  0xff   :  { %v867_v22 = vpop.f32.mrf.mxu1 }
 0x100   :  { %v868_v25 = vadd.f32 %v867_v22, %v698_v20  ;;  %v944_v14 = vpop.f32.mrf.mxu3  ;;  %v1919_v20 = vld [vmem:[%s3508_s0 + $0x1e4] sm:$0xf0] }
 0x101   :  { %737 = vmatmul.bf16.gmra.mxu0 %v1653_v17  ;;  %v126_v17 = vld [vmem:[%s3509_s2 + $0x158] sm:$0xff]  ;;  %v1781_v22 = vor.u32 %v1919_v20, %v1780_v19 }
 0x102   :  { %v1009_v33 = vadd.f32 %v868_v25, %v95_v21  ;;  %906 = vmatmul.bf16.gmra.mxu1 %v1657_v18  ;;  %v945_v18 = vadd.f32 %v944_v14, %v775_v12  ;;  %v104_v12 = vld [vmem:[%s3509_s2 + $0xa8] sm:$0xff] }
 0x104   :  { %1074 = vst.msk [vmem:[%s3509_s2 + $0x60] sm:$0xff] %vm18_vm0, %v1009_v33  ;;  %v1040_v25 = vadd.f32 %v945_v18, %v126_v17  ;;  %v778_v28 = vpop.f32.mrf.mxu2  ;;  %v127_v33 = vld [vmem:[%s3509_s2 + $0x160] sm:$0xff] }
 0x105   :  { %817 = vmatmul.bf16.gmra.mxu2 %v1781_v22  ;;  %v105_v22 = vld [vmem:[%s3509_s2 + $0xb0] sm:$0xff] }
 0x106   :  { %v700_v36 = vpop.f32.mrf.mxu0  ;;  %1105 = vst.msk [vmem:[%s3509_s2 + $0x158] sm:$0xff] %vm18_vm0, %v1040_v25  ;;  %986 = vmatmul.bf16.gmra.mxu3 %v1785_v26  ;;  %v132_v25 = vld [vmem:[%s3509_s2 + $0x188] sm:$0xff] }
 0x107   :  { %v869_v38 = vpop.f32.mrf.mxu1 }
 0x108   :  { %v870_v41 = vadd.f32 %v869_v38, %v700_v36  ;;  %v947_v34 = vpop.f32.mrf.mxu3 }
 0x109   :  { %v948_v35 = vadd.f32 %v947_v34, %v778_v28 }
 0x10a   :  { %v1010_v44 = vadd.f32 %v870_v41, %v96_v37 }
 0x10b   :  { %v1041_v37 = vadd.f32 %v948_v35, %v127_v33  ;;  %v133_v35 = vld [vmem:[%s3509_s2 + $0x190] sm:$0xff] }
 0x10c   :  { %1075 = vst.msk [vmem:[%s3509_s2 + $0x68] sm:$0xff] %vm18_vm0, %v1010_v44  ;;  %v780_v38 = vpop.f32.mrf.mxu2 }
 0x10d   :  { %1106 = vst.msk [vmem:[%s3509_s2 + $0x160] sm:$0xff] %vm18_vm0, %v1041_v37 }
 0x10e   :  { %v703_v53 = vpop.f32.mrf.mxu0 }
 0x10f   :  { %v872_v54 = vpop.f32.mrf.mxu1 }
 0x110   :  { %v873_v59 = vadd.f32 %v872_v54, %v703_v53  ;;  %v949_v46 = vpop.f32.mrf.mxu3 }
 0x111   :  { %742 = vmatmul.bf16.gmra.mxu0 %v1661_v50  ;;  %v950_v50 = vadd.f32 %v949_v46, %v780_v38 }
 0x112   :  { %v1011_v1 = vadd.f32 %v873_v59, %v97_v49  ;;  %911 = vmatmul.bf16.gmra.mxu1 %v1665_v51  ;;  %v1790_v49 = vld [vmem:[%s3508_s0 + $0x1f8] sm:$0xf0]  ;;  %v129_v59 = vld [vmem:[%s3509_s2 + $0x170] sm:$0xff] }
 0x113   :  { %v1793_v51 = vor.u32 %v1920_v48, %v1790_v49  ;;  %v1042_v53 = vadd.f32 %v950_v50, %v128_v45  ;;  %v134_v45 = vld [vmem:[%s3509_s2 + $0x198] sm:$0xff]  ;;  %v1129_v49 = vld [vmem:[%s3509_s2] sm:$0xff] }
 0x114   :  { %1076 = vst.msk [vmem:[%s3509_s2 + $0x70] sm:$0xff] %vm18_vm0, %v1011_v1  ;;  %v783_v54 = vpop.f32.mrf.mxu2 }
 0x115   :  { %822 = vmatmul.bf16.gmra.mxu2 %v1789_v47  ;;  %1107 = vst.msk [vmem:[%s3509_s2 + $0x168] sm:$0xff] %vm18_vm0, %v1042_v53  ;;  %v1130_v47 = vld [vmem:[%s3509_s2 + $0x8] sm:$0xff] }
 0x116   :  { %v705_v4 = vpop.f32.mrf.mxu0  ;;  %991 = vmatmul.bf16.gmra.mxu3 %v1793_v51  ;;  %v1131_v51 = vld [vmem:[%s3509_s2 + $0x10] sm:$0xff]  ;;  %v1329_v53 = vmul.f32 %v1130_v47, %v1130_v47 }
 0x117   :  { %v874_v6 = vpop.f32.mrf.mxu1 }
 0x118   :  { %v875_v9 = vadd.f32 %v874_v6, %v705_v4  ;;  %v952_v60 = vpop.f32.mrf.mxu3 }
 0x119   :  { %v953_v61 = vadd.f32 %v952_v60, %v783_v54  ;;  %v1328_v54 = vmul.f32 %v1129_v49, %v1129_v49  ;;  %v1133_v60 = vld [vmem:[%s3509_s2 + $0x20] sm:$0xff] }
 0x11a   :  { %v1012_v11 = vadd.f32 %v875_v9, %v98_v5  ;;  %v130_v5 = vld [vmem:[%s3509_s2 + $0x178] sm:$0xff] }
 0x11b   :  { %v1043_v63 = vadd.f32 %v953_v61, %v129_v59  ;;  %v1193_v59 = vsel %vm18_vm0, %v1129_v49, 0.0 }
 0x11c   :  { %1077 = vst.msk [vmem:[%s3509_s2 + $0x78] sm:$0xff] %vm18_vm0, %v1012_v11  ;;  %v785_v0 = vpop.f32.mrf.mxu2 }
 0x11d   :  { %1108 = vst.msk [vmem:[%s3509_s2 + $0x170] sm:$0xff] %vm18_vm0, %v1043_v63 }
 0x11e   :  { %v708_v15 = vpop.f32.mrf.mxu0 }
 0x11f   :  { %v877_v16 = vpop.f32.mrf.mxu1 }
 0x120   :  { %v878_v21 = vadd.f32 %v877_v16, %v708_v15  ;;  %v954_v6 = vpop.f32.mrf.mxu3  ;;  %v131_v15 = vld [vmem:[%s3509_s2 + $0x180] sm:$0xff] }
 0x121   :  { %v955_v7 = vadd.f32 %v954_v6, %v785_v0  ;;  %v1393_v0 = vsel %vm18_vm0, %v1329_v53, 0.0  ;;  %v1392_v6 = vsel %vm18_vm0, %v1328_v54, 0.0 }
 0x122   :  { %v1013_v27 = vadd.f32 %v878_v21, %v99_v13 }
 0x123   :  { %v1044_v9 = vadd.f32 %v955_v7, %v130_v5 }
 0x124   :  { %1078 = vst.msk [vmem:[%s3509_s2 + $0x80] sm:$0xff] %vm18_vm0, %v1013_v27  ;;  %v788_v10 = vpop.f32.mrf.mxu2 }
 0x125   :  { %1109 = vst.msk [vmem:[%s3509_s2 + $0x178] sm:$0xff] %vm18_vm0, %v1044_v9 }
 0x126   :  { %v710_v29 = vpop.f32.mrf.mxu0 }
 0x127   :  { %v879_v31 = vpop.f32.mrf.mxu1 }
 0x128   :  { %v880_v32 = vadd.f32 %v879_v31, %v710_v29  ;;  %v957_v16 = vpop.f32.mrf.mxu3 }
 0x129   :  { %v958_v17 = vadd.f32 %v957_v16, %v788_v10  ;;  %v1135_v16 = vld [vmem:[%s3509_s2 + $0x30] sm:$0xff] }
 0x12a   :  { %v1014_v36 = vadd.f32 %v880_v32, %v100_v30  ;;  %v106_v32 = vld [vmem:[%s3509_s2 + $0xb8] sm:$0xff] }
 0x12b   :  { %v1045_v19 = vadd.f32 %v958_v17, %v131_v15 }
 0x12c   :  { %1079 = vst.msk [vmem:[%s3509_s2 + $0x88] sm:$0xff] %vm18_vm0, %v1014_v36  ;;  %v790_v20 = vpop.f32.mrf.mxu2 }
 0x12d   :  { %1110 = vst.msk [vmem:[%s3509_s2 + $0x180] sm:$0xff] %vm18_vm0, %v1045_v19  ;;  %v1200_v19 = vsel %vm18_vm0, %v1133_v60, 0.0 }
 0x12e   :  { %v713_v39 = vpop.f32.mrf.mxu0 }
 0x12f   :  { %v882_v41 = vpop.f32.mrf.mxu1 }
 0x130   :  { %v883_v44 = vadd.f32 %v882_v41, %v713_v39  ;;  %v959_v26 = vpop.f32.mrf.mxu3 }
 0x131   :  { %v960_v27 = vadd.f32 %v959_v26, %v790_v20  ;;  %v1334_v26 = vmul.f32 %v1135_v16, %v1135_v16 }
 0x132   :  { %v1015_v52 = vadd.f32 %v883_v44, %v101_v40 }
 0x133   :  { %v1046_v29 = vadd.f32 %v960_v27, %v132_v25 }
 0x134   :  { %1080 = vst.msk [vmem:[%s3509_s2 + $0x90] sm:$0xff] %vm18_vm0, %v1015_v52 }
 0x135   :  { %1111 = vst.msk [vmem:[%s3509_s2 + $0x188] sm:$0xff] %vm18_vm0, %v1046_v29  ;;  %v793_v30 = vpop.f32.mrf.mxu2 }
 0x136   :  { %v715_v55 = vpop.f32.mrf.mxu0 }
 0x137   :  { %v884_v57 = vpop.f32.mrf.mxu1 }
 0x138   :  { %v885_v58 = vadd.f32 %v884_v57, %v715_v55  ;;  %v962_v36 = vpop.f32.mrf.mxu3  ;;  %v1132_v55 = vld [vmem:[%s3509_s2 + $0x18] sm:$0xff]  ;;  %v1330_v57 = vmul.f32 %v1131_v51, %v1131_v51 }
 0x139   :  { %v963_v37 = vadd.f32 %v962_v36, %v793_v30  ;;  %v1137_v30 = vld [vmem:[%s3509_s2 + $0x40] sm:$0xff] }
 0x13a   :  { %v1016_v62 = vadd.f32 %v885_v58, %v102_v56  ;;  %v1194_v56 = vsel %vm18_vm0, %v1130_v47, 0.0  ;;  %v1395_v10 = vsel %vm18_vm0, %v1330_v57, 0.0  ;;  %v1208_v53 = vsel %vm18_vm0, %v1137_v30, 0.0  ;;  %v1140_v57 = vld [vmem:[%s3509_s2 + $0x58] sm:$0xff] }
 0x13b   :  { %v1047_v39 = vadd.f32 %v963_v37, %v133_v35  ;;  %v1195_v7 = vadd.f32 %v1194_v56, %v1193_v59  ;;  %v1204_v35 = vsel %vm18_vm0, %v1135_v16, 0.0 }
 0x13c   :  { %1081 = vst.msk [vmem:[%s3509_s2 + $0x98] sm:$0xff] %vm18_vm0, %v1016_v62  ;;  %v108_v62 = vld [vmem:[%s3509_s2 + $0xc8] sm:$0xff] }
 0x13d   :  { %1112 = vst.msk [vmem:[%s3509_s2 + $0x190] sm:$0xff] %vm18_vm0, %v1047_v39  ;;  %v795_v40 = vpop.f32.mrf.mxu2 }
 0x13e   :  { %v718_v1 = vpop.f32.mrf.mxu0 }
 0x13f   :  { %v887_v3 = vpop.f32.mrf.mxu1 }
 0x140   :  { %v888_v4 = vadd.f32 %v887_v3, %v718_v1  ;;  %v964_v46 = vpop.f32.mrf.mxu3  ;;  %v1196_v1 = vsel %vm18_vm0, %v1131_v51, 0.0 }
 0x141   :  { %v965_v48 = vadd.f32 %v964_v46, %v795_v40  ;;  %v1197_v15 = vadd.f32 %v1196_v1, %v1195_v7  ;;  %v1336_v46 = vmul.f32 %v1137_v30, %v1137_v30 }
 0x142   :  { %v1017_v8 = vadd.f32 %v888_v4, %v103_v2  ;;  %v1331_v2 = vmul.f32 %v1132_v55, %v1132_v55  ;;  %v135_v4 = vld [vmem:[%s3509_s2 + $0x1a0] sm:$0xff] }
 0x143   :  { %v1048_v52 = vadd.f32 %v965_v48, %v134_v45 }
 0x144   :  { %1082 = vst.msk [vmem:[%s3509_s2 + $0xa0] sm:$0xff] %vm18_vm0, %v1017_v8  ;;  %v1134_v8 = vld [vmem:[%s3509_s2 + $0x28] sm:$0xff] }
 0x145   :  { %1113 = vst.msk [vmem:[%s3509_s2 + $0x198] sm:$0xff] %vm18_vm0, %v1048_v52  ;;  %v798_v58 = vpop.f32.mrf.mxu2  ;;  %v1333_v20 = vmul.f32 %v1134_v8, %v1134_v8  ;;  %v1202_v25 = vsel %vm18_vm0, %v1134_v8, 0.0  ;;  %v137_v8 = vld [vmem:[%s3509_s2 + $0x1b0] sm:$0xff] }
 0x146   :  { %v720_v11 = vpop.f32.mrf.mxu0 }
 0x147   :  { %v889_v13 = vpop.f32.mrf.mxu1 }
 0x148   :  { %v890_v14 = vadd.f32 %v889_v13, %v720_v11  ;;  %v1198_v11 = vsel %vm18_vm0, %v1132_v55, 0.0 }
 0x149   :  { %v967_v5 = vpop.f32.mrf.mxu3 }
 0x14a   :  { %v1018_v18 = vadd.f32 %v890_v14, %v104_v12  ;;  %v968_v9 = vadd.f32 %v967_v5, %v798_v58  ;;  %v1332_v12 = vmul.f32 %v1133_v60, %v1133_v60  ;;  %v1394_v14 = vadd.f32 %v1393_v0, %v1392_v6  ;;  %v1141_v0 = vld [vmem:[%s3509_s2 + $0x60] sm:$0xff] }
 0x14b   :  { %v1407_v58 = vsel %vm18_vm0, %v1336_v46, 0.0  ;;  %v1339_v6 = vmul.f32 %v1140_v57, %v1140_v57  ;;  %v1340_v16 = vmul.f32 %v1141_v0, %v1141_v0  ;;  %v1146_v46 = vld [vmem:[%s3509_s2 + $0x88] sm:$0xff] }
 0x14c   :  { %1083 = vst.msk [vmem:[%s3509_s2 + $0xa8] sm:$0xff] %vm18_vm0, %v1018_v18  ;;  %v1049_v17 = vadd.f32 %v968_v9, %v135_v4  ;;  %v1397_v18 = vsel %vm18_vm0, %v1331_v2, 0.0  ;;  %v110_v2 = vld [vmem:[%s3509_s2 + $0xd8] sm:$0xff] }
 0x14d   :  { %v800_v27 = vpop.f32.mrf.mxu2 }
 0x14e   :  { %v723_v21 = vpop.f32.mrf.mxu0  ;;  %1114 = vst.msk [vmem:[%s3509_s2 + $0x1a0] sm:$0xff] %vm18_vm0, %v1049_v17 }
 0x14f   :  { %v892_v23 = vpop.f32.mrf.mxu1 }
 0x150   :  { %v893_v24 = vadd.f32 %v892_v23, %v723_v21  ;;  %v1396_v21 = vadd.f32 %v1395_v10, %v1394_v14  ;;  %v1136_v23 = vld [vmem:[%s3509_s2 + $0x38] sm:$0xff] }
 0x151   :  { %v1335_v36 = vmul.f32 %v1136_v23, %v1136_v23  ;;  %v969_v39 = vpop.f32.mrf.mxu3  ;;  %v1206_v45 = vsel %vm18_vm0, %v1136_v23, 0.0  ;;  %v1216_v23 = vsel %vm18_vm0, %v1141_v0, 0.0 }
 0x152   :  { %v1019_v28 = vadd.f32 %v893_v24, %v105_v22  ;;  %v1199_v22 = vadd.f32 %v1198_v11, %v1197_v15  ;;  %v1399_v24 = vsel %vm18_vm0, %v1332_v12, 0.0  ;;  %v1142_v12 = vld [vmem:[%s3509_s2 + $0x68] sm:$0xff]  ;;  %v1214_v15 = vsel %vm18_vm0, %v1140_v57, 0.0 }
 0x153   :  { %v1405_v52 = vsel %vm18_vm0, %v1335_v36, 0.0  ;;  %v111_v36 = vld [vmem:[%s3509_s2 + $0xe0] sm:$0xff] }
 0x154   :  { %1084 = vst.msk [vmem:[%s3509_s2 + $0xb0] sm:$0xff] %vm18_vm0, %v1019_v28  ;;  %v1398_v28 = vadd.f32 %v1397_v18, %v1396_v21  ;;  %v1201_v29 = vadd.f32 %v1200_v19, %v1199_v22  ;;  %v1413_v22 = vsel %vm18_vm0, %v1339_v6, 0.0  ;;  %v112_v6 = vld [vmem:[%s3509_s2 + $0xe8] sm:$0xff] }
 0x156   :  { %v725_v31 = vpop.f32.mrf.mxu0  ;;  %v1400_v40 = vadd.f32 %v1399_v24, %v1398_v28  ;;  %v1341_v24 = vmul.f32 %v1142_v12, %v1142_v12  ;;  %v1415_v28 = vsel %vm18_vm0, %v1340_v16, 0.0 }
 0x157   :  { %v894_v33 = vpop.f32.mrf.mxu1 }
 0x158   :  { %v895_v34 = vadd.f32 %v894_v33, %v725_v31 }
 0x159   :  { %v972_v9 = vpop.f32.mrf.mxu3 }
 0x15a   :  { %v1020_v38 = vadd.f32 %v895_v34, %v106_v32  ;;  %v109_v32 = vld [vmem:[%s3509_s2 + $0xd0] sm:$0xff]  ;;  %v1401_v34 = vsel %vm18_vm0, %v1333_v20, 0.0 }
 0x15b   :  { %v1402_v48 = vadd.f32 %v1401_v34, %v1400_v40  ;;  %v1143_v20 = vld [vmem:[%s3509_s2 + $0x70] sm:$0xff]  ;;  %v1145_v34 = vld [vmem:[%s3509_s2 + $0x80] sm:$0xff] }
 0x15c   :  { %1085 = vst.msk [vmem:[%s3509_s2 + $0xb8] sm:$0xff] %vm18_vm0, %v1020_v38  ;;  %v136_v38 = vld [vmem:[%s3509_s2 + $0x1a8] sm:$0xff]  ;;  %v1342_v30 = vmul.f32 %v1143_v20, %v1143_v20  ;;  %v1224_v57 = vsel %vm18_vm0, %v1145_v34, 0.0 }
 0x15e   :  { %v728_v41 = vpop.f32.mrf.mxu0 }
 0x15f   :  { %v897_v43 = vpop.f32.mrf.mxu1 }
 0x160   :  { %v898_v44 = vadd.f32 %v897_v43, %v728_v41  ;;  %v1203_v41 = vadd.f32 %v1202_v25, %v1201_v29  ;;  %v970_v43 = vadd.f32 %v969_v39, %v800_v27  ;;  %v1144_v27 = vld [vmem:[%s3509_s2 + $0x78] sm:$0xff]  ;;  %v1218_v29 = vsel %vm18_vm0, %v1142_v12, 0.0 }
 0x161   :  { %v1220_v39 = vsel %vm18_vm0, %v1143_v20, 0.0  ;;  %v1343_v40 = vmul.f32 %v1144_v27, %v1144_v27 }
 0x162   :  { %v1021_v50 = vadd.f32 %v898_v44, %v107_v42  ;;  %v1138_v42 = vld [vmem:[%s3509_s2 + $0x48] sm:$0xff]  ;;  %v1403_v44 = vsel %vm18_vm0, %v1334_v26, 0.0  ;;  %v1205_v49 = vadd.f32 %v1204_v35, %v1203_v41  ;;  %v1050_v51 = vadd.f32 %v970_v43, %v136_v38  ;;  %v974_v43 = vpop.f32.mrf.mxu3 }
 0x163   :  { %v1337_v54 = vmul.f32 %v1138_v42, %v1138_v42  ;;  %v1404_v55 = vadd.f32 %v1403_v44, %v1402_v48  ;;  %v1210_v59 = vsel %vm18_vm0, %v1138_v42, 0.0  ;;  %v1417_v38 = vsel %vm18_vm0, %v1341_v24, 0.0  ;;  %v138_v42 = vld [vmem:[%s3509_s2 + $0x1b8] sm:$0xff] }
 0x164   :  { %1086 = vst.msk [vmem:[%s3509_s2 + $0xc0] sm:$0xff] %vm18_vm0, %v1021_v50  ;;  %v1139_v50 = vld [vmem:[%s3509_s2 + $0x50] sm:$0xff]  ;;  %v1207_v56 = vadd.f32 %v1206_v45, %v1205_v49  ;;  %v1419_v48 = vsel %vm18_vm0, %v1342_v30, 0.0  ;;  %v1222_v49 = vsel %vm18_vm0, %v1144_v27, 0.0 }
 0x165   :  { %1115 = vst.msk [vmem:[%s3509_s2 + $0x1a8] sm:$0xff] %vm18_vm0, %v1050_v51  ;;  %v1338_v60 = vmul.f32 %v1139_v50, %v1139_v50  ;;  %v1409_v4 = vsel %vm18_vm0, %v1337_v54, 0.0  ;;  %v1212_v5 = vsel %vm18_vm0, %v1139_v50, 0.0  ;;  %v1344_v50 = vmul.f32 %v1145_v34, %v1145_v34  ;;  %v1147_v54 = vld [vmem:[%s3509_s2 + $0x90] sm:$0xff] }
 0x166   :  { %v730_v61 = vpop.f32.mrf.mxu0  ;;  %v1346_v0 = vmul.f32 %v1147_v54, %v1147_v54 }
 0x167   :  { %v899_v63 = vpop.f32.mrf.mxu1  ;;  %v1411_v14 = vsel %vm18_vm0, %v1338_v60, 0.0 }
 0x168   :  { %v900_v3 = vadd.f32 %v899_v63, %v730_v61  ;;  %v803_v61 = vpop.f32.mrf.mxu2  ;;  %v1209_v63 = vadd.f32 %v1208_v53, %v1207_v56  ;;  %v1421_v56 = vsel %vm18_vm0, %v1343_v40, 0.0  ;;  %v1427_v16 = vsel %vm18_vm0, %v1346_v0, 0.0 }
 0x16a   :  { %v1022_v13 = vadd.f32 %v900_v3, %v108_v62  ;;  %v1406_v62 = vadd.f32 %v1405_v52, %v1404_v55  ;;  %v1211_v11 = vadd.f32 %v1210_v59, %v1209_v63  ;;  %v1226_v63 = vsel %vm18_vm0, %v1146_v46, 0.0  ;;  %v977_v12 = vpop.f32.mrf.mxu3 }
 0x16c   :  { %1087 = vst.msk [vmem:[%s3509_s2 + $0xc8] sm:$0xff] %vm18_vm0, %v1022_v13  ;;  %v1408_v10 = vadd.f32 %v1407_v58, %v1406_v62  ;;  %v973_v13 = vadd.f32 %v972_v9, %v803_v61  ;;  %v1213_v19 = vadd.f32 %v1212_v5, %v1211_v11  ;;  %v1345_v58 = vmul.f32 %v1146_v46, %v1146_v46  ;;  %v1148_v61 = vld [vmem:[%s3509_s2 + $0x98] sm:$0xff] }
 0x16d   :  { %v1423_v62 = vsel %vm18_vm0, %v1344_v50, 0.0  ;;  %v1228_v9 = vsel %vm18_vm0, %v1147_v54, 0.0 }
 0x16e   :  { %v733_v31 = vpop.f32.mrf.mxu0  ;;  %v1410_v18 = vadd.f32 %v1409_v4, %v1408_v10  ;;  %v1051_v21 = vadd.f32 %v973_v13, %v137_v8  ;;  %v1215_v26 = vadd.f32 %v1214_v15, %v1213_v19  ;;  %v1149_v4 = vld [vmem:[%s3509_s2 + $0xa0] sm:$0xff]  ;;  %v1425_v8 = vsel %vm18_vm0, %v1345_v58, 0.0  ;;  %v1150_v15 = vld [vmem:[%s3509_s2 + $0xa8] sm:$0xff] }
 0x16f   :  { %v902_v33 = vpop.f32.mrf.mxu1  ;;  %v1347_v10 = vmul.f32 %v1148_v61, %v1148_v61  ;;  %v1232_v24 = vsel %vm18_vm0, %v1149_v4, 0.0  ;;  %v1234_v30 = vsel %vm18_vm0, %v1150_v15, 0.0 }
 0x170   :  { %v903_v37 = vadd.f32 %v902_v33, %v733_v31  ;;  %v1412_v25 = vadd.f32 %v1411_v14, %v1410_v18  ;;  %1116 = vst.msk [vmem:[%s3509_s2 + $0x1b0] sm:$0xff] %vm18_vm0, %v1051_v21  ;;  %v805_v31 = vpop.f32.mrf.mxu2  ;;  %v1217_v33 = vadd.f32 %v1216_v23, %v1215_v26  ;;  %v1348_v18 = vmul.f32 %v1149_v4, %v1149_v4 }
 0x171   :  { %v1429_v23 = vsel %vm18_vm0, %v1347_v10, 0.0  ;;  %v114_v10 = vld [vmem:[%s3509_s2 + $0xf8] sm:$0xff] }
 0x172   :  { %v1023_v47 = vadd.f32 %v903_v37, %v109_v32  ;;  %v1414_v32 = vadd.f32 %v1413_v22, %v1412_v25  ;;  %v1219_v45 = vadd.f32 %v1218_v29, %v1217_v33  ;;  %v1151_v22 = vld [vmem:[%s3509_s2 + $0xb0] sm:$0xff]  ;;  %v1349_v25 = vmul.f32 %v1150_v15, %v1150_v15  ;;  %v979_v46 = vpop.f32.mrf.mxu3 }
 0x173   :  { %v1431_v29 = vsel %vm18_vm0, %v1348_v18, 0.0 }
 0x174   :  { %1088 = vst.msk [vmem:[%s3509_s2 + $0xd0] sm:$0xff] %vm18_vm0, %v1023_v47  ;;  %v1416_v44 = vadd.f32 %v1415_v28, %v1414_v32  ;;  %v975_v47 = vadd.f32 %v974_v43, %v805_v31  ;;  %v1221_v53 = vadd.f32 %v1220_v39, %v1219_v45  ;;  %v1152_v28 = vld [vmem:[%s3509_s2 + $0xb8] sm:$0xff]  ;;  %v1350_v31 = vmul.f32 %v1151_v22, %v1151_v22  ;;  %v140_v45 = vld [vmem:[%s3509_s2 + $0x1c8] sm:$0xff] }
 0x175   :  { %v1433_v40 = vsel %vm18_vm0, %v1349_v25, 0.0 }
 0x176   :  { %v735_v1 = vpop.f32.mrf.mxu0  ;;  %v1418_v52 = vadd.f32 %v1417_v38, %v1416_v44  ;;  %v1052_v55 = vadd.f32 %v975_v47, %v138_v42  ;;  %v1223_v60 = vadd.f32 %v1222_v49, %v1221_v53  ;;  %v1351_v42 = vmul.f32 %v1152_v28, %v1152_v28  ;;  %v139_v44 = vld [vmem:[%s3509_s2 + $0x1c0] sm:$0xff]  ;;  %v1154_v49 = vld [vmem:[%s3509_s2 + $0xc8] sm:$0xff] }
 0x177   :  { %v904_v3 = vpop.f32.mrf.mxu1  ;;  %v1238_v53 = vsel %vm18_vm0, %v1152_v28, 0.0 }
 0x178   :  { %v905_v7 = vadd.f32 %v904_v3, %v735_v1  ;;  %v1420_v59 = vadd.f32 %v1419_v48, %v1418_v52  ;;  %1117 = vst.msk [vmem:[%s3509_s2 + $0x1b8] sm:$0xff] %vm18_vm0, %v1052_v55  ;;  %v808_v1 = vpop.f32.mrf.mxu2  ;;  %v1225_v3 = vadd.f32 %v1224_v57, %v1223_v60  ;;  %v1435_v52 = vsel %vm18_vm0, %v1350_v31, 0.0 }
 0x179   :  { %v978_v39 = vadd.f32 %v977_v12, %v808_v1  ;;  %v1437_v60 = vsel %vm18_vm0, %v1351_v42, 0.0  ;;  %v142_v42 = vld [vmem:[%s3509_s2 + $0x1d8] sm:$0xff] }
 0x17a   :  { %v1024_v17 = vadd.f32 %v905_v7, %v110_v2  ;;  %v1422_v2 = vadd.f32 %v1421_v56, %v1420_v59  ;;  %v1227_v14 = vadd.f32 %v1226_v63, %v1225_v3  ;;  %v1242_v3 = vsel %vm18_vm0, %v1154_v49, 0.0 }
 0x17b   :  { %v1053_v50 = vadd.f32 %v978_v39, %v139_v44  ;;  %v1155_v58 = vld [vmem:[%s3509_s2 + $0xd0] sm:$0xff]  ;;  %v1161_v44 = vld [vmem:[%s3509_s2 + $0x100] sm:$0xff] }
 0x17c   :  { %1089 = vst.msk [vmem:[%s3509_s2 + $0xd8] sm:$0xff] %vm18_vm0, %v1024_v17  ;;  %v1424_v13 = vadd.f32 %v1423_v62, %v1422_v2  ;;  %v1230_v17 = vsel %vm18_vm0, %v1148_v61, 0.0  ;;  %v1229_v21 = vadd.f32 %v1228_v9, %v1227_v14  ;;  %v1353_v62 = vmul.f32 %v1154_v49, %v1154_v49 }
 0x17d   :  { %1118 = vst.msk [vmem:[%s3509_s2 + $0x1c0] sm:$0xff] %vm18_vm0, %v1053_v50  ;;  %v1354_v4 = vmul.f32 %v1155_v58, %v1155_v58  ;;  %v1162_v50 = vld [vmem:[%s3509_s2 + $0x108] sm:$0xff] }
 0x17e   :  { %v738_v35 = vpop.f32.mrf.mxu0  ;;  %v1426_v20 = vadd.f32 %v1425_v8, %v1424_v13  ;;  %v1231_v27 = vadd.f32 %v1230_v17, %v1229_v21  ;;  %v1441_v12 = vsel %vm18_vm0, %v1353_v62, 0.0  ;;  %v1244_v13 = vsel %vm18_vm0, %v1155_v58, 0.0  ;;  %v1163_v58 = vld [vmem:[%s3509_s2 + $0x110] sm:$0xff] }
 0x17f   :  { %v907_v37 = vpop.f32.mrf.mxu1  ;;  %v1361_v62 = vmul.f32 %v1162_v50, %v1162_v50 }
 0x180   :  { %v908_v41 = vadd.f32 %v907_v37, %v738_v35  ;;  %v1428_v26 = vadd.f32 %v1427_v16, %v1426_v20  ;;  %v810_v32 = vpop.f32.mrf.mxu2  ;;  %v1233_v34 = vadd.f32 %v1232_v24, %v1231_v27  ;;  %v1153_v35 = vld [vmem:[%s3509_s2 + $0xc0] sm:$0xff]  ;;  %v113_v37 = vld [vmem:[%s3509_s2 + $0xf0] sm:$0xff]  ;;  %v982_v16 = vpop.f32.mrf.mxu3  ;;  %v1443_v20 = vsel %vm18_vm0, %v1354_v4, 0.0 }
 0x181   :  { %v1352_v54 = vmul.f32 %v1153_v35, %v1153_v35  ;;  %v1240_v61 = vsel %vm18_vm0, %v1153_v35, 0.0 }
 0x182   :  { %v1025_v51 = vadd.f32 %v908_v41, %v111_v36  ;;  %v1430_v33 = vadd.f32 %v1429_v23, %v1428_v26  ;;  %v1236_v41 = vsel %vm18_vm0, %v1151_v22, 0.0  ;;  %v1235_v48 = vadd.f32 %v1234_v30, %v1233_v34 }
 0x183   :  { %v1156_v1 = vld [vmem:[%s3509_s2 + $0xd8] sm:$0xff]  ;;  %v1439_v2 = vsel %vm18_vm0, %v1352_v54, 0.0 }
 0x184   :  { %1090 = vst.msk [vmem:[%s3509_s2 + $0xe0] sm:$0xff] %vm18_vm0, %v1025_v51  ;;  %v1432_v47 = vadd.f32 %v1431_v29, %v1430_v33  ;;  %v980_v51 = vadd.f32 %v979_v46, %v810_v32  ;;  %v1237_v57 = vadd.f32 %v1236_v41, %v1235_v48  ;;  %v1355_v14 = vmul.f32 %v1156_v1, %v1156_v1  ;;  %v141_v41 = vld [vmem:[%s3509_s2 + $0x1d0] sm:$0xff] }
 0x185   :  { %v1246_v21 = vsel %vm18_vm0, %v1156_v1, 0.0  ;;  %v1164_v1 = vld [vmem:[%s3509_s2 + $0x118] sm:$0xff] }
 0x186   :  { %v740_v5 = vpop.f32.mrf.mxu0  ;;  %v1434_v56 = vadd.f32 %v1433_v40, %v1432_v47  ;;  %v1054_v59 = vadd.f32 %v980_v51, %v140_v45  ;;  %v1239_v0 = vadd.f32 %v1238_v53, %v1237_v57  ;;  %v1445_v27 = vsel %vm18_vm0, %v1355_v14, 0.0  ;;  %v1166_v14 = vld [vmem:[%s3509_s2 + $0x128] sm:$0xff] }
 0x187   :  { %v909_v7 = vpop.f32.mrf.mxu1 }
 0x188   :  { %v910_v11 = vadd.f32 %v909_v7, %v740_v5  ;;  %v1436_v63 = vadd.f32 %v1435_v52, %v1434_v56  ;;  %1119 = vst.msk [vmem:[%s3509_s2 + $0x1c8] sm:$0xff] %vm18_vm0, %v1054_v59  ;;  %v813_v5 = vpop.f32.mrf.mxu2  ;;  %v1241_v7 = vadd.f32 %v1240_v61, %v1239_v0  ;;  %v1256_v61 = vsel %vm18_vm0, %v1161_v44, 0.0 }
 0x18a   :  { %v1026_v19 = vadd.f32 %v910_v11, %v112_v6  ;;  %v1438_v6 = vadd.f32 %v1437_v60, %v1436_v63  ;;  %v1243_v18 = vadd.f32 %v1242_v3, %v1241_v7 }
 0x18b   :  { %v1157_v8 = vld [vmem:[%s3509_s2 + $0xe0] sm:$0xff] }
 0x18c   :  { %1091 = vst.msk [vmem:[%s3509_s2 + $0xe8] sm:$0xff] %vm18_vm0, %v1026_v19  ;;  %v1440_v17 = vadd.f32 %v1439_v2, %v1438_v6  ;;  %v1356_v22 = vmul.f32 %v1157_v8, %v1157_v8  ;;  %v1245_v25 = vadd.f32 %v1244_v13, %v1243_v18  ;;  %v1248_v28 = vsel %vm18_vm0, %v1157_v8, 0.0  ;;  %v1165_v8 = vld [vmem:[%s3509_s2 + $0x120] sm:$0xff] }
 0x18d   :  { %v1362_v6 = vmul.f32 %v1163_v58, %v1163_v58  ;;  %v1363_v13 = vmul.f32 %v1164_v1, %v1164_v1  ;;  %v1262_v18 = vsel %vm18_vm0, %v1164_v1, 0.0 }
 0x18e   :  { %v743_v36 = vpop.f32.mrf.mxu0  ;;  %v1442_v24 = vadd.f32 %v1441_v12, %v1440_v17  ;;  %v1247_v31 = vadd.f32 %v1246_v21, %v1245_v25  ;;  %v1447_v32 = vsel %vm18_vm0, %v1356_v22, 0.0  ;;  %v1260_v12 = vsel %vm18_vm0, %v1163_v58, 0.0 }
 0x18f   :  { %v912_v38 = vpop.f32.mrf.mxu1  ;;  %v1459_v17 = vsel %vm18_vm0, %v1362_v6, 0.0  ;;  %v1365_v25 = vmul.f32 %v1166_v14, %v1166_v14 }
 0x190   :  { %v913_v43 = vadd.f32 %v912_v38, %v743_v36  ;;  %v1444_v30 = vadd.f32 %v1443_v20, %v1442_v24  ;;  %v815_v35 = vpop.f32.mrf.mxu2  ;;  %v983_v38 = vadd.f32 %v982_v16, %v813_v5  ;;  %v1258_v5 = vsel %vm18_vm0, %v1162_v50, 0.0  ;;  %v1167_v20 = vld [vmem:[%s3509_s2 + $0x130] sm:$0xff] }
 0x191   :  { %v1264_v24 = vsel %vm18_vm0, %v1165_v8, 0.0 }
 0x192   :  { %v1027_v55 = vadd.f32 %v913_v43, %v113_v37  ;;  %v1446_v36 = vadd.f32 %v1445_v27, %v1444_v30  ;;  %v1249_v37 = vadd.f32 %v1248_v28, %v1247_v31  ;;  %v984_v43 = vpop.f32.mrf.mxu3  ;;  %v1055_v47 = vadd.f32 %v983_v38, %v141_v41  ;;  %v1168_v27 = vld [vmem:[%s3509_s2 + $0x138] sm:$0xff] }
 0x193   :  { %v1158_v19 = vld [vmem:[%s3509_s2 + $0xe8] sm:$0xff]  ;;  %v985_v48 = vadd.f32 %v984_v43, %v815_v35  ;;  %v1268_v43 = vsel %vm18_vm0, %v1167_v20, 0.0  ;;  %v1270_v50 = vsel %vm18_vm0, %v1168_v27, 0.0 }
 0x194   :  { %1092 = vst.msk [vmem:[%s3509_s2 + $0xf0] sm:$0xff] %vm18_vm0, %v1027_v55  ;;  %v1357_v29 = vmul.f32 %v1158_v19, %v1158_v19  ;;  %v1250_v33 = vsel %vm18_vm0, %v1158_v19, 0.0  ;;  %v1448_v45 = vadd.f32 %v1447_v32, %v1446_v36  ;;  %v1360_v55 = vmul.f32 %v1161_v44, %v1161_v44  ;;  %v144_v35 = vld [vmem:[%s3509_s2 + $0x1e8] sm:$0xff] }
 0x195   :  { %v1251_v46 = vadd.f32 %v1250_v33, %v1249_v37  ;;  %1120 = vst.msk [vmem:[%s3509_s2 + $0x1d0] sm:$0xff] %vm18_vm0, %v1055_v47  ;;  %v1056_v54 = vadd.f32 %v985_v48, %v142_v42  ;;  %v1364_v19 = vmul.f32 %v1165_v8, %v1165_v8  ;;  %v1266_v32 = vsel %vm18_vm0, %v1166_v14, 0.0  ;;  %v1169_v37 = vld [vmem:[%s3509_s2 + $0x140] sm:$0xff]  ;;  %v1174_v8 = vld [vmem:[%s3509_s2 + $0x168] sm:$0xff]  ;;  %v1175_v14 = vld [vmem:[%s3509_s2 + $0x170] sm:$0xff] }
 0x196   :  { %v745_v9 = vpop.f32.mrf.mxu0  ;;  %v1449_v39 = vsel %vm18_vm0, %v1357_v29, 0.0  ;;  %v1455_v4 = vsel %vm18_vm0, %v1360_v55, 0.0  ;;  %v1366_v33 = vmul.f32 %v1167_v20, %v1167_v20  ;;  %v1465_v42 = vsel %vm18_vm0, %v1365_v25, 0.0 }
 0x197   :  { %v914_v11 = vpop.f32.mrf.mxu1  ;;  %v1450_v51 = vadd.f32 %v1449_v39, %v1448_v45  ;;  %1121 = vst.msk [vmem:[%s3509_s2 + $0x1d8] sm:$0xff] %vm18_vm0, %v1056_v54  ;;  %v1463_v31 = vsel %vm18_vm0, %v1364_v19, 0.0  ;;  %v1367_v44 = vmul.f32 %v1168_v27, %v1168_v27  ;;  %v1170_v45 = vld [vmem:[%s3509_s2 + $0x148] sm:$0xff]  ;;  %v1373_v19 = vmul.f32 %v1174_v8, %v1174_v8 }
 0x198   :  { %v915_v15 = vadd.f32 %v914_v11, %v745_v9  ;;  %v818_v0 = vpop.f32.mrf.mxu2  ;;  %v1457_v11 = vsel %vm18_vm0, %v1361_v62, 0.0  ;;  %v1374_v27 = vmul.f32 %v1175_v14, %v1175_v14 }
 0x199   :  { %v1469_v55 = vsel %vm18_vm0, %v1367_v44, 0.0 }
 0x19a   :  { %v1028_v23 = vadd.f32 %v915_v15, %v114_v10  ;;  %v987_v7 = vpop.f32.mrf.mxu3 }
 0x19b   :  { %v1159_v26 = vld [vmem:[%s3509_s2 + $0xf0] sm:$0xff]  ;;  %v988_v30 = vadd.f32 %v987_v7, %v818_v0 }
 0x19c   :  { %1093 = vst.msk [vmem:[%s3509_s2 + $0xf8] sm:$0xff] %vm18_vm0, %v1028_v23  ;;  %v1358_v34 = vmul.f32 %v1159_v26, %v1159_v26  ;;  %v1252_v40 = vsel %vm18_vm0, %v1159_v26, 0.0  ;;  %v1461_v23 = vsel %vm18_vm0, %v1363_v13, 0.0 }
 0x19d   :  { %v1253_v52 = vadd.f32 %v1252_v40, %v1251_v46 }
 0x19e   :  { %v1451_v49 = vsel %vm18_vm0, %v1358_v34, 0.0  ;;  %v143_v34 = vld [vmem:[%s3509_s2 + $0x1e0] sm:$0xff] }
 0x19f   :  { %v1452_v59 = vadd.f32 %v1451_v49, %v1450_v51  ;;  %v1057_v40 = vadd.f32 %v988_v30, %v143_v34  ;;  %v1467_v49 = vsel %vm18_vm0, %v1366_v33, 0.0  ;;  %v1368_v51 = vmul.f32 %v1169_v37, %v1169_v37 }
 0x1a0   :  { %v820_v26 = vpop.f32.mrf.mxu2 }
 0x1a1   :  { %1122 = vst.msk [vmem:[%s3509_s2 + $0x1e0] sm:$0xff] %vm18_vm0, %v1057_v40  ;;  %v1471_v62 = vsel %vm18_vm0, %v1368_v51, 0.0 }
 0x1a2   :  { %v989_v36 = vpop.f32.mrf.mxu3 }
 0x1a3   :  { %v1160_v53 = vld [vmem:[%s3509_s2 + $0xf8] sm:$0xff]  ;;  %v990_v41 = vadd.f32 %v989_v36, %v820_v26  ;;  %v1282_v26 = vsel %vm18_vm0, %v1174_v8, 0.0  ;;  %v1481_v36 = vsel %vm18_vm0, %v1373_v19, 0.0 }
 0x1a4   :  { %v1254_v56 = vsel %vm18_vm0, %v1160_v53, 0.0  ;;  %v1359_v57 = vmul.f32 %v1160_v53, %v1160_v53 }
 0x1a5   :  { %v1255_v60 = vadd.f32 %v1254_v56, %v1253_v52  ;;  %v1058_v48 = vadd.f32 %v990_v41, %v144_v35  ;;  %v1171_v52 = vld [vmem:[%s3509_s2 + $0x150] sm:$0xff]  ;;  %v1272_v56 = vsel %vm18_vm0, %v1169_v37, 0.0  ;;  %v1284_v37 = vsel %vm18_vm0, %v1175_v14, 0.0 }
 0x1a6   :  { %v1453_v63 = vsel %vm18_vm0, %v1359_v57, 0.0  ;;  %v1369_v57 = vmul.f32 %v1170_v45, %v1170_v45  ;;  %v1370_v0 = vmul.f32 %v1171_v52, %v1171_v52  ;;  %v1276_v6 = vsel %vm18_vm0, %v1171_v52, 0.0  ;;  %v1180_v52 = vld [vmem:[%s3509_s2 + $0x198] sm:$0xff] }
 0x1a7   :  { %v1257_v2 = vadd.f32 %v1256_v61, %v1255_v60  ;;  %v1454_v3 = vadd.f32 %v1453_v63, %v1452_v59  ;;  %1123 = vst.msk [vmem:[%s3509_s2 + $0x1e8] sm:$0xff] %vm18_vm0, %v1058_v48  ;;  %v1172_v59 = vld [vmem:[%s3509_s2 + $0x158] sm:$0xff]  ;;  %v1274_v63 = vsel %vm18_vm0, %v1170_v45, 0.0 }
 0x1a8   :  { %v823_v58 = vpop.f32.mrf.mxu2  ;;  %v1371_v7 = vmul.f32 %v1172_v59, %v1172_v59 }
 0x1a9   :  { %v1259_v9 = vadd.f32 %v1258_v5, %v1257_v2  ;;  %v1456_v10 = vadd.f32 %v1455_v4, %v1454_v3  ;;  %v1173_v2 = vld [vmem:[%s3509_s2 + $0x160] sm:$0xff]  ;;  %v1473_v5 = vsel %vm18_vm0, %v1369_v57, 0.0 }
 0x1aa   :  { %v992_v1 = vpop.f32.mrf.mxu3  ;;  %v1372_v13 = vmul.f32 %v1173_v2, %v1173_v2 }
 0x1ab   :  { %v1261_v15 = vadd.f32 %v1260_v12, %v1259_v9  ;;  %v1458_v16 = vadd.f32 %v1457_v11, %v1456_v10  ;;  %v1475_v11 = vsel %vm18_vm0, %v1370_v0, 0.0  ;;  %v1278_v12 = vsel %vm18_vm0, %v1172_v59, 0.0  ;;  %v1182_v0 = vld [vmem:[%s3509_s2 + $0x1a8] sm:$0xff] }
 0x1ac   :  { %v1479_v25 = vsel %vm18_vm0, %v1372_v13, 0.0 }
 0x1ad   :  { %v1263_v21 = vadd.f32 %v1262_v18, %v1261_v15  ;;  %v1460_v22 = vadd.f32 %v1459_v17, %v1458_v16  ;;  %v1477_v17 = vsel %vm18_vm0, %v1371_v7, 0.0  ;;  %v1280_v18 = vsel %vm18_vm0, %v1173_v2, 0.0 }
 0x1af   :  { %v1265_v28 = vadd.f32 %v1264_v24, %v1263_v21  ;;  %v1462_v29 = vadd.f32 %v1461_v23, %v1460_v22  ;;  %v1176_v21 = vld [vmem:[%s3509_s2 + $0x178] sm:$0xff]  ;;  %v993_v24 = vadd.f32 %v992_v1, %v823_v58  ;;  %v1181_v58 = vld [vmem:[%s3509_s2 + $0x1a0] sm:$0xff] }
 0x1b0   :  { %v825_v20 = vpop.f32.mrf.mxu2  ;;  %v1286_v44 = vsel %vm18_vm0, %v1176_v21, 0.0 }
 0x1b1   :  { %v1267_v38 = vadd.f32 %v1266_v32, %v1265_v28  ;;  %v1464_v39 = vadd.f32 %v1463_v31, %v1462_v29  ;;  %v145_v28 = vld [vmem:[%s3509_s2 + $0x1f0] sm:$0xff]  ;;  %v146_v29 = vld [vmem:[%s3509_s2 + $0x1f8] sm:$0xff]  ;;  %v1177_v31 = vld [vmem:[%s3509_s2 + $0x180] sm:$0xff] }
 0x1b2   :  { %v994_v30 = vpop.f32.mrf.mxu3  ;;  %v1059_v34 = vadd.f32 %v993_v24, %v145_v28  ;;  %v1376_v45 = vmul.f32 %v1177_v31, %v1177_v31 }
 0x1b3   :  { %v1269_v46 = vadd.f32 %v1268_v43, %v1267_v38  ;;  %v1466_v47 = vadd.f32 %v1465_v42, %v1464_v39  ;;  %v995_v35 = vadd.f32 %v994_v30, %v825_v20  ;;  %v1375_v38 = vmul.f32 %v1176_v21, %v1176_v21  ;;  %v1178_v39 = vld [vmem:[%s3509_s2 + $0x188] sm:$0xff] }
 0x1b4   :  { %1124 = vst.msk [vmem:[%s3509_s2 + $0x1f0] sm:$0xff] %vm18_vm0, %v1059_v34  ;;  %v1483_v43 = vsel %vm18_vm0, %v1374_v27, 0.0  ;;  %v1377_v51 = vmul.f32 %v1178_v39, %v1178_v39 }
 0x1b5   :  { %v1271_v53 = vadd.f32 %v1270_v50, %v1269_v46  ;;  %v1468_v54 = vadd.f32 %v1467_v49, %v1466_v47  ;;  %v1060_v42 = vadd.f32 %v995_v35, %v146_v29  ;;  %v1179_v46 = vld [vmem:[%s3509_s2 + $0x190] sm:$0xff]  ;;  %v1485_v49 = vsel %vm18_vm0, %v1375_v38, 0.0  ;;  %v1188_v38 = vld [vmem:[%s3509_s2 + $0x1d8] sm:$0xff] }
 0x1b6   :  { %v1288_v50 = vsel %vm18_vm0, %v1177_v31, 0.0  ;;  %v1378_v57 = vmul.f32 %v1179_v46, %v1179_v46 }
 0x1b7   :  { %v1273_v60 = vadd.f32 %v1272_v56, %v1271_v53  ;;  %v1470_v61 = vadd.f32 %v1469_v55, %v1468_v54  ;;  %1125 = vst.msk [vmem:[%s3509_s2 + $0x1f8] sm:$0xff] %vm18_vm0, %v1060_v42  ;;  %v1487_v55 = vsel %vm18_vm0, %v1376_v45, 0.0  ;;  %v1290_v56 = vsel %vm18_vm0, %v1178_v39, 0.0 }
 0x1b9   :  { %v1275_v3 = vadd.f32 %v1274_v63, %v1273_v60  ;;  %v1472_v4 = vadd.f32 %v1471_v62, %v1470_v61  ;;  %v1489_v61 = vsel %vm18_vm0, %v1377_v51, 0.0  ;;  %v1292_v62 = vsel %vm18_vm0, %v1179_v46, 0.0 }
 0x1ba   :  { %v1379_v63 = vmul.f32 %v1180_v52, %v1180_v52 }
 0x1bb   :  { %v1277_v9 = vadd.f32 %v1276_v6, %v1275_v3  ;;  %v1474_v10 = vadd.f32 %v1473_v5, %v1472_v4  ;;  %v1491_v3 = vsel %vm18_vm0, %v1378_v57, 0.0  ;;  %v1294_v4 = vsel %vm18_vm0, %v1180_v52, 0.0  ;;  %v1183_v6 = vld [vmem:[%s3509_s2 + $0x1b0] sm:$0xff] }
 0x1bc   :  { %v1380_v5 = vmul.f32 %v1181_v58, %v1181_v58  ;;  %v1310_v52 = vsel %vm18_vm0, %v1188_v38, 0.0 }
 0x1bd   :  { %v1279_v15 = vadd.f32 %v1278_v12, %v1277_v9  ;;  %v1476_v16 = vadd.f32 %v1475_v11, %v1474_v10  ;;  %v1493_v9 = vsel %vm18_vm0, %v1379_v63, 0.0  ;;  %v1296_v10 = vsel %vm18_vm0, %v1181_v58, 0.0  ;;  %v1184_v12 = vld [vmem:[%s3509_s2 + $0x1b8] sm:$0xff] }
 0x1be   :  { %v1381_v11 = vmul.f32 %v1182_v0, %v1182_v0  ;;  %v1302_v28 = vsel %vm18_vm0, %v1184_v12, 0.0 }
 0x1bf   :  { %v1478_v22 = vadd.f32 %v1477_v17, %v1476_v16  ;;  %v1281_v23 = vadd.f32 %v1280_v18, %v1279_v15  ;;  %v1495_v15 = vsel %vm18_vm0, %v1380_v5, 0.0  ;;  %v1298_v16 = vsel %vm18_vm0, %v1182_v0, 0.0  ;;  %v1185_v18 = vld [vmem:[%s3509_s2 + $0x1c0] sm:$0xff] }
 0x1c0   :  { %v1382_v17 = vmul.f32 %v1183_v6, %v1183_v6  ;;  %v1497_v21 = vsel %vm18_vm0, %v1381_v11, 0.0  ;;  %v1384_v29 = vmul.f32 %v1185_v18, %v1185_v18  ;;  %v1304_v34 = vsel %vm18_vm0, %v1185_v18, 0.0 }
 0x1c1   :  { %v1283_v32 = vadd.f32 %v1282_v26, %v1281_v23  ;;  %v1480_v33 = vadd.f32 %v1479_v25, %v1478_v22  ;;  %v1300_v22 = vsel %vm18_vm0, %v1183_v6, 0.0  ;;  %v1383_v23 = vmul.f32 %v1184_v12, %v1184_v12  ;;  %v1186_v26 = vld [vmem:[%s3509_s2 + $0x1c8] sm:$0xff] }
 0x1c2   :  { %v1499_v27 = vsel %vm18_vm0, %v1382_v17, 0.0  ;;  %v1385_v35 = vmul.f32 %v1186_v26, %v1186_v26  ;;  %v1503_v39 = vsel %vm18_vm0, %v1384_v29, 0.0 }
 0x1c3   :  { %v1285_v40 = vadd.f32 %v1284_v37, %v1283_v32  ;;  %v1482_v41 = vadd.f32 %v1481_v36, %v1480_v33  ;;  %v1187_v32 = vld [vmem:[%s3509_s2 + $0x1d0] sm:$0xff]  ;;  %v1501_v33 = vsel %vm18_vm0, %v1383_v23, 0.0 }
 0x1c4   :  { %v1505_v45 = vsel %vm18_vm0, %v1385_v35, 0.0  ;;  %v1308_v46 = vsel %vm18_vm0, %v1187_v32, 0.0 }
 0x1c5   :  { %v1287_v47 = vadd.f32 %v1286_v44, %v1285_v40  ;;  %v1484_v48 = vadd.f32 %v1483_v43, %v1482_v41  ;;  %v1306_v40 = vsel %vm18_vm0, %v1186_v26, 0.0  ;;  %v1386_v41 = vmul.f32 %v1187_v32, %v1187_v32  ;;  %v1189_v44 = vld [vmem:[%s3509_s2 + $0x1e0] sm:$0xff] }
 0x1c6   :  { %v1312_v58 = vsel %vm18_vm0, %v1189_v44, 0.0 }
 0x1c7   :  { %v1289_v53 = vadd.f32 %v1288_v50, %v1287_v47  ;;  %v1486_v54 = vadd.f32 %v1485_v49, %v1484_v48  ;;  %v1387_v47 = vmul.f32 %v1188_v38, %v1188_v38  ;;  %v1190_v50 = vld [vmem:[%s3509_s2 + $0x1e8] sm:$0xff]  ;;  %v1507_v51 = vsel %vm18_vm0, %v1386_v41, 0.0 }
 0x1c8   :  { %v1314_v0 = vsel %vm18_vm0, %v1190_v50, 0.0 }
 0x1c9   :  { %v1291_v59 = vadd.f32 %v1290_v56, %v1289_v53  ;;  %v1488_v60 = vadd.f32 %v1487_v55, %v1486_v54  ;;  %v1388_v53 = vmul.f32 %v1189_v44, %v1189_v44  ;;  %v1191_v56 = vld [vmem:[%s3509_s2 + $0x1f0] sm:$0xff]  ;;  %v1509_v57 = vsel %vm18_vm0, %v1387_v47, 0.0 }
 0x1ca   :  { %v1316_v5 = vsel %vm18_vm0, %v1191_v56, 0.0 }
 0x1cb   :  { %v1293_v1 = vadd.f32 %v1292_v62, %v1291_v59  ;;  %v1490_v2 = vadd.f32 %v1489_v61, %v1488_v60  ;;  %v1389_v59 = vmul.f32 %v1190_v50, %v1190_v50  ;;  %v1192_v62 = vld [vmem:[%s3509_s2 + $0x1f8] sm:$0xff]  ;;  %v1511_v63 = vsel %vm18_vm0, %v1388_v53, 0.0 }
 0x1cc   :  { %v1391_v6 = vmul.f32 %v1192_v62, %v1192_v62 }
 0x1cd   :  { %v1295_v7 = vadd.f32 %v1294_v4, %v1293_v1  ;;  %v1492_v8 = vadd.f32 %v1491_v3, %v1490_v2  ;;  %v1390_v1 = vmul.f32 %v1191_v56, %v1191_v56  ;;  %v1513_v4 = vsel %vm18_vm0, %v1389_v59, 0.0 }
 0x1cf   :  { %v1297_v13 = vadd.f32 %v1296_v10, %v1295_v7  ;;  %v1494_v14 = vadd.f32 %v1493_v9, %v1492_v8  ;;  %v1515_v9 = vsel %vm18_vm0, %v1390_v1, 0.0  ;;  %v1318_v10 = vsel %vm18_vm0, %v1192_v62, 0.0 }
 0x1d1   :  { %v1299_v19 = vadd.f32 %v1298_v16, %v1297_v13  ;;  %v1496_v20 = vadd.f32 %v1495_v15, %v1494_v14  ;;  %v1517_v13 = vsel %vm18_vm0, %v1391_v6, 0.0 }
 0x1d3   :  { %v1301_v24 = vadd.f32 %v1300_v22, %v1299_v19  ;;  %v1498_v25 = vadd.f32 %v1497_v21, %v1496_v20 }
 0x1d5   :  { %v1303_v30 = vadd.f32 %v1302_v28, %v1301_v24  ;;  %v1500_v31 = vadd.f32 %v1499_v27, %v1498_v25 }
 0x1d7   :  { %v1305_v36 = vadd.f32 %v1304_v34, %v1303_v30  ;;  %v1502_v37 = vadd.f32 %v1501_v33, %v1500_v31 }
 0x1d9   :  { %v1504_v42 = vadd.f32 %v1503_v39, %v1502_v37  ;;  %v1307_v43 = vadd.f32 %v1306_v40, %v1305_v36 }
 0x1db   :  { %v1506_v48 = vadd.f32 %v1505_v45, %v1504_v42  ;;  %v1309_v49 = vadd.f32 %v1308_v46, %v1307_v43 }
 0x1dd   :  { %v1508_v54 = vadd.f32 %v1507_v51, %v1506_v48  ;;  %v1311_v55 = vadd.f32 %v1310_v52, %v1309_v49 }
 0x1df   :  { %v1510_v60 = vadd.f32 %v1509_v57, %v1508_v54  ;;  %v1313_v61 = vadd.f32 %v1312_v58, %v1311_v55 }
 0x1e1   :  { %v1512_v2 = vadd.f32 %v1511_v63, %v1510_v60  ;;  %v1315_v3 = vadd.f32 %v1314_v0, %v1313_v61 }
 0x1e3   :  { %v1514_v7 = vadd.f32 %v1513_v4, %v1512_v2  ;;  %v1317_v8 = vadd.f32 %v1316_v5, %v1315_v3 }
 0x1e5   :  { %v1516_v11 = vadd.f32 %v1515_v9, %v1514_v7  ;;  %v1319_v12 = vadd.f32 %v1318_v10, %v1317_v8 }
 0x1e7   :  { %v1320_v14 = vrot.slane %v1319_v12, 4  ;;  %v1518_v15 = vadd.f32 %v1517_v13, %v1516_v11 }
 0x1e9   :  { %v1321_v16 = vadd.f32 %v1320_v14, %v1319_v12  ;;  %v1519_v17 = vrot.slane %v1518_v15, 4 }
 0x1eb   :  { %v1322_v18 = vrot.slane %v1321_v16, 2  ;;  %v1520_v19 = vadd.f32 %v1519_v17, %v1518_v15 }
 0x1ed   :  { %v1323_v20 = vadd.f32 %v1322_v18, %v1321_v16  ;;  %v1521_v21 = vrot.slane %v1520_v19, 2 }
 0x1ef   :  { %v1324_v22 = vrot.slane %v1323_v20, 1  ;;  %v1522_v23 = vadd.f32 %v1521_v21, %v1520_v19 }
 0x1f1   :  { %v1325_v24 = vadd.f32 %v1324_v22, %v1323_v20  ;;  %v1523_v25 = vrot.slane %v1522_v23, 1 }
 0x1f3   :  { %1327 = vst.msk [vmem:[%s3510_s3] sm:$0x1] %vm1326_vm1, %v1325_v24  ;;  %v1524_v26 = vadd.f32 %v1523_v25, %v1522_v23 }
 0x1f5   :  { %1525 = vst.msk [vmem:[%s3511_s4] sm:$0x1] %vm1326_vm1, %v1524_v26 }

// kernel: discriminator_forward.12
= control target key start
LH: loop header
LB: loop body
LE: loop exit
PB: predicated region body
PF: predicated region fallthrough
CT: control target
= control target key end

     0   :  { %vm470_vm0 = vcmask 257024   ;;  %s1149_s0 = inlined_call_operand.vmem [shape: f32[512,32], index: 0, kind: input, shape index: {}]   ;;  %s1150_s1 = inlined_call_operand.vmem [shape: f32[1,32], index: 1, kind: input, shape index: {}]   ;;  %s1151_s2 = inlined_call_operand.vmem [shape: f32[1,32], index: 2, kind: input, shape index: {}]   ;;  %s1152_s3 = inlined_call_operand.vmem [shape: bf16[512,32], index: 3, kind: output, shape index: {}]  }
   0x1   :  { %v14_v0 = vld [vmem:[%s1149_s0] sm:$0xff]  ;;  %v15_v3 = vld [vmem:[%s1149_s0 + $0x8] sm:$0xff]  ;;  %v16_v6 = vld [vmem:[%s1149_s0 + $0x10] sm:$0xff] }
   0x2   :  { %v567_v1 = vld [vmem:[%s1150_s1] ss:$0 sm:$0xff]  ;;  %v17_v7 = vld [vmem:[%s1149_s0 + $0x18] sm:$0xff]  ;;  %v19_v12 = vld [vmem:[%s1149_s0 + $0x28] sm:$0xff] }
   0x3   :  { %v572_v2 = vld [vmem:[%s1151_s2] ss:$0 sm:$0xff]  ;;  %v82_v4 = vmul.f32 %v567_v1, %v14_v0  ;;  %v83_v5 = vmul.f32 %v567_v1, %v15_v3  ;;  %v84_v9 = vmul.f32 %v567_v1, %v16_v6  ;;  %v85_v10 = vmul.f32 %v567_v1, %v17_v7  ;;  %v20_v13 = vld [vmem:[%s1149_s0 + $0x30] sm:$0xff]  ;;  %v21_v14 = vld [vmem:[%s1149_s0 + $0x38] sm:$0xff] }
   0x4   :  { %v18_v8 = vld [vmem:[%s1149_s0 + $0x20] sm:$0xff]  ;;  %v87_v17 = vmul.f32 %v567_v1, %v19_v12  ;;  %v88_v18 = vmul.f32 %v567_v1, %v20_v13  ;;  %v89_v22 = vmul.f32 %v567_v1, %v21_v14  ;;  %v23_v35 = vld [vmem:[%s1149_s0 + $0x48] sm:$0xff]  ;;  %v24_v36 = vld [vmem:[%s1149_s0 + $0x50] sm:$0xff] }
   0x5   :  { %v86_v11 = vmul.f32 %v567_v1, %v18_v8  ;;  %v150_v15 = vadd.f32 %v572_v2, %v82_v4  ;;  %v151_v16 = vadd.f32 %v572_v2, %v83_v5  ;;  %v152_v19 = vadd.f32 %v572_v2, %v84_v9  ;;  %v22_v30 = vld [vmem:[%s1149_s0 + $0x40] sm:$0xff]  ;;  %v25_v54 = vld [vmem:[%s1149_s0 + $0x58] sm:$0xff]  ;;  %v27_v62 = vld [vmem:[%s1149_s0 + $0x68] sm:$0xff] }
   0x6   :  { %v153_v20 = vadd.f32 %v572_v2, %v85_v10  ;;  %v155_v40 = vadd.f32 %v572_v2, %v87_v17  ;;  %v156_v42 = vadd.f32 %v572_v2, %v88_v18  ;;  %v157_v43 = vadd.f32 %v572_v2, %v89_v22  ;;  %v26_v58 = vld [vmem:[%s1149_s0 + $0x60] sm:$0xff]  ;;  %v28_v63 = vld [vmem:[%s1149_s0 + $0x70] sm:$0xff]  ;;  %v29_v5 = vld [vmem:[%s1149_s0 + $0x78] sm:$0xff] }
   0x7   :  { %v154_v21 = vadd.f32 %v572_v2, %v86_v11  ;;  %vm214_vm1 = vcmp.ge.f32.partialorder %v150_v15, 0.0  ;;  %v278_v23 = vmul.f32 0.2, %v150_v15  ;;  %vm215_vm2 = vcmp.ge.f32.partialorder %v151_v16, 0.0  ;;  %v30_v10 = vld [vmem:[%s1149_s0 + $0x80] sm:$0xff]  ;;  %v31_v11 = vld [vmem:[%s1149_s0 + $0x88] sm:$0xff] }
   0x8   :  { %v279_v24 = vmul.f32 0.2, %v151_v16  ;;  %vm216_vm3 = vcmp.ge.f32.partialorder %v152_v19, 0.0  ;;  %v280_v25 = vmul.f32 0.2, %v152_v19  ;;  %vm217_vm4 = vcmp.ge.f32.partialorder %v153_v20, 0.0 }
   0x9   :  { %v281_v26 = vmul.f32 0.2, %v153_v20  ;;  %v342_v27 = vsel %vm214_vm1, %v150_v15, %v278_v23  ;;  %vm218_vm5 = vcmp.ge.f32.partialorder %v154_v21, 0.0  ;;  %v282_v29 = vmul.f32 0.2, %v154_v21 }
   0xa   :  { %v343_v28 = vsel %vm215_vm2, %v151_v16, %v279_v24  ;;  %v406_v31 = vpack.c.bf16 %v342_v27, %v342_v27  ;;  %v344_v33 = vsel %vm216_vm3, %v152_v19, %v280_v25  ;;  %v90_v44 = vmul.f32 %v567_v1, %v22_v30 }
   0xb   :  { %v407_v32 = vpack.c.bf16 %v343_v28, %v343_v28  ;;  %v345_v34 = vsel %vm217_vm4, %v153_v20, %v281_v26  ;;  %v408_v37 = vpack.c.bf16 %v344_v33, %v344_v33  ;;  %v346_v39 = vsel %vm218_vm5, %v154_v21, %v282_v29 }
   0xc   :  { %v409_v38 = vpack.c.bf16 %v345_v34, %v345_v34  ;;  %471 = vst.msk [vmem:[%s1152_s3] sm:$0xf] %vm470_vm0, %v406_v31  ;;  %v410_v41 = vpack.c.bf16 %v346_v39, %v346_v39  ;;  %vm219_vm6 = vcmp.ge.f32.partialorder %v155_v40, 0.0  ;;  %v283_v45 = vmul.f32 0.2, %v155_v40 }
   0xd   :  { %472 = vst.msk [vmem:[%s1152_s3 + $0x4] sm:$0xf] %vm470_vm0, %v407_v32  ;;  %v91_v46 = vmul.f32 %v567_v1, %v23_v35  ;;  %v92_v47 = vmul.f32 %v567_v1, %v24_v36  ;;  %vm220_vm7 = vcmp.ge.f32.partialorder %v156_v42, 0.0  ;;  %v284_v48 = vmul.f32 0.2, %v156_v42  ;;  %v32_v35 = vld [vmem:[%s1149_s0 + $0x90] sm:$0xff] }
   0xe   :  { %473 = vst.msk [vmem:[%s1152_s3 + $0x8] sm:$0xf] %vm470_vm0, %v408_v37  ;;  %vm221_vm8 = vcmp.ge.f32.partialorder %v157_v43, 0.0  ;;  %v158_v49 = vadd.f32 %v572_v2, %v90_v44  ;;  %v347_v50 = vsel %vm219_vm6, %v155_v40, %v283_v45  ;;  %v285_v51 = vmul.f32 0.2, %v157_v43  ;;  %v33_v36 = vld [vmem:[%s1149_s0 + $0x98] sm:$0xff] }
   0xf   :  { %474 = vst.msk [vmem:[%s1152_s3 + $0xc] sm:$0xf] %vm470_vm0, %v409_v38  ;;  %v159_v52 = vadd.f32 %v572_v2, %v91_v46  ;;  %v160_v53 = vadd.f32 %v572_v2, %v92_v47  ;;  %v411_v55 = vpack.c.bf16 %v347_v50, %v347_v50  ;;  %v348_v56 = vsel %vm220_vm7, %v156_v42, %v284_v48  ;;  %v34_v37 = vld [vmem:[%s1149_s0 + $0xa0] sm:$0xff]  ;;  %v35_v42 = vld [vmem:[%s1149_s0 + $0xa8] sm:$0xff]  ;;  %v37_v44 = vld [vmem:[%s1149_s0 + $0xb8] sm:$0xff] }
  0x10   :  { %475 = vst.msk [vmem:[%s1152_s3 + $0x10] sm:$0xf] %vm470_vm0, %v410_v41  ;;  %vm222_vm9 = vcmp.ge.f32.partialorder %v158_v49, 0.0  ;;  %v286_v57 = vmul.f32 0.2, %v158_v49  ;;  %v412_v59 = vpack.c.bf16 %v348_v56, %v348_v56  ;;  %v349_v60 = vsel %vm221_vm8, %v157_v43, %v285_v51  ;;  %v36_v43 = vld [vmem:[%s1149_s0 + $0xb0] sm:$0xff] }
  0x11   :  { %vm223_vm10 = vcmp.ge.f32.partialorder %v159_v52, 0.0  ;;  %v287_v61 = vmul.f32 0.2, %v159_v52  ;;  %476 = vst.msk [vmem:[%s1152_s3 + $0x14] sm:$0xf] %vm470_vm0, %v411_v55  ;;  %v413_v0 = vpack.c.bf16 %v349_v60, %v349_v60  ;;  %vm224_vm11 = vcmp.ge.f32.partialorder %v160_v53, 0.0 }
  0x12   :  { %v350_v3 = vsel %vm222_vm9, %v158_v49, %v286_v57  ;;  %v288_v4 = vmul.f32 0.2, %v160_v53  ;;  %477 = vst.msk [vmem:[%s1152_s3 + $0x18] sm:$0xf] %vm470_vm0, %v412_v59  ;;  %v93_v8 = vmul.f32 %v567_v1, %v25_v54  ;;  %v94_v9 = vmul.f32 %v567_v1, %v26_v58 }
  0x13   :  { %v414_v6 = vpack.c.bf16 %v350_v3, %v350_v3  ;;  %v351_v7 = vsel %vm223_vm10, %v159_v52, %v287_v61  ;;  %478 = vst.msk [vmem:[%s1152_s3 + $0x1c] sm:$0xf] %vm470_vm0, %v413_v0  ;;  %v95_v14 = vmul.f32 %v567_v1, %v27_v62  ;;  %v96_v15 = vmul.f32 %v567_v1, %v28_v63 }
  0x14   :  { %v415_v12 = vpack.c.bf16 %v351_v7, %v351_v7  ;;  %v352_v13 = vsel %vm224_vm11, %v160_v53, %v288_v4  ;;  %v161_v17 = vadd.f32 %v572_v2, %v93_v8  ;;  %v162_v18 = vadd.f32 %v572_v2, %v94_v9 }
  0x15   :  { %479 = vst.msk [vmem:[%s1152_s3 + $0x20] sm:$0xf] %vm470_vm0, %v414_v6  ;;  %v416_v16 = vpack.c.bf16 %v352_v13, %v352_v13  ;;  %v97_v19 = vmul.f32 %v567_v1, %v29_v5  ;;  %v163_v20 = vadd.f32 %v572_v2, %v95_v14  ;;  %v164_v21 = vadd.f32 %v572_v2, %v96_v15  ;;  %v38_v6 = vld [vmem:[%s1149_s0 + $0xc0] sm:$0xff]  ;;  %v40_v14 = vld [vmem:[%s1149_s0 + $0xd0] sm:$0xff] }
  0x16   :  { %480 = vst.msk [vmem:[%s1152_s3 + $0x24] sm:$0xf] %vm470_vm0, %v415_v12  ;;  %v98_v22 = vmul.f32 %v567_v1, %v30_v10  ;;  %v99_v23 = vmul.f32 %v567_v1, %v31_v11  ;;  %vm225_vm12 = vcmp.ge.f32.partialorder %v161_v17, 0.0  ;;  %v289_v24 = vmul.f32 0.2, %v161_v17  ;;  %v39_v10 = vld [vmem:[%s1149_s0 + $0xc8] sm:$0xff] }
  0x17   :  { %481 = vst.msk [vmem:[%s1152_s3 + $0x28] sm:$0xf] %vm470_vm0, %v416_v16  ;;  %vm226_vm13 = vcmp.ge.f32.partialorder %v162_v18, 0.0  ;;  %v165_v25 = vadd.f32 %v572_v2, %v97_v19  ;;  %v290_v26 = vmul.f32 0.2, %v162_v18  ;;  %vm227_vm14 = vcmp.ge.f32.partialorder %v163_v20, 0.0 }
  0x18   :  { %v291_v27 = vmul.f32 0.2, %v163_v20  ;;  %vm228_vm15 = vcmp.ge.f32.partialorder %v164_v21, 0.0  ;;  %v353_v28 = vsel %vm225_vm12, %v161_v17, %v289_v24  ;;  %v292_v29 = vmul.f32 0.2, %v164_v21  ;;  %v42_v19 = vld [vmem:[%s1149_s0 + $0xe0] sm:$0xff] }
  0x19   :  { %vm229_vm1 = vcmp.ge.f32.partialorder %v165_v25, 0.0  ;;  %v293_v30 = vmul.f32 0.2, %v165_v25  ;;  %v417_v31 = vpack.c.bf16 %v353_v28, %v353_v28  ;;  %v354_v32 = vsel %vm226_vm13, %v162_v18, %v290_v26  ;;  %v41_v18 = vld [vmem:[%s1149_s0 + $0xd8] sm:$0xff] }
  0x1a   :  { %v355_v33 = vsel %vm227_vm14, %v163_v20, %v291_v27  ;;  %v166_v34 = vadd.f32 %v572_v2, %v98_v22  ;;  %v418_v38 = vpack.c.bf16 %v354_v32, %v354_v32  ;;  %v356_v40 = vsel %vm228_vm15, %v164_v21, %v292_v29  ;;  %v43_v20 = vld [vmem:[%s1149_s0 + $0xe8] sm:$0xff]  ;;  %v44_v29 = vld [vmem:[%s1149_s0 + $0xf0] sm:$0xff] }
  0x1b   :  { %v419_v39 = vpack.c.bf16 %v355_v33, %v355_v33  ;;  %v357_v41 = vsel %vm229_vm1, %v165_v25, %v293_v30  ;;  %482 = vst.msk [vmem:[%s1152_s3 + $0x2c] sm:$0xf] %vm470_vm0, %v417_v31  ;;  %v420_v45 = vpack.c.bf16 %v356_v40, %v356_v40  ;;  %v167_v48 = vadd.f32 %v572_v2, %v99_v23 }
  0x1c   :  { %v421_v46 = vpack.c.bf16 %v357_v41, %v357_v41  ;;  %vm230_vm2 = vcmp.ge.f32.partialorder %v166_v34, 0.0  ;;  %v294_v47 = vmul.f32 0.2, %v166_v34  ;;  %483 = vst.msk [vmem:[%s1152_s3 + $0x30] sm:$0xf] %vm470_vm0, %v418_v38  ;;  %v100_v49 = vmul.f32 %v567_v1, %v32_v35 }
  0x1d   :  { %v101_v50 = vmul.f32 %v567_v1, %v33_v36  ;;  %v102_v51 = vmul.f32 %v567_v1, %v34_v37  ;;  %484 = vst.msk [vmem:[%s1152_s3 + $0x34] sm:$0xf] %vm470_vm0, %v419_v39  ;;  %v103_v53 = vmul.f32 %v567_v1, %v35_v42  ;;  %v104_v54 = vmul.f32 %v567_v1, %v36_v43 }
  0x1e   :  { %v358_v52 = vsel %vm230_vm2, %v166_v34, %v294_v47  ;;  %v105_v55 = vmul.f32 %v567_v1, %v37_v44  ;;  %485 = vst.msk [vmem:[%s1152_s3 + $0x38] sm:$0xf] %vm470_vm0, %v420_v45  ;;  %vm231_vm3 = vcmp.ge.f32.partialorder %v167_v48, 0.0  ;;  %v295_v57 = vmul.f32 0.2, %v167_v48  ;;  %v45_v34 = vld [vmem:[%s1149_s0 + $0xf8] sm:$0xff] }
  0x1f   :  { %v422_v56 = vpack.c.bf16 %v358_v52, %v358_v52  ;;  %v168_v58 = vadd.f32 %v572_v2, %v100_v49  ;;  %486 = vst.msk [vmem:[%s1152_s3 + $0x3c] sm:$0xf] %vm470_vm0, %v421_v46  ;;  %v169_v59 = vadd.f32 %v572_v2, %v101_v50  ;;  %v170_v60 = vadd.f32 %v572_v2, %v102_v51 }
  0x20   :  { %v171_v61 = vadd.f32 %v572_v2, %v103_v53  ;;  %v172_v62 = vadd.f32 %v572_v2, %v104_v54  ;;  %v359_v63 = vsel %vm231_vm3, %v167_v48, %v295_v57  ;;  %v173_v3 = vadd.f32 %v572_v2, %v105_v55  ;;  %v46_v53 = vld [vmem:[%s1149_s0 + $0x100] sm:$0xff]  ;;  %v47_v54 = vld [vmem:[%s1149_s0 + $0x108] sm:$0xff]  ;;  %v48_v55 = vld [vmem:[%s1149_s0 + $0x110] sm:$0xff] }
  0x21   :  { %487 = vst.msk [vmem:[%s1152_s3 + $0x40] sm:$0xf] %vm470_vm0, %v422_v56  ;;  %vm232_vm4 = vcmp.ge.f32.partialorder %v168_v58, 0.0  ;;  %v296_v0 = vmul.f32 0.2, %v168_v58  ;;  %v423_v4 = vpack.c.bf16 %v359_v63, %v359_v63  ;;  %vm233_vm5 = vcmp.ge.f32.partialorder %v169_v59, 0.0 }
  0x22   :  { %v297_v5 = vmul.f32 0.2, %v169_v59  ;;  %vm234_vm6 = vcmp.ge.f32.partialorder %v170_v60, 0.0  ;;  %v298_v8 = vmul.f32 0.2, %v170_v60  ;;  %vm235_vm7 = vcmp.ge.f32.partialorder %v171_v61, 0.0 }
  0x23   :  { %v360_v7 = vsel %vm232_vm4, %v168_v58, %v296_v0  ;;  %v299_v9 = vmul.f32 0.2, %v171_v61  ;;  %488 = vst.msk [vmem:[%s1152_s3 + $0x44] sm:$0xf] %vm470_vm0, %v423_v4  ;;  %vm236_vm8 = vcmp.ge.f32.partialorder %v172_v62, 0.0  ;;  %vm237_vm9 = vcmp.ge.f32.partialorder %v173_v3, 0.0 }
  0x24   :  { %v424_v11 = vpack.c.bf16 %v360_v7, %v360_v7  ;;  %v361_v12 = vsel %vm233_vm5, %v169_v59, %v297_v5  ;;  %v300_v13 = vmul.f32 0.2, %v172_v62  ;;  %v362_v16 = vsel %vm234_vm6, %v170_v60, %v298_v8  ;;  %v49_v60 = vld [vmem:[%s1149_s0 + $0x118] sm:$0xff] }
  0x25   :  { %v425_v15 = vpack.c.bf16 %v361_v12, %v361_v12  ;;  %v363_v17 = vsel %vm235_vm7, %v171_v61, %v299_v9  ;;  %v426_v21 = vpack.c.bf16 %v362_v16, %v362_v16  ;;  %v301_v24 = vmul.f32 0.2, %v173_v3 }
  0x26   :  { %489 = vst.msk [vmem:[%s1152_s3 + $0x48] sm:$0xf] %vm470_vm0, %v424_v11  ;;  %v427_v22 = vpack.c.bf16 %v363_v17, %v363_v17  ;;  %v364_v23 = vsel %vm236_vm8, %v172_v62, %v300_v13  ;;  %v106_v26 = vmul.f32 %v567_v1, %v38_v6  ;;  %v107_v27 = vmul.f32 %v567_v1, %v39_v10  ;;  %v50_v17 = vld [vmem:[%s1149_s0 + $0x120] sm:$0xff] }
  0x27   :  { %490 = vst.msk [vmem:[%s1152_s3 + $0x4c] sm:$0xf] %vm470_vm0, %v425_v15  ;;  %v428_v25 = vpack.c.bf16 %v364_v23, %v364_v23  ;;  %v108_v28 = vmul.f32 %v567_v1, %v40_v14  ;;  %v365_v30 = vsel %vm237_vm9, %v173_v3, %v301_v24  ;;  %v109_v31 = vmul.f32 %v567_v1, %v41_v18  ;;  %v52_v24 = vld [vmem:[%s1149_s0 + $0x130] sm:$0xff] }
  0x28   :  { %491 = vst.msk [vmem:[%s1152_s3 + $0x50] sm:$0xf] %vm470_vm0, %v426_v21  ;;  %v110_v32 = vmul.f32 %v567_v1, %v42_v19  ;;  %v111_v33 = vmul.f32 %v567_v1, %v43_v20  ;;  %v429_v35 = vpack.c.bf16 %v365_v30, %v365_v30  ;;  %v174_v36 = vadd.f32 %v572_v2, %v106_v26  ;;  %v51_v21 = vld [vmem:[%s1149_s0 + $0x128] sm:$0xff] }
  0x29   :  { %492 = vst.msk [vmem:[%s1152_s3 + $0x54] sm:$0xf] %vm470_vm0, %v427_v22  ;;  %v175_v37 = vadd.f32 %v572_v2, %v107_v27  ;;  %v176_v38 = vadd.f32 %v572_v2, %v108_v28  ;;  %v177_v39 = vadd.f32 %v572_v2, %v109_v31  ;;  %v112_v42 = vmul.f32 %v567_v1, %v44_v29  ;;  %v53_v28 = vld [vmem:[%s1149_s0 + $0x138] sm:$0xff] }
  0x2a   :  { %493 = vst.msk [vmem:[%s1152_s3 + $0x58] sm:$0xf] %vm470_vm0, %v428_v25  ;;  %v178_v40 = vadd.f32 %v572_v2, %v110_v32  ;;  %v179_v41 = vadd.f32 %v572_v2, %v111_v33  ;;  %vm238_vm10 = vcmp.ge.f32.partialorder %v174_v36, 0.0  ;;  %v302_v43 = vmul.f32 0.2, %v174_v36 }
  0x2b   :  { %494 = vst.msk [vmem:[%s1152_s3 + $0x5c] sm:$0xf] %vm470_vm0, %v429_v35  ;;  %vm239_vm11 = vcmp.ge.f32.partialorder %v175_v37, 0.0  ;;  %v113_v44 = vmul.f32 %v567_v1, %v45_v34  ;;  %v303_v45 = vmul.f32 0.2, %v175_v37  ;;  %vm240_vm12 = vcmp.ge.f32.partialorder %v176_v38, 0.0 }
  0x2c   :  { %v304_v46 = vmul.f32 0.2, %v176_v38  ;;  %vm241_vm13 = vcmp.ge.f32.partialorder %v177_v39, 0.0  ;;  %v366_v47 = vsel %vm238_vm10, %v174_v36, %v302_v43  ;;  %v305_v48 = vmul.f32 0.2, %v177_v39 }
  0x2d   :  { %vm242_vm14 = vcmp.ge.f32.partialorder %v178_v40, 0.0  ;;  %v306_v49 = vmul.f32 0.2, %v178_v40  ;;  %v430_v50 = vpack.c.bf16 %v366_v47, %v366_v47  ;;  %v367_v51 = vsel %vm239_vm11, %v175_v37, %v303_v45  ;;  %v54_v37 = vld [vmem:[%s1149_s0 + $0x140] sm:$0xff] }
  0x2e   :  { %v368_v52 = vsel %vm240_vm12, %v176_v38, %v304_v46  ;;  %vm243_vm15 = vcmp.ge.f32.partialorder %v179_v41, 0.0  ;;  %v431_v56 = vpack.c.bf16 %v367_v51, %v367_v51  ;;  %v369_v58 = vsel %vm241_vm13, %v177_v39, %v305_v48 }
  0x2f   :  { %v432_v57 = vpack.c.bf16 %v368_v52, %v368_v52  ;;  %v370_v59 = vsel %vm242_vm14, %v178_v40, %v306_v49  ;;  %495 = vst.msk [vmem:[%s1152_s3 + $0x60] sm:$0xf] %vm470_vm0, %v430_v50  ;;  %v433_v61 = vpack.c.bf16 %v369_v58, %v369_v58  ;;  %v307_v63 = vmul.f32 0.2, %v179_v41  ;;  %v56_v49 = vld [vmem:[%s1149_s0 + $0x150] sm:$0xff] }
  0x30   :  { %v434_v62 = vpack.c.bf16 %v370_v59, %v370_v59  ;;  %v180_v0 = vadd.f32 %v572_v2, %v112_v42  ;;  %496 = vst.msk [vmem:[%s1152_s3 + $0x64] sm:$0xf] %vm470_vm0, %v431_v56  ;;  %v181_v3 = vadd.f32 %v572_v2, %v113_v44  ;;  %v114_v4 = vmul.f32 %v567_v1, %v46_v53  ;;  %v55_v42 = vld [vmem:[%s1149_s0 + $0x148] sm:$0xff]  ;;  %v57_v53 = vld [vmem:[%s1149_s0 + $0x158] sm:$0xff] }
  0x31   :  { %v115_v5 = vmul.f32 %v567_v1, %v47_v54  ;;  %v116_v6 = vmul.f32 %v567_v1, %v48_v55  ;;  %497 = vst.msk [vmem:[%s1152_s3 + $0x68] sm:$0xf] %vm470_vm0, %v432_v57  ;;  %v371_v7 = vsel %vm243_vm15, %v179_v41, %v307_v63  ;;  %v117_v9 = vmul.f32 %v567_v1, %v49_v60 }
  0x32   :  { %vm244_vm1 = vcmp.ge.f32.partialorder %v180_v0, 0.0  ;;  %v308_v8 = vmul.f32 0.2, %v180_v0  ;;  %498 = vst.msk [vmem:[%s1152_s3 + $0x6c] sm:$0xf] %vm470_vm0, %v433_v61  ;;  %v435_v10 = vpack.c.bf16 %v371_v7, %v371_v7  ;;  %vm245_vm2 = vcmp.ge.f32.partialorder %v181_v3, 0.0 }
  0x33   :  { %v309_v11 = vmul.f32 0.2, %v181_v3  ;;  %v182_v12 = vadd.f32 %v572_v2, %v114_v4  ;;  %499 = vst.msk [vmem:[%s1152_s3 + $0x70] sm:$0xf] %vm470_vm0, %v434_v62  ;;  %v183_v14 = vadd.f32 %v572_v2, %v115_v5  ;;  %v184_v15 = vadd.f32 %v572_v2, %v116_v6  ;;  %v58_v61 = vld [vmem:[%s1149_s0 + $0x160] sm:$0xff]  ;;  %v59_v4 = vld [vmem:[%s1149_s0 + $0x168] sm:$0xff] }
  0x34   :  { %v372_v13 = vsel %vm244_vm1, %v180_v0, %v308_v8  ;;  %v185_v16 = vadd.f32 %v572_v2, %v117_v9  ;;  %500 = vst.msk [vmem:[%s1152_s3 + $0x74] sm:$0xf] %vm470_vm0, %v435_v10  ;;  %v118_v27 = vmul.f32 %v567_v1, %v50_v17  ;;  %v119_v32 = vmul.f32 %v567_v1, %v51_v21  ;;  %v60_v5 = vld [vmem:[%s1149_s0 + $0x170] sm:$0xff]  ;;  %v61_v6 = vld [vmem:[%s1149_s0 + $0x178] sm:$0xff] }
  0x35   :  { %v436_v18 = vpack.c.bf16 %v372_v13, %v372_v13  ;;  %v373_v19 = vsel %vm245_vm2, %v181_v3, %v309_v11  ;;  %vm246_vm3 = vcmp.ge.f32.partialorder %v182_v12, 0.0  ;;  %v310_v20 = vmul.f32 0.2, %v182_v12 }
  0x36   :  { %v437_v22 = vpack.c.bf16 %v373_v19, %v373_v19  ;;  %vm247_vm4 = vcmp.ge.f32.partialorder %v183_v14, 0.0  ;;  %v311_v23 = vmul.f32 0.2, %v183_v14  ;;  %vm248_vm5 = vcmp.ge.f32.partialorder %v184_v15, 0.0 }
  0x37   :  { %501 = vst.msk [vmem:[%s1152_s3 + $0x78] sm:$0xf] %vm470_vm0, %v436_v18  ;;  %v374_v25 = vsel %vm246_vm3, %v182_v12, %v310_v20  ;;  %v312_v26 = vmul.f32 0.2, %v184_v15  ;;  %vm249_vm6 = vcmp.ge.f32.partialorder %v185_v16, 0.0  ;;  %v186_v35 = vadd.f32 %v572_v2, %v118_v27  ;;  %v62_v27 = vld [vmem:[%s1149_s0 + $0x180] sm:$0xff] }
  0x38   :  { %502 = vst.msk [vmem:[%s1152_s3 + $0x7c] sm:$0xf] %vm470_vm0, %v437_v22  ;;  %v438_v29 = vpack.c.bf16 %v374_v25, %v374_v25  ;;  %v375_v30 = vsel %vm247_vm4, %v183_v14, %v311_v23  ;;  %v313_v31 = vmul.f32 0.2, %v185_v16  ;;  %v120_v36 = vmul.f32 %v567_v1, %v52_v24 }
  0x39   :  { %v439_v33 = vpack.c.bf16 %v375_v30, %v375_v30  ;;  %v376_v34 = vsel %vm248_vm5, %v184_v15, %v312_v26  ;;  %v187_v40 = vadd.f32 %v572_v2, %v119_v32  ;;  %v121_v41 = vmul.f32 %v567_v1, %v53_v28 }
  0x3a   :  { %503 = vst.msk [vmem:[%s1152_s3 + $0x80] sm:$0xf] %vm470_vm0, %v438_v29  ;;  %v440_v38 = vpack.c.bf16 %v376_v34, %v376_v34  ;;  %v377_v39 = vsel %vm249_vm6, %v185_v16, %v313_v31  ;;  %vm250_vm7 = vcmp.ge.f32.partialorder %v186_v35, 0.0  ;;  %v314_v44 = vmul.f32 0.2, %v186_v35  ;;  %v63_v31 = vld [vmem:[%s1149_s0 + $0x188] sm:$0xff] }
  0x3b   :  { %504 = vst.msk [vmem:[%s1152_s3 + $0x84] sm:$0xf] %vm470_vm0, %v439_v33  ;;  %v441_v43 = vpack.c.bf16 %v377_v39, %v377_v39  ;;  %v188_v45 = vadd.f32 %v572_v2, %v120_v36  ;;  %vm251_vm8 = vcmp.ge.f32.partialorder %v187_v40, 0.0  ;;  %v315_v46 = vmul.f32 0.2, %v187_v40  ;;  %v64_v34 = vld [vmem:[%s1149_s0 + $0x190] sm:$0xff] }
  0x3c   :  { %505 = vst.msk [vmem:[%s1152_s3 + $0x88] sm:$0xf] %vm470_vm0, %v440_v38  ;;  %v189_v47 = vadd.f32 %v572_v2, %v121_v41  ;;  %v122_v48 = vmul.f32 %v567_v1, %v54_v37  ;;  %v378_v50 = vsel %vm250_vm7, %v186_v35, %v314_v44  ;;  %v123_v52 = vmul.f32 %v567_v1, %v55_v42  ;;  %v65_v38 = vld [vmem:[%s1149_s0 + $0x198] sm:$0xff] }
  0x3d   :  { %506 = vst.msk [vmem:[%s1152_s3 + $0x8c] sm:$0xf] %vm470_vm0, %v441_v43  ;;  %vm252_vm9 = vcmp.ge.f32.partialorder %v188_v45, 0.0  ;;  %v316_v51 = vmul.f32 0.2, %v188_v45  ;;  %v442_v54 = vpack.c.bf16 %v378_v50, %v378_v50  ;;  %v379_v55 = vsel %vm251_vm8, %v187_v40, %v315_v46 }
  0x3e   :  { %vm253_vm10 = vcmp.ge.f32.partialorder %v189_v47, 0.0  ;;  %v317_v56 = vmul.f32 0.2, %v189_v47  ;;  %v443_v57 = vpack.c.bf16 %v379_v55, %v379_v55  ;;  %v190_v59 = vadd.f32 %v572_v2, %v122_v48 }
  0x3f   :  { %v380_v58 = vsel %vm252_vm9, %v188_v45, %v316_v51  ;;  %v191_v60 = vadd.f32 %v572_v2, %v123_v52  ;;  %507 = vst.msk [vmem:[%s1152_s3 + $0x90] sm:$0xf] %vm470_vm0, %v442_v54  ;;  %v124_v0 = vmul.f32 %v567_v1, %v56_v49  ;;  %v125_v3 = vmul.f32 %v567_v1, %v57_v53  ;;  %v67_v52 = vld [vmem:[%s1149_s0 + $0x1a8] sm:$0xff] }
  0x40   :  { %v444_v62 = vpack.c.bf16 %v380_v58, %v380_v58  ;;  %v381_v63 = vsel %vm253_vm10, %v189_v47, %v317_v56  ;;  %508 = vst.msk [vmem:[%s1152_s3 + $0x94] sm:$0xf] %vm470_vm0, %v443_v57  ;;  %vm254_vm11 = vcmp.ge.f32.partialorder %v190_v59, 0.0  ;;  %v318_v8 = vmul.f32 0.2, %v190_v59  ;;  %v66_v47 = vld [vmem:[%s1149_s0 + $0x1a0] sm:$0xff] }
  0x41   :  { %v445_v7 = vpack.c.bf16 %v381_v63, %v381_v63  ;;  %vm255_vm12 = vcmp.ge.f32.partialorder %v191_v60, 0.0  ;;  %v319_v9 = vmul.f32 0.2, %v191_v60  ;;  %v192_v10 = vadd.f32 %v572_v2, %v124_v0  ;;  %v69_v63 = vld [vmem:[%s1149_s0 + $0x1b8] sm:$0xff] }
  0x42   :  { %509 = vst.msk [vmem:[%s1152_s3 + $0x98] sm:$0xf] %vm470_vm0, %v444_v62  ;;  %v193_v11 = vadd.f32 %v572_v2, %v125_v3  ;;  %v126_v12 = vmul.f32 %v567_v1, %v58_v61  ;;  %v382_v13 = vsel %vm254_vm11, %v190_v59, %v318_v8  ;;  %v127_v14 = vmul.f32 %v567_v1, %v59_v4  ;;  %v68_v59 = vld [vmem:[%s1149_s0 + $0x1b0] sm:$0xff] }
  0x43   :  { %510 = vst.msk [vmem:[%s1152_s3 + $0x9c] sm:$0xf] %vm470_vm0, %v445_v7  ;;  %v128_v15 = vmul.f32 %v567_v1, %v60_v5  ;;  %v129_v16 = vmul.f32 %v567_v1, %v61_v6  ;;  %v446_v17 = vpack.c.bf16 %v382_v13, %v382_v13  ;;  %v383_v18 = vsel %vm255_vm12, %v191_v60, %v319_v9  ;;  %v70_v9 = vld [vmem:[%s1149_s0 + $0x1c0] sm:$0xff] }
  0x44   :  { %vm256_vm13 = vcmp.ge.f32.partialorder %v192_v10, 0.0  ;;  %v320_v19 = vmul.f32 0.2, %v192_v10  ;;  %v447_v20 = vpack.c.bf16 %v383_v18, %v383_v18  ;;  %vm257_vm14 = vcmp.ge.f32.partialorder %v193_v11, 0.0 }
  0x45   :  { %v321_v21 = vmul.f32 0.2, %v193_v11  ;;  %v194_v22 = vadd.f32 %v572_v2, %v126_v12  ;;  %511 = vst.msk [vmem:[%s1152_s3 + $0xa0] sm:$0xf] %vm470_vm0, %v446_v17  ;;  %v195_v24 = vadd.f32 %v572_v2, %v127_v14  ;;  %v196_v25 = vadd.f32 %v572_v2, %v128_v15  ;;  %v71_v14 = vld [vmem:[%s1149_s0 + $0x1c8] sm:$0xff]  ;;  %v72_v15 = vld [vmem:[%s1149_s0 + $0x1d0] sm:$0xff] }
  0x46   :  { %v384_v23 = vsel %vm256_vm13, %v192_v10, %v320_v19  ;;  %v197_v26 = vadd.f32 %v572_v2, %v129_v16  ;;  %512 = vst.msk [vmem:[%s1152_s3 + $0xa4] sm:$0xf] %vm470_vm0, %v447_v20  ;;  %v130_v37 = vmul.f32 %v567_v1, %v62_v27  ;;  %v131_v42 = vmul.f32 %v567_v1, %v63_v31  ;;  %v73_v16 = vld [vmem:[%s1149_s0 + $0x1d8] sm:$0xff] }
  0x47   :  { %v448_v28 = vpack.c.bf16 %v384_v23, %v384_v23  ;;  %v385_v29 = vsel %vm257_vm14, %v193_v11, %v321_v21  ;;  %vm258_vm15 = vcmp.ge.f32.partialorder %v194_v22, 0.0  ;;  %v322_v30 = vmul.f32 0.2, %v194_v22 }
  0x48   :  { %v449_v32 = vpack.c.bf16 %v385_v29, %v385_v29  ;;  %vm259_vm1 = vcmp.ge.f32.partialorder %v195_v24, 0.0  ;;  %v323_v33 = vmul.f32 0.2, %v195_v24  ;;  %vm260_vm2 = vcmp.ge.f32.partialorder %v196_v25, 0.0 }
  0x49   :  { %513 = vst.msk [vmem:[%s1152_s3 + $0xa8] sm:$0xf] %vm470_vm0, %v448_v28  ;;  %v386_v35 = vsel %vm258_vm15, %v194_v22, %v322_v30  ;;  %v324_v36 = vmul.f32 0.2, %v196_v25  ;;  %vm261_vm3 = vcmp.ge.f32.partialorder %v197_v26, 0.0  ;;  %v198_v45 = vadd.f32 %v572_v2, %v130_v37  ;;  %v74_v37 = vld [vmem:[%s1149_s0 + $0x1e0] sm:$0xff] }
  0x4a   :  { %514 = vst.msk [vmem:[%s1152_s3 + $0xac] sm:$0xf] %vm470_vm0, %v449_v32  ;;  %v450_v39 = vpack.c.bf16 %v386_v35, %v386_v35  ;;  %v387_v40 = vsel %vm259_vm1, %v195_v24, %v323_v33  ;;  %v325_v41 = vmul.f32 0.2, %v197_v26  ;;  %v132_v46 = vmul.f32 %v567_v1, %v64_v34 }
  0x4b   :  { %v451_v43 = vpack.c.bf16 %v387_v40, %v387_v40  ;;  %v388_v44 = vsel %vm260_vm2, %v196_v25, %v324_v36  ;;  %v199_v50 = vadd.f32 %v572_v2, %v131_v42  ;;  %v133_v51 = vmul.f32 %v567_v1, %v65_v38 }
  0x4c   :  { %515 = vst.msk [vmem:[%s1152_s3 + $0xb0] sm:$0xf] %vm470_vm0, %v450_v39  ;;  %v452_v48 = vpack.c.bf16 %v388_v44, %v388_v44  ;;  %v389_v49 = vsel %vm261_vm3, %v197_v26, %v325_v41  ;;  %vm262_vm4 = vcmp.ge.f32.partialorder %v198_v45, 0.0  ;;  %v326_v54 = vmul.f32 0.2, %v198_v45  ;;  %v75_v41 = vld [vmem:[%s1149_s0 + $0x1e8] sm:$0xff] }
  0x4d   :  { %516 = vst.msk [vmem:[%s1152_s3 + $0xb4] sm:$0xf] %vm470_vm0, %v451_v43  ;;  %v453_v53 = vpack.c.bf16 %v389_v49, %v389_v49  ;;  %v200_v55 = vadd.f32 %v572_v2, %v132_v46  ;;  %vm263_vm5 = vcmp.ge.f32.partialorder %v199_v50, 0.0  ;;  %v327_v56 = vmul.f32 0.2, %v199_v50  ;;  %v76_v44 = vld [vmem:[%s1149_s0 + $0x1f0] sm:$0xff] }
  0x4e   :  { %517 = vst.msk [vmem:[%s1152_s3 + $0xb8] sm:$0xf] %vm470_vm0, %v452_v48  ;;  %v201_v57 = vadd.f32 %v572_v2, %v133_v51  ;;  %v134_v58 = vmul.f32 %v567_v1, %v66_v47  ;;  %v390_v60 = vsel %vm262_vm4, %v198_v45, %v326_v54  ;;  %v135_v62 = vmul.f32 %v567_v1, %v67_v52  ;;  %v77_v48 = vld [vmem:[%s1149_s0 + $0x1f8] sm:$0xff] }
  0x4f   :  { %518 = vst.msk [vmem:[%s1152_s3 + $0xbc] sm:$0xf] %vm470_vm0, %v453_v53  ;;  %vm264_vm6 = vcmp.ge.f32.partialorder %v200_v55, 0.0  ;;  %v328_v61 = vmul.f32 0.2, %v200_v55  ;;  %v454_v0 = vpack.c.bf16 %v390_v60, %v390_v60  ;;  %v391_v3 = vsel %vm263_vm5, %v199_v50, %v327_v56 }
  0x50   :  { %vm265_vm7 = vcmp.ge.f32.partialorder %v201_v57, 0.0  ;;  %v329_v4 = vmul.f32 0.2, %v201_v57  ;;  %v455_v5 = vpack.c.bf16 %v391_v3, %v391_v3  ;;  %v202_v7 = vadd.f32 %v572_v2, %v134_v58 }
  0x51   :  { %v392_v6 = vsel %vm264_vm6, %v200_v55, %v328_v61  ;;  %v203_v8 = vadd.f32 %v572_v2, %v135_v62  ;;  %519 = vst.msk [vmem:[%s1152_s3 + $0xc0] sm:$0xf] %vm470_vm0, %v454_v0  ;;  %v136_v12 = vmul.f32 %v567_v1, %v68_v59  ;;  %v137_v13 = vmul.f32 %v567_v1, %v69_v63 }
  0x52   :  { %v456_v10 = vpack.c.bf16 %v392_v6, %v392_v6  ;;  %v393_v11 = vsel %vm265_vm7, %v201_v57, %v329_v4  ;;  %520 = vst.msk [vmem:[%s1152_s3 + $0xc4] sm:$0xf] %vm470_vm0, %v455_v5  ;;  %vm266_vm8 = vcmp.ge.f32.partialorder %v202_v7, 0.0  ;;  %v330_v18 = vmul.f32 0.2, %v202_v7 }
  0x53   :  { %v457_v17 = vpack.c.bf16 %v393_v11, %v393_v11  ;;  %vm267_vm9 = vcmp.ge.f32.partialorder %v203_v8, 0.0  ;;  %v331_v19 = vmul.f32 0.2, %v203_v8  ;;  %v204_v20 = vadd.f32 %v572_v2, %v136_v12 }
  0x54   :  { %521 = vst.msk [vmem:[%s1152_s3 + $0xc8] sm:$0xf] %vm470_vm0, %v456_v10  ;;  %v205_v21 = vadd.f32 %v572_v2, %v137_v13  ;;  %v138_v22 = vmul.f32 %v567_v1, %v70_v9  ;;  %v394_v23 = vsel %vm266_vm8, %v202_v7, %v330_v18  ;;  %v139_v24 = vmul.f32 %v567_v1, %v71_v14 }
  0x55   :  { %522 = vst.msk [vmem:[%s1152_s3 + $0xcc] sm:$0xf] %vm470_vm0, %v457_v17  ;;  %v140_v25 = vmul.f32 %v567_v1, %v72_v15  ;;  %v141_v26 = vmul.f32 %v567_v1, %v73_v16  ;;  %v458_v27 = vpack.c.bf16 %v394_v23, %v394_v23  ;;  %v395_v28 = vsel %vm267_vm9, %v203_v8, %v331_v19 }
  0x56   :  { %vm268_vm10 = vcmp.ge.f32.partialorder %v204_v20, 0.0  ;;  %v332_v29 = vmul.f32 0.2, %v204_v20  ;;  %v459_v30 = vpack.c.bf16 %v395_v28, %v395_v28  ;;  %vm269_vm11 = vcmp.ge.f32.partialorder %v205_v21, 0.0 }
  0x57   :  { %v333_v31 = vmul.f32 0.2, %v205_v21  ;;  %v206_v32 = vadd.f32 %v572_v2, %v138_v22  ;;  %523 = vst.msk [vmem:[%s1152_s3 + $0xd0] sm:$0xf] %vm470_vm0, %v458_v27  ;;  %v207_v34 = vadd.f32 %v572_v2, %v139_v24  ;;  %v208_v35 = vadd.f32 %v572_v2, %v140_v25 }
  0x58   :  { %v396_v33 = vsel %vm268_vm10, %v204_v20, %v332_v29  ;;  %v209_v36 = vadd.f32 %v572_v2, %v141_v26  ;;  %524 = vst.msk [vmem:[%s1152_s3 + $0xd4] sm:$0xf] %vm470_vm0, %v459_v30  ;;  %v142_v47 = vmul.f32 %v567_v1, %v74_v37  ;;  %v143_v52 = vmul.f32 %v567_v1, %v75_v41 }
  0x59   :  { %v460_v38 = vpack.c.bf16 %v396_v33, %v396_v33  ;;  %v397_v39 = vsel %vm269_vm11, %v205_v21, %v333_v31  ;;  %vm270_vm12 = vcmp.ge.f32.partialorder %v206_v32, 0.0  ;;  %v334_v40 = vmul.f32 0.2, %v206_v32 }
  0x5a   :  { %v461_v42 = vpack.c.bf16 %v397_v39, %v397_v39  ;;  %vm271_vm13 = vcmp.ge.f32.partialorder %v207_v34, 0.0  ;;  %v335_v43 = vmul.f32 0.2, %v207_v34  ;;  %vm272_vm14 = vcmp.ge.f32.partialorder %v208_v35, 0.0 }
  0x5b   :  { %525 = vst.msk [vmem:[%s1152_s3 + $0xd8] sm:$0xf] %vm470_vm0, %v460_v38  ;;  %v398_v45 = vsel %vm270_vm12, %v206_v32, %v334_v40  ;;  %v336_v46 = vmul.f32 0.2, %v208_v35  ;;  %vm273_vm15 = vcmp.ge.f32.partialorder %v209_v36, 0.0  ;;  %v210_v55 = vadd.f32 %v572_v2, %v142_v47 }
  0x5c   :  { %526 = vst.msk [vmem:[%s1152_s3 + $0xdc] sm:$0xf] %vm470_vm0, %v461_v42  ;;  %v462_v49 = vpack.c.bf16 %v398_v45, %v398_v45  ;;  %v399_v50 = vsel %vm271_vm13, %v207_v34, %v335_v43  ;;  %v337_v51 = vmul.f32 0.2, %v209_v36  ;;  %v144_v56 = vmul.f32 %v567_v1, %v76_v44 }
  0x5d   :  { %v463_v53 = vpack.c.bf16 %v399_v50, %v399_v50  ;;  %v400_v54 = vsel %vm272_vm14, %v208_v35, %v336_v46  ;;  %v211_v59 = vadd.f32 %v572_v2, %v143_v52  ;;  %v145_v60 = vmul.f32 %v567_v1, %v77_v48 }
  0x5e   :  { %527 = vst.msk [vmem:[%s1152_s3 + $0xe0] sm:$0xf] %vm470_vm0, %v462_v49  ;;  %v464_v57 = vpack.c.bf16 %v400_v54, %v400_v54  ;;  %v401_v58 = vsel %vm273_vm15, %v209_v36, %v337_v51  ;;  %vm274_vm1 = vcmp.ge.f32.partialorder %v210_v55, 0.0  ;;  %v338_v62 = vmul.f32 0.2, %v210_v55 }
  0x5f   :  { %528 = vst.msk [vmem:[%s1152_s3 + $0xe4] sm:$0xf] %vm470_vm0, %v463_v53  ;;  %v465_v61 = vpack.c.bf16 %v401_v58, %v401_v58  ;;  %v212_v63 = vadd.f32 %v572_v2, %v144_v56  ;;  %vm275_vm2 = vcmp.ge.f32.partialorder %v211_v59, 0.0  ;;  %v339_v0 = vmul.f32 0.2, %v211_v59 }
  0x60   :  { %529 = vst.msk [vmem:[%s1152_s3 + $0xe8] sm:$0xf] %vm470_vm0, %v464_v57  ;;  %v213_v3 = vadd.f32 %v572_v2, %v145_v60  ;;  %v402_v1 = vsel %vm274_vm1, %v210_v55, %v338_v62 }
  0x61   :  { %530 = vst.msk [vmem:[%s1152_s3 + $0xec] sm:$0xf] %vm470_vm0, %v465_v61  ;;  %vm276_vm3 = vcmp.ge.f32.partialorder %v212_v63, 0.0  ;;  %v340_v4 = vmul.f32 0.2, %v212_v63  ;;  %v466_v5 = vpack.c.bf16 %v402_v1, %v402_v1  ;;  %v403_v6 = vsel %vm275_vm2, %v211_v59, %v339_v0 }
  0x62   :  { %vm277_vm4 = vcmp.ge.f32.partialorder %v213_v3, 0.0  ;;  %v341_v7 = vmul.f32 0.2, %v213_v3  ;;  %v467_v8 = vpack.c.bf16 %v403_v6, %v403_v6 }
  0x63   :  { %v404_v9 = vsel %vm276_vm3, %v212_v63, %v340_v4  ;;  %531 = vst.msk [vmem:[%s1152_s3 + $0xf0] sm:$0xf] %vm470_vm0, %v466_v5 }
  0x64   :  { %v468_v2 = vpack.c.bf16 %v404_v9, %v404_v9  ;;  %v405_v10 = vsel %vm277_vm4, %v213_v3, %v341_v7  ;;  %532 = vst.msk [vmem:[%s1152_s3 + $0xf4] sm:$0xf] %vm470_vm0, %v467_v8 }
  0x65   :  { %v469_v11 = vpack.c.bf16 %v405_v10, %v405_v10 }
  0x66   :  { %533 = vst.msk [vmem:[%s1152_s3 + $0xf8] sm:$0xf] %vm470_vm0, %v468_v2 }
  0x67   :  { %534 = vst.msk [vmem:[%s1152_s3 + $0xfc] sm:$0xf] %vm470_vm0, %v469_v11 }

// kernel: discriminator_forward.13
= control target key start
LH: loop header
LB: loop body
LE: loop exit
PB: predicated region body
PF: predicated region fallthrough
CT: control target
= control target key end

     0   :  { %vm18_vm0 = vcmask 523264   ;;  %vm784_vm1 = vcmask 516096   ;;  %s1749_s1 = inlined_call_operand.vmem [shape: bf16[512,64], index: 1, kind: input, shape index: {}]   ;;  %s1750_s0 = inlined_call_operand.vmem [shape: bf16[128,512], index: 0, kind: input, shape index: {}]   ;;  %s1751_s2 = inlined_call_operand.vmem [shape: f32[128,64], index: 2, kind: output, shape index: {0}]   ;;  %s1752_s3 = inlined_call_operand.vmem [shape: f32[1,1,64], index: 3, kind: output, shape index: {1}]   ;;  %s1753_s4 = inlined_call_operand.vmem [shape: f32[1,1,64], index: 4, kind: output, shape index: {2}]  }
   0x1   :  { %v1147_v0 = vld [vmem:[%s1749_s1 + $0x38] sm:$0xff]  ;;  %v1146_v4 = vld [vmem:[%s1749_s1 + $0x30] sm:$0xff]  ;;  %v1145_v8 = vld [vmem:[%s1749_s1 + $0x28] sm:$0xff] }
   0x2   :  { %v1155_v1 = vld [vmem:[%s1749_s1 + $0x78] sm:$0xff]  ;;  %499 = vmatpush.bf16.msra.mxu0 %v1147_v0  ;;  %v1154_v5 = vld [vmem:[%s1749_s1 + $0x70] sm:$0xff]  ;;  %v1153_v9 = vld [vmem:[%s1749_s1 + $0x68] sm:$0xff] }
   0x3   :  { %v1163_v2 = vld [vmem:[%s1749_s1 + $0xb8] sm:$0xff]  ;;  %548 = vmatpush.bf16.msra.mxu1 %v1155_v1  ;;  %v1162_v6 = vld [vmem:[%s1749_s1 + $0xb0] sm:$0xff]  ;;  %v1161_v10 = vld [vmem:[%s1749_s1 + $0xa8] sm:$0xff] }
   0x4   :  { %v1171_v3 = vld [vmem:[%s1749_s1 + $0xf8] sm:$0xff]  ;;  %597 = vmatpush.bf16.msra.mxu2 %v1163_v2  ;;  %v1170_v7 = vld [vmem:[%s1749_s1 + $0xf0] sm:$0xff]  ;;  %v1169_v11 = vld [vmem:[%s1749_s1 + $0xe8] sm:$0xff] }
   0x5   :  { %646 = vmatpush.bf16.msra.mxu3 %v1171_v3  ;;  %v1144_v12 = vld [vmem:[%s1749_s1 + $0x20] sm:$0xff]  ;;  %v1143_v16 = vld [vmem:[%s1749_s1 + $0x18] sm:$0xff]  ;;  %v1142_v20 = vld [vmem:[%s1749_s1 + $0x10] sm:$0xff] }
   0x6   :  { %500 = vmatpush.bf16.msra.mxu0 %v1146_v4  ;;  %v1152_v13 = vld [vmem:[%s1749_s1 + $0x60] sm:$0xff]  ;;  %v1151_v17 = vld [vmem:[%s1749_s1 + $0x58] sm:$0xff]  ;;  %v1150_v21 = vld [vmem:[%s1749_s1 + $0x50] sm:$0xff] }
   0x7   :  { %549 = vmatpush.bf16.msra.mxu1 %v1154_v5  ;;  %v1160_v14 = vld [vmem:[%s1749_s1 + $0xa0] sm:$0xff]  ;;  %v1159_v18 = vld [vmem:[%s1749_s1 + $0x98] sm:$0xff]  ;;  %v1158_v22 = vld [vmem:[%s1749_s1 + $0x90] sm:$0xff] }
   0x8   :  { %598 = vmatpush.bf16.msra.mxu2 %v1162_v6  ;;  %v1168_v15 = vld [vmem:[%s1749_s1 + $0xe0] sm:$0xff]  ;;  %v1167_v19 = vld [vmem:[%s1749_s1 + $0xd8] sm:$0xff]  ;;  %v1166_v23 = vld [vmem:[%s1749_s1 + $0xd0] sm:$0xff] }
   0x9   :  { %647 = vmatpush.bf16.msra.mxu3 %v1170_v7  ;;  %v1141_v24 = vld [vmem:[%s1749_s1 + $0x8] sm:$0xff]  ;;  %v1140_v28 = vld [vmem:[%s1749_s1] sm:$0xff]  ;;  %v1110_v33 = vld [vmem:[%s1750_s0 + $0xc] sm:$0xf0] }
   0xa   :  { %501 = vmatpush.bf16.msra.mxu0 %v1145_v8  ;;  %v1149_v25 = vld [vmem:[%s1749_s1 + $0x48] sm:$0xff]  ;;  %v1148_v29 = vld [vmem:[%s1749_s1 + $0x40] sm:$0xff]  ;;  %v856_v35 = vld [vmem:[%s1750_s0 + $0x10] sm:$0xf0] }
   0xb   :  { %550 = vmatpush.bf16.msra.mxu1 %v1153_v9  ;;  %v1157_v26 = vld [vmem:[%s1749_s1 + $0x88] sm:$0xff]  ;;  %v1156_v30 = vld [vmem:[%s1749_s1 + $0x80] sm:$0xff]  ;;  %v1111_v37 = vld [vmem:[%s1750_s0 + $0x14] sm:$0xf0] }
   0xc   :  { %599 = vmatpush.bf16.msra.mxu2 %v1161_v10  ;;  %v1165_v27 = vld [vmem:[%s1749_s1 + $0xc8] sm:$0xff]  ;;  %v1164_v31 = vld [vmem:[%s1749_s1 + $0xc0] sm:$0xff]  ;;  %v864_v39 = vld [vmem:[%s1750_s0 + $0x18] sm:$0xf0] }
   0xd   :  { %648 = vmatpush.bf16.msra.mxu3 %v1169_v11  ;;  %v854_v32 = vld [vmem:[%s1750_s0] sm:$0xf]  ;;  %v1108_v34 = vld [vmem:[%s1750_s0 + $0x4] sm:$0xf]  ;;  %v862_v36 = vld [vmem:[%s1750_s0 + $0x8] sm:$0xf] }
   0xe   :  { %502 = vmatpush.bf16.msra.mxu0 %v1144_v12  ;;  %v1109_v38 = vld [vmem:[%s1750_s0 + $0xc] sm:$0xf]  ;;  %v855_v40 = vor.u32 %v1110_v33, %v854_v32  ;;  %v859_v41 = vor.u32 %v1108_v34, %v856_v35  ;;  %v863_v42 = vor.u32 %v1111_v37, %v862_v36  ;;  %v870_v44 = vld [vmem:[%s1750_s0 + $0x20] sm:$0xf]  ;;  %v1114_v45 = vld [vmem:[%s1750_s0 + $0x2c] sm:$0xf0] }
   0xf   :  { %551 = vmatpush.bf16.msra.mxu1 %v1152_v13  ;;  %v867_v43 = vor.u32 %v1109_v38, %v864_v39  ;;  %v1112_v46 = vld [vmem:[%s1750_s0 + $0x24] sm:$0xf]  ;;  %v872_v47 = vld [vmem:[%s1750_s0 + $0x30] sm:$0xf0]  ;;  %v878_v48 = vld [vmem:[%s1750_s0 + $0x28] sm:$0xf]  ;;  %v871_v52 = vor.u32 %v1114_v45, %v870_v44 }
  0x10   :  { %600 = vmatpush.bf16.msra.mxu2 %v1160_v14  ;;  %v1115_v49 = vld [vmem:[%s1750_s0 + $0x34] sm:$0xf0]  ;;  %v1113_v50 = vld [vmem:[%s1750_s0 + $0x2c] sm:$0xf]  ;;  %v880_v51 = vld [vmem:[%s1750_s0 + $0x38] sm:$0xf0]  ;;  %v875_v53 = vor.u32 %v1112_v46, %v872_v47 }
  0x11   :  { %649 = vmatpush.bf16.msra.mxu3 %v1168_v15  ;;  %v879_v54 = vor.u32 %v1115_v49, %v878_v48  ;;  %v883_v55 = vor.u32 %v1113_v50, %v880_v51  ;;  %v886_v56 = vld [vmem:[%s1750_s0 + $0x40] sm:$0xf]  ;;  %v1118_v57 = vld [vmem:[%s1750_s0 + $0x4c] sm:$0xf0]  ;;  %v1116_v58 = vld [vmem:[%s1750_s0 + $0x44] sm:$0xf] }
  0x12   :  { %503 = vmatpush.bf16.msra.mxu0 %v1143_v16  ;;  %v888_v59 = vld [vmem:[%s1750_s0 + $0x50] sm:$0xf0]  ;;  %v894_v60 = vld [vmem:[%s1750_s0 + $0x48] sm:$0xf]  ;;  %v1119_v61 = vld [vmem:[%s1750_s0 + $0x54] sm:$0xf0]  ;;  %v887_v0 = vor.u32 %v1118_v57, %v886_v56 }
  0x13   :  { %552 = vmatpush.bf16.msra.mxu1 %v1151_v17  ;;  %v1117_v62 = vld [vmem:[%s1750_s0 + $0x4c] sm:$0xf]  ;;  %v896_v63 = vld [vmem:[%s1750_s0 + $0x58] sm:$0xf0]  ;;  %v891_v1 = vor.u32 %v1116_v58, %v888_v59  ;;  %v895_v2 = vor.u32 %v1119_v61, %v894_v60  ;;  %v902_v4 = vld [vmem:[%s1750_s0 + $0x60] sm:$0xf] }
  0x14   :  { %601 = vmatpush.bf16.msra.mxu2 %v1159_v18  ;;  %v899_v3 = vor.u32 %v1117_v62, %v896_v63  ;;  %v1122_v5 = vld [vmem:[%s1750_s0 + $0x6c] sm:$0xf0]  ;;  %v1120_v6 = vld [vmem:[%s1750_s0 + $0x64] sm:$0xf]  ;;  %v904_v7 = vld [vmem:[%s1750_s0 + $0x70] sm:$0xf0] }
  0x15   :  { %650 = vmatpush.bf16.msra.mxu3 %v1167_v19  ;;  %v910_v8 = vld [vmem:[%s1750_s0 + $0x68] sm:$0xf]  ;;  %v1123_v9 = vld [vmem:[%s1750_s0 + $0x74] sm:$0xf0]  ;;  %v1121_v10 = vld [vmem:[%s1750_s0 + $0x6c] sm:$0xf]  ;;  %v903_v12 = vor.u32 %v1122_v5, %v902_v4  ;;  %v907_v13 = vor.u32 %v1120_v6, %v904_v7 }
  0x16   :  { %504 = vmatpush.bf16.msra.mxu0 %v1142_v20  ;;  %v912_v11 = vld [vmem:[%s1750_s0 + $0x78] sm:$0xf0]  ;;  %v911_v14 = vor.u32 %v1123_v9, %v910_v8  ;;  %v918_v16 = vld [vmem:[%s1750_s0 + $0x80] sm:$0xf]  ;;  %v1126_v17 = vld [vmem:[%s1750_s0 + $0x8c] sm:$0xf0] }
  0x17   :  { %553 = vmatpush.bf16.msra.mxu1 %v1150_v21  ;;  %v915_v15 = vor.u32 %v1121_v10, %v912_v11  ;;  %v1124_v18 = vld [vmem:[%s1750_s0 + $0x84] sm:$0xf]  ;;  %v920_v19 = vld [vmem:[%s1750_s0 + $0x90] sm:$0xf0]  ;;  %v926_v20 = vld [vmem:[%s1750_s0 + $0x88] sm:$0xf] }
  0x18   :  { %602 = vmatpush.bf16.msra.mxu2 %v1158_v22  ;;  %v1127_v21 = vld [vmem:[%s1750_s0 + $0x94] sm:$0xf0]  ;;  %v1125_v22 = vld [vmem:[%s1750_s0 + $0x8c] sm:$0xf]  ;;  %v942_v32 = vld [vmem:[%s1750_s0 + $0xa8] sm:$0xf] }
  0x19   :  { %651 = vmatpush.bf16.msra.mxu3 %v1166_v23  ;;  %v928_v23 = vld [vmem:[%s1750_s0 + $0x98] sm:$0xf0]  ;;  %v1131_v33 = vld [vmem:[%s1750_s0 + $0xb4] sm:$0xf0]  ;;  %v1129_v34 = vld [vmem:[%s1750_s0 + $0xac] sm:$0xf] }
  0x1a   :  { %505 = vmatpush.bf16.msra.mxu0 %v1141_v24  ;;  %v919_v24 = vor.u32 %v1126_v17, %v918_v16  ;;  %v944_v35 = vld [vmem:[%s1750_s0 + $0xb8] sm:$0xf0]  ;;  %v943_v38 = vor.u32 %v1131_v33, %v942_v32  ;;  %v958_v44 = vld [vmem:[%s1750_s0 + $0xc8] sm:$0xf]  ;;  %v1135_v45 = vld [vmem:[%s1750_s0 + $0xd4] sm:$0xf0] }
  0x1b   :  { %554 = vmatpush.bf16.msra.mxu1 %v1149_v25  ;;  %v923_v25 = vor.u32 %v1124_v18, %v920_v19  ;;  %v947_v39 = vor.u32 %v1129_v34, %v944_v35  ;;  %v1133_v46 = vld [vmem:[%s1750_s0 + $0xcc] sm:$0xf]  ;;  %v960_v47 = vld [vmem:[%s1750_s0 + $0xd8] sm:$0xf0]  ;;  %v959_v50 = vor.u32 %v1135_v45, %v958_v44  ;;  %v968_v56 = vld [vmem:[%s1750_s0 + $0xf0] sm:$0xf0] }
  0x1c   :  { %603 = vmatpush.bf16.msra.mxu2 %v1157_v26  ;;  %v927_v26 = vor.u32 %v1127_v21, %v926_v20  ;;  %v963_v51 = vor.u32 %v1133_v46, %v960_v47  ;;  %v974_v57 = vld [vmem:[%s1750_s0 + $0xe8] sm:$0xf]  ;;  %v1139_v58 = vld [vmem:[%s1750_s0 + $0xf4] sm:$0xf0]  ;;  %v1137_v59 = vld [vmem:[%s1750_s0 + $0xec] sm:$0xf] }
  0x1d   :  { %652 = vmatpush.bf16.msra.mxu3 %v1165_v27  ;;  %v931_v27 = vor.u32 %v1125_v22, %v928_v23  ;;  %v976_v60 = vld [vmem:[%s1750_s0 + $0xf8] sm:$0xf0]  ;;  %v975_v63 = vor.u32 %v1139_v58, %v974_v57 }
  0x1e   :  { %506 = vmatpush.bf16.msra.mxu0 %v1140_v28  ;;  %v934_v28 = vld [vmem:[%s1750_s0 + $0xa0] sm:$0xf] }
  0x1f   :  { %555 = vmatpush.bf16.msra.mxu1 %v1148_v29  ;;  %v1130_v29 = vld [vmem:[%s1750_s0 + $0xac] sm:$0xf0] }
  0x20   :  { %604 = vmatpush.bf16.msra.mxu2 %v1156_v30  ;;  %v1128_v30 = vld [vmem:[%s1750_s0 + $0xa4] sm:$0xf]  ;;  %v935_v36 = vor.u32 %v1130_v29, %v934_v28 }
  0x21   :  { %653 = vmatpush.bf16.msra.mxu3 %v1164_v31  ;;  %507 = vmatmul.bf16.vlgmr.msra.gmra.mxu0 %v855_v40  ;;  %v936_v31 = vld [vmem:[%s1750_s0 + $0xb0] sm:$0xf0]  ;;  %v950_v40 = vld [vmem:[%s1750_s0 + $0xc0] sm:$0xf] }
  0x22   :  { %556 = vmatmul.bf16.vlgmr.msra.gmra.mxu1 %v859_v41  ;;  %v939_v37 = vor.u32 %v1128_v30, %v936_v31  ;;  %v1134_v41 = vld [vmem:[%s1750_s0 + $0xcc] sm:$0xf0] }
  0x23   :  { %605 = vmatmul.bf16.vlgmr.msra.gmra.mxu2 %v863_v42  ;;  %v1132_v42 = vld [vmem:[%s1750_s0 + $0xc4] sm:$0xf]  ;;  %v951_v48 = vor.u32 %v1134_v41, %v950_v40 }
  0x24   :  { %654 = vmatmul.bf16.vlgmr.msra.gmra.mxu3 %v867_v43  ;;  %v952_v43 = vld [vmem:[%s1750_s0 + $0xd0] sm:$0xf0] }
  0x25   :  { %v955_v49 = vor.u32 %v1132_v42, %v952_v43 }
  0x31   :  { %512 = vmatmul.bf16.gmra.mxu0 %v871_v52  ;;  %v1173_v52 = vmov 0.0  }
  0x32   :  { %561 = vmatmul.bf16.gmra.mxu1 %v875_v53  ;;  %19 = vst.msk [vmem:[%s1751_s2] sm:$0xff] %vm18_vm0, %v1173_v52  ;;  %v966_v53 = vld [vmem:[%s1750_s0 + $0xe0] sm:$0xf] }
  0x33   :  { %610 = vmatmul.bf16.gmra.mxu2 %v879_v54  ;;  %20 = vst.msk [vmem:[%s1751_s2 + $0x8] sm:$0xff] %vm18_vm0, %v1173_v52  ;;  %v1138_v54 = vld [vmem:[%s1750_s0 + $0xec] sm:$0xf0] }
  0x34   :  { %659 = vmatmul.bf16.gmra.mxu3 %v883_v55  ;;  %21 = vst.msk [vmem:[%s1751_s2 + $0x10] sm:$0xff] %vm18_vm0, %v1173_v52  ;;  %v1136_v55 = vld [vmem:[%s1750_s0 + $0xe4] sm:$0xf]  ;;  %v967_v61 = vor.u32 %v1138_v54, %v966_v53 }
  0x35   :  { %22 = vst.msk [vmem:[%s1751_s2 + $0x18] sm:$0xff] %vm18_vm0, %v1173_v52  ;;  %v971_v62 = vor.u32 %v1136_v55, %v968_v56 }
  0x36   :  { %23 = vst.msk [vmem:[%s1751_s2 + $0x20] sm:$0xff] %vm18_vm0, %v1173_v52 }
  0x37   :  { %24 = vst.msk [vmem:[%s1751_s2 + $0x28] sm:$0xff] %vm18_vm0, %v1173_v52 }
  0x38   :  { %25 = vst.msk [vmem:[%s1751_s2 + $0x30] sm:$0xff] %vm18_vm0, %v1173_v52 }
  0x39   :  { %26 = vst.msk [vmem:[%s1751_s2 + $0x38] sm:$0xff] %vm18_vm0, %v1173_v52  ;;  %v35_v9 = vld [vmem:[%s1751_s2] sm:$0xff] }
  0x3a   :  { %27 = vst.msk [vmem:[%s1751_s2 + $0x40] sm:$0xff] %vm18_vm0, %v1173_v52  ;;  %v36_v18 = vld [vmem:[%s1751_s2 + $0x8] sm:$0xff] }
  0x3b   :  { %28 = vst.msk [vmem:[%s1751_s2 + $0x48] sm:$0xff] %vm18_vm0, %v1173_v52 }
  0x3c   :  { %29 = vst.msk [vmem:[%s1751_s2 + $0x50] sm:$0xff] %vm18_vm0, %v1173_v52 }
  0x3d   :  { %30 = vst.msk [vmem:[%s1751_s2 + $0x58] sm:$0xff] %vm18_vm0, %v1173_v52  ;;  %v39_v45 = vld [vmem:[%s1751_s2 + $0x20] sm:$0xff] }
  0x3e   :  { %31 = vst.msk [vmem:[%s1751_s2 + $0x60] sm:$0xff] %vm18_vm0, %v1173_v52  ;;  %v40_v54 = vld [vmem:[%s1751_s2 + $0x28] sm:$0xff] }
  0x3f   :  { %32 = vst.msk [vmem:[%s1751_s2 + $0x68] sm:$0xff] %vm18_vm0, %v1173_v52 }
  0x40   :  { %33 = vst.msk [vmem:[%s1751_s2 + $0x70] sm:$0xff] %vm18_vm0, %v1173_v52 }
  0x41   :  { %517 = vmatmul.bf16.gmra.mxu0 %v887_v0  ;;  %v979_v0 = vor.u32 %v1137_v59, %v976_v60  ;;  %34 = vst.msk [vmem:[%s1751_s2 + $0x78] sm:$0xff] %vm18_vm0, %v1173_v52 }
  0x42   :  { %566 = vmatmul.bf16.gmra.mxu1 %v891_v1 }
  0x43   :  { %615 = vmatmul.bf16.gmra.mxu2 %v895_v2 }
  0x44   :  { %664 = vmatmul.bf16.gmra.mxu3 %v899_v3 }
  0x51   :  { %522 = vmatmul.bf16.gmra.mxu0 %v903_v12 }
  0x52   :  { %571 = vmatmul.bf16.gmra.mxu1 %v907_v13 }
  0x53   :  { %620 = vmatmul.bf16.gmra.mxu2 %v911_v14 }
  0x54   :  { %669 = vmatmul.bf16.gmra.mxu3 %v915_v15 }
  0x61   :  { %527 = vmatmul.bf16.gmra.mxu0 %v919_v24 }
  0x62   :  { %576 = vmatmul.bf16.gmra.mxu1 %v923_v25 }
  0x63   :  { %625 = vmatmul.bf16.gmra.mxu2 %v927_v26 }
  0x64   :  { %674 = vmatmul.bf16.gmra.mxu3 %v931_v27  ;;  %v37_v27 = vld [vmem:[%s1751_s2 + $0x10] sm:$0xff] }
  0x71   :  { %532 = vmatmul.bf16.gmra.mxu0 %v935_v36  ;;  %v38_v36 = vld [vmem:[%s1751_s2 + $0x18] sm:$0xff] }
  0x72   :  { %581 = vmatmul.bf16.gmra.mxu1 %v939_v37 }
  0x73   :  { %630 = vmatmul.bf16.gmra.mxu2 %v943_v38 }
  0x74   :  { %679 = vmatmul.bf16.gmra.mxu3 %v947_v39 }
  0x81   :  { %537 = vmatmul.bf16.gmra.mxu0 %v951_v48 }
  0x82   :  { %586 = vmatmul.bf16.gmra.mxu1 %v955_v49 }
  0x83   :  { %635 = vmatmul.bf16.gmra.mxu2 %v959_v50 }
  0x84   :  { %684 = vmatmul.bf16.gmra.mxu3 %v963_v51 }
  0x91   :  { %542 = vmatmul.bf16.gmra.mxu0 %v967_v61 }
  0x92   :  { %591 = vmatmul.bf16.gmra.mxu1 %v971_v62 }
  0x93   :  { %640 = vmatmul.bf16.gmra.mxu2 %v975_v63  ;;  %v41_v63 = vld [vmem:[%s1751_s2 + $0x30] sm:$0xff] }
  0x94   :  { %689 = vmatmul.bf16.gmra.mxu3 %v979_v0 }
  0x9e   :  { %v508_v1 = vpop.f32.mrf.mxu0 }
  0x9f   :  { %v557_v2 = vpop.f32.mrf.mxu1 }
  0xa0   :  { %v558_v3 = vadd.f32 %v557_v2, %v508_v1 }
  0xa6   :  { %v606_v4 = vpop.f32.mrf.mxu2  ;;  %v510_v7 = vpop.f32.mrf.mxu0 }
  0xa7   :  { %v655_v5 = vpop.f32.mrf.mxu3  ;;  %v607_v6 = vadd.f32 %v606_v4, %v558_v3  ;;  %v559_v8 = vpop.f32.mrf.mxu1 }
  0xa8   :  { %v560_v12 = vadd.f32 %v559_v8, %v510_v7  ;;  %v42_v8 = vld [vmem:[%s1751_s2 + $0x38] sm:$0xff] }
  0xa9   :  { %v656_v10 = vadd.f32 %v655_v5, %v607_v6 }
  0xab   :  { %v695_v11 = vadd.f32 %v656_v10, %v35_v9 }
  0xad   :  { %712 = vst.msk [vmem:[%s1751_s2] sm:$0xff] %vm18_vm0, %v695_v11 }
  0xae   :  { %v608_v13 = vpop.f32.mrf.mxu2  ;;  %v513_v16 = vpop.f32.mrf.mxu0 }
  0xaf   :  { %v657_v14 = vpop.f32.mrf.mxu3  ;;  %v609_v15 = vadd.f32 %v608_v13, %v560_v12  ;;  %v562_v17 = vpop.f32.mrf.mxu1 }
  0xb0   :  { %v563_v21 = vadd.f32 %v562_v17, %v513_v16  ;;  %v43_v17 = vld [vmem:[%s1751_s2 + $0x40] sm:$0xff] }
  0xb1   :  { %v658_v19 = vadd.f32 %v657_v14, %v609_v15 }
  0xb3   :  { %v696_v20 = vadd.f32 %v658_v19, %v36_v18 }
  0xb5   :  { %713 = vst.msk [vmem:[%s1751_s2 + $0x8] sm:$0xff] %vm18_vm0, %v696_v20 }
  0xb6   :  { %v611_v22 = vpop.f32.mrf.mxu2  ;;  %v515_v25 = vpop.f32.mrf.mxu0 }
  0xb7   :  { %v660_v23 = vpop.f32.mrf.mxu3  ;;  %v612_v24 = vadd.f32 %v611_v22, %v563_v21  ;;  %v564_v26 = vpop.f32.mrf.mxu1 }
  0xb8   :  { %v565_v30 = vadd.f32 %v564_v26, %v515_v25  ;;  %v44_v26 = vld [vmem:[%s1751_s2 + $0x48] sm:$0xff] }
  0xb9   :  { %v661_v28 = vadd.f32 %v660_v23, %v612_v24 }
  0xbb   :  { %v697_v29 = vadd.f32 %v661_v28, %v37_v27 }
  0xbd   :  { %714 = vst.msk [vmem:[%s1751_s2 + $0x10] sm:$0xff] %vm18_vm0, %v697_v29 }
  0xbe   :  { %v613_v31 = vpop.f32.mrf.mxu2  ;;  %v518_v34 = vpop.f32.mrf.mxu0 }
  0xbf   :  { %v662_v32 = vpop.f32.mrf.mxu3  ;;  %v614_v33 = vadd.f32 %v613_v31, %v565_v30  ;;  %v567_v35 = vpop.f32.mrf.mxu1 }
  0xc0   :  { %v568_v39 = vadd.f32 %v567_v35, %v518_v34  ;;  %v45_v35 = vld [vmem:[%s1751_s2 + $0x50] sm:$0xff] }
  0xc1   :  { %v663_v37 = vadd.f32 %v662_v32, %v614_v33 }
  0xc3   :  { %v698_v38 = vadd.f32 %v663_v37, %v38_v36 }
  0xc5   :  { %715 = vst.msk [vmem:[%s1751_s2 + $0x18] sm:$0xff] %vm18_vm0, %v698_v38 }
  0xc6   :  { %v616_v40 = vpop.f32.mrf.mxu2  ;;  %v520_v43 = vpop.f32.mrf.mxu0 }
  0xc7   :  { %v665_v41 = vpop.f32.mrf.mxu3  ;;  %v617_v42 = vadd.f32 %v616_v40, %v568_v39  ;;  %v569_v44 = vpop.f32.mrf.mxu1 }
  0xc8   :  { %v570_v48 = vadd.f32 %v569_v44, %v520_v43  ;;  %v46_v44 = vld [vmem:[%s1751_s2 + $0x58] sm:$0xff] }
  0xc9   :  { %v666_v46 = vadd.f32 %v665_v41, %v617_v42 }
  0xcb   :  { %v699_v47 = vadd.f32 %v666_v46, %v39_v45 }
  0xcd   :  { %716 = vst.msk [vmem:[%s1751_s2 + $0x20] sm:$0xff] %vm18_vm0, %v699_v47 }
  0xce   :  { %v618_v49 = vpop.f32.mrf.mxu2  ;;  %v523_v52 = vpop.f32.mrf.mxu0 }
  0xcf   :  { %v667_v50 = vpop.f32.mrf.mxu3  ;;  %v619_v51 = vadd.f32 %v618_v49, %v570_v48  ;;  %v572_v53 = vpop.f32.mrf.mxu1 }
  0xd0   :  { %v573_v57 = vadd.f32 %v572_v53, %v523_v52  ;;  %v47_v53 = vld [vmem:[%s1751_s2 + $0x60] sm:$0xff] }
  0xd1   :  { %v668_v55 = vadd.f32 %v667_v50, %v619_v51 }
  0xd3   :  { %v700_v56 = vadd.f32 %v668_v55, %v40_v54  ;;  %v732_v55 = vld [vmem:[%s1751_s2 + $0x8] sm:$0xff] }
  0xd5   :  { %717 = vst.msk [vmem:[%s1751_s2 + $0x28] sm:$0xff] %vm18_vm0, %v700_v56  ;;  %v731_v56 = vld [vmem:[%s1751_s2] sm:$0xff] }
  0xd6   :  { %v621_v58 = vpop.f32.mrf.mxu2  ;;  %v525_v61 = vpop.f32.mrf.mxu0 }
  0xd7   :  { %v670_v59 = vpop.f32.mrf.mxu3  ;;  %v622_v60 = vadd.f32 %v621_v58, %v573_v57  ;;  %v574_v62 = vpop.f32.mrf.mxu1  ;;  %v733_v57 = vld [vmem:[%s1751_s2 + $0x10] sm:$0xff] }
  0xd8   :  { %v575_v2 = vadd.f32 %v574_v62, %v525_v61  ;;  %v786_v61 = vmul.f32 %v731_v56, %v731_v56  ;;  %v788_v62 = vmul.f32 %v733_v57, %v733_v57 }
  0xd9   :  { %v671_v0 = vadd.f32 %v670_v59, %v622_v60  ;;  %v787_v59 = vmul.f32 %v732_v55, %v732_v55 }
  0xdb   :  { %v701_v1 = vadd.f32 %v671_v0, %v41_v63  ;;  %v734_v63 = vld [vmem:[%s1751_s2 + $0x18] sm:$0xff] }
  0xdd   :  { %718 = vst.msk [vmem:[%s1751_s2 + $0x30] sm:$0xff] %vm18_vm0, %v701_v1 }
  0xde   :  { %v623_v3 = vpop.f32.mrf.mxu2  ;;  %v528_v6 = vpop.f32.mrf.mxu0 }
  0xdf   :  { %v672_v4 = vpop.f32.mrf.mxu3  ;;  %v624_v5 = vadd.f32 %v623_v3, %v575_v2  ;;  %v577_v7 = vpop.f32.mrf.mxu1  ;;  %v748_v2 = vsel %vm18_vm0, %v732_v55, 0.0 }
  0xe0   :  { %v578_v11 = vadd.f32 %v577_v7, %v528_v6  ;;  %v48_v6 = vld [vmem:[%s1751_s2 + $0x68] sm:$0xff] }
  0xe1   :  { %v673_v9 = vadd.f32 %v672_v4, %v624_v5  ;;  %v747_v4 = vsel %vm18_vm0, %v731_v56, 0.0  ;;  %v735_v5 = vld [vmem:[%s1751_s2 + $0x20] sm:$0xff] }
  0xe3   :  { %v702_v10 = vadd.f32 %v673_v9, %v42_v8  ;;  %v803_v9 = vsel %vm18_vm0, %v787_v59, 0.0 }
  0xe5   :  { %719 = vst.msk [vmem:[%s1751_s2 + $0x38] sm:$0xff] %vm18_vm0, %v702_v10  ;;  %v750_v10 = vsel %vm18_vm0, %v733_v57, 0.0 }
  0xe6   :  { %v626_v12 = vpop.f32.mrf.mxu2  ;;  %v530_v15 = vpop.f32.mrf.mxu0 }
  0xe7   :  { %v675_v13 = vpop.f32.mrf.mxu3  ;;  %v627_v14 = vadd.f32 %v626_v12, %v578_v11  ;;  %v579_v16 = vpop.f32.mrf.mxu1  ;;  %v789_v11 = vmul.f32 %v734_v63, %v734_v63 }
  0xe8   :  { %v580_v20 = vadd.f32 %v579_v16, %v530_v15  ;;  %v805_v15 = vsel %vm18_vm0, %v788_v62, 0.0  ;;  %v736_v16 = vld [vmem:[%s1751_s2 + $0x28] sm:$0xff] }
  0xe9   :  { %v676_v18 = vadd.f32 %v675_v13, %v627_v14  ;;  %v802_v13 = vsel %vm18_vm0, %v786_v61, 0.0  ;;  %v749_v14 = vadd.f32 %v748_v2, %v747_v4 }
  0xeb   :  { %v703_v19 = vadd.f32 %v676_v18, %v43_v17  ;;  %v752_v17 = vsel %vm18_vm0, %v734_v63, 0.0  ;;  %v790_v18 = vmul.f32 %v735_v5, %v735_v5 }
  0xed   :  { %720 = vst.msk [vmem:[%s1751_s2 + $0x40] sm:$0xff] %vm18_vm0, %v703_v19 }
  0xee   :  { %v628_v21 = vpop.f32.mrf.mxu2  ;;  %v533_v24 = vpop.f32.mrf.mxu0 }
  0xef   :  { %v677_v22 = vpop.f32.mrf.mxu3  ;;  %v629_v23 = vadd.f32 %v628_v21, %v580_v20  ;;  %v582_v25 = vpop.f32.mrf.mxu1  ;;  %v804_v21 = vadd.f32 %v803_v9, %v802_v13 }
  0xf0   :  { %v583_v29 = vadd.f32 %v582_v25, %v533_v24  ;;  %v807_v24 = vsel %vm18_vm0, %v789_v11, 0.0  ;;  %v754_v25 = vsel %vm18_vm0, %v735_v5, 0.0 }
  0xf1   :  { %v678_v27 = vadd.f32 %v677_v22, %v629_v23  ;;  %v751_v22 = vadd.f32 %v750_v10, %v749_v14  ;;  %v737_v23 = vld [vmem:[%s1751_s2 + $0x30] sm:$0xff] }
  0xf3   :  { %v704_v28 = vadd.f32 %v678_v27, %v44_v26  ;;  %v791_v26 = vmul.f32 %v736_v16, %v736_v16  ;;  %v806_v27 = vadd.f32 %v805_v15, %v804_v21 }
  0xf5   :  { %721 = vst.msk [vmem:[%s1751_s2 + $0x48] sm:$0xff] %vm18_vm0, %v704_v28  ;;  %v753_v28 = vadd.f32 %v752_v17, %v751_v22 }
  0xf6   :  { %v631_v30 = vpop.f32.mrf.mxu2  ;;  %v535_v33 = vpop.f32.mrf.mxu0 }
  0xf7   :  { %v680_v31 = vpop.f32.mrf.mxu3  ;;  %v632_v32 = vadd.f32 %v631_v30, %v583_v29  ;;  %v584_v34 = vpop.f32.mrf.mxu1  ;;  %v738_v29 = vld [vmem:[%s1751_s2 + $0x38] sm:$0xff] }
  0xf8   :  { %v585_v38 = vadd.f32 %v584_v34, %v535_v33  ;;  %v756_v33 = vsel %vm18_vm0, %v736_v16, 0.0  ;;  %v792_v34 = vmul.f32 %v737_v23, %v737_v23 }
  0xf9   :  { %v681_v36 = vadd.f32 %v680_v31, %v632_v32  ;;  %v809_v32 = vsel %vm18_vm0, %v790_v18, 0.0 }
  0xfb   :  { %v705_v37 = vadd.f32 %v681_v36, %v45_v35  ;;  %v808_v36 = vadd.f32 %v807_v24, %v806_v27 }
  0xfd   :  { %722 = vst.msk [vmem:[%s1751_s2 + $0x50] sm:$0xff] %vm18_vm0, %v705_v37  ;;  %v755_v37 = vadd.f32 %v754_v25, %v753_v28 }
  0xfe   :  { %v633_v39 = vpop.f32.mrf.mxu2  ;;  %v538_v42 = vpop.f32.mrf.mxu0 }
  0xff   :  { %v682_v40 = vpop.f32.mrf.mxu3  ;;  %v634_v41 = vadd.f32 %v633_v39, %v585_v38  ;;  %v587_v43 = vpop.f32.mrf.mxu1  ;;  %v739_v38 = vld [vmem:[%s1751_s2 + $0x40] sm:$0xff]  ;;  %v49_v39 = vld [vmem:[%s1751_s2 + $0x70] sm:$0xff] }
 0x100   :  { %v588_v47 = vadd.f32 %v587_v43, %v538_v42  ;;  %v793_v42 = vmul.f32 %v738_v29, %v738_v29  ;;  %v762_v57 = vsel %vm18_vm0, %v739_v38, 0.0 }
 0x101   :  { %v683_v45 = vadd.f32 %v682_v40, %v634_v41  ;;  %v811_v40 = vsel %vm18_vm0, %v791_v26, 0.0  ;;  %v758_v41 = vsel %vm18_vm0, %v737_v23, 0.0 }
 0x102   :  { %v815_v56 = vsel %vm18_vm0, %v793_v42, 0.0 }
 0x103   :  { %v706_v46 = vadd.f32 %v683_v45, %v46_v44  ;;  %v810_v44 = vadd.f32 %v809_v32, %v808_v36  ;;  %v757_v45 = vadd.f32 %v756_v33, %v755_v37 }
 0x104   :  { %v741_v55 = vld [vmem:[%s1751_s2 + $0x50] sm:$0xff] }
 0x105   :  { %723 = vst.msk [vmem:[%s1751_s2 + $0x58] sm:$0xff] %vm18_vm0, %v706_v46  ;;  %v740_v46 = vld [vmem:[%s1751_s2 + $0x48] sm:$0xff]  ;;  %v796_v2 = vmul.f32 %v741_v55, %v741_v55  ;;  %v766_v10 = vsel %vm18_vm0, %v741_v55, 0.0 }
 0x106   :  { %v636_v48 = vpop.f32.mrf.mxu2  ;;  %v540_v51 = vpop.f32.mrf.mxu0 }
 0x107   :  { %v685_v49 = vpop.f32.mrf.mxu3  ;;  %v637_v50 = vadd.f32 %v636_v48, %v588_v47  ;;  %v589_v52 = vpop.f32.mrf.mxu1  ;;  %v821_v16 = vsel %vm18_vm0, %v796_v2, 0.0 }
 0x108   :  { %v590_v60 = vadd.f32 %v589_v52, %v540_v51  ;;  %v794_v51 = vmul.f32 %v739_v38, %v739_v38 }
 0x109   :  { %v686_v54 = vadd.f32 %v685_v49, %v637_v50  ;;  %v813_v49 = vsel %vm18_vm0, %v792_v34, 0.0  ;;  %v760_v50 = vsel %vm18_vm0, %v738_v29, 0.0 }
 0x10b   :  { %v707_v58 = vadd.f32 %v686_v54, %v47_v53  ;;  %v812_v53 = vadd.f32 %v811_v40, %v810_v44  ;;  %v759_v54 = vadd.f32 %v758_v41, %v757_v45 }
 0x10c   :  { %v742_v62 = vld [vmem:[%s1751_s2 + $0x58] sm:$0xff] }
 0x10d   :  { %724 = vst.msk [vmem:[%s1751_s2 + $0x60] sm:$0xff] %vm18_vm0, %v707_v58  ;;  %v795_v58 = vmul.f32 %v740_v46, %v740_v46  ;;  %v761_v61 = vadd.f32 %v760_v50, %v759_v54  ;;  %v797_v11 = vmul.f32 %v742_v62, %v742_v62  ;;  %v768_v17 = vsel %vm18_vm0, %v742_v62, 0.0 }
 0x10e   :  { %v638_v0 = vpop.f32.mrf.mxu2  ;;  %v543_v7 = vpop.f32.mrf.mxu0 }
 0x10f   :  { %v687_v1 = vpop.f32.mrf.mxu3  ;;  %v639_v3 = vadd.f32 %v638_v0, %v590_v60  ;;  %v592_v8 = vpop.f32.mrf.mxu1  ;;  %v814_v60 = vadd.f32 %v813_v49, %v812_v53  ;;  %v817_v0 = vsel %vm18_vm0, %v794_v51, 0.0  ;;  %v763_v5 = vadd.f32 %v762_v57, %v761_v61 }
 0x110   :  { %v593_v20 = vadd.f32 %v592_v8, %v543_v7  ;;  %v50_v7 = vld [vmem:[%s1751_s2 + $0x78] sm:$0xff]  ;;  %v819_v9 = vsel %vm18_vm0, %v795_v58, 0.0  ;;  %v823_v23 = vsel %vm18_vm0, %v797_v11, 0.0 }
 0x111   :  { %v688_v12 = vadd.f32 %v687_v1, %v639_v3  ;;  %v764_v1 = vsel %vm18_vm0, %v740_v46, 0.0  ;;  %v816_v4 = vadd.f32 %v815_v56, %v814_v60 }
 0x112   :  { %v765_v14 = vadd.f32 %v764_v1, %v763_v5 }
 0x113   :  { %v708_v19 = vadd.f32 %v688_v12, %v48_v6  ;;  %v818_v13 = vadd.f32 %v817_v0, %v816_v4 }
 0x114   :  { %v743_v6 = vld [vmem:[%s1751_s2 + $0x60] sm:$0xff]  ;;  %v767_v21 = vadd.f32 %v766_v10, %v765_v14 }
 0x115   :  { %725 = vst.msk [vmem:[%s1751_s2 + $0x68] sm:$0xff] %vm18_vm0, %v708_v19  ;;  %v798_v18 = vmul.f32 %v743_v6, %v743_v6  ;;  %v770_v24 = vsel %vm18_vm0, %v743_v6, 0.0 }
 0x116   :  { %v641_v30 = vpop.f32.mrf.mxu2  ;;  %v545_v47 = vpop.f32.mrf.mxu0  ;;  %v769_v27 = vadd.f32 %v768_v17, %v767_v21 }
 0x117   :  { %v690_v31 = vpop.f32.mrf.mxu3  ;;  %v642_v35 = vadd.f32 %v641_v30, %v593_v20  ;;  %v594_v48 = vpop.f32.mrf.mxu1  ;;  %v820_v20 = vadd.f32 %v819_v9, %v818_v13  ;;  %v825_v28 = vsel %vm18_vm0, %v798_v18, 0.0 }
 0x118   :  { %v595_v59 = vadd.f32 %v594_v48, %v545_v47  ;;  %v771_v32 = vadd.f32 %v770_v24, %v769_v27 }
 0x119   :  { %v691_v43 = vadd.f32 %v690_v31, %v642_v35  ;;  %v822_v26 = vadd.f32 %v821_v16, %v820_v20 }
 0x11b   :  { %v709_v52 = vadd.f32 %v691_v43, %v49_v39  ;;  %v824_v31 = vadd.f32 %v823_v23, %v822_v26 }
 0x11c   :  { %v744_v15 = vld [vmem:[%s1751_s2 + $0x68] sm:$0xff] }
 0x11d   :  { %726 = vst.msk [vmem:[%s1751_s2 + $0x70] sm:$0xff] %vm18_vm0, %v709_v52  ;;  %v799_v25 = vmul.f32 %v744_v15, %v744_v15  ;;  %v772_v29 = vsel %vm18_vm0, %v744_v15, 0.0  ;;  %v826_v35 = vadd.f32 %v825_v28, %v824_v31 }
 0x11e   :  { %v643_v63 = vpop.f32.mrf.mxu2  ;;  %v773_v36 = vadd.f32 %v772_v29, %v771_v32 }
 0x11f   :  { %v644_v3 = vadd.f32 %v643_v63, %v595_v59  ;;  %v692_v8 = vpop.f32.mrf.mxu3  ;;  %v827_v33 = vsel %vm18_vm0, %v799_v25, 0.0 }
 0x120   :  { %v828_v38 = vadd.f32 %v827_v33, %v826_v35 }
 0x121   :  { %v693_v12 = vadd.f32 %v692_v8, %v644_v3 }
 0x123   :  { %v710_v19 = vadd.f32 %v693_v12, %v50_v7 }
 0x124   :  { %v745_v22 = vld [vmem:[%s1751_s2 + $0x70] sm:$0xff] }
 0x125   :  { %727 = vst.msk [vmem:[%s1751_s2 + $0x78] sm:$0xff] %vm18_vm0, %v710_v19  ;;  %v800_v30 = vmul.f32 %v745_v22, %v745_v22  ;;  %v774_v34 = vsel %vm18_vm0, %v745_v22, 0.0 }
 0x126   :  { %v775_v39 = vadd.f32 %v774_v34, %v773_v36 }
 0x127   :  { %v829_v37 = vsel %vm18_vm0, %v800_v30, 0.0 }
 0x128   :  { %v830_v43 = vadd.f32 %v829_v37, %v828_v38 }
 0x12c   :  { %v746_v40 = vld [vmem:[%s1751_s2 + $0x78] sm:$0xff] }
 0x12d   :  { %v776_v41 = vsel %vm18_vm0, %v746_v40, 0.0  ;;  %v801_v42 = vmul.f32 %v746_v40, %v746_v40 }
 0x12e   :  { %v777_v44 = vadd.f32 %v776_v41, %v775_v39 }
 0x12f   :  { %v831_v45 = vsel %vm18_vm0, %v801_v42, 0.0 }
 0x130   :  { %v778_v46 = vrot.slane %v777_v44, 4  ;;  %v832_v47 = vadd.f32 %v831_v45, %v830_v43 }
 0x132   :  { %v779_v48 = vadd.f32 %v778_v46, %v777_v44  ;;  %v833_v49 = vrot.slane %v832_v47, 4 }
 0x134   :  { %v780_v50 = vrot.slane %v779_v48, 2  ;;  %v834_v51 = vadd.f32 %v833_v49, %v832_v47 }
 0x136   :  { %v781_v52 = vadd.f32 %v780_v50, %v779_v48  ;;  %v835_v53 = vrot.slane %v834_v51, 2 }
 0x138   :  { %v782_v54 = vrot.slane %v781_v52, 1  ;;  %v836_v55 = vadd.f32 %v835_v53, %v834_v51 }
 0x13a   :  { %v783_v56 = vadd.f32 %v782_v54, %v781_v52  ;;  %v837_v57 = vrot.slane %v836_v55, 1 }
 0x13c   :  { %785 = vst.msk [vmem:[%s1752_s3] sm:$0x1] %vm784_vm1, %v783_v56  ;;  %v838_v58 = vadd.f32 %v837_v57, %v836_v55 }
 0x13e   :  { %839 = vst.msk [vmem:[%s1753_s4] sm:$0x1] %vm784_vm1, %v838_v58 }

// kernel: discriminator_forward.14
= control target key start
LH: loop header
LB: loop body
LE: loop exit
PB: predicated region body
PF: predicated region fallthrough
CT: control target
= control target key end

     0   :  { %vm134_vm0 = vcmask 519168   ;;  %s331_s0 = inlined_call_operand.vmem [shape: f32[128,64], index: 0, kind: input, shape index: {}]   ;;  %s332_s1 = inlined_call_operand.vmem [shape: f32[1,64], index: 1, kind: input, shape index: {}]   ;;  %s333_s2 = inlined_call_operand.vmem [shape: f32[1,64], index: 2, kind: input, shape index: {}]   ;;  %s334_s3 = inlined_call_operand.vmem [shape: bf16[128,64], index: 3, kind: output, shape index: {}]  }
   0x1   :  { %v14_v0 = vld [vmem:[%s331_s0] sm:$0xff]  ;;  %v15_v3 = vld [vmem:[%s331_s0 + $0x8] sm:$0xff]  ;;  %v16_v6 = vld [vmem:[%s331_s0 + $0x10] sm:$0xff] }
   0x2   :  { %v183_v1 = vld [vmem:[%s332_s1] ss:$0 sm:$0xff]  ;;  %v17_v7 = vld [vmem:[%s331_s0 + $0x18] sm:$0xff]  ;;  %v19_v12 = vld [vmem:[%s331_s0 + $0x28] sm:$0xff] }
   0x3   :  { %v188_v2 = vld [vmem:[%s333_s2] ss:$0 sm:$0xff]  ;;  %v34_v4 = vmul.f32 %v183_v1, %v14_v0  ;;  %v35_v5 = vmul.f32 %v183_v1, %v15_v3  ;;  %v36_v9 = vmul.f32 %v183_v1, %v16_v6  ;;  %v37_v10 = vmul.f32 %v183_v1, %v17_v7  ;;  %v20_v13 = vld [vmem:[%s331_s0 + $0x30] sm:$0xff]  ;;  %v21_v14 = vld [vmem:[%s331_s0 + $0x38] sm:$0xff] }
   0x4   :  { %v18_v8 = vld [vmem:[%s331_s0 + $0x20] sm:$0xff]  ;;  %v39_v17 = vmul.f32 %v183_v1, %v19_v12  ;;  %v40_v18 = vmul.f32 %v183_v1, %v20_v13  ;;  %v41_v22 = vmul.f32 %v183_v1, %v21_v14  ;;  %v23_v35 = vld [vmem:[%s331_s0 + $0x48] sm:$0xff]  ;;  %v24_v36 = vld [vmem:[%s331_s0 + $0x50] sm:$0xff] }
   0x5   :  { %v38_v11 = vmul.f32 %v183_v1, %v18_v8  ;;  %v54_v15 = vadd.f32 %v188_v2, %v34_v4  ;;  %v55_v16 = vadd.f32 %v188_v2, %v35_v5  ;;  %v56_v19 = vadd.f32 %v188_v2, %v36_v9  ;;  %v22_v30 = vld [vmem:[%s331_s0 + $0x40] sm:$0xff]  ;;  %v25_v54 = vld [vmem:[%s331_s0 + $0x58] sm:$0xff]  ;;  %v27_v62 = vld [vmem:[%s331_s0 + $0x68] sm:$0xff] }
   0x6   :  { %v57_v20 = vadd.f32 %v188_v2, %v37_v10  ;;  %v59_v40 = vadd.f32 %v188_v2, %v39_v17  ;;  %v60_v42 = vadd.f32 %v188_v2, %v40_v18  ;;  %v61_v43 = vadd.f32 %v188_v2, %v41_v22  ;;  %v26_v58 = vld [vmem:[%s331_s0 + $0x60] sm:$0xff]  ;;  %v28_v63 = vld [vmem:[%s331_s0 + $0x70] sm:$0xff]  ;;  %v29_v5 = vld [vmem:[%s331_s0 + $0x78] sm:$0xff] }
   0x7   :  { %v58_v21 = vadd.f32 %v188_v2, %v38_v11  ;;  %vm70_vm1 = vcmp.ge.f32.partialorder %v54_v15, 0.0  ;;  %v86_v23 = vmul.f32 0.2, %v54_v15  ;;  %vm71_vm2 = vcmp.ge.f32.partialorder %v55_v16, 0.0 }
   0x8   :  { %v87_v24 = vmul.f32 0.2, %v55_v16  ;;  %vm72_vm3 = vcmp.ge.f32.partialorder %v56_v19, 0.0  ;;  %v88_v25 = vmul.f32 0.2, %v56_v19  ;;  %vm73_vm4 = vcmp.ge.f32.partialorder %v57_v20, 0.0 }
   0x9   :  { %v89_v26 = vmul.f32 0.2, %v57_v20  ;;  %v102_v27 = vsel %vm70_vm1, %v54_v15, %v86_v23  ;;  %vm74_vm5 = vcmp.ge.f32.partialorder %v58_v21, 0.0  ;;  %v90_v29 = vmul.f32 0.2, %v58_v21 }
   0xa   :  { %v103_v28 = vsel %vm71_vm2, %v55_v16, %v87_v24  ;;  %v118_v31 = vpack.c.bf16 %v102_v27, %v102_v27  ;;  %v104_v33 = vsel %vm72_vm3, %v56_v19, %v88_v25  ;;  %v42_v44 = vmul.f32 %v183_v1, %v22_v30 }
   0xb   :  { %v119_v32 = vpack.c.bf16 %v103_v28, %v103_v28  ;;  %v105_v34 = vsel %vm73_vm4, %v57_v20, %v89_v26  ;;  %v120_v37 = vpack.c.bf16 %v104_v33, %v104_v33  ;;  %v106_v39 = vsel %vm74_vm5, %v58_v21, %v90_v29 }
   0xc   :  { %v121_v38 = vpack.c.bf16 %v105_v34, %v105_v34  ;;  %135 = vst.msk [vmem:[%s334_s3] sm:$0xf] %vm134_vm0, %v118_v31  ;;  %v122_v41 = vpack.c.bf16 %v106_v39, %v106_v39  ;;  %vm75_vm6 = vcmp.ge.f32.partialorder %v59_v40, 0.0  ;;  %v91_v45 = vmul.f32 0.2, %v59_v40 }
   0xd   :  { %136 = vst.msk [vmem:[%s334_s3 + $0x4] sm:$0xf] %vm134_vm0, %v119_v32  ;;  %v43_v46 = vmul.f32 %v183_v1, %v23_v35  ;;  %v44_v47 = vmul.f32 %v183_v1, %v24_v36  ;;  %vm76_vm7 = vcmp.ge.f32.partialorder %v60_v42, 0.0  ;;  %v92_v48 = vmul.f32 0.2, %v60_v42 }
   0xe   :  { %137 = vst.msk [vmem:[%s334_s3 + $0x8] sm:$0xf] %vm134_vm0, %v120_v37  ;;  %vm77_vm8 = vcmp.ge.f32.partialorder %v61_v43, 0.0  ;;  %v62_v49 = vadd.f32 %v188_v2, %v42_v44  ;;  %v107_v50 = vsel %vm75_vm6, %v59_v40, %v91_v45  ;;  %v93_v51 = vmul.f32 0.2, %v61_v43 }
   0xf   :  { %138 = vst.msk [vmem:[%s334_s3 + $0xc] sm:$0xf] %vm134_vm0, %v121_v38  ;;  %v63_v52 = vadd.f32 %v188_v2, %v43_v46  ;;  %v64_v53 = vadd.f32 %v188_v2, %v44_v47  ;;  %v123_v55 = vpack.c.bf16 %v107_v50, %v107_v50  ;;  %v108_v56 = vsel %vm76_vm7, %v60_v42, %v92_v48 }
  0x10   :  { %139 = vst.msk [vmem:[%s334_s3 + $0x10] sm:$0xf] %vm134_vm0, %v122_v41  ;;  %vm78_vm9 = vcmp.ge.f32.partialorder %v62_v49, 0.0  ;;  %v94_v57 = vmul.f32 0.2, %v62_v49  ;;  %v124_v59 = vpack.c.bf16 %v108_v56, %v108_v56  ;;  %v109_v60 = vsel %vm77_vm8, %v61_v43, %v93_v51 }
  0x11   :  { %vm79_vm10 = vcmp.ge.f32.partialorder %v63_v52, 0.0  ;;  %v95_v61 = vmul.f32 0.2, %v63_v52  ;;  %140 = vst.msk [vmem:[%s334_s3 + $0x14] sm:$0xf] %vm134_vm0, %v123_v55  ;;  %v125_v0 = vpack.c.bf16 %v109_v60, %v109_v60  ;;  %vm80_vm11 = vcmp.ge.f32.partialorder %v64_v53, 0.0 }
  0x12   :  { %v110_v3 = vsel %vm78_vm9, %v62_v49, %v94_v57  ;;  %v96_v4 = vmul.f32 0.2, %v64_v53  ;;  %141 = vst.msk [vmem:[%s334_s3 + $0x18] sm:$0xf] %vm134_vm0, %v124_v59  ;;  %v45_v8 = vmul.f32 %v183_v1, %v25_v54  ;;  %v46_v9 = vmul.f32 %v183_v1, %v26_v58 }
  0x13   :  { %v126_v6 = vpack.c.bf16 %v110_v3, %v110_v3  ;;  %v111_v7 = vsel %vm79_vm10, %v63_v52, %v95_v61  ;;  %142 = vst.msk [vmem:[%s334_s3 + $0x1c] sm:$0xf] %vm134_vm0, %v125_v0  ;;  %v47_v12 = vmul.f32 %v183_v1, %v27_v62  ;;  %v48_v13 = vmul.f32 %v183_v1, %v28_v63 }
  0x14   :  { %v127_v10 = vpack.c.bf16 %v111_v7, %v111_v7  ;;  %v112_v11 = vsel %vm80_vm11, %v64_v53, %v96_v4  ;;  %v65_v15 = vadd.f32 %v188_v2, %v45_v8  ;;  %v66_v16 = vadd.f32 %v188_v2, %v46_v9 }
  0x15   :  { %143 = vst.msk [vmem:[%s334_s3 + $0x20] sm:$0xf] %vm134_vm0, %v126_v6  ;;  %v128_v14 = vpack.c.bf16 %v112_v11, %v112_v11  ;;  %v49_v17 = vmul.f32 %v183_v1, %v29_v5  ;;  %v67_v18 = vadd.f32 %v188_v2, %v47_v12  ;;  %v68_v19 = vadd.f32 %v188_v2, %v48_v13 }
  0x16   :  { %144 = vst.msk [vmem:[%s334_s3 + $0x24] sm:$0xf] %vm134_vm0, %v127_v10  ;;  %vm81_vm12 = vcmp.ge.f32.partialorder %v65_v15, 0.0  ;;  %v97_v20 = vmul.f32 0.2, %v65_v15  ;;  %vm82_vm13 = vcmp.ge.f32.partialorder %v66_v16, 0.0 }
  0x17   :  { %145 = vst.msk [vmem:[%s334_s3 + $0x28] sm:$0xf] %vm134_vm0, %v128_v14  ;;  %v69_v21 = vadd.f32 %v188_v2, %v49_v17  ;;  %v98_v1 = vmul.f32 0.2, %v66_v16  ;;  %vm83_vm14 = vcmp.ge.f32.partialorder %v67_v18, 0.0  ;;  %vm84_vm15 = vcmp.ge.f32.partialorder %v68_v19, 0.0 }
  0x18   :  { %v99_v22 = vmul.f32 0.2, %v67_v18  ;;  %v113_v23 = vsel %vm81_vm12, %v65_v15, %v97_v20  ;;  %v100_v24 = vmul.f32 0.2, %v68_v19 }
  0x19   :  { %vm85_vm1 = vcmp.ge.f32.partialorder %v69_v21, 0.0  ;;  %v101_v25 = vmul.f32 0.2, %v69_v21  ;;  %v129_v26 = vpack.c.bf16 %v113_v23, %v113_v23  ;;  %v114_v27 = vsel %vm82_vm13, %v66_v16, %v98_v1 }
  0x1a   :  { %v115_v28 = vsel %vm83_vm14, %v67_v18, %v99_v22  ;;  %v130_v29 = vpack.c.bf16 %v114_v27, %v114_v27  ;;  %v116_v31 = vsel %vm84_vm15, %v68_v19, %v100_v24 }
  0x1b   :  { %v131_v30 = vpack.c.bf16 %v115_v28, %v115_v28  ;;  %v117_v32 = vsel %vm85_vm1, %v69_v21, %v101_v25  ;;  %146 = vst.msk [vmem:[%s334_s3 + $0x2c] sm:$0xf] %vm134_vm0, %v129_v26  ;;  %v132_v2 = vpack.c.bf16 %v116_v31, %v116_v31 }
  0x1c   :  { %v133_v33 = vpack.c.bf16 %v117_v32, %v117_v32  ;;  %147 = vst.msk [vmem:[%s334_s3 + $0x30] sm:$0xf] %vm134_vm0, %v130_v29 }
  0x1d   :  { %148 = vst.msk [vmem:[%s334_s3 + $0x34] sm:$0xf] %vm134_vm0, %v131_v30 }
  0x1e   :  { %149 = vst.msk [vmem:[%s334_s3 + $0x38] sm:$0xf] %vm134_vm0, %v132_v2 }
  0x1f   :  { %150 = vst.msk [vmem:[%s334_s3 + $0x3c] sm:$0xf] %vm134_vm0, %v133_v33 }

// kernel: discriminator_forward.15
= control target key start
LH: loop header
LB: loop body
LE: loop exit
PB: predicated region body
PF: predicated region fallthrough
CT: control target
= control target key end

     0   :  { %s1176_s15 = smov 0   ;;  %s1178_s16 = smov 0   ;;  %s1349_s0 = inlined_call_operand.vmem [shape: bf16[32,1024], index: 0, kind: input, shape index: {}]   ;;  %s1350_s1 = inlined_call_operand.vmem [shape: bf16[1024,128], index: 1, kind: input, shape index: {}]   ;;  %s1351_s2 = inlined_call_operand.vmem [shape: f32[32,128], index: 2, kind: output, shape index: {0}]   ;;  %s1352_s3 = inlined_call_operand.vmem [shape: f32[1,1,128], index: 3, kind: output, shape index: {1}]   ;;  %s1353_s4 = inlined_call_operand.vmem [shape: f32[1,1,128], index: 4, kind: output, shape index: {2}]  }
   0x1   :  { %s1180_s17 = smov 0   ;;  %s1182_s18 = smov 0  }
   0x2   :  { %s1184_s19 = smov 0  }
   0x3 LB: > { %s24_s20 = sadd.s32 1, %s1144_s18  ;;  %p43_p1 = scmp.ne.s32.totalorder %s1136_s16, %s1132_s15  ;;  %s1148_s19 = sphi %s1184_s19, %s15_s19   ;;  %s1144_s18 = sphi %s1182_s18, %s1357_s18   ;;  %s1140_s17 = sphi %s1180_s17, %s1356_s17   ;;  %s1136_s16 = sphi %s1178_s16, %s1355_s16   ;;  %s1132_s15 = sphi %s1176_s15, %s1354_s15  }
   0x4   : > { %p25_p0 = scmp.ge.s32.totalorder %s24_s20, 2  ;;  %p44_p2 = scmp.eq.s32.totalorder %s1148_s19, 0 }
   0x5   : > { %s36_s22 = sadd.s32 1, %s1136_s16  ;;  %p852_p5 = scmp.ge.s32.totalorder %s1148_s19, 2 }
   0x6   : > { %s1359_s20 = smov (%p25_p0, %s24_s20), 0  ;;  %p45_p3 = por %p44_p2, %p43_p1 }
   0x7   : > { %s32_s21 = ssub.s32 %s1144_s18, %s1359_s20  ;;  %173 = sbr.rel (%p852_p5) target bundleno = 24 (0x18), region = 16 }
   0x8   : > { %p34_p4 = scmp.eq.s32.totalorder %s32_s21, 0 }
   0xa   : > { %s1211_s23 = scalar_select %p34_p4, %s1136_s16, %s36_s22  }
   0xc   : > { %176 = sbr.rel (!%p45_p3) target bundleno = 24 (0x18), region = 20  ;;  %s178_s24 = sand.u32 (%p45_p3), 1, %s1136_s16  }
   0xd   : > { %s1028_s25 = sshll.u32 (%p45_p3), %s1144_s18, 4  ;;  %s853_s26 = sshll.u32 (%p45_p3), %s178_s24, 6 }
   0xe   : > { %s186_s29 = scalar_lea.vmem (%p45_p3), %s1349_s0, %s1028_s25  ;;  %s180_s30 = scalar_lea.vmem (%p45_p3), [#allocation2], %s853_s26 }
   0xf   : > { %v199_v0 = vld [vmem:[%s186_s29] sm:$0xff] (%p45_p3)  ;;  %v201_v1 = vld [vmem:[%s186_s29 + $0x8] sm:$0xff] (%p45_p3) }
  0x10   : > { %v203_v2 = vld [vmem:[%s186_s29 + $0x20] sm:$0xff] (%p45_p3)  ;;  %200 = vst [vmem:[%s180_s30] sm:$0xff] (%p45_p3), %v199_v0  ;;  %v205_v3 = vld [vmem:[%s186_s29 + $0x28] sm:$0xff] (%p45_p3) }
  0x11   : > { %202 = vst [vmem:[%s180_s30 + $0x8] sm:$0xff] %v201_v1  ;;  %v207_v4 = vld [vmem:[%s186_s29 + $0x40] sm:$0xff]  ;;  %v209_v5 = vld [vmem:[%s186_s29 + $0x48] sm:$0xff] }
  0x12   : > { %204 = vst [vmem:[%s180_s30 + $0x10] sm:$0xff] %v203_v2  ;;  %v211_v6 = vld [vmem:[%s186_s29 + $0x60] sm:$0xff]  ;;  %v213_v7 = vld [vmem:[%s186_s29 + $0x68] sm:$0xff] }
  0x13   : > { %206 = vst [vmem:[%s180_s30 + $0x18] sm:$0xff] %v205_v3 }
  0x14   : > { %208 = vst [vmem:[%s180_s30 + $0x20] sm:$0xff] %v207_v4 }
  0x15   : > { %210 = vst [vmem:[%s180_s30 + $0x28] sm:$0xff] %v209_v5 }
  0x16   : > { %212 = vst [vmem:[%s180_s30 + $0x30] sm:$0xff] %v211_v6 }
  0x17   : > { %214 = vst [vmem:[%s180_s30 + $0x38] sm:$0xff] %v213_v7 }
  0x18 PF: > { %p856_p6 = scmp.ge.s32.totalorder %s1148_s19, 1  ;;  %p228_p7 = scmp.lt.s32.totalorder %s1148_s19, 3 }
  0x1a   : > { %p229_p8 = pnand %p856_p6, %p228_p7 }
  0x1b   : > { %s235_s5 = sand.u32 (!%p229_p8), 1, %s1132_s15   ;;  %s858_s6 = sshll.u32 (!%p229_p8), %s1140_s17, 6 }
  0x1c   : > { %232 = sbr.rel (%p229_p8) target bundleno = 264 (0x108), region = 47  ;;  %s857_s7 = sshll.u32 (!%p229_p8), %s235_s5, 6 }
  0x1d   : > { %p274_p9 = scmp.lt.s32.totalorder (!%p229_p8), %s858_s6, 127  ;;  %s1228_s12 = scalar_lea.vmem (!%p229_p8), [#allocation2], %s857_s7 }
  0x1e   : > { %p860_p10 = scmp.ne.s32.totalorder (!%p229_p8), %s1140_s17, 0 }
  0x21   : > { %s1361_s6 = smov (!%p274_p9, %s858_s6), 127  ;;  %294 = sbr.rel (%p860_p10) target bundleno = 43 (0x2b), region = 55 }
  0x22   : > { %s859_s8 = sshll.u32 %s1361_s6, 2 }
  0x23   : > { %s1226_s11 = scalar_lea.vmem %s1350_s1, %s859_s8 }
  0x26   : > { %v1150_v8 = vmov 0.0  }
  0x27   : > { %295 = vst [vmem:[%s1351_s2] sm:$0xff] %v1150_v8 }
  0x28   : > { %296 = vst [vmem:[%s1351_s2 + $0x8] sm:$0xff] %v1150_v8 }
  0x29   : > { %297 = vst [vmem:[%s1351_s2 + $0x10] sm:$0xff] %v1150_v8 }
  0x2a   : > { %298 = vst [vmem:[%s1351_s2 + $0x18] sm:$0xff] %v1150_v8 }
  0x2b PF: > { %v1044_v9 = vld [vmem:[%s1226_s11 + $0x38] sm:$0xff]  ;;  %v1043_v13 = vld [vmem:[%s1226_s11 + $0x30] sm:$0xff]  ;;  %v1042_v17 = vld [vmem:[%s1226_s11 + $0x28] sm:$0xff]  ;;  %p1021_p11 = scmp.ne.s32.totalorder %s1140_s17, 1 }
  0x2c   : > { %v1052_v10 = vld [vmem:[%s1226_s11 + $0x78] sm:$0xff]  ;;  %607 = vmatpush.bf16.msra.mxu0 %v1044_v9  ;;  %v1051_v14 = vld [vmem:[%s1226_s11 + $0x70] sm:$0xff]  ;;  %v1050_v18 = vld [vmem:[%s1226_s11 + $0x68] sm:$0xff] }
  0x2d   : > { %v1060_v11 = vld [vmem:[%s1226_s11 + $0xb8] sm:$0xff]  ;;  %626 = vmatpush.bf16.msra.mxu1 %v1052_v10  ;;  %v1059_v15 = vld [vmem:[%s1226_s11 + $0xb0] sm:$0xff]  ;;  %v1058_v19 = vld [vmem:[%s1226_s11 + $0xa8] sm:$0xff] }
  0x2e   : > { %v1068_v12 = vld [vmem:[%s1226_s11 + $0xf8] sm:$0xff]  ;;  %645 = vmatpush.bf16.msra.mxu2 %v1060_v11  ;;  %v1067_v16 = vld [vmem:[%s1226_s11 + $0xf0] sm:$0xff]  ;;  %v1066_v20 = vld [vmem:[%s1226_s11 + $0xe8] sm:$0xff] }
  0x2f   : > { %664 = vmatpush.bf16.msra.mxu3 %v1068_v12  ;;  %v1041_v21 = vld [vmem:[%s1226_s11 + $0x20] sm:$0xff]  ;;  %v1040_v25 = vld [vmem:[%s1226_s11 + $0x18] sm:$0xff]  ;;  %v1039_v29 = vld [vmem:[%s1226_s11 + $0x10] sm:$0xff] }
  0x30   : > { %608 = vmatpush.bf16.msra.mxu0 %v1043_v13  ;;  %v1049_v22 = vld [vmem:[%s1226_s11 + $0x60] sm:$0xff]  ;;  %v1048_v26 = vld [vmem:[%s1226_s11 + $0x58] sm:$0xff]  ;;  %v1047_v30 = vld [vmem:[%s1226_s11 + $0x50] sm:$0xff] }
  0x31   : > { %627 = vmatpush.bf16.msra.mxu1 %v1051_v14  ;;  %v1057_v23 = vld [vmem:[%s1226_s11 + $0xa0] sm:$0xff]  ;;  %v1056_v27 = vld [vmem:[%s1226_s11 + $0x98] sm:$0xff]  ;;  %v1055_v31 = vld [vmem:[%s1226_s11 + $0x90] sm:$0xff] }
  0x32   : > { %646 = vmatpush.bf16.msra.mxu2 %v1059_v15  ;;  %v1065_v24 = vld [vmem:[%s1226_s11 + $0xe0] sm:$0xff]  ;;  %v1064_v28 = vld [vmem:[%s1226_s11 + $0xd8] sm:$0xff]  ;;  %v1063_v32 = vld [vmem:[%s1226_s11 + $0xd0] sm:$0xff] }
  0x33   : > { %665 = vmatpush.bf16.msra.mxu3 %v1067_v16  ;;  %v1038_v33 = vld [vmem:[%s1226_s11 + $0x8] sm:$0xff]  ;;  %v1037_v37 = vld [vmem:[%s1226_s11] sm:$0xff]  ;;  %v1031_v42 = vld [vmem:[%s1228_s12 + $0xc] sm:$0xf0] }
  0x34   : > { %609 = vmatpush.bf16.msra.mxu0 %v1042_v17  ;;  %v1046_v34 = vld [vmem:[%s1226_s11 + $0x48] sm:$0xff]  ;;  %v1045_v38 = vld [vmem:[%s1226_s11 + $0x40] sm:$0xff]  ;;  %v865_v44 = vld [vmem:[%s1228_s12 + $0x10] sm:$0xf0] }
  0x35   : > { %628 = vmatpush.bf16.msra.mxu1 %v1050_v18  ;;  %v1054_v35 = vld [vmem:[%s1226_s11 + $0x88] sm:$0xff]  ;;  %v1053_v39 = vld [vmem:[%s1226_s11 + $0x80] sm:$0xff]  ;;  %v1032_v46 = vld [vmem:[%s1228_s12 + $0x14] sm:$0xf0] }
  0x36   : > { %647 = vmatpush.bf16.msra.mxu2 %v1058_v19  ;;  %v1062_v36 = vld [vmem:[%s1226_s11 + $0xc8] sm:$0xff]  ;;  %v1061_v40 = vld [vmem:[%s1226_s11 + $0xc0] sm:$0xff]  ;;  %v873_v48 = vld [vmem:[%s1228_s12 + $0x18] sm:$0xf0] }
  0x37   : > { %666 = vmatpush.bf16.msra.mxu3 %v1066_v20  ;;  %v863_v41 = vld [vmem:[%s1228_s12] sm:$0xf]  ;;  %v1029_v43 = vld [vmem:[%s1228_s12 + $0x4] sm:$0xf]  ;;  %v871_v45 = vld [vmem:[%s1228_s12 + $0x8] sm:$0xf] }
  0x38   : > { %610 = vmatpush.bf16.msra.mxu0 %v1041_v21  ;;  %v1030_v47 = vld [vmem:[%s1228_s12 + $0xc] sm:$0xf]  ;;  %v864_v49 = vor.u32 %v1031_v42, %v863_v41  ;;  %v868_v50 = vor.u32 %v1029_v43, %v865_v44  ;;  %v872_v51 = vor.u32 %v1032_v46, %v871_v45  ;;  %v879_v53 = vld [vmem:[%s1228_s12 + $0x20] sm:$0xf]  ;;  %v1035_v54 = vld [vmem:[%s1228_s12 + $0x2c] sm:$0xf0] }
  0x39   : > { %629 = vmatpush.bf16.msra.mxu1 %v1049_v22  ;;  %v876_v52 = vor.u32 %v1030_v47, %v873_v48  ;;  %v1033_v55 = vld [vmem:[%s1228_s12 + $0x24] sm:$0xf]  ;;  %v881_v56 = vld [vmem:[%s1228_s12 + $0x30] sm:$0xf0]  ;;  %v887_v57 = vld [vmem:[%s1228_s12 + $0x28] sm:$0xf]  ;;  %v880_v61 = vor.u32 %v1035_v54, %v879_v53 }
  0x3a   : > { %648 = vmatpush.bf16.msra.mxu2 %v1057_v23  ;;  %v1036_v58 = vld [vmem:[%s1228_s12 + $0x34] sm:$0xf0]  ;;  %v1034_v59 = vld [vmem:[%s1228_s12 + $0x2c] sm:$0xf]  ;;  %v889_v60 = vld [vmem:[%s1228_s12 + $0x38] sm:$0xf0]  ;;  %v884_v62 = vor.u32 %v1033_v55, %v881_v56 }
  0x3b   : > { %667 = vmatpush.bf16.msra.mxu3 %v1065_v24  ;;  %v888_v63 = vor.u32 %v1036_v58, %v887_v57  ;;  %v892_v0 = vor.u32 %v1034_v59, %v889_v60  ;;  %v299_v9 = vld [vmem:[%s1351_s2] sm:$0xff]  ;;  %v300_v16 = vld [vmem:[%s1351_s2 + $0x8] sm:$0xff] }
  0x3c   : > { %611 = vmatpush.bf16.msra.mxu0 %v1040_v25  ;;  %v301_v25 = vld [vmem:[%s1351_s2 + $0x10] sm:$0xff] }
  0x3d   : > { %630 = vmatpush.bf16.msra.mxu1 %v1048_v26 }
  0x3e   : > { %649 = vmatpush.bf16.msra.mxu2 %v1056_v27 }
  0x3f   : > { %668 = vmatpush.bf16.msra.mxu3 %v1064_v28 }
  0x40   : > { %612 = vmatpush.bf16.msra.mxu0 %v1039_v29 }
  0x41   : > { %631 = vmatpush.bf16.msra.mxu1 %v1047_v30 }
  0x42   : > { %650 = vmatpush.bf16.msra.mxu2 %v1055_v31 }
  0x43   : > { %669 = vmatpush.bf16.msra.mxu3 %v1063_v32 }
  0x44   : > { %613 = vmatpush.bf16.msra.mxu0 %v1038_v33  ;;  %v302_v33 = vld [vmem:[%s1351_s2 + $0x18] sm:$0xff] }
  0x45   : > { %632 = vmatpush.bf16.msra.mxu1 %v1046_v34 }
  0x46   : > { %651 = vmatpush.bf16.msra.mxu2 %v1054_v35 }
  0x47   : > { %670 = vmatpush.bf16.msra.mxu3 %v1062_v36 }
  0x48   : > { %614 = vmatpush.bf16.msra.mxu0 %v1037_v37 }
  0x49   : > { %633 = vmatpush.bf16.msra.mxu1 %v1045_v38 }
  0x4a   : > { %652 = vmatpush.bf16.msra.mxu2 %v1053_v39 }
  0x4b   : > { %671 = vmatpush.bf16.msra.mxu3 %v1061_v40  ;;  %615 = vmatmul.bf16.vlgmr.msra.gmra.mxu0 %v864_v49 }
  0x4c   : > { %634 = vmatmul.bf16.vlgmr.msra.gmra.mxu1 %v868_v50 }
  0x4d   : > { %653 = vmatmul.bf16.vlgmr.msra.gmra.mxu2 %v872_v51 }
  0x4e   : > { %672 = vmatmul.bf16.vlgmr.msra.gmra.mxu3 %v876_v52 }
  0x5b   : > { %620 = vmatmul.bf16.gmra.mxu0 %v880_v61 }
  0x5c   : > { %639 = vmatmul.bf16.gmra.mxu1 %v884_v62 }
  0x5d   : > { %658 = vmatmul.bf16.gmra.mxu2 %v888_v63 }
  0x5e   : > { %677 = vmatmul.bf16.gmra.mxu3 %v892_v0 }
  0xc8   : > { %v616_v1 = vpop.f32.mrf.mxu0 }
  0xc9   : > { %v635_v2 = vpop.f32.mrf.mxu1 }
  0xca   : > { %v636_v3 = vadd.f32 %v635_v2, %v616_v1 }
  0xd0   : > { %v654_v4 = vpop.f32.mrf.mxu2  ;;  %v618_v7 = vpop.f32.mrf.mxu0 }
  0xd1   : > { %v673_v5 = vpop.f32.mrf.mxu3  ;;  %v655_v6 = vadd.f32 %v654_v4, %v636_v3  ;;  %v637_v8 = vpop.f32.mrf.mxu1 }
  0xd2   : > { %v638_v12 = vadd.f32 %v637_v8, %v618_v7 }
  0xd3   : > { %v674_v10 = vadd.f32 %v673_v5, %v655_v6 }
  0xd5   : > { %v683_v11 = vadd.f32 %v674_v10, %v299_v9 }
  0xd7   : > { %687 = vst [vmem:[%s1351_s2] sm:$0xff] %v683_v11 }
  0xd8   : > { %v656_v13 = vpop.f32.mrf.mxu2  ;;  %v621_v17 = vpop.f32.mrf.mxu0 }
  0xd9   : > { %v675_v14 = vpop.f32.mrf.mxu3  ;;  %v657_v15 = vadd.f32 %v656_v13, %v638_v12  ;;  %v640_v18 = vpop.f32.mrf.mxu1 }
  0xda   : > { %v641_v21 = vadd.f32 %v640_v18, %v621_v17 }
  0xdb   : > { %v676_v19 = vadd.f32 %v675_v14, %v657_v15 }
  0xdd   : > { %v684_v20 = vadd.f32 %v676_v19, %v300_v16 }
  0xdf   : > { %688 = vst [vmem:[%s1351_s2 + $0x8] sm:$0xff] %v684_v20 }
  0xe0   : > { %v659_v22 = vpop.f32.mrf.mxu2  ;;  %v623_v27 = vpop.f32.mrf.mxu0 }
  0xe1   : > { %v678_v23 = vpop.f32.mrf.mxu3  ;;  %v660_v24 = vadd.f32 %v659_v22, %v641_v21  ;;  %v642_v28 = vpop.f32.mrf.mxu1 }
  0xe2   : > { %v643_v30 = vadd.f32 %v642_v28, %v623_v27 }
  0xe3   : > { %v679_v26 = vadd.f32 %v678_v23, %v660_v24 }
  0xe5   : > { %v685_v29 = vadd.f32 %v679_v26, %v301_v25 }
  0xe7   : > { %689 = vst [vmem:[%s1351_s2 + $0x10] sm:$0xff] %v685_v29 }
  0xe8   : > { %v661_v31 = vpop.f32.mrf.mxu2 }
  0xe9   : > { %v662_v32 = vadd.f32 %v661_v31, %v643_v30  ;;  %v680_v34 = vpop.f32.mrf.mxu3 }
  0xeb   : > { %v681_v35 = vadd.f32 %v680_v34, %v662_v32  ;;  %694 = sbr.rel (%p1021_p11) target bundleno = 264 (0x108), region = 59 }
  0xed   : > { %v686_v36 = vadd.f32 %v681_v35, %v302_v33 }
  0xef   : > { %690 = vst [vmem:[%s1351_s2 + $0x18] sm:$0xff] %v686_v36 }
  0xf0   : > { %v695_v37 = vld [vmem:[%s1351_s2] sm:$0xff]  ;;  %v696_v38 = vld [vmem:[%s1351_s2 + $0x8] sm:$0xff]  ;;  %v697_v39 = vld [vmem:[%s1351_s2 + $0x10] sm:$0xff] }
  0xf1   : > { %v699_v41 = vadd.f32 %v696_v38, %v695_v37  ;;  %v709_v42 = vmul.f32 %v695_v37, %v695_v37  ;;  %v710_v43 = vmul.f32 %v696_v38, %v696_v38  ;;  %v711_v44 = vmul.f32 %v697_v39, %v697_v39 }
  0xf3   : > { %v700_v45 = vadd.f32 %v699_v41, %v697_v39  ;;  %v713_v47 = vadd.f32 %v710_v43, %v709_v42 }
  0xf5   : > { %v714_v49 = vadd.f32 %v713_v47, %v711_v44 }
  0xf6   : > { %v698_v40 = vld [vmem:[%s1351_s2 + $0x18] sm:$0xff] }
  0xf7   : > { %v712_v46 = vmul.f32 %v698_v40, %v698_v40  ;;  %v701_v48 = vadd.f32 %v700_v45, %v698_v40 }
  0xf9   : > { %v702_v50 = vrot.slane %v701_v48, 4  ;;  %v715_v51 = vadd.f32 %v714_v49, %v712_v46 }
  0xfb   : > { %v703_v52 = vadd.f32 %v702_v50, %v701_v48  ;;  %v716_v53 = vrot.slane %v715_v51, 4 }
  0xfd   : > { %v704_v54 = vrot.slane %v703_v52, 2  ;;  %v717_v55 = vadd.f32 %v716_v53, %v715_v51 }
  0xff   : > { %v705_v56 = vadd.f32 %v704_v54, %v703_v52  ;;  %v718_v57 = vrot.slane %v717_v55, 2 }
 0x101   : > { %v706_v58 = vrot.slane %v705_v56, 1  ;;  %v719_v59 = vadd.f32 %v718_v57, %v717_v55 }
 0x103   : > { %v707_v60 = vadd.f32 %v706_v58, %v705_v56  ;;  %v720_v61 = vrot.slane %v719_v59, 1 }
 0x105   : > { %708 = vst [vmem:[%s1352_s3] sm:$0x1] %v707_v60  ;;  %v721_v62 = vadd.f32 %v720_v61, %v719_v59 }
 0x107   : > { %722 = vst [vmem:[%s1353_s4] sm:$0x1] %v721_v62 }
 0x108 PF: > { %s15_s19 = sadd.s32 1, %s1148_s19   ;;  %s1354_s15 = smov %s1136_s16 }
 0x109   : > { %p12_p12 = scmp.ge.s32.totalorder %s15_s19, 4   ;;  %s1355_s16 = smov %s1211_s23 }
 0x10a   : > { %s1356_s17 = smov %s1144_s18  ;;  %s1357_s18 = smov %s1359_s20 }
 0x10b   :  { %14 = sbr.rel (!%p12_p12) target bundleno = 3 (0x3), region = 121 }

// kernel: discriminator_forward.16
= control target key start
LH: loop header
LB: loop body
LE: loop exit
PB: predicated region body
PF: predicated region fallthrough
CT: control target
= control target key end

     0   :  { %s115_s0 = inlined_call_operand.vmem [shape: f32[32,128], index: 0, kind: input, shape index: {}]   ;;  %s116_s1 = inlined_call_operand.vmem [shape: f32[1,128], index: 1, kind: input, shape index: {}]   ;;  %s117_s2 = inlined_call_operand.vmem [shape: f32[1,128], index: 2, kind: input, shape index: {}]   ;;  %s118_s3 = inlined_call_operand.vmem [shape: bf16[32,128], index: 3, kind: output, shape index: {}]  }
   0x1   :  { %v14_v0 = vld [vmem:[%s115_s0] sm:$0xff]  ;;  %v15_v1 = vld [vmem:[%s115_s0 + $0x8] sm:$0xff]  ;;  %v16_v4 = vld [vmem:[%s115_s0 + $0x10] sm:$0xff] }
   0x2   :  { %v69_v2 = vld [vmem:[%s116_s1] ss:$0 sm:$0xff]  ;;  %v17_v5 = vld [vmem:[%s115_s0 + $0x18] sm:$0xff] }
   0x3   :  { %v70_v3 = vld [vmem:[%s117_s2] ss:$0 sm:$0xff]  ;;  %v22_v6 = vmul.f32 %v69_v2, %v14_v0  ;;  %v23_v7 = vmul.f32 %v69_v2, %v15_v1  ;;  %v24_v8 = vmul.f32 %v69_v2, %v16_v4  ;;  %v25_v9 = vmul.f32 %v69_v2, %v17_v5 }
   0x5   :  { %v30_v10 = vadd.f32 %v70_v3, %v22_v6  ;;  %v31_v11 = vadd.f32 %v70_v3, %v23_v7  ;;  %v32_v12 = vadd.f32 %v70_v3, %v24_v8  ;;  %v33_v13 = vadd.f32 %v70_v3, %v25_v9 }
   0x7   :  { %vm34_vm0 = vcmp.ge.f32.partialorder %v30_v10, 0.0  ;;  %vm35_vm1 = vcmp.ge.f32.partialorder %v31_v11, 0.0  ;;  %v38_v14 = vmul.f32 0.2, %v30_v10  ;;  %v39_v15 = vmul.f32 0.2, %v31_v11 }
   0x8   :  { %vm36_vm2 = vcmp.ge.f32.partialorder %v32_v12, 0.0  ;;  %vm37_vm3 = vcmp.ge.f32.partialorder %v33_v13, 0.0  ;;  %v40_v16 = vmul.f32 0.2, %v32_v12  ;;  %v41_v17 = vmul.f32 0.2, %v33_v13 }
   0x9   :  { %v42_v18 = vsel %vm34_vm0, %v30_v10, %v38_v14  ;;  %v43_v19 = vsel %vm35_vm1, %v31_v11, %v39_v15 }
   0xa   :  { %v61_v20 = vpack.c.bf16 %v43_v19, %v42_v18  ;;  %v44_v21 = vsel %vm36_vm2, %v32_v12, %v40_v16  ;;  %v45_v22 = vsel %vm37_vm3, %v33_v13, %v41_v17 }
   0xb   :  { %v66_v23 = vpack.c.bf16 %v45_v22, %v44_v21 }
   0xc   :  { %62 = vst [vmem:[%s118_s3] sm:$0xff] %v61_v20  }
   0xd   :  { %68 = vst [vmem:[%s118_s3 + $0x8] sm:$0xff] %v66_v23  }

// kernel: discriminator_forward.17
= control target key start
LH: loop header
LB: loop body
LE: loop exit
PB: predicated region body
PF: predicated region fallthrough
CT: control target
= control target key end

     0   :  { %vm54_vm0 = vcmask 1041408   ;;  %vm56_vm1 = vcmask 1045508   ;;  %vm58_vm2 = vcmask 1043456   ;;  %vm175_vm6 = vcmask 1024   ;;  %s252_s0 = inlined_call_operand.vmem [shape: bf16[2,2048], index: 0, kind: input, shape index: {}]   ;;  %s253_s1 = inlined_call_operand.vmem [shape: f32[1,2048], index: 1, kind: input, shape index: {}]   ;;  %s254_s2 = inlined_call_operand.<no memory space> [shape: f32[1,1], index: 2, kind: input, shape index: {}]   ;;  %s255_s3 = inlined_call_operand.vmem [shape: f32[2,1], index: 3, kind: output, shape index: {}]  }
   0x1   :  { %v8_v0 = vstv %s254_s2  ;;  %v22_v1 = vld [vmem:[%s253_s1] sm:$0xff]  ;;  %v23_v3 = vld [vmem:[%s253_s1 + $0x8] sm:$0xff] }
   0x2   :  { %9 = vst [vmem:[#allocation2] sm:$0x1] %v8_v0  ;;  %v16_v2 = vld [vmem:[%s252_s0] sm:$0xff]  ;;  %v27_v4 = vperm.slane %v22_v1, 1  ;;  %v28_v5 = vperm.slane %v22_v1, 2  ;;  %v29_v6 = vperm.slane %v22_v1, 3 }
   0x3   :  { %v31_v7 = vperm.slane %v22_v1, 5  ;;  %v32_v8 = vperm.slane %v22_v1, 6  ;;  %v33_v9 = vperm.slane %v22_v1, 7  ;;  %v18_v10 = vunpack.c.l.bf16 %v16_v2  ;;  %v17_v42 = vld [vmem:[%s252_s0 + $0x8] sm:$0xff] }
   0x4   :  { %v26_v11 = vperm.slane %v22_v1, 0  ;;  %v35_v12 = vperm.slane %v23_v3, 1  ;;  %v30_v13 = vperm.slane %v22_v1, 4  ;;  %v36_v14 = vperm.slane %v23_v3, 2 }
   0x5   :  { %v37_v15 = vperm.slane %v23_v3, 3  ;;  %v39_v16 = vperm.slane %v23_v3, 5  ;;  %v42_v17 = vrot.slane %v27_v4, 6  ;;  %v43_v18 = vrot.slane %v28_v5, 4 }
   0x6   :  { %v44_v19 = vrot.slane %v29_v6, 2  ;;  %v45_v20 = vrot.slane %v31_v7, 6  ;;  %v40_v21 = vperm.slane %v23_v3, 6  ;;  %v41_v22 = vperm.slane %v23_v3, 7 }
   0x7   :  { %v46_v23 = vrot.slane %v32_v8, 4  ;;  %v47_v24 = vrot.slane %v33_v9, 2  ;;  %v19_v25 = vunpack.c.h.bf16 %v16_v2  ;;  %v34_v26 = vperm.slane %v23_v3, 0 }
   0x8   :  { %v38_v27 = vperm.slane %v23_v3, 4  ;;  %v48_v28 = vrot.slane %v35_v12, 6  ;;  %v55_v29 = vsel %vm54_vm0, %v26_v11, %v42_v17  ;;  %v57_v30 = vsel %vm56_vm1, %v43_v18, %v44_v19 }
   0x9   :  { %v60_v31 = vsel %vm54_vm0, %v30_v13, %v45_v20  ;;  %v61_v32 = vsel %vm56_vm1, %v46_v23, %v47_v24  ;;  %v49_v33 = vrot.slane %v36_v14, 4  ;;  %v50_v34 = vrot.slane %v37_v15, 2 }
   0xa   :  { %v59_v35 = vsel %vm58_vm2, %v55_v29, %v57_v30  ;;  %v62_v36 = vsel %vm58_vm2, %v60_v31, %v61_v32  ;;  %v51_v37 = vrot.slane %v39_v16, 6  ;;  %v52_v38 = vrot.slane %v40_v21, 4 }
   0xb   :  { %v53_v39 = vrot.slane %v41_v22, 2  ;;  %v73_v40 = vmul.f32 %v59_v35, %v18_v10  ;;  %v74_v41 = vmul.f32 %v62_v36, %v19_v25  ;;  %v63_v43 = vsel %vm54_vm0, %v34_v26, %v48_v28  ;;  %v181_v36 = vld [vmem:[#allocation2] ss:$0 sm:$0xff] }
   0xc   :  { %v64_v44 = vsel %vm56_vm1, %v49_v33, %v50_v34  ;;  %v66_v45 = vsel %vm54_vm0, %v38_v27, %v51_v37  ;;  %v20_v47 = vunpack.c.l.bf16 %v17_v42  ;;  %v21_v48 = vunpack.c.h.bf16 %v17_v42 }
   0xd   :  { %81 = vst [vmem:[#allocation1] ss:$4 sm:$0xff] %v73_v40  ;;  %v67_v46 = vsel %vm56_vm1, %v52_v38, %v53_v39  ;;  %v65_v49 = vsel %vm58_vm2, %v63_v43, %v64_v44 }
   0xe   :  { %83 = vst [vmem:[#allocation1 + $0x20] ss:$4 sm:$0xff] %v74_v41  ;;  %v68_v50 = vsel %vm58_vm2, %v66_v45, %v67_v46  ;;  %v75_v51 = vmul.f32 %v65_v49, %v20_v47 }
   0xf   :  { %v76_v54 = vmul.f32 %v68_v50, %v21_v48 }
  0x14   :  { %v84_v52 = vld.sshfl [vmem:[#allocation1] sm:$0xff pattern:$0x73625140]  ;;  %v85_v53 = vld.sshfl [vmem:[#allocation1 + $0x8] sm:$0xff pattern:$0x73625140] }
  0x15   :  { %v86_v55 = vld.sshfl [vmem:[#allocation1 + $0x10] sm:$0xff pattern:$0x73625140]  ;;  %v87_v56 = vld.sshfl [vmem:[#allocation1 + $0x18] sm:$0xff pattern:$0x73625140] }
  0x16   :  { %v88_v57 = vld.sshfl [vmem:[#allocation1 + $0x20] sm:$0xff pattern:$0x73625140]  ;;  %v89_v58 = vld.sshfl [vmem:[#allocation1 + $0x28] sm:$0xff pattern:$0x73625140] }
  0x17   :  { %v90_v59 = vld.sshfl [vmem:[#allocation1 + $0x30] sm:$0xff pattern:$0x73625140]  ;;  %v91_v60 = vld.sshfl [vmem:[#allocation1 + $0x38] sm:$0xff pattern:$0x73625140] }
  0x18   :  { %92 = vst [vmem:[#allocation1] ss:$4 sm:$0xff] %v75_v51  ;;  %v118_v61 = vsel %vm54_vm0, %v84_v52, 0.0  ;;  %v119_v62 = vsel %vm54_vm0, %v85_v53, 0.0  ;;  %v121_v63 = vsel %vm54_vm0, %v86_v55, 0.0  ;;  %v123_v1 = vsel %vm54_vm0, %v87_v56, 0.0 }
  0x19   :  { %93 = vst [vmem:[#allocation1 + $0x20] ss:$4 sm:$0xff] %v76_v54  ;;  %v120_v0 = vadd.f32 %v119_v62, %v118_v61  ;;  %v125_v3 = vsel %vm54_vm0, %v88_v57, 0.0  ;;  %v127_v5 = vsel %vm54_vm0, %v89_v58, 0.0  ;;  %v129_v7 = vsel %vm54_vm0, %v90_v59, 0.0 }
  0x1a   :  { %v131_v10 = vsel %vm54_vm0, %v91_v60, 0.0 }
  0x1b   :  { %v122_v2 = vadd.f32 %v121_v63, %v120_v0 }
  0x1d   :  { %v124_v4 = vadd.f32 %v123_v1, %v122_v2 }
  0x1f   :  { %v126_v6 = vadd.f32 %v125_v3, %v124_v4  ;;  %v94_v8 = vld.sshfl [vmem:[#allocation1] sm:$0xff pattern:$0x73625140]  ;;  %v95_v11 = vld.sshfl [vmem:[#allocation1 + $0x8] sm:$0xff pattern:$0x73625140] }
  0x20   :  { %v133_v13 = vsel %vm54_vm0, %v94_v8, 0.0  ;;  %v96_v14 = vld.sshfl [vmem:[#allocation1 + $0x10] sm:$0xff pattern:$0x73625140]  ;;  %v135_v16 = vsel %vm54_vm0, %v95_v11, 0.0 }
  0x21   :  { %v128_v9 = vadd.f32 %v127_v5, %v126_v6  ;;  %v97_v17 = vld.sshfl [vmem:[#allocation1 + $0x18] sm:$0xff pattern:$0x73625140]  ;;  %v137_v19 = vsel %vm54_vm0, %v96_v14, 0.0 }
  0x22   :  { %v98_v20 = vld.sshfl [vmem:[#allocation1 + $0x20] sm:$0xff pattern:$0x73625140]  ;;  %v139_v22 = vsel %vm54_vm0, %v97_v17, 0.0 }
  0x23   :  { %v130_v12 = vadd.f32 %v129_v7, %v128_v9  ;;  %v99_v23 = vld.sshfl [vmem:[#allocation1 + $0x28] sm:$0xff pattern:$0x73625140]  ;;  %v141_v25 = vsel %vm54_vm0, %v98_v20, 0.0 }
  0x24   :  { %v100_v26 = vld.sshfl [vmem:[#allocation1 + $0x30] sm:$0xff pattern:$0x73625140]  ;;  %v143_v28 = vsel %vm54_vm0, %v99_v23, 0.0 }
  0x25   :  { %v132_v15 = vadd.f32 %v131_v10, %v130_v12  ;;  %v101_v29 = vld.sshfl [vmem:[#allocation1 + $0x38] sm:$0xff pattern:$0x73625140]  ;;  %v145_v31 = vsel %vm54_vm0, %v100_v26, 0.0 }
  0x26   :  { %v147_v33 = vsel %vm54_vm0, %v101_v29, 0.0 }
  0x27   :  { %v134_v18 = vadd.f32 %v133_v13, %v132_v15 }
  0x29   :  { %v136_v21 = vadd.f32 %v135_v16, %v134_v18 }
  0x2b   :  { %v138_v24 = vadd.f32 %v137_v19, %v136_v21 }
  0x2d   :  { %v140_v27 = vadd.f32 %v139_v22, %v138_v24 }
  0x2f   :  { %v142_v30 = vadd.f32 %v141_v25, %v140_v27 }
  0x31   :  { %v144_v32 = vadd.f32 %v143_v28, %v142_v30 }
  0x33   :  { %v146_v34 = vadd.f32 %v145_v31, %v144_v32 }
  0x35   :  { %v148_v35 = vadd.f32 %v147_v33, %v146_v34 }
  0x37   :  { %149 = vadd.xlane.f32.xlu0 %v148_v35 }
  0xaa   :  { %v150_v37 = vpop.xlane.xlu0 %149 }
  0xab   :  { %v155_v38 = vadd.f32 %v181_v36, %v150_v37 }
  0xad   :  { %v156_v39 = vsub.f32 0.0, %v155_v38 }
  0xaf   :  { %v157_v40 = vmul.f32 1.442695, %v156_v39 }
  0xb1   :  { %182 = vpow2.f32 %v157_v40 }
  0xb7   :  { %v183_v41 = vpop.eup %182 }
  0xb8   :  { %v159_v42 = vadd.f32 1.0, %v183_v41 }
  0xba   :  { %184 = vrcp.f32 %v159_v42  ;;  %v171_v46 = vand.u32 2147483648, %v159_v42  ;;  %v169_v48 = vand.u32 2147483647, %v159_v42  ;;  %vm165_vm4 = vweird.f32 %v159_v42 }
  0xbc   :  { %v172_v50 = vor.u32 1.1754944e-38, %v171_v46  ;;  %vm170_vm7 = vcmp.eq.f32.partialorder %v169_v48, 8.507059e+37 }
  0xc0   :  { %v185_v43 = vpop.eup %184 }
  0xc1   :  { %v161_v44 = vmul.f32 %v185_v43, %v159_v42  ;;  %vm166_vm3 = vweird.f32 %v185_v43 }
  0xc2   :  { %vm167_vm5 = vmor %vm165_vm4, %vm166_vm3 }
  0xc3   :  { %v162_v45 = vsub.f32 1.0, %v161_v44 }
  0xc5   :  { %v163_v47 = vmul.f32 %v185_v43, %v162_v45 }
  0xc7   :  { %v164_v49 = vadd.f32 %v185_v43, %v163_v47 }
  0xc9   :  { %v168_v51 = vsel %vm167_vm5, %v185_v43, %v164_v49 }
  0xca   :  { %v173_v52 = vsel %vm170_vm7, %v172_v50, %v168_v51 }
  0xcb   :  { %176 = vst.msk [vmem:[%s255_s3] sm:$0x3] %vm175_vm6, %v173_v52 }

</bundles_post_ra>
